<compile_context>
chip_gen: v6e
topology: v6e:2x2x1
jax: 0.10.0
libtpu: 0.0.40
codegen_flags: <defaults>
</compile_context>

<pallas_src>
import numpy as np

import jax
import jax.numpy as jnp
from jax.experimental import pallas as pl
from jax.experimental.pallas import tpu as pltpu

BF16 = jnp.bfloat16
F32 = jnp.float32


# ----------------------------- fused Pallas kernel ------------------------------ #

def _fused_cnn_kernel(x_ref, b1_ref, bias1_ref, sh1_ref, sw1_ref,
                      b2_ref, bias2_ref, sh2_ref, sw2_ref, shf_ref,
                      wfc1_ref, bfc1_ref, wfc2_ref, bfc2_ref, o_ref):
    def mm(a, b):
        # bf16 MXU matmul, f32 accumulation.
        return jnp.dot(a.astype(BF16), b.astype(BF16),
                       preferred_element_type=F32)

    # ---- conv1 (3x3, pad=1) + bias + relu: (30, 28*3) -> (28, 28*32) ----
    # H padding was done in the wrapper; W padding is folded into the banded weights.
    x = x_ref[0]                                                   # (30, 84) bf16
    acc = mm(x[0:28, :], b1_ref[0])
    acc = acc + mm(x[1:29, :], b1_ref[1])
    acc = acc + mm(x[2:30, :], b1_ref[2])
    y1 = jnp.maximum(acc + bias1_ref[...], 0.0)                    # (28, 896) f32

    # ---- 2x2 max-pool #1 via exact 0/1 selection matmuls ----
    zh = jnp.maximum(mm(sh1_ref[0], y1), mm(sh1_ref[1], y1))       # (14, 896)
    p1 = jnp.maximum(mm(zh, sw1_ref[0]), mm(zh, sw1_ref[1]))       # (14, 448)

    # ---- conv2 (3x3, pad=1) + bias + relu: (14, 14*32) -> (14, 14*64) ----
    # H zero-padding realized with +-1 row-shift selection matmuls (row 0 / 13 -> 0).
    p1_dn = mm(shf_ref[0], p1)                                     # row h = p1[h-1]
    p1_up = mm(shf_ref[1], p1)                                     # row h = p1[h+1]
    acc = mm(p1_dn, b2_ref[0]) + mm(p1, b2_ref[1]) + mm(p1_up, b2_ref[2])
    y2 = jnp.maximum(acc + bias2_ref[...], 0.0)                    # (14, 896) f32

    # ---- 2x2 max-pool #2 ----
    zh2 = jnp.maximum(mm(sh2_ref[0], y2), mm(sh2_ref[1], y2))      # (7, 896)
    p2 = jnp.maximum(mm(zh2, sw2_ref[0]), mm(zh2, sw2_ref[1]))     # (7, 448)

    # ---- fc1 + relu: contract the (7 rows x 448 lanes) feature tile ----
    # (fc1 weights were pre-permuted to this NHWC-like layout at init.)
    a = mm(p2[0:1, :], wfc1_ref[0])
    for h in range(1, 7):
        a = a + mm(p2[h:h + 1, :], wfc1_ref[h])
    h1 = jnp.maximum(a + bfc1_ref[...], 0.0)                       # (1, 128)

    # ---- fc2 (output padded to 128 lanes; wrapper slices the first 10) ----
    o_ref[0] = mm(h1, wfc2_ref[...]) + bfc2_ref[...]               # (1, 128)


# ----------------------------- one-time weight packing --------------------------- #

def _banded_conv3x3(w_oihw, width):
    """Per-kH-tap banded matrix (3, width*I, width*O); folds the W zero-padding."""
    O, I, KH, KW = w_oihw.shape
    B = np.zeros((KH, width * I, width * O), np.float32)
    for dy in range(KH):
        for dx in range(KW):
            tap = w_oihw[:, :, dy, dx].T                           # (I, O)
            for wo in range(width):
                wi = wo + dx - 1
                if 0 <= wi < width:
                    B[dy, wi * I:(wi + 1) * I, wo * O:(wo + 1) * O] = tap
    return B


def _rowpool_sel(h):
    """(2, h//2, h): S[b, i, 2i+b] = 1  (even/odd row selection)."""
    S = np.zeros((2, h // 2, h), np.float32)
    i = np.arange(h // 2)
    S[0, i, 2 * i] = 1.0
    S[1, i, 2 * i + 1] = 1.0
    return S


def _colpool_sel(w, c):
    """(2, w*c, (w//2)*c): selects even/odd w lane-blocks of size c."""
    S = np.zeros((2, w * c, (w // 2) * c), np.float32)
    eye = np.eye(c, dtype=np.float32)
    for b in range(2):
        for wi in range(w // 2):
            S[b, (2 * wi + b) * c:(2 * wi + b + 1) * c, wi * c:(wi + 1) * c] = eye
    return S


def _shift_sel(n):
    """(2, n, n): row-shift-down / row-shift-up selections (boundary rows -> 0)."""
    S = np.zeros((2, n, n), np.float32)
    i = np.arange(1, n)
    S[0, i, i - 1] = 1.0          # row h = input row h-1
    S[1, i - 1, i] = 1.0          # row h = input row h+1
    return S


def prepare_params(p):
    """Pre-pack PyTorch-convention params into the kernel's MXU-friendly layouts."""
    w1 = np.asarray(p["w1"], np.float32)                  # (32, 3, 3, 3)
    w2 = np.asarray(p["w2"], np.float32)                  # (64, 32, 3, 3)
    b1 = np.asarray(p["b1"], np.float32)
    b2 = np.asarray(p["b2"], np.float32)
    wfc1 = np.asarray(p["wfc1"], np.float32)              # (128, 3136)
    bfc1 = np.asarray(p["bfc1"], np.float32)
    wfc2 = np.asarray(p["wfc2"], np.float32)              # (10, 128)
    bfc2 = np.asarray(p["bfc2"], np.float32)

    # fc1 columns permuted from PyTorch NCHW-flatten order to the kernel's
    # (h, w*64 + c) feature layout -> (7, 448, 128).
    wfc1_prep = np.transpose(wfc1.reshape(128, 64, 7, 7), (2, 3, 1, 0)).reshape(7, 448, 128)

    # fc2 padded to 128 output lanes (dense stores; wrapper slices [:10]).
    wfc2_prep = np.zeros((128, 128), np.float32)
    wfc2_prep[:, :10] = wfc2.T
    bfc2_prep = np.zeros((1, 128), np.float32)
    bfc2_prep[0, :10] = bfc2

    return {
        "b1": jnp.asarray(_banded_conv3x3(w1, 28), BF16),          # (3, 84, 896)
        "bias1": jnp.asarray(np.tile(b1, 28)[None, :], F32),       # (1, 896)
        "sh1": jnp.asarray(_rowpool_sel(28), BF16),                # (2, 14, 28)
        "sw1": jnp.asarray(_colpool_sel(28, 32), BF16),            # (2, 896, 448)
        "b2": jnp.asarray(_banded_conv3x3(w2, 14), BF16),          # (3, 448, 896)
        "bias2": jnp.asarray(np.tile(b2, 14)[None, :], F32),       # (1, 896)
        "sh2": jnp.asarray(_rowpool_sel(14), BF16),                # (2, 7, 14)
        "sw2": jnp.asarray(_colpool_sel(14, 64), BF16),            # (2, 896, 448)
        "shf": jnp.asarray(_shift_sel(14), BF16),                  # (2, 14, 14)
        "wfc1": jnp.asarray(wfc1_prep, BF16),                      # (7, 448, 128)
        "bfc1": jnp.asarray(bfc1[None, :], F32),                   # (1, 128)
        "wfc2": jnp.asarray(wfc2_prep, BF16),                      # (128, 128)
        "bfc2": jnp.asarray(bfc2_prep, F32),                       # (1, 128)
    }


_WEIGHT_ORDER = ("b1", "bias1", "sh1", "sw1", "b2", "bias2",
                 "sh2", "sw2", "shf", "wfc1", "bfc1", "wfc2", "bfc2")


# ----------------------------------- forward ------------------------------------- #

@jax.jit
def cnn_forward(x_nchw, prep):
    N = x_nchw.shape[0]
    # NCHW -> (rows = H padded by 1, lanes = w*3 + cin); cast to bf16 for the MXU.
    xr = jnp.transpose(x_nchw, (0, 2, 3, 1)).reshape(N, 28, 28 * 3)
    xr = jnp.pad(xr, ((0, 0), (1, 1), (0, 0))).astype(BF16)        # (N, 30, 84)

    def rep(name):
        a = prep[name]
        nd = a.ndim
        return pl.BlockSpec(a.shape, lambda i, _n=nd: (0,) * _n)

    out = pl.pallas_call(
        _fused_cnn_kernel,
        out_shape=jax.ShapeDtypeStruct((N, 1, 128), jnp.float32),
        grid_spec=pltpu.PrefetchScalarGridSpec(
            num_scalar_prefetch=0,
            grid=(N,),
            in_specs=[pl.BlockSpec((1, 30, 84), lambda i: (i, 0, 0))]
                     + [rep(n) for n in _WEIGHT_ORDER],
            out_specs=pl.BlockSpec((1, 1, 128), lambda i: (i, 0, 0)),
        ),
        compiler_params=pltpu.CompilerParams(
            dimension_semantics=("parallel",),
            vmem_limit_bytes=32 * 1024 * 1024),
    )(xr, *[prep[n] for n in _WEIGHT_ORDER])
    return out[:, 0, :10]


# -------------------------------- init & reference -------------------------------- #

def init_params(key):
    ks = jax.random.split(key, 8)
    s = 0.05
    return {
        # PyTorch conventions: conv weight (O, I, kH, kW), linear weight (out, in)
        "w1": jax.random.normal(ks[0], (32, 3, 3, 3), jnp.float32) * s,
        "b1": jax.random.normal(ks[1], (32,), jnp.float32) * s,
        "w2": jax.random.normal(ks[2], (64, 32, 3, 3), jnp.float32) * s,
        "b2": jax.random.normal(ks[3], (64,), jnp.float32) * s,
        "wfc1": jax.random.normal(ks[4], (128, 64 * 7 * 7), jnp.float32) * s,
        "bfc1": jax.random.normal(ks[5], (128,), jnp.float32) * s,
        "wfc2": jax.random.normal(ks[6], (10, 128), jnp.float32) * s,
        "bfc2": jax.random.normal(ks[7], (10,), jnp.float32) * s,
    }


def _reference_forward(x_nchw, p):
    """Pure-JAX f32 reference mirroring the PyTorch module (sanity check only)."""
    def conv(x, w, b):
        y = jax.lax.conv_general_dilated(
            x, w, window_strides=(1, 1), padding=((1, 1), (1, 1)),
            dimension_numbers=("NCHW", "OIHW", "NCHW"))
        return jax.nn.relu(y + b[None, :, None, None])

    def pool(x):
        return jax.lax.reduce_window(
            x, -jnp.inf, jax.lax.max, (1, 1, 2, 2), (1, 1, 2, 2), "VALID")

    x = pool(conv(x_nchw, p["w1"], p["b1"]))
    x = pool(conv(x, p["w2"], p["b2"]))
    x = x.reshape(x.shape[0], -1)
    x = jax.nn.relu(x @ p["wfc1"].T + p["bfc1"])
    return x @ p["wfc2"].T + p["bfc2"]


if __name__ == "__main__":
    key = jax.random.PRNGKey(0)
    kx, kp = jax.random.split(key)
    # Input consistent with the module: 3-channel 28x28 (28 -> pool -> 14 -> pool -> 7).
    x = jax.random.normal(kx, (2, 3, 28, 28), jnp.float32)
    params = init_params(kp)
    prep = prepare_params(params)          # one-time weight packing

    out = jax.block_until_ready(cnn_forward(x, prep))
    assert out.shape == (2, 10), out.shape

    ref = _reference_forward(x, params)
    err = float(jnp.max(jnp.abs(out - ref)))
    # bf16 MXU inputs (f32 accumulation) -> slightly looser tolerance than pure f32.
    assert jnp.allclose(out, ref, rtol=2e-2, atol=2e-2), err

    print("KERNEL_OK")
</pallas_src>

<mosaic_0001>
module attributes {stable_mosaic.version = 11 : i64} {
  func.func @_fused_cnn_kernel(%arg0: i32, %arg1: memref<1x30x84xbf16, #tpu.memory_space<vmem>>, %arg2: memref<3x84x896xbf16, #tpu.memory_space<vmem>>, %arg3: memref<1x896xf32, #tpu.memory_space<vmem>>, %arg4: memref<2x14x28xbf16, #tpu.memory_space<vmem>>, %arg5: memref<2x896x448xbf16, #tpu.memory_space<vmem>>, %arg6: memref<3x448x896xbf16, #tpu.memory_space<vmem>>, %arg7: memref<1x896xf32, #tpu.memory_space<vmem>>, %arg8: memref<2x7x14xbf16, #tpu.memory_space<vmem>>, %arg9: memref<2x896x448xbf16, #tpu.memory_space<vmem>>, %arg10: memref<2x14x14xbf16, #tpu.memory_space<vmem>>, %arg11: memref<7x448x128xbf16, #tpu.memory_space<vmem>>, %arg12: memref<1x128xf32, #tpu.memory_space<vmem>>, %arg13: memref<128x128xbf16, #tpu.memory_space<vmem>>, %arg14: memref<1x128xf32, #tpu.memory_space<vmem>>, %arg15: memref<1x1x128xf32, #tpu.memory_space<vmem>>) attributes {dimension_semantics = [#tpu.dimension_semantics<parallel>], iteration_bounds = array<i64: 2>, scalar_prefetch = 0 : i64, scratch_operands = 0 : i64, tpu.core_type = #tpu.core_type<tc>, window_params = [{transform_indices = @transform_0, window_bounds = array<i64: 1, 30, 84>}, {pipeline_mode = #tpu.pipeline_mode<synchronous>, transform_indices = @transform_1, window_bounds = array<i64: 3, 84, 896>}, {pipeline_mode = #tpu.pipeline_mode<synchronous>, transform_indices = @transform_2, window_bounds = array<i64: 1, 896>}, {pipeline_mode = #tpu.pipeline_mode<synchronous>, transform_indices = @transform_3, window_bounds = array<i64: 2, 14, 28>}, {pipeline_mode = #tpu.pipeline_mode<synchronous>, transform_indices = @transform_4, window_bounds = array<i64: 2, 896, 448>}, {pipeline_mode = #tpu.pipeline_mode<synchronous>, transform_indices = @transform_5, window_bounds = array<i64: 3, 448, 896>}, {pipeline_mode = #tpu.pipeline_mode<synchronous>, transform_indices = @transform_6, window_bounds = array<i64: 1, 896>}, {pipeline_mode = #tpu.pipeline_mode<synchronous>, transform_indices = @transform_7, window_bounds = array<i64: 2, 7, 14>}, {pipeline_mode = #tpu.pipeline_mode<synchronous>, transform_indices = @transform_8, window_bounds = array<i64: 2, 896, 448>}, {pipeline_mode = #tpu.pipeline_mode<synchronous>, transform_indices = @transform_9, window_bounds = array<i64: 2, 14, 14>}, {pipeline_mode = #tpu.pipeline_mode<synchronous>, transform_indices = @transform_10, window_bounds = array<i64: 7, 448, 128>}, {pipeline_mode = #tpu.pipeline_mode<synchronous>, transform_indices = @transform_11, window_bounds = array<i64: 1, 128>}, {pipeline_mode = #tpu.pipeline_mode<synchronous>, transform_indices = @transform_12, window_bounds = array<i64: 128, 128>}, {pipeline_mode = #tpu.pipeline_mode<synchronous>, transform_indices = @transform_13, window_bounds = array<i64: 1, 128>}, {transform_indices = @transform_14, window_bounds = array<i64: 1, 1, 128>}]} {
    %c0 = arith.constant 0 : index
    %c0_0 = arith.constant 0 : index
    %c0_1 = arith.constant 0 : index
    %0 = vector.load %arg1[%c0, %c0_0, %c0_1] : memref<1x30x84xbf16, #tpu.memory_space<vmem>>, vector<1x30x84xbf16>
    %1 = vector.shape_cast %0 : vector<1x30x84xbf16> to vector<30x84xbf16>
    %2 = vector.extract_strided_slice %1 {offsets = [0, 0], sizes = [28, 84], strides = [1, 1]} : vector<30x84xbf16> to vector<28x84xbf16>
    %c0_2 = arith.constant 0 : index
    %c0_3 = arith.constant 0 : index
    %c0_4 = arith.constant 0 : index
    %3 = vector.load %arg2[%c0_2, %c0_3, %c0_4] : memref<3x84x896xbf16, #tpu.memory_space<vmem>>, vector<1x84x896xbf16>
    %4 = vector.shape_cast %3 : vector<1x84x896xbf16> to vector<84x896xbf16>
    %cst = arith.constant dense<0.000000e+00> : vector<28x896xf32>
    %5 = tpu.matmul %2, %4, %cst {dimension_numbers = #tpu.dot_dimension_numbers<[1], [0], [0], [1], [0, 0, 1, 1], [], []>} : vector<28x84xbf16>, vector<84x896xbf16>, vector<28x896xf32> -> vector<28x896xf32>
    %6 = vector.extract_strided_slice %1 {offsets = [1, 0], sizes = [28, 84], strides = [1, 1]} : vector<30x84xbf16> to vector<28x84xbf16>
    %c1 = arith.constant 1 : index
    %c0_5 = arith.constant 0 : index
    %c0_6 = arith.constant 0 : index
    %7 = vector.load %arg2[%c1, %c0_5, %c0_6] : memref<3x84x896xbf16, #tpu.memory_space<vmem>>, vector<1x84x896xbf16>
    %8 = vector.shape_cast %7 : vector<1x84x896xbf16> to vector<84x896xbf16>
    %cst_7 = arith.constant dense<0.000000e+00> : vector<28x896xf32>
    %9 = tpu.matmul %6, %8, %cst_7 {dimension_numbers = #tpu.dot_dimension_numbers<[1], [0], [0], [1], [0, 0, 1, 1], [], []>} : vector<28x84xbf16>, vector<84x896xbf16>, vector<28x896xf32> -> vector<28x896xf32>
    %10 = arith.addf %5, %9 : vector<28x896xf32>
    %11 = vector.extract_strided_slice %1 {offsets = [2, 0], sizes = [28, 84], strides = [1, 1]} : vector<30x84xbf16> to vector<28x84xbf16>
    %c2 = arith.constant 2 : index
    %c0_8 = arith.constant 0 : index
    %c0_9 = arith.constant 0 : index
    %12 = vector.load %arg2[%c2, %c0_8, %c0_9] : memref<3x84x896xbf16, #tpu.memory_space<vmem>>, vector<1x84x896xbf16>
    %13 = vector.shape_cast %12 : vector<1x84x896xbf16> to vector<84x896xbf16>
    %cst_10 = arith.constant dense<0.000000e+00> : vector<28x896xf32>
    %14 = tpu.matmul %11, %13, %cst_10 {dimension_numbers = #tpu.dot_dimension_numbers<[1], [0], [0], [1], [0, 0, 1, 1], [], []>} : vector<28x84xbf16>, vector<84x896xbf16>, vector<28x896xf32> -> vector<28x896xf32>
    %15 = arith.addf %10, %14 : vector<28x896xf32>
    %c0_11 = arith.constant 0 : index
    %c0_12 = arith.constant 0 : index
    %16 = vector.load %arg3[%c0_11, %c0_12] : memref<1x896xf32, #tpu.memory_space<vmem>>, vector<1x896xf32>
    %17 = vector.broadcast %16 : vector<1x896xf32> to vector<28x896xf32>
    %18 = arith.addf %15, %17 : vector<28x896xf32>
    %cst_13 = arith.constant 0.000000e+00 : f32
    %19 = vector.broadcast %cst_13 : f32 to vector<28x896xf32>
    %20 = arith.maximumf %18, %19 : vector<28x896xf32>
    %c0_14 = arith.constant 0 : index
    %c0_15 = arith.constant 0 : index
    %c0_16 = arith.constant 0 : index
    %21 = vector.load %arg4[%c0_14, %c0_15, %c0_16] : memref<2x14x28xbf16, #tpu.memory_space<vmem>>, vector<1x14x28xbf16>
    %22 = vector.shape_cast %21 : vector<1x14x28xbf16> to vector<14x28xbf16>
    %23 = arith.truncf %20 : vector<28x896xf32> to vector<28x896xbf16>
    %cst_17 = arith.constant dense<0.000000e+00> : vector<14x896xf32>
    %24 = tpu.matmul %22, %23, %cst_17 {dimension_numbers = #tpu.dot_dimension_numbers<[1], [0], [0], [1], [0, 0, 1, 1], [], []>} : vector<14x28xbf16>, vector<28x896xbf16>, vector<14x896xf32> -> vector<14x896xf32>
    %c1_18 = arith.constant 1 : index
    %c0_19 = arith.constant 0 : index
    %c0_20 = arith.constant 0 : index
    %25 = vector.load %arg4[%c1_18, %c0_19, %c0_20] : memref<2x14x28xbf16, #tpu.memory_space<vmem>>, vector<1x14x28xbf16>
    %26 = vector.shape_cast %25 : vector<1x14x28xbf16> to vector<14x28xbf16>
    %27 = arith.truncf %20 : vector<28x896xf32> to vector<28x896xbf16>
    %cst_21 = arith.constant dense<0.000000e+00> : vector<14x896xf32>
    %28 = tpu.matmul %26, %27, %cst_21 {dimension_numbers = #tpu.dot_dimension_numbers<[1], [0], [0], [1], [0, 0, 1, 1], [], []>} : vector<14x28xbf16>, vector<28x896xbf16>, vector<14x896xf32> -> vector<14x896xf32>
    %29 = arith.maximumf %24, %28 : vector<14x896xf32>
    %c0_22 = arith.constant 0 : index
    %c0_23 = arith.constant 0 : index
    %c0_24 = arith.constant 0 : index
    %30 = vector.load %arg5[%c0_22, %c0_23, %c0_24] : memref<2x896x448xbf16, #tpu.memory_space<vmem>>, vector<1x896x448xbf16>
    %31 = vector.shape_cast %30 : vector<1x896x448xbf16> to vector<896x448xbf16>
    %32 = arith.truncf %29 : vector<14x896xf32> to vector<14x896xbf16>
    %cst_25 = arith.constant dense<0.000000e+00> : vector<14x448xf32>
    %33 = tpu.matmul %32, %31, %cst_25 {dimension_numbers = #tpu.dot_dimension_numbers<[1], [0], [0], [1], [0, 0, 1, 1], [], []>} : vector<14x896xbf16>, vector<896x448xbf16>, vector<14x448xf32> -> vector<14x448xf32>
    %c1_26 = arith.constant 1 : index
    %c0_27 = arith.constant 0 : index
    %c0_28 = arith.constant 0 : index
    %34 = vector.load %arg5[%c1_26, %c0_27, %c0_28] : memref<2x896x448xbf16, #tpu.memory_space<vmem>>, vector<1x896x448xbf16>
    %35 = vector.shape_cast %34 : vector<1x896x448xbf16> to vector<896x448xbf16>
    %36 = arith.truncf %29 : vector<14x896xf32> to vector<14x896xbf16>
    %cst_29 = arith.constant dense<0.000000e+00> : vector<14x448xf32>
    %37 = tpu.matmul %36, %35, %cst_29 {dimension_numbers = #tpu.dot_dimension_numbers<[1], [0], [0], [1], [0, 0, 1, 1], [], []>} : vector<14x896xbf16>, vector<896x448xbf16>, vector<14x448xf32> -> vector<14x448xf32>
    %38 = arith.maximumf %33, %37 : vector<14x448xf32>
    %c0_30 = arith.constant 0 : index
    %c0_31 = arith.constant 0 : index
    %c0_32 = arith.constant 0 : index
    %39 = vector.load %arg10[%c0_30, %c0_31, %c0_32] : memref<2x14x14xbf16, #tpu.memory_space<vmem>>, vector<1x14x14xbf16>
    %40 = vector.shape_cast %39 : vector<1x14x14xbf16> to vector<14x14xbf16>
    %41 = arith.truncf %38 : vector<14x448xf32> to vector<14x448xbf16>
    %cst_33 = arith.constant dense<0.000000e+00> : vector<14x448xf32>
    %42 = tpu.matmul %40, %41, %cst_33 {dimension_numbers = #tpu.dot_dimension_numbers<[1], [0], [0], [1], [0, 0, 1, 1], [], []>} : vector<14x14xbf16>, vector<14x448xbf16>, vector<14x448xf32> -> vector<14x448xf32>
    %c1_34 = arith.constant 1 : index
    %c0_35 = arith.constant 0 : index
    %c0_36 = arith.constant 0 : index
    %43 = vector.load %arg10[%c1_34, %c0_35, %c0_36] : memref<2x14x14xbf16, #tpu.memory_space<vmem>>, vector<1x14x14xbf16>
    %44 = vector.shape_cast %43 : vector<1x14x14xbf16> to vector<14x14xbf16>
    %45 = arith.truncf %38 : vector<14x448xf32> to vector<14x448xbf16>
    %cst_37 = arith.constant dense<0.000000e+00> : vector<14x448xf32>
    %46 = tpu.matmul %44, %45, %cst_37 {dimension_numbers = #tpu.dot_dimension_numbers<[1], [0], [0], [1], [0, 0, 1, 1], [], []>} : vector<14x14xbf16>, vector<14x448xbf16>, vector<14x448xf32> -> vector<14x448xf32>
    %c0_38 = arith.constant 0 : index
    %c0_39 = arith.constant 0 : index
    %c0_40 = arith.constant 0 : index
    %47 = vector.load %arg6[%c0_38, %c0_39, %c0_40] : memref<3x448x896xbf16, #tpu.memory_space<vmem>>, vector<1x448x896xbf16>
    %48 = vector.shape_cast %47 : vector<1x448x896xbf16> to vector<448x896xbf16>
    %49 = arith.truncf %42 : vector<14x448xf32> to vector<14x448xbf16>
    %cst_41 = arith.constant dense<0.000000e+00> : vector<14x896xf32>
    %50 = tpu.matmul %49, %48, %cst_41 {dimension_numbers = #tpu.dot_dimension_numbers<[1], [0], [0], [1], [0, 0, 1, 1], [], []>} : vector<14x448xbf16>, vector<448x896xbf16>, vector<14x896xf32> -> vector<14x896xf32>
    %c1_42 = arith.constant 1 : index
    %c0_43 = arith.constant 0 : index
    %c0_44 = arith.constant 0 : index
    %51 = vector.load %arg6[%c1_42, %c0_43, %c0_44] : memref<3x448x896xbf16, #tpu.memory_space<vmem>>, vector<1x448x896xbf16>
    %52 = vector.shape_cast %51 : vector<1x448x896xbf16> to vector<448x896xbf16>
    %53 = arith.truncf %38 : vector<14x448xf32> to vector<14x448xbf16>
    %cst_45 = arith.constant dense<0.000000e+00> : vector<14x896xf32>
    %54 = tpu.matmul %53, %52, %cst_45 {dimension_numbers = #tpu.dot_dimension_numbers<[1], [0], [0], [1], [0, 0, 1, 1], [], []>} : vector<14x448xbf16>, vector<448x896xbf16>, vector<14x896xf32> -> vector<14x896xf32>
    %55 = arith.addf %50, %54 : vector<14x896xf32>
    %c2_46 = arith.constant 2 : index
    %c0_47 = arith.constant 0 : index
    %c0_48 = arith.constant 0 : index
    %56 = vector.load %arg6[%c2_46, %c0_47, %c0_48] : memref<3x448x896xbf16, #tpu.memory_space<vmem>>, vector<1x448x896xbf16>
    %57 = vector.shape_cast %56 : vector<1x448x896xbf16> to vector<448x896xbf16>
    %58 = arith.truncf %46 : vector<14x448xf32> to vector<14x448xbf16>
    %cst_49 = arith.constant dense<0.000000e+00> : vector<14x896xf32>
    %59 = tpu.matmul %58, %57, %cst_49 {dimension_numbers = #tpu.dot_dimension_numbers<[1], [0], [0], [1], [0, 0, 1, 1], [], []>} : vector<14x448xbf16>, vector<448x896xbf16>, vector<14x896xf32> -> vector<14x896xf32>
    %60 = arith.addf %55, %59 : vector<14x896xf32>
    %c0_50 = arith.constant 0 : index
    %c0_51 = arith.constant 0 : index
    %61 = vector.load %arg7[%c0_50, %c0_51] : memref<1x896xf32, #tpu.memory_space<vmem>>, vector<1x896xf32>
    %62 = vector.broadcast %61 : vector<1x896xf32> to vector<14x896xf32>
    %63 = arith.addf %60, %62 : vector<14x896xf32>
    %cst_52 = arith.constant 0.000000e+00 : f32
    %64 = vector.broadcast %cst_52 : f32 to vector<14x896xf32>
    %65 = arith.maximumf %63, %64 : vector<14x896xf32>
    %c0_53 = arith.constant 0 : index
    %c0_54 = arith.constant 0 : index
    %c0_55 = arith.constant 0 : index
    %66 = vector.load %arg8[%c0_53, %c0_54, %c0_55] : memref<2x7x14xbf16, #tpu.memory_space<vmem>>, vector<1x7x14xbf16>
    %67 = vector.shape_cast %66 : vector<1x7x14xbf16> to vector<7x14xbf16>
    %68 = arith.truncf %65 : vector<14x896xf32> to vector<14x896xbf16>
    %cst_56 = arith.constant dense<0.000000e+00> : vector<7x896xf32>
    %69 = tpu.matmul %67, %68, %cst_56 {dimension_numbers = #tpu.dot_dimension_numbers<[1], [0], [0], [1], [0, 0, 1, 1], [], []>} : vector<7x14xbf16>, vector<14x896xbf16>, vector<7x896xf32> -> vector<7x896xf32>
    %c1_57 = arith.constant 1 : index
    %c0_58 = arith.constant 0 : index
    %c0_59 = arith.constant 0 : index
    %70 = vector.load %arg8[%c1_57, %c0_58, %c0_59] : memref<2x7x14xbf16, #tpu.memory_space<vmem>>, vector<1x7x14xbf16>
    %71 = vector.shape_cast %70 : vector<1x7x14xbf16> to vector<7x14xbf16>
    %72 = arith.truncf %65 : vector<14x896xf32> to vector<14x896xbf16>
    %cst_60 = arith.constant dense<0.000000e+00> : vector<7x896xf32>
    %73 = tpu.matmul %71, %72, %cst_60 {dimension_numbers = #tpu.dot_dimension_numbers<[1], [0], [0], [1], [0, 0, 1, 1], [], []>} : vector<7x14xbf16>, vector<14x896xbf16>, vector<7x896xf32> -> vector<7x896xf32>
    %74 = arith.maximumf %69, %73 : vector<7x896xf32>
    %c0_61 = arith.constant 0 : index
    %c0_62 = arith.constant 0 : index
    %c0_63 = arith.constant 0 : index
    %75 = vector.load %arg9[%c0_61, %c0_62, %c0_63] : memref<2x896x448xbf16, #tpu.memory_space<vmem>>, vector<1x896x448xbf16>
    %76 = vector.shape_cast %75 : vector<1x896x448xbf16> to vector<896x448xbf16>
    %77 = arith.truncf %74 : vector<7x896xf32> to vector<7x896xbf16>
    %cst_64 = arith.constant dense<0.000000e+00> : vector<7x448xf32>
    %78 = tpu.matmul %77, %76, %cst_64 {dimension_numbers = #tpu.dot_dimension_numbers<[1], [0], [0], [1], [0, 0, 1, 1], [], []>} : vector<7x896xbf16>, vector<896x448xbf16>, vector<7x448xf32> -> vector<7x448xf32>
    %c1_65 = arith.constant 1 : index
    %c0_66 = arith.constant 0 : index
    %c0_67 = arith.constant 0 : index
    %79 = vector.load %arg9[%c1_65, %c0_66, %c0_67] : memref<2x896x448xbf16, #tpu.memory_space<vmem>>, vector<1x896x448xbf16>
    %80 = vector.shape_cast %79 : vector<1x896x448xbf16> to vector<896x448xbf16>
    %81 = arith.truncf %74 : vector<7x896xf32> to vector<7x896xbf16>
    %cst_68 = arith.constant dense<0.000000e+00> : vector<7x448xf32>
    %82 = tpu.matmul %81, %80, %cst_68 {dimension_numbers = #tpu.dot_dimension_numbers<[1], [0], [0], [1], [0, 0, 1, 1], [], []>} : vector<7x896xbf16>, vector<896x448xbf16>, vector<7x448xf32> -> vector<7x448xf32>
    %83 = arith.maximumf %78, %82 : vector<7x448xf32>
    %84 = vector.extract_strided_slice %83 {offsets = [0, 0], sizes = [1, 448], strides = [1, 1]} : vector<7x448xf32> to vector<1x448xf32>
    %c0_69 = arith.constant 0 : index
    %c0_70 = arith.constant 0 : index
    %c0_71 = arith.constant 0 : index
    %85 = vector.load %arg11[%c0_69, %c0_70, %c0_71] : memref<7x448x128xbf16, #tpu.memory_space<vmem>>, vector<1x448x128xbf16>
    %86 = vector.shape_cast %85 : vector<1x448x128xbf16> to vector<448x128xbf16>
    %87 = arith.truncf %84 : vector<1x448xf32> to vector<1x448xbf16>
    %cst_72 = arith.constant dense<0.000000e+00> : vector<1x128xf32>
    %88 = tpu.matmul %87, %86, %cst_72 {dimension_numbers = #tpu.dot_dimension_numbers<[1], [0], [0], [1], [0, 0, 1, 1], [], []>} : vector<1x448xbf16>, vector<448x128xbf16>, vector<1x128xf32> -> vector<1x128xf32>
    %89 = vector.extract_strided_slice %83 {offsets = [1, 0], sizes = [1, 448], strides = [1, 1]} : vector<7x448xf32> to vector<1x448xf32>
    %c1_73 = arith.constant 1 : index
    %c0_74 = arith.constant 0 : index
    %c0_75 = arith.constant 0 : index
    %90 = vector.load %arg11[%c1_73, %c0_74, %c0_75] : memref<7x448x128xbf16, #tpu.memory_space<vmem>>, vector<1x448x128xbf16>
    %91 = vector.shape_cast %90 : vector<1x448x128xbf16> to vector<448x128xbf16>
    %92 = arith.truncf %89 : vector<1x448xf32> to vector<1x448xbf16>
    %cst_76 = arith.constant dense<0.000000e+00> : vector<1x128xf32>
    %93 = tpu.matmul %92, %91, %cst_76 {dimension_numbers = #tpu.dot_dimension_numbers<[1], [0], [0], [1], [0, 0, 1, 1], [], []>} : vector<1x448xbf16>, vector<448x128xbf16>, vector<1x128xf32> -> vector<1x128xf32>
    %94 = arith.addf %88, %93 : vector<1x128xf32>
    %95 = vector.extract_strided_slice %83 {offsets = [2, 0], sizes = [1, 448], strides = [1, 1]} : vector<7x448xf32> to vector<1x448xf32>
    %c2_77 = arith.constant 2 : index
    %c0_78 = arith.constant 0 : index
    %c0_79 = arith.constant 0 : index
    %96 = vector.load %arg11[%c2_77, %c0_78, %c0_79] : memref<7x448x128xbf16, #tpu.memory_space<vmem>>, vector<1x448x128xbf16>
    %97 = vector.shape_cast %96 : vector<1x448x128xbf16> to vector<448x128xbf16>
    %98 = arith.truncf %95 : vector<1x448xf32> to vector<1x448xbf16>
    %cst_80 = arith.constant dense<0.000000e+00> : vector<1x128xf32>
    %99 = tpu.matmul %98, %97, %cst_80 {dimension_numbers = #tpu.dot_dimension_numbers<[1], [0], [0], [1], [0, 0, 1, 1], [], []>} : vector<1x448xbf16>, vector<448x128xbf16>, vector<1x128xf32> -> vector<1x128xf32>
    %100 = arith.addf %94, %99 : vector<1x128xf32>
    %101 = vector.extract_strided_slice %83 {offsets = [3, 0], sizes = [1, 448], strides = [1, 1]} : vector<7x448xf32> to vector<1x448xf32>
    %c3 = arith.constant 3 : index
    %c0_81 = arith.constant 0 : index
    %c0_82 = arith.constant 0 : index
    %102 = vector.load %arg11[%c3, %c0_81, %c0_82] : memref<7x448x128xbf16, #tpu.memory_space<vmem>>, vector<1x448x128xbf16>
    %103 = vector.shape_cast %102 : vector<1x448x128xbf16> to vector<448x128xbf16>
    %104 = arith.truncf %101 : vector<1x448xf32> to vector<1x448xbf16>
    %cst_83 = arith.constant dense<0.000000e+00> : vector<1x128xf32>
    %105 = tpu.matmul %104, %103, %cst_83 {dimension_numbers = #tpu.dot_dimension_numbers<[1], [0], [0], [1], [0, 0, 1, 1], [], []>} : vector<1x448xbf16>, vector<448x128xbf16>, vector<1x128xf32> -> vector<1x128xf32>
    %106 = arith.addf %100, %105 : vector<1x128xf32>
    %107 = vector.extract_strided_slice %83 {offsets = [4, 0], sizes = [1, 448], strides = [1, 1]} : vector<7x448xf32> to vector<1x448xf32>
    %c4 = arith.constant 4 : index
    %c0_84 = arith.constant 0 : index
    %c0_85 = arith.constant 0 : index
    %108 = vector.load %arg11[%c4, %c0_84, %c0_85] : memref<7x448x128xbf16, #tpu.memory_space<vmem>>, vector<1x448x128xbf16>
    %109 = vector.shape_cast %108 : vector<1x448x128xbf16> to vector<448x128xbf16>
    %110 = arith.truncf %107 : vector<1x448xf32> to vector<1x448xbf16>
    %cst_86 = arith.constant dense<0.000000e+00> : vector<1x128xf32>
    %111 = tpu.matmul %110, %109, %cst_86 {dimension_numbers = #tpu.dot_dimension_numbers<[1], [0], [0], [1], [0, 0, 1, 1], [], []>} : vector<1x448xbf16>, vector<448x128xbf16>, vector<1x128xf32> -> vector<1x128xf32>
    %112 = arith.addf %106, %111 : vector<1x128xf32>
    %113 = vector.extract_strided_slice %83 {offsets = [5, 0], sizes = [1, 448], strides = [1, 1]} : vector<7x448xf32> to vector<1x448xf32>
    %c5 = arith.constant 5 : index
    %c0_87 = arith.constant 0 : index
    %c0_88 = arith.constant 0 : index
    %114 = vector.load %arg11[%c5, %c0_87, %c0_88] : memref<7x448x128xbf16, #tpu.memory_space<vmem>>, vector<1x448x128xbf16>
    %115 = vector.shape_cast %114 : vector<1x448x128xbf16> to vector<448x128xbf16>
    %116 = arith.truncf %113 : vector<1x448xf32> to vector<1x448xbf16>
    %cst_89 = arith.constant dense<0.000000e+00> : vector<1x128xf32>
    %117 = tpu.matmul %116, %115, %cst_89 {dimension_numbers = #tpu.dot_dimension_numbers<[1], [0], [0], [1], [0, 0, 1, 1], [], []>} : vector<1x448xbf16>, vector<448x128xbf16>, vector<1x128xf32> -> vector<1x128xf32>
    %118 = arith.addf %112, %117 : vector<1x128xf32>
    %119 = vector.extract_strided_slice %83 {offsets = [6, 0], sizes = [1, 448], strides = [1, 1]} : vector<7x448xf32> to vector<1x448xf32>
    %c6 = arith.constant 6 : index
    %c0_90 = arith.constant 0 : index
    %c0_91 = arith.constant 0 : index
    %120 = vector.load %arg11[%c6, %c0_90, %c0_91] : memref<7x448x128xbf16, #tpu.memory_space<vmem>>, vector<1x448x128xbf16>
    %121 = vector.shape_cast %120 : vector<1x448x128xbf16> to vector<448x128xbf16>
    %122 = arith.truncf %119 : vector<1x448xf32> to vector<1x448xbf16>
    %cst_92 = arith.constant dense<0.000000e+00> : vector<1x128xf32>
    %123 = tpu.matmul %122, %121, %cst_92 {dimension_numbers = #tpu.dot_dimension_numbers<[1], [0], [0], [1], [0, 0, 1, 1], [], []>} : vector<1x448xbf16>, vector<448x128xbf16>, vector<1x128xf32> -> vector<1x128xf32>
    %124 = arith.addf %118, %123 : vector<1x128xf32>
    %c0_93 = arith.constant 0 : index
    %c0_94 = arith.constant 0 : index
    %125 = vector.load %arg12[%c0_93, %c0_94] : memref<1x128xf32, #tpu.memory_space<vmem>>, vector<1x128xf32>
    %126 = arith.addf %124, %125 : vector<1x128xf32>
    %cst_95 = arith.constant 0.000000e+00 : f32
    %127 = vector.broadcast %cst_95 : f32 to vector<1x128xf32>
    %128 = arith.maximumf %126, %127 : vector<1x128xf32>
    %c0_96 = arith.constant 0 : index
    %c0_97 = arith.constant 0 : index
    %129 = vector.load %arg13[%c0_96, %c0_97] : memref<128x128xbf16, #tpu.memory_space<vmem>>, vector<128x128xbf16>
    %130 = arith.truncf %128 : vector<1x128xf32> to vector<1x128xbf16>
    %cst_98 = arith.constant dense<0.000000e+00> : vector<1x128xf32>
    %131 = tpu.matmul %130, %129, %cst_98 {dimension_numbers = #tpu.dot_dimension_numbers<[1], [0], [0], [1], [0, 0, 1, 1], [], []>} : vector<1x128xbf16>, vector<128x128xbf16>, vector<1x128xf32> -> vector<1x128xf32>
    %c0_99 = arith.constant 0 : index
    %c0_100 = arith.constant 0 : index
    %132 = vector.load %arg14[%c0_99, %c0_100] : memref<1x128xf32, #tpu.memory_space<vmem>>, vector<1x128xf32>
    %133 = arith.addf %131, %132 : vector<1x128xf32>
    %c0_101 = arith.constant 0 : index
    %c0_102 = arith.constant 0 : index
    %c0_103 = arith.constant 0 : index
    %134 = vector.load %arg15[%c0_101, %c0_102, %c0_103] : memref<1x1x128xf32, #tpu.memory_space<vmem>>, vector<1x1x128xf32>
    %135 = vector.shape_cast %134 : vector<1x1x128xf32> to vector<1x128xf32>
    %136 = vector.shape_cast %133 : vector<1x128xf32> to vector<1x1x128xf32>
    tpu.vector_store %arg15[%c0_101, %c0_102, %c0_103], %136 {strides = array<i32>} : memref<1x1x128xf32, #tpu.memory_space<vmem>>, vector<1x1x128xf32>,
    return
  }
  func.func @transform_0(%arg0: i32) -> (i32, i32, i32) {
    %c0_i32 = arith.constant 0 : i32
    %c0_i32_0 = arith.constant 0 : i32
    %c0_i32_1 = arith.constant 0 : i32
    return %arg0, %c0_i32, %c0_i32_0 : i32, i32, i32
  }
  func.func @transform_1(%arg0: i32) -> (i32, i32, i32) {
    %c0_i32 = arith.constant 0 : i32
    %c0_i32_0 = arith.constant 0 : i32
    %c0_i32_1 = arith.constant 0 : i32
    %c0_i32_2 = arith.constant 0 : i32
    return %c0_i32, %c0_i32_0, %c0_i32_1 : i32, i32, i32
  }
  func.func @transform_2(%arg0: i32) -> (i32, i32) {
    %c0_i32 = arith.constant 0 : i32
    %c0_i32_0 = arith.constant 0 : i32
    %c0_i32_1 = arith.constant 0 : i32
    return %c0_i32, %c0_i32_0 : i32, i32
  }
  func.func @transform_3(%arg0: i32) -> (i32, i32, i32) {
    %c0_i32 = arith.constant 0 : i32
    %c0_i32_0 = arith.constant 0 : i32
    %c0_i32_1 = arith.constant 0 : i32
    %c0_i32_2 = arith.constant 0 : i32
    return %c0_i32, %c0_i32_0, %c0_i32_1 : i32, i32, i32
  }
  func.func @transform_4(%arg0: i32) -> (i32, i32, i32) {
    %c0_i32 = arith.constant 0 : i32
    %c0_i32_0 = arith.constant 0 : i32
    %c0_i32_1 = arith.constant 0 : i32
    %c0_i32_2 = arith.constant 0 : i32
    return %c0_i32, %c0_i32_0, %c0_i32_1 : i32, i32, i32
  }
  func.func @transform_5(%arg0: i32) -> (i32, i32, i32) {
    %c0_i32 = arith.constant 0 : i32
    %c0_i32_0 = arith.constant 0 : i32
    %c0_i32_1 = arith.constant 0 : i32
    %c0_i32_2 = arith.constant 0 : i32
    return %c0_i32, %c0_i32_0, %c0_i32_1 : i32, i32, i32
  }
  func.func @transform_6(%arg0: i32) -> (i32, i32) {
    %c0_i32 = arith.constant 0 : i32
    %c0_i32_0 = arith.constant 0 : i32
    %c0_i32_1 = arith.constant 0 : i32
    return %c0_i32, %c0_i32_0 : i32, i32
  }
  func.func @transform_7(%arg0: i32) -> (i32, i32, i32) {
    %c0_i32 = arith.constant 0 : i32
    %c0_i32_0 = arith.constant 0 : i32
    %c0_i32_1 = arith.constant 0 : i32
    %c0_i32_2 = arith.constant 0 : i32
    return %c0_i32, %c0_i32_0, %c0_i32_1 : i32, i32, i32
  }
  func.func @transform_8(%arg0: i32) -> (i32, i32, i32) {
    %c0_i32 = arith.constant 0 : i32
    %c0_i32_0 = arith.constant 0 : i32
    %c0_i32_1 = arith.constant 0 : i32
    %c0_i32_2 = arith.constant 0 : i32
    return %c0_i32, %c0_i32_0, %c0_i32_1 : i32, i32, i32
  }
  func.func @transform_9(%arg0: i32) -> (i32, i32, i32) {
    %c0_i32 = arith.constant 0 : i32
    %c0_i32_0 = arith.constant 0 : i32
    %c0_i32_1 = arith.constant 0 : i32
    %c0_i32_2 = arith.constant 0 : i32
    return %c0_i32, %c0_i32_0, %c0_i32_1 : i32, i32, i32
  }
  func.func @transform_10(%arg0: i32) -> (i32, i32, i32) {
    %c0_i32 = arith.constant 0 : i32
    %c0_i32_0 = arith.constant 0 : i32
    %c0_i32_1 = arith.constant 0 : i32
    %c0_i32_2 = arith.constant 0 : i32
    return %c0_i32, %c0_i32_0, %c0_i32_1 : i32, i32, i32
  }
  func.func @transform_11(%arg0: i32) -> (i32, i32) {
    %c0_i32 = arith.constant 0 : i32
    %c0_i32_0 = arith.constant 0 : i32
    %c0_i32_1 = arith.constant 0 : i32
    return %c0_i32, %c0_i32_0 : i32, i32
  }
  func.func @transform_12(%arg0: i32) -> (i32, i32) {
    %c0_i32 = arith.constant 0 : i32
    %c0_i32_0 = arith.constant 0 : i32
    %c0_i32_1 = arith.constant 0 : i32
    return %c0_i32, %c0_i32_0 : i32, i32
  }
  func.func @transform_13(%arg0: i32) -> (i32, i32) {
    %c0_i32 = arith.constant 0 : i32
    %c0_i32_0 = arith.constant 0 : i32
    %c0_i32_1 = arith.constant 0 : i32
    return %c0_i32, %c0_i32_0 : i32, i32
  }
  func.func @transform_14(%arg0: i32) -> (i32, i32, i32) {
    %c0_i32 = arith.constant 0 : i32
    %c0_i32_0 = arith.constant 0 : i32
    %c0_i32_1 = arith.constant 0 : i32
    return %arg0, %c0_i32, %c0_i32_0 : i32, i32, i32
  }
}

</mosaic_0001>

<bundles_post_ra>
// kernel: cnn_forward.1
= control target key start
LH: loop header
LB: loop body
LE: loop exit
PB: predicated region body
PF: predicated region fallthrough
CT: control target
= control target key end

     0   :  { %19 = vsyncpa [#allocation3], 0  ;;  %s30058_s0 = inlined_call_operand.vmem [shape: bf16[2,30,84], index: 0, kind: input, shape index: {}]   ;;  %s30059_s1 = inlined_call_operand.vmem [shape: bf16[3,84,896], index: 1, kind: input, shape index: {}]   ;;  %s30060_s2 = inlined_call_operand.vmem [shape: f32[1,896], index: 2, kind: input, shape index: {}]   ;;  %s30061_s3 = inlined_call_operand.vmem [shape: bf16[2,14,28], index: 3, kind: input, shape index: {}]   ;;  %s30062_s4 = inlined_call_operand.vmem [shape: bf16[2,896,448], index: 4, kind: input, shape index: {}]   ;;  %s30063_s5 = inlined_call_operand.vmem [shape: bf16[3,448,896], index: 5, kind: input, shape index: {}]   ;;  %s30064_s6 = inlined_call_operand.vmem [shape: f32[1,896], index: 6, kind: input, shape index: {}]   ;;  %s30065_s7 = inlined_call_operand.vmem [shape: bf16[2,7,14], index: 7, kind: input, shape index: {}]   ;;  %s30066_s8 = inlined_call_operand.vmem [shape: bf16[2,896,448], index: 8, kind: input, shape index: {}]   ;;  %s30067_s9 = inlined_call_operand.vmem [shape: bf16[2,14,14], index: 9, kind: input, shape index: {}]   ;;  %s30068_s10 = inlined_call_operand.vmem [shape: bf16[7,448,128], index: 10, kind: input, shape index: {}]   ;;  %s30069_s11 = inlined_call_operand.vmem [shape: f32[1,128], index: 11, kind: input, shape index: {}]   ;;  %s30070_s12 = inlined_call_operand.vmem [shape: bf16[128,128], index: 12, kind: input, shape index: {}]   ;;  %s30071_s13 = inlined_call_operand.vmem [shape: f32[1,128], index: 13, kind: input, shape index: {}]   ;;  %s30072_s14 = inlined_call_operand.hbm [shape: f32[2,1,128], index: 14, kind: output, shape index: {}]  }
   0x1   :  { %21 = vsyncpa [#allocation3 + $0x1], 0  ;;  %s23357_s29 = smov 0   ;;  %s23359_s30 = smov 0  }
   0x2   :  { %s23361_s15 = smov 0   ;;  %s23363_s16 = smov 0  }
   0x3 LB: > { %30083 = sst [smem:[#allocation5_spill]] %s23264_s29  ;;  %s23378_s17 = sadd.s32 4294967295, %s23276_s16   ;;  %s23276_s16 = sphi %s23363_s16, %s30122_s16   ;;  %s23272_s15 = sphi %s23361_s15, %s30124_s15   ;;  %s23268_s30 = sphi %s23359_s30, %s30126_s30   ;;  %s23264_s29 = sphi %s23357_s29, %s30125_s29  }
   0x4   : > { %30084 = sst [smem:[#allocation6_spill]] %s23272_s15  ;;  %s17004_s18 = sadd.s32 4294967294, %s23276_s16  }
   0x5   : > { %s23382_s19 = sadd.s32 1, %s23276_s16   ;;  %s333_s20 = sadd.s32 1, %s23272_s15 }
   0x6   : > { %30085 = sst [smem:[#allocation7_spill]] %s23382_s19  ;;  %s330_s21 = ssub.s32 %s23276_s16, %s23382_s19 }
   0x7   : > { %p343_p0 = scmp.ne.s32.totalorder %s23272_s15, %s23268_s30  ;;  %p331_p1 = scmp.eq.s32.totalorder %s330_s21, 0 }
   0x8   : > { %p344_p2 = scmp.eq.s32.totalorder %s23378_s17, 1  ;;  %p349_p3 = scmp.ne.s32.totalorder %s23268_s30, %s23264_s29 }
   0x9   : > { %p350_p4 = scmp.eq.s32.totalorder %s17004_s18, 1  ;;  %p17007_p7 = scmp.ge.s32.totalorder %s23276_s16, 1 }
   0xa   : > { %s23393_s22 = scalar_select %p331_p1, %s23272_s15, %s333_s20  }
   0xb   : > { %p23395_p5 = por %p344_p2, %p343_p0  ;;  %p23399_p6 = por %p350_p4, %p349_p3 }
   0xc   : > { %30086 = sst [smem:[#allocation8_spill]] %s23393_s22  ;;  %p415_p8 = scmp.lt.s32.totalorder %s23276_s16, 3 }
   0xd   : > { %s30088_s24 = scalar_select %p23399_p6, 1, 0 }
   0xe   : > { %p416_p9 = pnand %p17007_p7, %p415_p8 }
   0xf   : > { %30089 = sst [smem:[#allocation9_spill]] %s30088_s24 }
  0x10   : > { %419 = sbr.rel (%p416_p9) target bundleno = 3447 (0xd77), region = 76 }
  0x15   : > { %v17050_v0 = vld [vmem:[%s30059_s1 + $0x24c] sm:$0x33]  ;;  %vm790_vm0 = vcmask 1041408   ;;  %v17051_v1 = vld [vmem:[%s30059_s1 + $0x254] sm:$0x33]  ;;  %p460_p10 = scmp.lt.s32.totalorder %s23378_s17, 1 }
  0x16   : > { %v17092_v2 = vcombine.high %v17050_v0, %v17050_v0  ;;  %v17094_v3 = vcombine.high %v17051_v1, %v17051_v1  ;;  %v17091_v4 = vcombine.low %v17050_v0, %v17050_v0  ;;  %v17093_v5 = vcombine.low %v17051_v1, %v17051_v1  ;;  %v20655_v6 = vld [vmem:[%s30059_s1 + $0x218] ss:$28 sps:$4 sm:$0xff]   ;;  %v20657_v7 = vld [vmem:[%s30059_s1 + $0x220] ss:$28 sps:$4 sm:$0xff]   ;;  %v20663_v13 = vld [vmem:[%s30059_s1 + $0x1e8] ss:$28 sps:$4 sm:$0xff]  }
  0x17   : > { %v20659_v8 = vld [vmem:[%s30059_s1 + $0x214] ss:$28 sps:$4 sm:$0xff]   ;;  %v20660_v11 = vld [vmem:[%s30059_s1 + $0x21c] ss:$28 sps:$4 sm:$0xff]   ;;  %s461_s25 = scalar_select %p460_p10, %s23378_s17, 1  ;;  %v30078_v14 = vmov 0  }
  0x18   : > { %17098 = vmatprep.subr.msk.bf16.mxu0 %vm790_vm0, %v17092_v2  ;;  %17101 = vmatprep.subr.msk.bf16.mxu1 %vm790_vm0, %v17094_v3  ;;  %v792_v9 = vsel %vm790_vm0, %v17091_v4, 0  ;;  %v798_v10 = vsel %vm790_vm0, %v17093_v5, 0  ;;  %v20661_v12 = vld [vmem:[%s30059_s1 + $0x1e0] ss:$28 sps:$4 sm:$0xff]   ;;  %v20667_v17 = vld [vmem:[%s30059_s1 + $0x1a8] ss:$28 sps:$4 sm:$0xff]  }
  0x19   : > { %817 = vmatpush1.bf16.msra.mxu0 %v792_v9  ;;  %870 = vmatpush1.bf16.msra.mxu1 %v798_v10  ;;  %v20665_v15 = vld [vmem:[%s30059_s1 + $0x1dc] ss:$28 sps:$4 sm:$0xff]   ;;  %v20666_v16 = vld [vmem:[%s30059_s1 + $0x1e4] ss:$28 sps:$4 sm:$0xff]   ;;  %v20669_v18 = vld [vmem:[%s30059_s1 + $0x1b0] ss:$28 sps:$4 sm:$0xff]  }
  0x1a   : > { %818 = vmatprep.subr.bf16.mxu0 %v20655_v6  ;;  %871 = vmatprep.subr.bf16.mxu1 %v20657_v7  ;;  %s20246_s19 = sshll.u32 %s461_s25, 4  ;;  %v20671_v19 = vld [vmem:[%s30059_s1 + $0x1a4] ss:$28 sps:$4 sm:$0xff]   ;;  %v20672_v20 = vld [vmem:[%s30059_s1 + $0x1ac] ss:$28 sps:$4 sm:$0xff]   ;;  %vm783_vm2 = vcmask 687104  }
  0x1b   : > { %844 = vmatprep.mubr.bf16.mxu0 %v30078_v14  ;;  %897 = vmatprep.mubr.bf16.mxu1 %v30078_v14  ;;  %s464_s22 = scalar_lea.vmem %s30058_s0, %s20246_s19  ;;  %v20673_v21 = vld [vmem:[%s30059_s1 + $0x170] ss:$28 sps:$4 sm:$0xff]   ;;  %v20675_v22 = vld [vmem:[%s30059_s1 + $0x178] ss:$28 sps:$4 sm:$0xff]   ;;  %v20681_v28 = vld [vmem:[%s30059_s1 + $0x140] ss:$28 sps:$4 sm:$0xff]  }
  0x1c   : > { %v20677_v23 = vld [vmem:[%s30059_s1 + $0x16c] ss:$28 sps:$4 sm:$0xff]   ;;  %v20678_v24 = vld [vmem:[%s30059_s1 + $0x174] ss:$28 sps:$4 sm:$0xff]   ;;  %v23472_v25 = vld [vmem:[%s464_s22] sm:$0xff]   ;;  %vm1496_vm3 = vcmask 1046528  }
  0x1d   : > { %819 = vmatpush1.bf16.msra.mxu0 %v20659_v8  ;;  %872 = vmatpush1.bf16.msra.mxu1 %v20660_v11  ;;  %v23474_v26 = vld [vmem:[%s464_s22 + $0x8] sm:$0x7f]   ;;  %v20679_v27 = vld [vmem:[%s30059_s1 + $0x138] ss:$28 sps:$4 sm:$0xff]   ;;  %v571_v29 = vshrl.u32 %v23472_v25, 16  ;;  %v573_v30 = vshll.u32 %v23472_v25, 16 }
  0x1e   : > { %820 = vmatprep.subr.bf16.mxu0 %v20661_v12  ;;  %873 = vmatprep.subr.bf16.mxu1 %v20663_v13  ;;  %v578_v31 = vshll.u32 %v23474_v26, 16  ;;  %vm569_vm1 = vsmask.f32 7424  ;;  %v17052_v32 = vld [vmem:[%s30059_s1 + $0x25c] sm:$0x33]  ;;  %v582_v46 = vshrl.u32 %v23474_v26, 16 }
  0x1f   : > { %v20683_v33 = vld [vmem:[%s30059_s1 + $0x134] ss:$28 sps:$4 sm:$0xff]   ;;  %v575_v34 = vrot.slane %v573_v30, 1  ;;  %v20684_v35 = vld [vmem:[%s30059_s1 + $0x13c] ss:$28 sps:$4 sm:$0xff]   ;;  %v17096_v38 = vcombine.high %v17052_v32, %v17052_v32  ;;  %v17095_v40 = vcombine.low %v17052_v32, %v17052_v32  ;;  %vm2079_vm4 = vcmask 1045504  }
  0x20   : > { %v580_v36 = vrot.slane %v578_v31, 1  ;;  %v20688_v39 = vld [vmem:[%s30059_s1 + $0x264] ss:$0 sps:$4 sm:$0x33]   ;;  %v20693_v45 = vld [vmem:[%s30059_s1 + $0x22c] ss:$28 sps:$4 sm:$0xff]  }
  0x21   : > { %821 = vmatpush1.bf16.msra.mxu0 %v20665_v15  ;;  %874 = vmatpush1.bf16.msra.mxu1 %v20666_v16  ;;  %v576_v37 = vor.u32 %v575_v34, %v571_v29  ;;  %v20692_v42 = vld [vmem:[%s30059_s1 + $0x228] ss:$28 sps:$4 sm:$0xff]   ;;  %v804_v43 = vsel %vm790_vm0, %v17095_v40, 0  ;;  %v810_v44 = vsel %vm790_vm0, %v20688_v39, 0  ;;  %v20696_v48 = vld [vmem:[%s30059_s1 + $0x1f0] ss:$28 sps:$4 sm:$0xff]  }
  0x22   : > { %822 = vmatprep.subr.bf16.mxu0 %v20667_v17  ;;  %875 = vmatprep.subr.bf16.mxu1 %v20669_v18  ;;  %v20690_v47 = vld [vmem:[%s30059_s1 + $0x224] ss:$28 sps:$4 sm:$0xff]   ;;  %v20697_v49 = vld [vmem:[%s30059_s1 + $0x1f4] ss:$28 sps:$4 sm:$0xff]   ;;  %v23526_v50 = vor.u32 %v582_v46, %v580_v36  ;;  %v20694_v51 = vld [vmem:[%s30059_s1 + $0x1ec] ss:$28 sps:$4 sm:$0xff]  }
  0x23   : > { %v23498_v41 = vsel %vm569_vm1, %v576_v37, %v580_v36  ;;  %v20700_v52 = vld [vmem:[%s30059_s1 + $0x1b8] ss:$28 sps:$4 sm:$0xff]   ;;  %v20704_v55 = vld [vmem:[%s30059_s1 + $0x180] ss:$28 sps:$4 sm:$0xff]   ;;  %v20708_v58 = vld [vmem:[%s30059_s1 + $0x148] ss:$28 sps:$4 sm:$0xff]  }
  0x24   : > { %v20701_v53 = vld [vmem:[%s30059_s1 + $0x1bc] ss:$28 sps:$4 sm:$0xff]   ;;  %v20698_v54 = vld [vmem:[%s30059_s1 + $0x1b4] ss:$28 sps:$4 sm:$0xff]   ;;  %v20705_v56 = vld [vmem:[%s30059_s1 + $0x184] ss:$28 sps:$4 sm:$0xff]  }
  0x25   : > { %823 = vmatpush1.bf16.msra.mxu0 %v20671_v19  ;;  %876 = vmatpush1.bf16.msra.mxu1 %v20672_v20  ;;  %v20702_v57 = vld [vmem:[%s30059_s1 + $0x17c] ss:$28 sps:$4 sm:$0xff]   ;;  %v20709_v59 = vld [vmem:[%s30059_s1 + $0x14c] ss:$28 sps:$4 sm:$0xff]   ;;  %v511_v61 = vld [vmem:[%s30059_s1 + $0x120] sm:$0x33] }
  0x26   : > { %824 = vmatprep.subr.bf16.mxu0 %v20673_v21  ;;  %877 = vmatprep.subr.bf16.mxu1 %v20675_v22  ;;  %v510_v60 = vld [vmem:[%s30059_s1 + $0x118] sm:$0x33]  ;;  %v20706_v62 = vld [vmem:[%s30059_s1 + $0x144] ss:$28 sps:$4 sm:$0xff]   ;;  %v17147_v1 = vcombine.high %v511_v61, %v511_v61  ;;  %v17146_v2 = vcombine.low %v511_v61, %v511_v61  ;;  %v20719_v6 = vld [vmem:[%s30059_s1 + $0xec] ss:$28 sps:$4 sm:$0xff]  }
  0x27   : > { %v17144_v63 = vcombine.low %v510_v60, %v510_v60  ;;  %v17145_v0 = vcombine.high %v510_v60, %v510_v60  ;;  %v20716_v4 = vld [vmem:[%s30059_s1 + $0xe4] ss:$28 sps:$4 sm:$0xff]   ;;  %v20722_v9 = vld [vmem:[%s30059_s1 + $0xac] ss:$28 sps:$4 sm:$0xff]   ;;  %v20725_v10 = vld [vmem:[%s30059_s1 + $0xb4] ss:$28 sps:$4 sm:$0xff]  }
  0x28   : > { %v1229_v5 = vsel %vm790_vm0, %v17146_v2, 0  ;;  %v20714_v7 = vld [vmem:[%s30059_s1 + $0xe0] ss:$28 sps:$4 sm:$0xff]   ;;  %v20717_v8 = vld [vmem:[%s30059_s1 + $0xe8] ss:$28 sps:$4 sm:$0xff]   ;;  %vm2075_vm5 = vcmask 228352  }
  0x29   : > { %825 = vmatpush1.bf16.msra.mxu0 %v20677_v23  ;;  %878 = vmatpush1.bf16.msra.mxu1 %v20678_v24  ;;  %v1223_v3 = vsel %vm790_vm0, %v17144_v63, 0  ;;  %v20720_v11 = vld [vmem:[%s30059_s1 + $0xa8] ss:$28 sps:$4 sm:$0xff]   ;;  %v20723_v12 = vld [vmem:[%s30059_s1 + $0xb0] ss:$28 sps:$4 sm:$0xff]   ;;  %vm23280_vm6 = vmmov 0  }
  0x2a   : > { %826 = vmatprep.subr.bf16.mxu0 %v20679_v27  ;;  %879 = vmatprep.subr.bf16.mxu1 %v20681_v28  ;;  %v20728_v13 = vld [vmem:[%s30059_s1 + $0x74] ss:$28 sps:$4 sm:$0xff]   ;;  %v20731_v15 = vld [vmem:[%s30059_s1 + $0x7c] ss:$28 sps:$4 sm:$0xff]   ;;  %v20737_v19 = vld [vmem:[%s30059_s1 + $0x44] ss:$28 sps:$4 sm:$0xff]  }
  0x2b   : > { %v20726_v16 = vld [vmem:[%s30059_s1 + $0x70] ss:$28 sps:$4 sm:$0xff]   ;;  %v20729_v17 = vld [vmem:[%s30059_s1 + $0x78] ss:$28 sps:$4 sm:$0xff]   ;;  %v20735_v21 = vld [vmem:[%s30059_s1 + $0x40] ss:$28 sps:$4 sm:$0xff]  }
  0x2c   : > { %v20734_v18 = vld [vmem:[%s30059_s1 + $0x3c] ss:$28 sps:$4 sm:$0xff]   ;;  %v20740_v22 = vld [vmem:[%s30059_s1 + $0x4] ss:$28 sps:$4 sm:$0xff]   ;;  %v20743_v23 = vld [vmem:[%s30059_s1 + $0xc] ss:$28 sps:$4 sm:$0xff]  }
  0x2d   : > { %827 = vmatpush1.bf16.msra.mxu0 %v20683_v33  ;;  %880 = vmatpush1.bf16.msra.mxu1 %v20684_v35  ;;  %v20732_v20 = vld [vmem:[%s30059_s1 + $0x38] ss:$28 sps:$4 sm:$0xff]   ;;  %v512_v24 = vld [vmem:[%s30059_s1 + $0x128] sm:$0x33]  ;;  %v20738_v27 = vld [vmem:[%s30059_s1] ss:$28 sps:$4 sm:$0xff]  }
  0x2e   : > { %17104 = vmatprep.subr.msk.bf16.mxu0 %vm790_vm0, %v17096_v38  ;;  %20606 = vmatprep.subr.msk.bf16.mxu1 %vm790_vm0, %v20688_v39  ;;  %v20741_v28 = vld [vmem:[%s30059_s1 + $0x8] ss:$28 sps:$4 sm:$0xff]   ;;  %v20745_v29 = vld [vmem:[%s30059_s1 + $0x130] ss:$0 sps:$4 sm:$0x33]   ;;  %v17148_v30 = vcombine.low %v512_v24, %v512_v24  ;;  %v17149_v31 = vcombine.high %v512_v24, %v512_v24  ;;  %vm5869_vm7 = vcmask 113664  }
  0x2f   : > { %v1241_v33 = vsel %vm790_vm0, %v20745_v29, 0  ;;  %v20749_v34 = vld [vmem:[%s30059_s1 + $0xf4] ss:$28 sps:$4 sm:$0xff]   ;;  %v20753_v37 = vld [vmem:[%s30059_s1 + $0xbc] ss:$28 sps:$4 sm:$0xff]   ;;  %vm7530_vm8 = vcmask 523264  }
  0x30   : > { %17099 = vmatmul.mubr.msk.bf16.vlgmr.msra.gmra.mxu0 %vm783_vm2, %v23498_v41  ;;  %17102 = vmatmul.mubr.msk.bf16.vlgmr.msra.gmra.mxu1 %vm783_vm2, %v23498_v41  ;;  %v1235_v32 = vsel %vm790_vm0, %v17148_v30, 0  ;;  %v20750_v35 = vld [vmem:[%s30059_s1 + $0xf8] ss:$28 sps:$4 sm:$0xff]   ;;  %v20747_v36 = vld [vmem:[%s30059_s1 + $0xf0] ss:$28 sps:$4 sm:$0xff]   ;;  %s458_s22 = sand.u32 1, %s23268_s30  }
  0x31   : > { %923 = vmatpush1.bf16.msra.mxu0 %v804_v43  ;;  %20511 = vmatpush3.bf16.msra.mxu1 %v810_v44  ;;  %v20754_v38 = vld [vmem:[%s30059_s1 + $0xc0] ss:$28 sps:$4 sm:$0xff]   ;;  %v20751_v39 = vld [vmem:[%s30059_s1 + $0xb8] ss:$28 sps:$4 sm:$0xff]   ;;  %v20761_v43 = vld [vmem:[%s30059_s1 + $0x4c] ss:$28 sps:$4 sm:$0xff]  }
  0x32   : > { %924 = vmatprep.subr.bf16.mxu0 %v20692_v42  ;;  %20512 = vmatprep.subr.bf16.mxu1 %v20693_v45  ;;  %v20757_v40 = vld [vmem:[%s30059_s1 + $0x84] ss:$28 sps:$4 sm:$0xff]   ;;  %v20762_v44 = vld [vmem:[%s30059_s1 + $0x50] ss:$28 sps:$4 sm:$0xff]   ;;  %s20243_s21 = sshll.u32 %s23378_s17, 4  ;;  %s459_s24 = scalar_lea.vmem [#allocation2], %s458_s22 }
  0x33   : > { %854 = vmatprep.mubr.bf16.mxu0 %v30078_v14  ;;  %907 = vmatprep.mubr.bf16.mxu1 %v30078_v14  ;;  %v20755_v42 = vld [vmem:[%s30059_s1 + $0x80] ss:$28 sps:$4 sm:$0xff]   ;;  %v20765_v46 = vld [vmem:[%s30059_s1 + $0x14] ss:$28 sps:$4 sm:$0xff]   ;;  %s16949_s26 = sshll.u32 %s459_s24, 4  ;;  %s30017_s29 = scalar_lea.hbm %s30072_s14, %s20243_s21  ;;  %s30019_s26 = int_to_ptr.vmem [resolvable:$true] %s16949_s26 }
  0x34   : > { %v20774_v60 = vld [vmem:[%s30059_s1 + $0x350] ss:$28 sps:$4 sm:$0xff]   ;;  %v20788_v2 = vld [vmem:[%s30059_s1 + $0x2e4] ss:$28 sps:$4 sm:$0xff]   ;;  %s16937_s19 = scalar_lea.sflag [#allocation3], %s458_s22  ;;  %s23216_s18 = scalar_lea.vmem %s30019_s26, 16 }
  0x35   : > { %925 = vmatpush1.bf16.msra.mxu0 %v20690_v47  ;;  %20513 = vmatpush3.bf16.msra.mxu1 %v20693_v45  ;;  %v20759_v45 = vld [vmem:[%s30059_s1 + $0x48] ss:$28 sps:$4 sm:$0xff]   ;;  %v20766_v47 = vld [vmem:[%s30059_s1 + $0x18] ss:$28 sps:$4 sm:$0xff]   ;;  %v20777_v63 = vld [vmem:[%s30059_s1 + $0x310] ss:$28 sps:$4 sm:$0xff]   ;;  %p23217_p11 = scmp.ne.s32.totalorder %s30019_s26, %s23216_s18 }
  0x36   : > { %926 = vmatprep.subr.bf16.mxu0 %v20696_v48  ;;  %20514 = vmatprep.subr.bf16.mxu1 %v20697_v49  ;;  %v17202_v48 = vld [vmem:[%s30059_s1 + $0x380] sm:$0x33]  ;;  %v20779_v61 = vld [vmem:[%s30059_s1 + $0x314] ss:$28 sps:$4 sm:$0xff]   ;;  %s23281_s17 = smov [#allocation2]  }
  0x37   : > { %v20810_v24 = vld [vmem:[%s30059_s1 + $0x324] ss:$28 sps:$4 sm:$0xff]   ;;  %v20815_v30 = vld [vmem:[%s30059_s1 + $0x2f0] ss:$28 sps:$4 sm:$0xff]   ;;  %p23218_p12 = pnand %p23217_p11, %p23395_p5  ;;  %s23220_s20 = sshll.u32 %s23281_s17, 4  ;;  %s23221_s20 = int_to_ptr.vmem [resolvable:$false] %s23220_s20 }
  0x38   : > { %17100 = vmatmul.mubr.msk.bf16.gmra.mxu0 %vm783_vm2, %v23526_v50  ;;  %17103 = vmatmul.mubr.msk.bf16.gmra.mxu1 %vm783_vm2, %v23526_v50  ;;  %s23222_s15 = scalar_lea.vmem %s23221_s20, 32  ;;  %p23223_p0 = scmp.lt.s32.totalorder %s30019_s26, %s23221_s20 }
  0x39   : > { %927 = vmatpush1.bf16.msra.mxu0 %v20694_v51  ;;  %20515 = vmatpush3.bf16.msra.mxu1 %v20697_v49  ;;  %v17203_v49 = vld [vmem:[%s30059_s1 + $0x388] sm:$0x33]  ;;  %v17242_v51 = vcombine.high %v17202_v48, %v17202_v48  ;;  %p23219_p13 = pneg %p23218_p12  ;;  %p23224_p1 = scmp.lt.s32.totalorder %s23222_s15, %s23216_s18 }
  0x3a   : > { %928 = vmatprep.subr.bf16.mxu0 %v20700_v52  ;;  %20516 = vmatprep.subr.bf16.mxu1 %v20701_v53  ;;  %v17244_v52 = vcombine.high %v17203_v49, %v17203_v49 }
  0x3b   : > { %950 = vmatprep.mubr.bf16.mxu0 %v30078_v14  ;;  %20522 = vmatprep.mubr.msk.bf16.mxu1 %vm783_vm2, %v23498_v41  ;;  %p23225_p2 = por %p23224_p1, %p23223_p0 }
  0x3d   : > { %929 = vmatpush1.bf16.msra.mxu0 %v20698_v54  ;;  %20517 = vmatpush3.bf16.msra.mxu1 %v20701_v53  ;;  %v17241_v53 = vcombine.low %v17202_v48, %v17202_v48  ;;  %v17243_v54 = vcombine.low %v17203_v49, %v17203_v49  ;;  %p23226_p3 = pnand %p23225_p2, %p23219_p13 }
  0x3e   : > { %930 = vmatprep.subr.bf16.mxu0 %v20704_v55  ;;  %20518 = vmatprep.subr.bf16.mxu1 %v20705_v56  ;;  %v20773_v55 = vld [vmem:[%s30059_s1 + $0x34c] ss:$28 sps:$4 sm:$0xff]  }
  0x41   : > { %931 = vmatpush1.bf16.msra.mxu0 %v20702_v57  ;;  %20519 = vmatpush3.bf16.msra.mxu1 %v20705_v56  ;;  %v20776_v56 = vld [vmem:[%s30059_s1 + $0x354] ss:$28 sps:$4 sm:$0xff]   ;;  %v1705_v57 = vsel %vm790_vm0, %v17241_v53, 0 }
  0x42   : > { %932 = vmatprep.subr.bf16.mxu0 %v20708_v58  ;;  %20520 = vmatprep.subr.bf16.mxu1 %v20709_v59  ;;  %v1711_v58 = vsel %vm790_vm0, %v17243_v54, 0 }
  0x45   : > { %933 = vmatpush1.bf16.msra.mxu0 %v20706_v62  ;;  %20521 = vmatpush3.bf16.msra.mxu1 %v20709_v59  ;;  %v20771_v59 = vld [vmem:[%s30059_s1 + $0x348] ss:$28 sps:$4 sm:$0xff]   ;;  %v20782_v62 = vld [vmem:[%s30059_s1 + $0x31c] ss:$28 sps:$4 sm:$0xff]  }
  0x46   : > { %17151 = vmatprep.subr.msk.bf16.mxu0 %vm790_vm0, %v17145_v0  ;;  %17154 = vmatprep.subr.msk.bf16.mxu1 %vm790_vm0, %v17147_v1  ;;  %v20780_v0 = vld [vmem:[%s30059_s1 + $0x318] ss:$28 sps:$4 sm:$0xff]  }
  0x47   : > { %v20785_v1 = vld [vmem:[%s30059_s1 + $0x2dc] ss:$28 sps:$4 sm:$0xff]  }
  0x48   : > { %17105 = vmatmul.mubr.msk.bf16.vlgmr.msra.gmra.mxu0 %vm783_vm2, %v23498_v41  ;;  %20523 = vmatmul.mubr.msk.bf16.vlgmr.msra.gmra.mxu1 %vm783_vm2, %v23526_v50  ;;  %v20758_v41 = vld [vmem:[%s30059_s1 + $0x88] ss:$28 sps:$4 sm:$0xff]  }
  0x49   : > { %1248 = vmatpush1.bf16.msra.mxu0 %v1223_v3  ;;  %1301 = vmatpush1.bf16.msra.mxu1 %v1229_v5  ;;  %v20783_v3 = vld [vmem:[%s30059_s1 + $0x2d8] ss:$28 sps:$4 sm:$0xff]   ;;  %v20791_v5 = vld [vmem:[%s30059_s1 + $0x2a4] ss:$28 sps:$4 sm:$0xff]  }
  0x4a   : > { %1249 = vmatprep.subr.bf16.mxu0 %v20716_v4  ;;  %1302 = vmatprep.subr.bf16.mxu1 %v20719_v6  ;;  %v20786_v4 = vld [vmem:[%s30059_s1 + $0x2e0] ss:$28 sps:$4 sm:$0xff]   ;;  %v20794_v6 = vld [vmem:[%s30059_s1 + $0x2ac] ss:$28 sps:$4 sm:$0xff]  }
  0x4b   : > { %960 = vmatprep.mubr.bf16.mxu0 %v30078_v14  ;;  %1328 = vmatprep.mubr.bf16.mxu1 %v30078_v14 }
  0x4d   : > { %1250 = vmatpush1.bf16.msra.mxu0 %v20714_v7  ;;  %1303 = vmatpush1.bf16.msra.mxu1 %v20717_v8  ;;  %v20789_v7 = vld [vmem:[%s30059_s1 + $0x2a0] ss:$28 sps:$4 sm:$0xff]   ;;  %v20792_v8 = vld [vmem:[%s30059_s1 + $0x2a8] ss:$28 sps:$4 sm:$0xff]  }
  0x4e   : > { %1251 = vmatprep.subr.bf16.mxu0 %v20722_v9  ;;  %1304 = vmatprep.subr.bf16.mxu1 %v20725_v10  ;;  %v20797_v9 = vld [vmem:[%s30059_s1 + $0x26c] ss:$28 sps:$4 sm:$0xff]   ;;  %v20800_v10 = vld [vmem:[%s30059_s1 + $0x274] ss:$28 sps:$4 sm:$0xff]  }
  0x50   : > { %17106 = vmatmul.mubr.msk.bf16.gmra.mxu0 %vm783_vm2, %v23526_v50  ;;  %v20763_v50 = vld [vmem:[%s30059_s1 + $0x10] ss:$28 sps:$4 sm:$0xff]  }
  0x51   : > { %1252 = vmatpush1.bf16.msra.mxu0 %v20720_v11  ;;  %1305 = vmatpush1.bf16.msra.mxu1 %v20723_v12  ;;  %v17204_v11 = vld [vmem:[%s30059_s1 + $0x390] sm:$0x33]  ;;  %v20795_v12 = vld [vmem:[%s30059_s1 + $0x268] ss:$28 sps:$4 sm:$0xff]  }
  0x52   : > { %1253 = vmatprep.subr.bf16.mxu0 %v20728_v13  ;;  %1306 = vmatprep.subr.bf16.mxu1 %v20731_v15  ;;  %v20798_v13 = vld [vmem:[%s30059_s1 + $0x270] ss:$28 sps:$4 sm:$0xff]   ;;  %v20802_v15 = vld [vmem:[%s30059_s1 + $0x398] ss:$0 sps:$4 sm:$0x33]  }
  0x53   : > { %1275 = vmatprep.mubr.bf16.mxu0 %v30078_v14 }
  0x55   : > { %1254 = vmatpush1.bf16.msra.mxu0 %v20726_v16  ;;  %1307 = vmatpush1.bf16.msra.mxu1 %v20729_v17  ;;  %v1497_v16 = vrot.slane %v23472_v25, 1  ;;  %v1498_v17 = vrot.slane %v23474_v26, 1 }
  0x56   : > { %1255 = vmatprep.subr.bf16.mxu0 %v20734_v18  ;;  %1308 = vmatprep.subr.bf16.mxu1 %v20737_v19  ;;  %v17246_v18 = vcombine.high %v17204_v11, %v17204_v11  ;;  %v17245_v19 = vcombine.low %v17204_v11, %v17204_v11 }
  0x59   : > { %1256 = vmatpush1.bf16.msra.mxu0 %v20732_v20  ;;  %1309 = vmatpush1.bf16.msra.mxu1 %v20735_v21  ;;  %v20806_v20 = vld [vmem:[%s30059_s1 + $0x35c] ss:$28 sps:$4 sm:$0xff]  }
  0x5a   : > { %1257 = vmatprep.subr.bf16.mxu0 %v20740_v22  ;;  %1310 = vmatprep.subr.bf16.mxu1 %v20743_v23  ;;  %v20807_v21 = vld [vmem:[%s30059_s1 + $0x360] ss:$28 sps:$4 sm:$0xff]   ;;  %v1499_v22 = vsel %vm1496_vm3, %v1497_v16, %v1498_v17  ;;  %v20804_v23 = vld [vmem:[%s30059_s1 + $0x358] ss:$28 sps:$4 sm:$0xff]  }
  0x5d   : > { %1258 = vmatpush1.bf16.msra.mxu0 %v20738_v27  ;;  %1311 = vmatpush1.bf16.msra.mxu1 %v20741_v28  ;;  %v20811_v27 = vld [vmem:[%s30059_s1 + $0x328] ss:$28 sps:$4 sm:$0xff]   ;;  %v20808_v28 = vld [vmem:[%s30059_s1 + $0x320] ss:$28 sps:$4 sm:$0xff]  }
  0x5e   : > { %17157 = vmatprep.subr.msk.bf16.mxu0 %vm790_vm0, %v17149_v31  ;;  %20607 = vmatprep.subr.msk.bf16.mxu1 %vm790_vm0, %v20745_v29  ;;  %v20814_v29 = vld [vmem:[%s30059_s1 + $0x2ec] ss:$28 sps:$4 sm:$0xff]  }
  0x5f   : > { %v20812_v31 = vld [vmem:[%s30059_s1 + $0x2e8] ss:$28 sps:$4 sm:$0xff]  }
  0x60   : > { %17152 = vmatmul.mubr.msk.bf16.vlgmr.msra.gmra.mxu0 %vm783_vm2, %v23472_v25  ;;  %17155 = vmatmul.mubr.msk.bf16.vlgmr.msra.gmra.mxu1 %vm783_vm2, %v23472_v25 }
  0x61   : > { %1354 = vmatpush1.bf16.msra.mxu0 %v1235_v32  ;;  %20527 = vmatpush3.bf16.msra.mxu1 %v1241_v33  ;;  %v20818_v32 = vld [vmem:[%s30059_s1 + $0x2b4] ss:$28 sps:$4 sm:$0xff]  }
  0x62   : > { %1355 = vmatprep.subr.bf16.mxu0 %v20749_v34  ;;  %20528 = vmatprep.subr.bf16.mxu1 %v20750_v35  ;;  %v20819_v33 = vld [vmem:[%s30059_s1 + $0x2b8] ss:$28 sps:$4 sm:$0xff]   ;;  %v20816_v34 = vld [vmem:[%s30059_s1 + $0x2b0] ss:$28 sps:$4 sm:$0xff]  }
  0x63   : > { %1285 = vmatprep.mubr.bf16.mxu0 %v30078_v14  ;;  %1338 = vmatprep.mubr.bf16.mxu1 %v30078_v14 }
  0x65   : > { %1356 = vmatpush1.bf16.msra.mxu0 %v20747_v36  ;;  %20529 = vmatpush3.bf16.msra.mxu1 %v20750_v35  ;;  %v20822_v35 = vld [vmem:[%s30059_s1 + $0x27c] ss:$28 sps:$4 sm:$0xff]  }
  0x66   : > { %1357 = vmatprep.subr.bf16.mxu0 %v20753_v37  ;;  %20530 = vmatprep.subr.bf16.mxu1 %v20754_v38  ;;  %v20823_v36 = vld [vmem:[%s30059_s1 + $0x280] ss:$28 sps:$4 sm:$0xff]   ;;  %v20820_v37 = vld [vmem:[%s30059_s1 + $0x278] ss:$28 sps:$4 sm:$0xff]  }
  0x68   : > { %17153 = vmatmul.mubr.msk.bf16.gmra.mxu0 %vm783_vm2, %v23474_v26  ;;  %17156 = vmatmul.mubr.msk.bf16.gmra.mxu1 %vm783_vm2, %v23474_v26 }
  0x69   : > { %1358 = vmatpush1.bf16.msra.mxu0 %v20751_v39  ;;  %20531 = vmatpush3.bf16.msra.mxu1 %v20754_v38 }
  0x6a   : > { %1359 = vmatprep.subr.bf16.mxu0 %v20757_v40  ;;  %20532 = vmatprep.subr.bf16.mxu1 %v20758_v41 }
  0x6b   : > { %1381 = vmatprep.mubr.bf16.mxu0 %v30078_v14  ;;  %20538 = vmatprep.mubr.msk.bf16.mxu1 %vm783_vm2, %v23472_v25 }
  0x6d   : > { %1360 = vmatpush1.bf16.msra.mxu0 %v20755_v42  ;;  %20533 = vmatpush3.bf16.msra.mxu1 %v20758_v41 }
  0x6e   : > { %1361 = vmatprep.subr.bf16.mxu0 %v20761_v43  ;;  %20534 = vmatprep.subr.bf16.mxu1 %v20762_v44 }
  0x71   : > { %1362 = vmatpush1.bf16.msra.mxu0 %v20759_v45  ;;  %20535 = vmatpush3.bf16.msra.mxu1 %v20762_v44 }
  0x72   : > { %1363 = vmatprep.subr.bf16.mxu0 %v20765_v46  ;;  %20536 = vmatprep.subr.bf16.mxu1 %v20766_v47 }
  0x75   : > { %1364 = vmatpush1.bf16.msra.mxu0 %v20763_v50  ;;  %20537 = vmatpush3.bf16.msra.mxu1 %v20766_v47 }
  0x76   : > { %17248 = vmatprep.subr.msk.bf16.mxu0 %vm790_vm0, %v17242_v51  ;;  %17251 = vmatprep.subr.msk.bf16.mxu1 %vm790_vm0, %v17244_v52 }
  0x78   : > { %17158 = vmatmul.mubr.msk.bf16.vlgmr.msra.gmra.mxu0 %vm783_vm2, %v23472_v25  ;;  %20539 = vmatmul.mubr.msk.bf16.vlgmr.msra.gmra.mxu1 %vm783_vm2, %v23474_v26  ;;  %v1717_v25 = vsel %vm790_vm0, %v17245_v19, 0 }
  0x79   : > { %1730 = vmatpush1.bf16.msra.mxu0 %v1705_v57  ;;  %1783 = vmatpush1.bf16.msra.mxu1 %v1711_v58 }
  0x7a   : > { %1731 = vmatprep.subr.bf16.mxu0 %v20773_v55  ;;  %1784 = vmatprep.subr.bf16.mxu1 %v20776_v56 }
  0x7b   : > { %1391 = vmatprep.mubr.bf16.mxu0 %v30078_v14  ;;  %1810 = vmatprep.mubr.bf16.mxu1 %v30078_v14 }
  0x7d   : > { %1732 = vmatpush1.bf16.msra.mxu0 %v20771_v59  ;;  %1785 = vmatpush1.bf16.msra.mxu1 %v20774_v60 }
  0x7e   : > { %1733 = vmatprep.subr.bf16.mxu0 %v20779_v61  ;;  %1786 = vmatprep.subr.bf16.mxu1 %v20782_v62 }
  0x80   : > { %17159 = vmatmul.mubr.msk.bf16.gmra.mxu0 %vm783_vm2, %v23474_v26  ;;  %v1723_v26 = vsel %vm790_vm0, %v20802_v15, 0 }
  0x81   : > { %1734 = vmatpush1.bf16.msra.mxu0 %v20777_v63  ;;  %1787 = vmatpush1.bf16.msra.mxu1 %v20780_v0 }
  0x82   : > { %1735 = vmatprep.subr.bf16.mxu0 %v20785_v1  ;;  %1788 = vmatprep.subr.bf16.mxu1 %v20788_v2 }
  0x83   : > { %1757 = vmatprep.mubr.bf16.mxu0 %v30078_v14 }
  0x85   : > { %1736 = vmatpush1.bf16.msra.mxu0 %v20783_v3  ;;  %1789 = vmatpush1.bf16.msra.mxu1 %v20786_v4 }
  0x86   : > { %1737 = vmatprep.subr.bf16.mxu0 %v20791_v5  ;;  %1790 = vmatprep.subr.bf16.mxu1 %v20794_v6 }
  0x89   : > { %1738 = vmatpush1.bf16.msra.mxu0 %v20789_v7  ;;  %1791 = vmatpush1.bf16.msra.mxu1 %v20792_v8 }
  0x8a   : > { %1739 = vmatprep.subr.bf16.mxu0 %v20797_v9  ;;  %1792 = vmatprep.subr.bf16.mxu1 %v20800_v10 }
  0x8d   : > { %1740 = vmatpush1.bf16.msra.mxu0 %v20795_v12  ;;  %1793 = vmatpush1.bf16.msra.mxu1 %v20798_v13 }
  0x8e   : > { %17254 = vmatprep.subr.msk.bf16.mxu0 %vm790_vm0, %v17246_v18  ;;  %20608 = vmatprep.subr.msk.bf16.mxu1 %vm790_vm0, %v20802_v15 }
  0x90   : > { %17249 = vmatmul.mubr.msk.bf16.vlgmr.msra.gmra.mxu0 %vm783_vm2, %v1499_v22  ;;  %17252 = vmatmul.mubr.msk.bf16.vlgmr.msra.gmra.mxu1 %vm783_vm2, %v1499_v22 }
  0x91   : > { %1836 = vmatpush1.bf16.msra.mxu0 %v1717_v25  ;;  %20543 = vmatpush3.bf16.msra.mxu1 %v1723_v26 }
  0x92   : > { %1837 = vmatprep.subr.bf16.mxu0 %v20806_v20  ;;  %20544 = vmatprep.subr.bf16.mxu1 %v20807_v21 }
  0x93   : > { %1767 = vmatprep.mubr.bf16.mxu0 %v30078_v14  ;;  %1820 = vmatprep.mubr.bf16.mxu1 %v30078_v14 }
  0x95   : > { %1838 = vmatpush1.bf16.msra.mxu0 %v20804_v23  ;;  %20545 = vmatpush3.bf16.msra.mxu1 %v20807_v21 }
  0x96   : > { %1839 = vmatprep.subr.bf16.mxu0 %v20810_v24  ;;  %20546 = vmatprep.subr.bf16.mxu1 %v20811_v27 }
  0x98   : > { %17250 = vmatmul.mubr.msk.bf16.gmra.mxu0 %vm783_vm2, %v1498_v17  ;;  %17253 = vmatmul.mubr.msk.bf16.gmra.mxu1 %vm783_vm2, %v1498_v17 }
  0x99   : > { %1840 = vmatpush1.bf16.msra.mxu0 %v20808_v28  ;;  %20547 = vmatpush3.bf16.msra.mxu1 %v20811_v27  ;;  %v1963_v27 = vlaneseq }
  0x9a   : > { %1841 = vmatprep.subr.bf16.mxu0 %v20814_v29  ;;  %20548 = vmatprep.subr.bf16.mxu1 %v20815_v30 }
  0x9b   : > { %1863 = vmatprep.mubr.bf16.mxu0 %v30078_v14  ;;  %20554 = vmatprep.mubr.msk.bf16.mxu1 %vm783_vm2, %v1499_v22 }
  0x9d   : > { %1842 = vmatpush1.bf16.msra.mxu0 %v20812_v31  ;;  %20549 = vmatpush3.bf16.msra.mxu1 %v20815_v30  ;;  %v23937_v30 = vshrl.u32 %v1963_v27, 7  ;;  %v23942_v31 = vld [vmem:[%s30060_s2] sm:$0xff] }
  0x9e   : > { %1843 = vmatprep.subr.bf16.mxu0 %v20818_v32  ;;  %20550 = vmatprep.subr.bf16.mxu1 %v20819_v33 }
  0xa1   : > { %1844 = vmatpush1.bf16.msra.mxu0 %v20816_v34  ;;  %20551 = vmatpush3.bf16.msra.mxu1 %v20819_v33  ;;  %v30080_v34 = vsub.s32 0, %v23937_v30 }
  0xa2   : > { %1845 = vmatprep.subr.bf16.mxu0 %v20822_v35  ;;  %20552 = vmatprep.subr.bf16.mxu1 %v20823_v36  ;;  %v30081_v35 = vsub.s32 2, %v23937_v30 }
  0xa5   : > { %1846 = vmatpush1.bf16.msra.mxu0 %v20820_v37  ;;  %20553 = vmatpush3.bf16.msra.mxu1 %v20823_v36  ;;  %v30082_v36 = vsub.s32 1, %v23937_v30 }
  0xa8   : > { %17255 = vmatmul.mubr.msk.bf16.vlgmr.msra.gmra.mxu0 %vm783_vm2, %v1499_v22  ;;  %20555 = vmatmul.mubr.msk.bf16.vlgmr.msra.gmra.mxu1 %vm783_vm2, %v1498_v17 }
  0xa9   : > { %1873 = vmatprep.mubr.bf16.mxu0 %v30078_v14  ;;  %2133 = vmatprep.mubr.bf16.mxu1 %v30078_v14 }
  0xb0   : > { %17256 = vmatmul.mubr.msk.bf16.gmra.mxu0 %vm783_vm2, %v1498_v17 }
  0xb1   : > { %2176 = vmatprep.mubr.bf16.mxu0 %v30078_v14 }
  0xf0   : > { %v846_v38 = vpop.f32.mrf.mxu0  ;;  %v23867_v41 = vpop.f32.mrf.mxu1 }
  0xf2   : > { %v23863_v39 = vpop.f32.mrf.mxu0  ;;  %v23873_v44 = vpop.f32.mrf.mxu1 }
  0xf4   : > { %v23865_v40 = vpop.f32.mrf.mxu0  ;;  %v23877_v46 = vpop.f32.mrf.mxu1 }
  0xf6   : > { %v23869_v42 = vpop.f32.mrf.mxu0  ;;  %v23881_v48 = vpop.f32.mrf.mxu1 }
  0xf8   : > { %v23871_v43 = vpop.f32.mrf.mxu0  ;;  %v23885_v50 = vpop.f32.mrf.mxu1 }
  0xfa   : > { %v23875_v45 = vpop.f32.mrf.mxu0  ;;  %v23889_v52 = vpop.f32.mrf.mxu1 }
  0xfc   : > { %v23879_v47 = vpop.f32.mrf.mxu0  ;;  %v23895_v55 = vpop.f32.mrf.mxu1 }
  0xfe   : > { %v23883_v49 = vpop.f32.mrf.mxu0  ;;  %v23899_v57 = vpop.f32.mrf.mxu1 }
 0x108   : > { %v23887_v51 = vpop.f32.mrf.mxu0  ;;  %v23903_v59 = vpop.f32.mrf.mxu1 }
 0x10a   : > { %v23891_v53 = vpop.f32.mrf.mxu0  ;;  %v23907_v61 = vpop.f32.mrf.mxu1 }
 0x10b   : > { %30090 = vst [vmem:[#allocation10_spill] sm:$0xff] %v23891_v53 }
 0x10c   : > { %v23893_v54 = vpop.f32.mrf.mxu0  ;;  %v23911_v63 = vpop.f32.mrf.mxu1 }
 0x10e   : > { %v23897_v56 = vpop.f32.mrf.mxu0  ;;  %v23915_v2 = vpop.f32.mrf.mxu1 }
 0x10f   : > { %30091 = vst [vmem:[#allocation11_spill] sm:$0xff] %v23897_v56 }
 0x110   : > { %v23901_v58 = vpop.f32.mrf.mxu0 }
 0x111   : > { %30092 = vst [vmem:[#allocation12_spill] sm:$0xff] %v23901_v58 }
 0x112   : > { %v23905_v60 = vpop.f32.mrf.mxu0 }
 0x113   : > { %30093 = vst [vmem:[#allocation13_spill] sm:$0xff] %v23905_v60 }
 0x114   : > { %v23909_v62 = vpop.f32.mrf.mxu0 }
 0x115   : > { %30094 = vst [vmem:[#allocation14_spill] sm:$0xff] %v23909_v62  ;;  %v1966_v62 = vrot.slane %v23942_v31, %v30080_v34 }
 0x116   : > { %v23913_v0 = vpop.f32.mrf.mxu0 }
 0x117   : > { %30095 = vst [vmem:[#allocation15_spill] sm:$0xff] %v23913_v0 }
 0x120   : > { %v1277_v1 = vpop.f32.mrf.mxu0  ;;  %v1330_v4 = vpop.f32.mrf.mxu1 }
 0x121   : > { %v1278_v37 = vadd.f32 %v1277_v1, %v846_v38  ;;  %v23964_v38 = vrot.slane %v23942_v31, %v30082_v36 }
 0x122   : > { %v1279_v3 = vpop.f32.mrf.mxu0  ;;  %v1332_v7 = vpop.f32.mrf.mxu1 }
 0x123   : > { %v1280_v34 = vadd.f32 %v1279_v3, %v23863_v39 }
 0x124   : > { %v1281_v5 = vpop.f32.mrf.mxu0  ;;  %v1334_v9 = vpop.f32.mrf.mxu1 }
 0x125   : > { %v1335_v56 = vadd.f32 %v1334_v9, %v23877_v46 }
 0x126   : > { %v1283_v6 = vpop.f32.mrf.mxu0  ;;  %v1336_v11 = vpop.f32.mrf.mxu1 }
 0x127   : > { %v1284_v27 = vadd.f32 %v1283_v6, %v23869_v42  ;;  %v1337_v53 = vadd.f32 %v1336_v11, %v23881_v48 }
 0x128   : > { %v1287_v8 = vpop.f32.mrf.mxu0  ;;  %v1340_v13 = vpop.f32.mrf.mxu1 }
 0x129   : > { %v1341_v39 = vadd.f32 %v1340_v13, %v23885_v50 }
 0x12a   : > { %v1289_v10 = vpop.f32.mrf.mxu0  ;;  %v1342_v16 = vpop.f32.mrf.mxu1 }
 0x12b   : > { %v1290_v42 = vadd.f32 %v1289_v10, %v23875_v45 }
 0x12c   : > { %v1291_v12 = vpop.f32.mrf.mxu0  ;;  %v1344_v19 = vpop.f32.mrf.mxu1 }
 0x12d   : > { %v1292_v6 = vadd.f32 %v1291_v12, %v23879_v47  ;;  %v1345_v9 = vadd.f32 %v1344_v19, %v23895_v55 }
 0x12e   : > { %v1293_v15 = vpop.f32.mrf.mxu0  ;;  %v1346_v22 = vpop.f32.mrf.mxu1 }
 0x12f   : > { %v1294_v48 = vadd.f32 %v1293_v15, %v23883_v49  ;;  %v1347_v45 = vadd.f32 %v1346_v22, %v23899_v57 }
 0x138   : > { %v23917_v17 = vpop.f32.mrf.mxu0  ;;  %v23925_v25 = vpop.f32.mrf.mxu1 }
 0x13a   : > { %v23919_v18 = vpop.f32.mrf.mxu0  ;;  %v23929_v23 = vpop.f32.mrf.mxu1 }
 0x13b   : > { %30096 = vst [vmem:[#allocation16_spill] sm:$0xff] %v23919_v18 }
 0x13c   : > { %v23921_v20 = vpop.f32.mrf.mxu0  ;;  %v23933_v28 = vpop.f32.mrf.mxu1 }
 0x13e   : > { %v23923_v21 = vpop.f32.mrf.mxu0  ;;  %v23944_v32 = vpop.f32.mrf.mxu1 }
 0x13f   : > { %30097 = vst [vmem:[#allocation17_spill] sm:$0xff] %v23923_v21  ;;  %v23959_v21 = vrot.slane %v23942_v31, %v30081_v35  ;;  %v1333_v35 = vadd.f32 %v1332_v7, %v23873_v44 }
 0x140   : > { %v23927_v26 = vpop.f32.mrf.mxu0 }
 0x141   : > { %30098 = vst [vmem:[#allocation18_spill] sm:$0xff] %v23927_v26 }
 0x142   : > { %v23931_v24 = vpop.f32.mrf.mxu0 }
 0x143   : > { %30099 = vst [vmem:[#allocation19_spill] sm:$0xff] %v23931_v24 }
 0x144   : > { %v23935_v29 = vpop.f32.mrf.mxu0 }
 0x145   : > { %30100 = vst [vmem:[#allocation20_spill] sm:$0xff] %v23935_v29 }
 0x146   : > { %v23946_v33 = vpop.f32.mrf.mxu0 }
 0x147   : > { %30101 = vst [vmem:[#allocation21_spill] sm:$0xff] %v23946_v33  ;;  %v1282_v33 = vadd.f32 %v1281_v5, %v23865_v40  ;;  %v30102_v40 = vsub.s32 3, %v23937_v30 }
 0x149   : > { %v1978_v5 = vrot.slane %v23942_v31, %v30102_v40 }
 0x150   : > { %v1759_v14 = vpop.f32.mrf.mxu0  ;;  %v1812_v0 = vpop.f32.mrf.mxu1 }
 0x151   : > { %v1933_v29 = vadd.f32 %v1759_v14, %v1278_v37  ;;  %v1331_v37 = vadd.f32 %v1330_v4, %v23867_v41  ;;  %v1288_v41 = vadd.f32 %v1287_v8, %v23871_v43  ;;  %v1343_v4 = vadd.f32 %v1342_v16, %v23889_v52 }
 0x152   : > { %v1761_v24 = vpop.f32.mrf.mxu0  ;;  %v1814_v60 = vpop.f32.mrf.mxu1 }
 0x153   : > { %v1998_v26 = vadd.f32 %v1966_v62, %v1933_v29  ;;  %v1934_v29 = vadd.f32 %v1761_v24, %v1280_v34  ;;  %v1936_v52 = vadd.f32 %v1814_v60, %v1333_v35  ;;  %v1935_v49 = vadd.f32 %v1812_v0, %v1331_v37 }
 0x154   : > { %v1763_v1 = vpop.f32.mrf.mxu0  ;;  %v1816_v14 = vpop.f32.mrf.mxu1 }
 0x155   : > { %v1940_v58 = vadd.f32 %v1763_v1, %v1282_v33  ;;  %v2026_v43 = vmax.f32 %v1998_v26, 0.0  ;;  %v1999_v15 = vadd.f32 %v23964_v38, %v1934_v29  ;;  %v1942_v26 = vadd.f32 %v1816_v14, %v1335_v56 }
 0x156   : > { %v1765_v36 = vpop.f32.mrf.mxu0  ;;  %v1818_v18 = vpop.f32.mrf.mxu1 }
 0x157   : > { %v1941_v3 = vadd.f32 %v1765_v36, %v1284_v27  ;;  %v2005_v44 = vadd.f32 %v1966_v62, %v1940_v58  ;;  %v1943_v50 = vadd.f32 %v1818_v18, %v1337_v53  ;;  %v2007_v14 = vadd.f32 %v23959_v21, %v1942_v26 }
 0x158   : > { %v1769_v7 = vpop.f32.mrf.mxu0  ;;  %v1822_v46 = vpop.f32.mrf.mxu1  ;;  %v1448_v26 = vadd.f32 %v23933_v28, %v23911_v63 }
 0x159   : > { %v1947_v33 = vadd.f32 %v1769_v7, %v1288_v41  ;;  %v1949_v1 = vadd.f32 %v1822_v46, %v1341_v39  ;;  %v2033_v8 = vmax.f32 %v2005_v44, 0.0  ;;  %v2006_v47 = vadd.f32 %v23964_v38, %v1941_v3 }
 0x15a   : > { %v1771_v11 = vpop.f32.mrf.mxu0  ;;  %v1824_v13 = vpop.f32.mrf.mxu1  ;;  %v2008_v34 = vadd.f32 %v1978_v5, %v1943_v50  ;;  %v2001_v39 = vadd.f32 %v1978_v5, %v1936_v52 }
 0x15b   : > { %v2012_v58 = vadd.f32 %v1966_v62, %v1947_v33  ;;  %v23984_v10 = vpack.c.bf16 %v2033_v8, %v2026_v43  ;;  %v2014_v55 = vadd.f32 %v23959_v21, %v1949_v1  ;;  %v1948_v12 = vadd.f32 %v1771_v11, %v1290_v42 }
 0x15c   : > { %v1950_v16 = vadd.f32 %v1824_v13, %v1343_v4  ;;  %v1773_v19 = vpop.f32.mrf.mxu0  ;;  %v1826_v24 = vpop.f32.mrf.mxu1  ;;  %v2034_v3 = vmax.f32 %v2006_v47, 0.0  ;;  %v2036_v44 = vmax.f32 %v2008_v34, 0.0  ;;  %v2000_v1 = vadd.f32 %v23959_v21, %v1935_v49 }
 0x15d   : > { %v1954_v53 = vadd.f32 %v1773_v19, %v1292_v6  ;;  %v1956_v18 = vadd.f32 %v1826_v24, %v1345_v9  ;;  %v2013_v57 = vadd.f32 %v23964_v38, %v1948_v12  ;;  %v2040_v42 = vmax.f32 %v2012_v58, 0.0 }
 0x15e   : > { %v2015_v60 = vadd.f32 %v1978_v5, %v1950_v16  ;;  %v1775_v22 = vpop.f32.mrf.mxu0  ;;  %v1828_v35 = vpop.f32.mrf.mxu1  ;;  %v2042_v0 = vmax.f32 %v2014_v55, 0.0  ;;  %v2027_v43 = vmax.f32 %v1999_v15, 0.0  ;;  %v2029_v8 = vmax.f32 %v2001_v39, 0.0  ;;  %v30106_v39 = vld [vmem:[#allocation18_spill] sm:$0xff] }
 0x15f   : > { %v2019_v36 = vadd.f32 %v1966_v62, %v1954_v53  ;;  %v2021_v27 = vadd.f32 %v23959_v21, %v1956_v18  ;;  %v1955_v40 = vadd.f32 %v1775_v22, %v1294_v48  ;;  %v1957_v41 = vadd.f32 %v1828_v35, %v1347_v45 }
 0x160   : > { %v2041_v7 = vmax.f32 %v2013_v57, 0.0  ;;  %v2043_v46 = vmax.f32 %v2015_v60, 0.0  ;;  %v1981_v48 = vsub.s32 4, %v23937_v30  ;;  %v2035_v11 = vmax.f32 %v2007_v14, 0.0 }
 0x161   : > { %v2047_v37 = vmax.f32 %v2019_v36, 0.0  ;;  %v2049_v4 = vmax.f32 %v2021_v27, 0.0  ;;  %v2020_v6 = vadd.f32 %v23964_v38, %v1955_v40  ;;  %v2022_v56 = vadd.f32 %v1978_v5, %v1957_v41  ;;  %v30103_v36 = vld [vmem:[#allocation10_spill] sm:$0xff]  ;;  %v30104_v27 = vld [vmem:[#allocation16_spill] sm:$0xff] }
 0x162   : > { %v1384_v5 = vadd.f32 %v23917_v17, %v23887_v51  ;;  %v1989_v13 = vsub.s32 6, %v23937_v30  ;;  %v24011_v52 = vpack.c.bf16 %v2034_v3, %v2027_v43  ;;  %v24013_v47 = vpack.c.bf16 %v2036_v44, %v2029_v8  ;;  %v30105_v41 = vld [vmem:[#allocation12_spill] sm:$0xff]  ;;  %v30110_v44 = vld [vmem:[#allocation13_spill] sm:$0xff] }
 0x163   : > { %v2063_v9 = vpack.c.bf16 %v2047_v37, %v2040_v42  ;;  %v2065_v62 = vpack.c.bf16 %v2049_v4, %v2042_v0  ;;  %v2048_v29 = vmax.f32 %v2020_v6, 0.0  ;;  %v2050_v33 = vmax.f32 %v2022_v56, 0.0 }
 0x164   : > { %v1445_v51 = vadd.f32 %v23925_v25, %v23903_v59  ;;  %v2028_v17 = vmax.f32 %v2000_v1, 0.0  ;;  %v24022_v16 = vrot.slane %v23942_v31, %v1981_v48  ;;  %v24029_v59 = vld [vmem:[%s30061_s3] sm:$0x7f]   ;;  %v1990_v24 = vrot.slane %v23942_v31, %v1989_v13 }
 0x165   : > { %v23994_v50 = vpack.c.bf16 %v2048_v29, %v2041_v7  ;;  %v23996_v38 = vpack.c.bf16 %v2050_v33, %v2043_v46  ;;  %v24006_v21 = vsel %vm2079_vm4, %v2063_v9, 0  ;;  %v24009_v45 = vsel %vm2079_vm4, %v2065_v62, 0  ;;  %v30111_v7 = vld [vmem:[#allocation19_spill] sm:$0xff] }
 0x166   : > { %v24031_v25 = vpack.c.bf16 %v2035_v11, %v2028_v17  ;;  %v1437_v53 = vadd.f32 %v23929_v23, %v23907_v61  ;;  %v1388_v18 = vadd.f32 %v23921_v20, %v23893_v54  ;;  %v1440_v60 = vadd.f32 %v23944_v32, %v23915_v2  ;;  %v30107_v2 = vld [vmem:[#allocation11_spill] sm:$0xff]  ;;  %v30108_v32 = vld [vmem:[#allocation17_spill] sm:$0xff]  ;;  %v30112_v11 = vld [vmem:[#allocation14_spill] sm:$0xff] }
 0x167   : > { %17260 = vmatprep.subr.msk.bf16.mxu1 %vm2079_vm4, %v23994_v50  ;;  %17262 = vmatprep.subr.msk.bf16.mxu0 %vm2079_vm4, %v23996_v38  ;;  %v23279_v35 = vmov 0.0   ;;  %v1386_v40 = vadd.f32 %v30104_v27, %v30103_v36  ;;  %v1394_v3 = vadd.f32 %v30106_v39, %v30105_v41  ;;  %v1390_v0 = vadd.f32 %v30108_v32, %v30107_v2 }
 0x168   : > { %v1865_v58 = vpop.f32.mrf.mxu0  ;;  %v20556_v55 = vpop.f32.mrf.mxu1  ;;  %2114 = vmatpush1.bf16.msra.mxu1 %v24006_v21  ;;  %2157 = vmatpush1.bf16.msra.mxu0 %v24009_v45  ;;  %v1985_v37 = vsub.s32 5, %v23937_v30  ;;  %v30109_v14 = vmov 0   ;;  %v1396_v46 = vadd.f32 %v30111_v7, %v30110_v44  ;;  %v20838_v44 = vld [vmem:[%s30062_s4 + $0x280] ss:$16 sps:$4 sm:$0xff]  }
 0x169   : > { %v1937_v12 = vadd.f32 %v1865_v58, %v1384_v5  ;;  %2115 = vmatprep.subr.bf16.mxu1 %v24011_v52  ;;  %2158 = vmatprep.subr.bf16.mxu0 %v24013_v47  ;;  %v1953_v19 = vadd.f32 %v20556_v55, %v1445_v51  ;;  %v30113_v51 = vld [vmem:[#allocation20_spill] sm:$0xff] }
 0x16a   : > { %v1867_v49 = vpop.f32.mrf.mxu0  ;;  %v1918_v15 = vpop.f32.mrf.mxu1  ;;  %v1398_v17 = vadd.f32 %v30113_v51, %v30112_v11  ;;  %v20841_v7 = vld [vmem:[%s30062_s4 + $0xc0] ss:$16 sps:$4 sm:$0xff]   ;;  %v20861_v11 = vld [vmem:[%s30062_s4 + $0x64] ss:$16 sps:$4 sm:$0xff]  }
 0x16b   : > { %v2002_v22 = vadd.f32 %v24022_v16, %v1937_v12  ;;  %v2018_v61 = vadd.f32 %v1990_v24, %v1953_v19  ;;  %v1939_v54 = vadd.f32 %v1918_v15, %v1437_v53  ;;  %v1938_v12 = vadd.f32 %v1867_v49, %v1386_v40  ;;  %v20856_v51 = vld [vmem:[%s30062_s4 + $0x220] ss:$16 sps:$4 sm:$0xff]  }
 0x16c   : > { %v1869_v34 = vpop.f32.mrf.mxu0  ;;  %v20557_v57 = vpop.f32.mrf.mxu1  ;;  %2116 = vmatpush1.bf16.msra.mxu1 %v23984_v10  ;;  %2159 = vmatpush1.bf16.msra.mxu0 %v24031_v25  ;;  %v1986_v19 = vrot.slane %v23942_v31, %v1985_v37 }
 0x16d   : > { %20558 = vmatprep.subr.bf16.mxu0 %v23279_v35  ;;  %v1944_v20 = vadd.f32 %v1869_v34, %v1388_v18  ;;  %v1960_v23 = vadd.f32 %v20557_v57, %v1448_v26  ;;  %v2030_v9 = vmax.f32 %v2002_v22, 0.0  ;;  %v2046_v33 = vmax.f32 %v2018_v61, 0.0  ;;  %v30114_v26 = vld [vmem:[#allocation15_spill] sm:$0xff]  ;;  %v30115_v34 = vld [vmem:[#allocation21_spill] sm:$0xff] }
 0x16e   : > { %v1871_v63 = vpop.f32.mrf.mxu0  ;;  %v1921_v28 = vpop.f32.mrf.mxu1  ;;  %v2004_v1 = vadd.f32 %v1990_v24, %v1939_v54 }
 0x16f   : > { %v1946_v42 = vadd.f32 %v1921_v28, %v1440_v60  ;;  %17263 = vmatmul.mubr.msk.bf16.vlgmr.msra.gmra.mxu0 %vm2075_vm5, %v24029_v59  ;;  %17261 = vmatmul.mubr.msk.bf16.vlgmr.msra.gmra.mxu1 %vm2075_vm5, %v24029_v59  ;;  %v2009_v4 = vadd.f32 %v24022_v16, %v1944_v20  ;;  %v2025_v6 = vadd.f32 %v1990_v24, %v1960_v23 }
 0x170   : > { %v1875_v56 = vpop.f32.mrf.mxu0  ;;  %20562 = vmatprep.mubr.msk.bf16.mxu0 %vm23280_vm6, %v23279_v35  ;;  %2219 = vmatprep.mubr.bf16.mxu1 %v30109_v14  ;;  %v1945_v58 = vadd.f32 %v1871_v63, %v1390_v0  ;;  %v2032_v61 = vmax.f32 %v2004_v1, 0.0  ;;  %v2003_v28 = vadd.f32 %v1986_v19, %v1938_v12  ;;  %v20855_v1 = vld [vmem:[%s30062_s4 + $0x84] ss:$16 sps:$4 sm:$0xff]   ;;  %v20862_v12 = vld [vmem:[%s30062_s4 + $0x200] ss:$16 sps:$4 sm:$0xff]  }
 0x171   : > { %v2011_v62 = vadd.f32 %v1990_v24, %v1946_v42  ;;  %v1951_v29 = vadd.f32 %v1875_v56, %v1394_v3  ;;  %v2037_v43 = vmax.f32 %v2009_v4, 0.0  ;;  %v2053_v8 = vmax.f32 %v2025_v6, 0.0  ;;  %v20825_v6 = vld [vmem:[%s30061_s3 + $0x8] sm:$0x7f]   ;;  %v20843_v56 = vld [vmem:[%s30062_s4 + $0xc4] ss:$16 sps:$4 sm:$0xff]  }
 0x172   : > { %v1877_v5 = vpop.f32.mrf.mxu0  ;;  %v1400_v24 = vadd.f32 %v30115_v34, %v30114_v26  ;;  %v2010_v49 = vadd.f32 %v1986_v19, %v1945_v58  ;;  %v2031_v32 = vmax.f32 %v2003_v28, 0.0  ;;  %v20864_v58 = vld [vmem:[%s30062_s4 + $0x204] ss:$16 sps:$4 sm:$0xff]   ;;  %v20871_v26 = vld [vmem:[%s30062_s4 + $0x20] ss:$16 sps:$4 sm:$0xff]  }
 0x173   : > { %v1952_v55 = vadd.f32 %v1877_v5, %v1396_v46  ;;  %v24070_v15 = vpack.c.bf16 %v2037_v43, %v2030_v9  ;;  %v2069_v53 = vpack.c.bf16 %v2053_v8, %v2046_v33  ;;  %v2039_v57 = vmax.f32 %v2011_v62, 0.0  ;;  %v20846_v46 = vld [vmem:[%s30062_s4 + $0x264] ss:$16 sps:$4 sm:$0xff]   ;;  %v20844_v62 = vld [vmem:[%s30062_s4 + $0x260] ss:$16 sps:$4 sm:$0xff]  }
 0x174   : > { %v1879_v18 = vpop.f32.mrf.mxu0  ;;  %v2016_v60 = vadd.f32 %v24022_v16, %v1951_v29  ;;  %v2038_v39 = vmax.f32 %v2010_v49, 0.0  ;;  %v20849_v9 = vld [vmem:[%s30062_s4 + $0xa4] ss:$16 sps:$4 sm:$0xff]   ;;  %v20847_v29 = vld [vmem:[%s30062_s4 + $0xa0] ss:$16 sps:$4 sm:$0xff]  }
 0x175   : > { %v1958_v22 = vadd.f32 %v1879_v18, %v1398_v17  ;;  %v2099_v20 = vsel %vm2079_vm4, %v2069_v53, 0  ;;  %v2017_v23 = vadd.f32 %v1986_v19, %v1952_v55  ;;  %v2062_v36 = vpack.c.bf16 %v2039_v57, %v2032_v61  ;;  %v20852_v33 = vld [vmem:[%s30062_s4 + $0x244] ss:$16 sps:$4 sm:$0xff]   ;;  %v20850_v43 = vld [vmem:[%s30062_s4 + $0x240] ss:$16 sps:$4 sm:$0xff]  }
 0x176   : > { %v1881_v54 = vpop.f32.mrf.mxu0  ;;  %20559 = vmatpush3.bf16.msra.mxu0 %v2099_v20  ;;  %v2044_v27 = vmax.f32 %v2016_v60, 0.0  ;;  %v2061_v4 = vpack.c.bf16 %v2038_v39, %v2031_v32  ;;  %v20853_v8 = vld [vmem:[%s30062_s4 + $0x80] ss:$16 sps:$4 sm:$0xff]   ;;  %v20858_v5 = vld [vmem:[%s30062_s4 + $0x224] ss:$16 sps:$4 sm:$0xff]  }
 0x177   : > { %v2023_v63 = vadd.f32 %v24022_v16, %v1958_v22  ;;  %v1959_v31 = vadd.f32 %v1881_v54, %v1400_v24  ;;  %20560 = vmatprep.subr.bf16.mxu0 %v23279_v35  ;;  %v2045_v3 = vmax.f32 %v2017_v23, 0.0  ;;  %v20859_v17 = vld [vmem:[%s30062_s4 + $0x60] ss:$16 sps:$4 sm:$0xff]   ;;  %v20867_v55 = vld [vmem:[%s30062_s4 + $0x44] ss:$16 sps:$4 sm:$0xff]  }
 0x178   : > { %v20873_v53 = vld [vmem:[%s30062_s4 + $0x24] ss:$16 sps:$4 sm:$0xff]   ;;  %v20868_v18 = vld [vmem:[%s30062_s4 + $0x3e0] ss:$16 sps:$4 sm:$0xff]  }
 0x179   : > { %v2051_v40 = vmax.f32 %v2023_v63, 0.0  ;;  %v2024_v41 = vadd.f32 %v1986_v19, %v1959_v31  ;;  %v20865_v19 = vld [vmem:[%s30062_s4 + $0x40] ss:$16 sps:$4 sm:$0xff]   ;;  %v20876_v34 = vld [vmem:[%s30062_s4 + $0x3c4] ss:$16 sps:$4 sm:$0xff]  }
 0x17a   : > { %20561 = vmatpush3.bf16.msra.mxu0 %v2062_v36  ;;  %v20874_v24 = vld [vmem:[%s30062_s4 + $0x3c0] ss:$16 sps:$4 sm:$0xff]   ;;  %v20879_v60 = vld [vmem:[%s30062_s4 + $0x4] ss:$16 sps:$4 sm:$0xff]  }
 0x17b   : > { %v2067_v42 = vpack.c.bf16 %v2051_v40, %v2044_v27  ;;  %v2052_v2 = vmax.f32 %v2024_v41, 0.0  ;;  %17272 = vmatprep.subr.msk.bf16.mxu0 %vm2079_vm4, %v23996_v38  ;;  %v20828_v38 = vld [vmem:[%s30062_s4 + $0x2e4] ss:$16 sps:$4 sm:$0xff]   ;;  %v20877_v57 = vld [vmem:[%s30062_s4] ss:$16 sps:$4 sm:$0xff]  }
 0x17c   : > { %v20880_v22 = vld [vmem:[%s30062_s4 + $0x3a0] ss:$16 sps:$4 sm:$0xff]   ;;  %v20882_v61 = vld [vmem:[%s30062_s4 + $0x3a4] ss:$16 sps:$4 sm:$0xff]  }
 0x17d   : > { %v2068_v0 = vpack.c.bf16 %v2052_v2, %v2045_v3  ;;  %20563 = vmatmul.mubr.msk.bf16.vlgmr.msra.gmra.mxu0 %vm2075_vm5, %v24029_v59  ;;  %v2093_v16 = vsel %vm2079_vm4, %v2067_v42, 0  ;;  %v20883_v54 = vld [vmem:[%s30062_s4 + $0x1e0] ss:$16 sps:$4 sm:$0xff]   ;;  %v20888_v23 = vld [vmem:[%s30062_s4 + $0x384] ss:$16 sps:$4 sm:$0xff]  }
 0x17e   : > { %2338 = vmatpush1.bf16.msra.mxu0 %v24009_v45  ;;  %2357 = vmatprep.mubr.bf16.mxu0 %v30109_v14  ;;  %v20831_v45 = vld [vmem:[%s30062_s4 + $0x2c4] ss:$16 sps:$4 sm:$0xff]   ;;  %v20886_v49 = vld [vmem:[%s30062_s4 + $0x380] ss:$16 sps:$4 sm:$0xff]  }
 0x17f   : > { %17264 = vmatprep.subr.msk.bf16.mxu1 %vm2079_vm4, %v2068_v0  ;;  %2339 = vmatprep.subr.bf16.mxu0 %v24013_v47  ;;  %v20832_v47 = vld [vmem:[%s30062_s4 + $0x2a0] ss:$16 sps:$4 sm:$0xff]   ;;  %v20891_v63 = vld [vmem:[%s30062_s4 + $0x1c4] ss:$16 sps:$4 sm:$0xff]  }
 0x180   : > { %2200 = vmatpush1.bf16.msra.mxu1 %v2093_v16  ;;  %v20889_v31 = vld [vmem:[%s30062_s4 + $0x1c0] ss:$16 sps:$4 sm:$0xff]   ;;  %v20894_v28 = vld [vmem:[%s30062_s4 + $0x364] ss:$16 sps:$4 sm:$0xff]  }
 0x181   : > { %2201 = vmatprep.subr.bf16.mxu1 %v2061_v4  ;;  %v20897_v27 = vld [vmem:[%s30062_s4 + $0x1a4] ss:$16 sps:$4 sm:$0xff]   ;;  %v20895_v40 = vld [vmem:[%s30062_s4 + $0x1a0] ss:$16 sps:$4 sm:$0xff]  }
 0x182   : > { %2340 = vmatpush1.bf16.msra.mxu0 %v24031_v25  ;;  %v20840_v25 = vld [vmem:[%s30062_s4 + $0x284] ss:$16 sps:$4 sm:$0xff]   ;;  %v20898_v39 = vld [vmem:[%s30062_s4 + $0x340] ss:$16 sps:$4 sm:$0xff]  }
 0x183   : > { %20566 = vmatprep.subr.bf16.mxu0 %v23279_v35  ;;  %v20900_v41 = vld [vmem:[%s30062_s4 + $0x344] ss:$16 sps:$4 sm:$0xff]   ;;  %v20901_v42 = vld [vmem:[%s30062_s4 + $0x180] ss:$16 sps:$4 sm:$0xff]  }
 0x184   : > { %2202 = vmatpush1.bf16.msra.mxu1 %v24070_v15  ;;  %v20903_v3 = vld [vmem:[%s30062_s4 + $0x184] ss:$16 sps:$4 sm:$0xff]   ;;  %v20904_v32 = vld [vmem:[%s30062_s4 + $0x320] ss:$16 sps:$4 sm:$0xff]  }
 0x185   : > { %17270 = vmatprep.subr.msk.bf16.mxu1 %vm2079_vm4, %v23994_v50  ;;  %17273 = vmatmul.mubr.msk.bf16.vlgmr.msra.gmra.mxu0 %vm2075_vm5, %v20825_v6  ;;  %v20826_v50 = vld [vmem:[%s30062_s4 + $0x2e0] ss:$16 sps:$4 sm:$0xff]   ;;  %v20906_v2 = vld [vmem:[%s30062_s4 + $0x324] ss:$16 sps:$4 sm:$0xff]  }
 0x186   : > { %20567 = vmatpush3.bf16.msra.mxu0 %v2099_v20  ;;  %20570 = vmatprep.mubr.msk.bf16.mxu0 %vm23280_vm6, %v23279_v35  ;;  %v20885_v20 = vld [vmem:[%s30062_s4 + $0x1e4] ss:$16 sps:$4 sm:$0xff]  }
 0x187   : > { %17265 = vmatmul.mubr.msk.bf16.vlgmr.msra.gmra.mxu1 %vm2075_vm5, %v24029_v59  ;;  %20568 = vmatprep.subr.bf16.mxu0 %v23279_v35  ;;  %v20835_v59 = vld [vmem:[%s30062_s4 + $0xe0] ss:$16 sps:$4 sm:$0xff]  }
 0x188   : > { %2295 = vmatpush1.bf16.msra.mxu1 %v24006_v21  ;;  %2314 = vmatprep.mubr.bf16.mxu1 %v30109_v14  ;;  %v20829_v21 = vld [vmem:[%s30062_s4 + $0x2c0] ss:$16 sps:$4 sm:$0xff]  }
 0x189   : > { %2296 = vmatprep.subr.bf16.mxu1 %v24011_v52  ;;  %v20834_v52 = vld [vmem:[%s30062_s4 + $0x2a4] ss:$16 sps:$4 sm:$0xff]  }
 0x18a   : > { %20569 = vmatpush3.bf16.msra.mxu0 %v2062_v36  ;;  %v20892_v36 = vld [vmem:[%s30062_s4 + $0x360] ss:$16 sps:$4 sm:$0xff]  }
 0x18b   : > { %3860 = vmatprep.subr.bf16.mxu0 %v20828_v38  ;;  %v20915_v38 = vld [vmem:[%s30062_s4 + $0x144] ss:$16 sps:$4 sm:$0xff]  }
 0x18c   : > { %2297 = vmatpush1.bf16.msra.mxu1 %v23984_v10  ;;  %v20837_v10 = vld [vmem:[%s30062_s4 + $0xe4] ss:$16 sps:$4 sm:$0xff]  }
 0x18d   : > { %17274 = vmatprep.subr.msk.bf16.mxu1 %vm2079_vm4, %v2068_v0  ;;  %20571 = vmatmul.mubr.msk.bf16.vlgmr.msra.gmra.mxu0 %vm2075_vm5, %v20825_v6  ;;  %v20909_v0 = vld [vmem:[%s30062_s4 + $0x164] ss:$16 sps:$4 sm:$0xff]  }
 0x18e   : > { %3861 = vmatpush1.bf16.msra.mxu0 %v20826_v50  ;;  %v20913_v50 = vld [vmem:[%s30062_s4 + $0x140] ss:$16 sps:$4 sm:$0xff]  }
 0x18f   : > { %17271 = vmatmul.mubr.msk.bf16.vlgmr.msra.gmra.mxu1 %vm2075_vm5, %v20825_v6  ;;  %3862 = vmatprep.subr.bf16.mxu0 %v20831_v45  ;;  %v20918_v45 = vld [vmem:[%s30062_s4 + $0x6e4] ss:$16 sps:$4 sm:$0xff]  }
 0x190   : > { %2381 = vmatpush1.bf16.msra.mxu1 %v2093_v16  ;;  %2400 = vmatprep.mubr.bf16.mxu1 %v30109_v14  ;;  %v20907_v16 = vld [vmem:[%s30062_s4 + $0x160] ss:$16 sps:$4 sm:$0xff]  }
 0x191   : > { %2382 = vmatprep.subr.bf16.mxu1 %v2061_v4  ;;  %v20912_v4 = vld [vmem:[%s30062_s4 + $0x304] ss:$16 sps:$4 sm:$0xff]  }
 0x192   : > { %3863 = vmatpush1.bf16.msra.mxu0 %v20829_v21  ;;  %v20921_v21 = vld [vmem:[%s30062_s4 + $0x124] ss:$16 sps:$4 sm:$0xff]  }
 0x193   : > { %3864 = vmatprep.subr.bf16.mxu0 %v20834_v52  ;;  %v20919_v52 = vld [vmem:[%s30062_s4 + $0x120] ss:$16 sps:$4 sm:$0xff]  }
 0x194   : > { %2383 = vmatpush1.bf16.msra.mxu1 %v24070_v15  ;;  %v20870_v15 = vld [vmem:[%s30062_s4 + $0x3e4] ss:$16 sps:$4 sm:$0xff]  }
 0x195   : > { %3817 = vmatprep.subr.bf16.mxu1 %v20837_v10  ;;  %v20927_v10 = vld [vmem:[%s30062_s4 + $0x104] ss:$16 sps:$4 sm:$0xff]  }
 0x196   : > { %3865 = vmatpush1.bf16.msra.mxu0 %v20832_v47  ;;  %v20925_v47 = vld [vmem:[%s30062_s4 + $0x100] ss:$16 sps:$4 sm:$0xff]  }
 0x197   : > { %17275 = vmatmul.mubr.msk.bf16.vlgmr.msra.gmra.mxu1 %vm2075_vm5, %v20825_v6  ;;  %3866 = vmatprep.subr.bf16.mxu0 %v20840_v25  ;;  %v20910_v6 = vld [vmem:[%s30062_s4 + $0x300] ss:$16 sps:$4 sm:$0xff]  }
 0x198   : > { %3818 = vmatpush1.bf16.msra.mxu1 %v20835_v59  ;;  %v20933_v59 = vld [vmem:[%s30062_s4 + $0x4e4] ss:$16 sps:$4 sm:$0xff]  }
 0x199   : > { %3819 = vmatprep.subr.bf16.mxu1 %v20843_v56 }
 0x19a   : > { %3867 = vmatpush1.bf16.msra.mxu0 %v20838_v44 }
 0x19b   : > { %3868 = vmatprep.subr.bf16.mxu0 %v20846_v46 }
 0x19c   : > { %3820 = vmatpush1.bf16.msra.mxu1 %v20841_v7 }
 0x19d   : > { %3821 = vmatprep.subr.bf16.mxu1 %v20849_v9 }
 0x19e   : > { %3869 = vmatpush1.bf16.msra.mxu0 %v20844_v62 }
 0x19f   : > { %3870 = vmatprep.subr.bf16.mxu0 %v20852_v33 }
 0x1a0   : > { %3822 = vmatpush1.bf16.msra.mxu1 %v20847_v29 }
 0x1a1   : > { %3823 = vmatprep.subr.bf16.mxu1 %v20855_v1 }
 0x1a2   : > { %3871 = vmatpush1.bf16.msra.mxu0 %v20850_v43 }
 0x1a3   : > { %3872 = vmatprep.subr.bf16.mxu0 %v20858_v5 }
 0x1a4   : > { %3824 = vmatpush1.bf16.msra.mxu1 %v20853_v8 }
 0x1a5   : > { %3825 = vmatprep.subr.bf16.mxu1 %v20861_v11 }
 0x1a6   : > { %3873 = vmatpush1.bf16.msra.mxu0 %v20856_v51 }
 0x1a7   : > { %3874 = vmatprep.subr.bf16.mxu0 %v20864_v58 }
 0x1a8   : > { %3826 = vmatpush1.bf16.msra.mxu1 %v20859_v17 }
 0x1a9   : > { %3827 = vmatprep.subr.bf16.mxu1 %v20867_v55 }
 0x1aa   : > { %3875 = vmatpush1.bf16.msra.mxu0 %v20862_v12 }
 0x1ab   : > { %3876 = vmatprep.subr.bf16.mxu0 %v20870_v15 }
 0x1ac   : > { %3828 = vmatpush1.bf16.msra.mxu1 %v20865_v19 }
 0x1ad   : > { %3829 = vmatprep.subr.bf16.mxu1 %v20873_v53 }
 0x1ae   : > { %3877 = vmatpush2.bf16.msra.mxu0 %v20868_v18 }
 0x1af   : > { %3878 = vmatprep.subr.bf16.mxu0 %v20876_v34 }
 0x1b0   : > { %3830 = vmatpush1.bf16.msra.mxu1 %v20871_v26 }
 0x1b1   : > { %3831 = vmatprep.subr.bf16.mxu1 %v20879_v60  ;;  %v20916_v60 = vld [vmem:[%s30062_s4 + $0x6e0] ss:$16 sps:$4 sm:$0xff]  }
 0x1b2   : > { %3879 = vmatpush2.bf16.msra.mxu0 %v20874_v24 }
 0x1b3   : > { %3880 = vmatprep.subr.bf16.mxu0 %v20882_v61 }
 0x1b4   : > { %3832 = vmatpush1.bf16.msra.mxu1 %v20877_v57 }
 0x1b5   : > { %3833 = vmatprep.subr.bf16.mxu1 %v20885_v20 }
 0x1b6   : > { %3881 = vmatpush2.bf16.msra.mxu0 %v20880_v22 }
 0x1b7   : > { %3882 = vmatprep.subr.bf16.mxu0 %v20888_v23 }
 0x1b8   : > { %3834 = vmatpush2.bf16.msra.mxu1 %v20883_v54  ;;  %v20924_v54 = vld [vmem:[%s30062_s4 + $0x6c4] ss:$16 sps:$4 sm:$0xff]  }
 0x1b9   : > { %3835 = vmatprep.subr.bf16.mxu1 %v20891_v63  ;;  %v20922_v63 = vld [vmem:[%s30062_s4 + $0x6c0] ss:$16 sps:$4 sm:$0xff]  }
 0x1ba   : > { %3883 = vmatpush2.bf16.msra.mxu0 %v20886_v49 }
 0x1bb   : > { %3884 = vmatprep.subr.bf16.mxu0 %v20894_v28 }
 0x1bc   : > { %3836 = vmatpush2.bf16.msra.mxu1 %v20889_v31  ;;  %v20930_v31 = vld [vmem:[%s30062_s4 + $0x6a4] ss:$16 sps:$4 sm:$0xff]  }
 0x1bd   : > { %3837 = vmatprep.subr.bf16.mxu1 %v20897_v27 }
 0x1be   : > { %3885 = vmatpush2.bf16.msra.mxu0 %v20892_v36 }
 0x1bf   : > { %3886 = vmatprep.subr.bf16.mxu0 %v20900_v41 }
 0x1c0   : > { %3838 = vmatpush2.bf16.msra.mxu1 %v20895_v40 }
 0x1c1   : > { %3839 = vmatprep.subr.bf16.mxu1 %v20903_v3 }
 0x1c2   : > { %3887 = vmatpush2.bf16.msra.mxu0 %v20898_v39  ;;  %v20928_v39 = vld [vmem:[%s30062_s4 + $0x6a0] ss:$16 sps:$4 sm:$0xff]  }
 0x1c3   : > { %3888 = vmatprep.subr.bf16.mxu0 %v20906_v2  ;;  %v20931_v2 = vld [vmem:[%s30062_s4 + $0x4e0] ss:$16 sps:$4 sm:$0xff]  }
 0x1c4   : > { %3840 = vmatpush2.bf16.msra.mxu1 %v20901_v42 }
 0x1c5   : > { %3841 = vmatprep.subr.bf16.mxu1 %v20909_v0  ;;  %v20936_v0 = vld [vmem:[%s30062_s4 + $0x684] ss:$16 sps:$4 sm:$0xff]  }
 0x1c6   : > { %3889 = vmatpush2.bf16.msra.mxu0 %v20904_v32 }
 0x1c7   : > { %3890 = vmatprep.subr.bf16.mxu0 %v20912_v4 }
 0x1c8   : > { %3842 = vmatpush2.bf16.msra.mxu1 %v20907_v16  ;;  %v20939_v16 = vld [vmem:[%s30062_s4 + $0x4c4] ss:$16 sps:$4 sm:$0xff]  }
 0x1c9   : > { %3843 = vmatprep.subr.bf16.mxu1 %v20915_v38  ;;  %v20934_v38 = vld [vmem:[%s30062_s4 + $0x680] ss:$16 sps:$4 sm:$0xff]  }
 0x1ca   : > { %3891 = vmatpush2.bf16.msra.mxu0 %v20910_v6 }
 0x1cb   : > { %3946 = vmatprep.subr.bf16.mxu0 %v20918_v45  ;;  %v20937_v45 = vld [vmem:[%s30062_s4 + $0x4c0] ss:$16 sps:$4 sm:$0xff]  }
 0x1cc   : > { %3844 = vmatpush2.bf16.msra.mxu1 %v20913_v50 }
 0x1cd   : > { %3845 = vmatprep.subr.bf16.mxu1 %v20921_v21 }
 0x1d0   : > { %3846 = vmatpush2.bf16.msra.mxu1 %v20919_v52 }
 0x1d1   : > { %3847 = vmatprep.subr.bf16.mxu1 %v20927_v10  ;;  %v20942_v10 = vld [vmem:[%s30062_s4 + $0x664] ss:$16 sps:$4 sm:$0xff]  }
 0x1d4   : > { %3848 = vmatpush2.bf16.msra.mxu1 %v20925_v47  ;;  %v20945_v47 = vld [vmem:[%s30062_s4 + $0x4a4] ss:$16 sps:$4 sm:$0xff]  }
 0x1d5   : > { %3903 = vmatprep.subr.bf16.mxu1 %v20933_v59 }
 0x22f   : > { %v2178_v25 = vpop.f32.mrf.mxu0  ;;  %v2135_v7 = vpop.f32.mrf.mxu1 }
 0x231   : > { %v2180_v56 = vpop.f32.mrf.mxu0  ;;  %v2137_v9 = vpop.f32.mrf.mxu1 }
 0x233   : > { %v2182_v44 = vpop.f32.mrf.mxu0  ;;  %v2139_v33 = vpop.f32.mrf.mxu1 }
 0x235   : > { %v2184_v46 = vpop.f32.mrf.mxu0  ;;  %v2141_v8 = vpop.f32.mrf.mxu1 }
 0x23d   : > { %v24309_v62 = vpop.f32.mrf.mxu0 }
 0x23f   : > { %v20564_v29 = vpop.f32.mrf.mxu0 }
 0x240   : > { %v20948_v29 = vld [vmem:[%s30062_s4 + $0x644] ss:$16 sps:$4 sm:$0xff]  }
 0x241   : > { %v24311_v1 = vpop.f32.mrf.mxu0 }
 0x243   : > { %v20565_v43 = vpop.f32.mrf.mxu0 }
 0x244   : > { %v20946_v43 = vld [vmem:[%s30062_s4 + $0x640] ss:$16 sps:$4 sm:$0xff]  }
 0x245   : > { %v2359_v5 = vpop.f32.mrf.mxu0 }
 0x246   : > { %v2454_v26 = vmax.f32 %v2178_v25, %v2359_v5  ;;  %v20954_v5 = vld [vmem:[%s30062_s4 + $0x624] ss:$16 sps:$4 sm:$0xff]  }
 0x247   : > { %v2221_v11 = vpop.f32.mrf.mxu1  ;;  %v2361_v51 = vpop.f32.mrf.mxu0 }
 0x248   : > { %v2455_v15 = vmax.f32 %v2180_v56, %v2361_v51  ;;  %v20952_v51 = vld [vmem:[%s30062_s4 + $0x620] ss:$16 sps:$4 sm:$0xff]  }
 0x249   : > { %v24313_v17 = vpop.f32.mrf.mxu1  ;;  %v2363_v58 = vpop.f32.mrf.mxu0 }
 0x24a   : > { %v2461_v12 = vmax.f32 %v2182_v44, %v2363_v58  ;;  %v20960_v58 = vld [vmem:[%s30062_s4 + $0x604] ss:$16 sps:$4 sm:$0xff]  }
 0x24b   : > { %v2225_v55 = vpop.f32.mrf.mxu1  ;;  %v2365_v19 = vpop.f32.mrf.mxu0 }
 0x24c   : > { %v2462_v53 = vmax.f32 %v2184_v46, %v2365_v19  ;;  %v24322_v22 = vpack.c.bf16 %v2461_v12, %v2454_v26  ;;  %v20943_v46 = vld [vmem:[%s30062_s4 + $0x4a0] ss:$16 sps:$4 sm:$0xff]  }
 0x24d   : > { %v2227_v18 = vpop.f32.mrf.mxu1  ;;  %v24315_v34 = vpop.f32.mrf.mxu0  ;;  %v20958_v12 = vld [vmem:[%s30062_s4 + $0x600] ss:$16 sps:$4 sm:$0xff]  }
 0x24e   : > { %v24317_v24 = vpack.c.bf16 %v2462_v53, %v2455_v15  ;;  %v20961_v19 = vld [vmem:[%s30062_s4 + $0x440] ss:$16 sps:$4 sm:$0xff]   ;;  %v20966_v53 = vld [vmem:[%s30062_s4 + $0xec] ss:$16 sps:$4 sm:$0xff]   ;;  %v2458_v26 = vmax.f32 %v24309_v62, %v24315_v34  ;;  %v20975_v62 = vld [vmem:[%s30062_s4 + $0x404] ss:$16 sps:$4 sm:$0xff]  }
 0x24f   : > { %v2316_v57 = vpop.f32.mrf.mxu1  ;;  %v20572_v61 = vpop.f32.mrf.mxu0  ;;  %v20970_v34 = vld [vmem:[%s30062_s4 + $0xc8] ss:$16 sps:$4 sm:$0xff]  }
 0x250   : > { %3892 = vmatprep.mubr.bf16.mxu0 %v24317_v24  ;;  %v2452_v3 = vmax.f32 %v2135_v7, %v2316_v57  ;;  %v20940_v7 = vld [vmem:[%s30062_s4 + $0x660] ss:$16 sps:$4 sm:$0xff]   ;;  %v20964_v57 = vld [vmem:[%s30062_s4 + $0xe8] ss:$16 sps:$4 sm:$0xff]   ;;  %v20972_v61 = vld [vmem:[%s30062_s4 + $0xcc] ss:$16 sps:$4 sm:$0xff]  }
 0x251   : > { %v2318_v20 = vpop.f32.mrf.mxu1  ;;  %v24328_v49 = vpop.f32.mrf.mxu0  ;;  %3893 = vmatmul.mubr.bf16.vlgmr.msra.gmra.mxu0 %v24322_v22 }
 0x252   : > { %3947 = vmatpush1.bf16.msra.mxu0 %v20916_v60  ;;  %3978 = vmatprep.mubr.bf16.mxu0 %v30109_v14  ;;  %v2453_v40 = vmax.f32 %v2137_v9, %v2318_v20  ;;  %v2465_v15 = vmax.f32 %v24311_v1, %v24328_v49  ;;  %v20967_v1 = vld [vmem:[%s30062_s4 + $0x420] ss:$16 sps:$4 sm:$0xff]   ;;  %v20978_v20 = vld [vmem:[%s30062_s4 + $0xac] ss:$16 sps:$4 sm:$0xff]   ;;  %v20981_v49 = vld [vmem:[%s30062_s4 + $0x5e4] ss:$16 sps:$4 sm:$0xff]  }
 0x253   : > { %v2320_v23 = vpop.f32.mrf.mxu1  ;;  %3948 = vmatprep.subr.bf16.mxu0 %v20924_v54  ;;  %v20573_v28 = vpop.f32.mrf.mxu0  ;;  %v20973_v54 = vld [vmem:[%s30062_s4 + $0x400] ss:$16 sps:$4 sm:$0xff]  }
 0x254   : > { %v2459_v36 = vmax.f32 %v2139_v33, %v2320_v23  ;;  %v20951_v33 = vld [vmem:[%s30062_s4 + $0x484] ss:$16 sps:$4 sm:$0xff]   ;;  %v24432_v60 = vpack.c.bf16 %v2465_v15, %v2458_v26  ;;  %v20976_v23 = vld [vmem:[%s30062_s4 + $0xa8] ss:$16 sps:$4 sm:$0xff]   ;;  %v21041_v15 = vld [vmem:[%s30062_s4 + $0x2ac] ss:$16 sps:$4 sm:$0xff]  }
 0x255   : > { %v2322_v27 = vpop.f32.mrf.mxu1  ;;  %v20987_v28 = vld [vmem:[%s30062_s4 + $0x5c4] ss:$16 sps:$4 sm:$0xff]   ;;  %v21044_v26 = vld [vmem:[%s30062_s4 + $0x14c] ss:$16 sps:$4 sm:$0xff]  }
 0x256   : > { %v2460_v41 = vmax.f32 %v2141_v8, %v2322_v27  ;;  %3949 = vmatpush1.bf16.msra.mxu0 %v20922_v63  ;;  %v24352_v4 = vpack.c.bf16 %v2459_v36, %v2452_v3  ;;  %v20949_v8 = vld [vmem:[%s30062_s4 + $0x480] ss:$16 sps:$4 sm:$0xff]   ;;  %v20982_v36 = vld [vmem:[%s30062_s4 + $0x88] ss:$16 sps:$4 sm:$0xff]  }
 0x257   : > { %v2402_v42 = vpop.f32.mrf.mxu1  ;;  %3950 = vmatprep.subr.bf16.mxu0 %v20930_v31  ;;  %v20979_v63 = vld [vmem:[%s30062_s4 + $0x5e0] ss:$16 sps:$4 sm:$0xff]   ;;  %v20984_v31 = vld [vmem:[%s30062_s4 + $0x8c] ss:$16 sps:$4 sm:$0xff]  }
 0x258   : > { %v24344_v32 = vpack.c.bf16 %v2460_v41, %v2453_v40  ;;  %v2456_v21 = vmax.f32 %v2221_v11, %v2402_v42  ;;  %v20957_v11 = vld [vmem:[%s30062_s4 + $0x464] ss:$16 sps:$4 sm:$0xff]   ;;  %v20985_v27 = vld [vmem:[%s30062_s4 + $0x5c0] ss:$16 sps:$4 sm:$0xff]   ;;  %v20990_v40 = vld [vmem:[%s30062_s4 + $0x6c] ss:$16 sps:$4 sm:$0xff]  }
 0x259   : > { %v2404_v6 = vpop.f32.mrf.mxu1  ;;  %v20993_v41 = vld [vmem:[%s30062_s4 + $0x5a4] ss:$16 sps:$4 sm:$0xff]   ;;  %v20991_v3 = vld [vmem:[%s30062_s4 + $0x5a0] ss:$16 sps:$4 sm:$0xff]   ;;  %v20996_v42 = vld [vmem:[%s30062_s4 + $0x4c] ss:$16 sps:$4 sm:$0xff]  }
 0x25a   : > { %3849 = vmatprep.mubr.bf16.mxu1 %v24344_v32  ;;  %3951 = vmatpush1.bf16.msra.mxu0 %v20928_v39  ;;  %v2457_v25 = vmax.f32 %v24313_v17, %v2404_v6  ;;  %v20955_v17 = vld [vmem:[%s30062_s4 + $0x460] ss:$16 sps:$4 sm:$0xff]   ;;  %v20988_v39 = vld [vmem:[%s30062_s4 + $0x68] ss:$16 sps:$4 sm:$0xff]   ;;  %v21002_v6 = vld [vmem:[%s30062_s4 + $0x2c] ss:$16 sps:$4 sm:$0xff]  }
 0x25b   : > { %v2406_v50 = vpop.f32.mrf.mxu1  ;;  %3850 = vmatmul.mubr.bf16.vlgmr.msra.gmra.mxu1 %v24352_v4  ;;  %3952 = vmatprep.subr.bf16.mxu0 %v20936_v0  ;;  %v20994_v0 = vld [vmem:[%s30062_s4 + $0x48] ss:$16 sps:$4 sm:$0xff]  }
 0x25c   : > { %v2463_v52 = vmax.f32 %v2225_v55, %v2406_v50  ;;  %3904 = vmatpush1.bf16.msra.mxu1 %v20931_v2  ;;  %v20963_v55 = vld [vmem:[%s30062_s4 + $0x444] ss:$16 sps:$4 sm:$0xff]   ;;  %v21000_v50 = vld [vmem:[%s30062_s4 + $0x28] ss:$16 sps:$4 sm:$0xff]  }
 0x25d   : > { %v2408_v59 = vpop.f32.mrf.mxu1  ;;  %3905 = vmatprep.subr.bf16.mxu1 %v20939_v16  ;;  %v20999_v2 = vld [vmem:[%s30062_s4 + $0x584] ss:$16 sps:$4 sm:$0xff]   ;;  %v20997_v16 = vld [vmem:[%s30062_s4 + $0x580] ss:$16 sps:$4 sm:$0xff]  }
 0x25e   : > { %v24369_v56 = vpack.c.bf16 %v2463_v52, %v2456_v21  ;;  %v2464_v44 = vmax.f32 %v2227_v18, %v2408_v59  ;;  %3953 = vmatpush1.bf16.msra.mxu0 %v20934_v38  ;;  %v20969_v18 = vld [vmem:[%s30062_s4 + $0x424] ss:$16 sps:$4 sm:$0xff]   ;;  %v21008_v21 = vld [vmem:[%s30062_s4 + $0xc] ss:$16 sps:$4 sm:$0xff]  }
 0x25f   : > { %3954 = vmatprep.subr.bf16.mxu0 %v20942_v10  ;;  %v21005_v38 = vld [vmem:[%s30062_s4 + $0x564] ss:$16 sps:$4 sm:$0xff]   ;;  %v21006_v10 = vld [vmem:[%s30062_s4 + $0x8] ss:$16 sps:$4 sm:$0xff]   ;;  %v21014_v59 = vld [vmem:[%s30062_s4 + $0x1ec] ss:$16 sps:$4 sm:$0xff]  }
 0x260   : > { %v24377_v9 = vpack.c.bf16 %v2464_v44, %v2457_v25  ;;  %3906 = vmatpush1.bf16.msra.mxu1 %v20937_v45  ;;  %v21003_v45 = vld [vmem:[%s30062_s4 + $0x560] ss:$16 sps:$4 sm:$0xff]   ;;  %v21011_v52 = vld [vmem:[%s30062_s4 + $0x544] ss:$16 sps:$4 sm:$0xff]   ;;  %v21012_v44 = vld [vmem:[%s30062_s4 + $0x1e8] ss:$16 sps:$4 sm:$0xff]  }
 0x261   : > { %3907 = vmatprep.subr.bf16.mxu1 %v20945_v47  ;;  %v21009_v47 = vld [vmem:[%s30062_s4 + $0x540] ss:$16 sps:$4 sm:$0xff]   ;;  %v21017_v25 = vld [vmem:[%s30062_s4 + $0x524] ss:$16 sps:$4 sm:$0xff]  }
 0x262   : > { %3935 = vmatprep.mubr.bf16.mxu1 %v24377_v9  ;;  %3955 = vmatpush1.bf16.msra.mxu0 %v20940_v7  ;;  %v21015_v7 = vld [vmem:[%s30062_s4 + $0x520] ss:$16 sps:$4 sm:$0xff]  }
 0x263   : > { %3956 = vmatprep.subr.bf16.mxu0 %v20948_v29  ;;  %v21023_v29 = vld [vmem:[%s30062_s4 + $0x504] ss:$16 sps:$4 sm:$0xff]  }
 0x264   : > { %3908 = vmatpush1.bf16.msra.mxu1 %v20943_v46  ;;  %v21020_v46 = vld [vmem:[%s30062_s4 + $0x1cc] ss:$16 sps:$4 sm:$0xff]  }
 0x265   : > { %3909 = vmatprep.subr.bf16.mxu1 %v20951_v33  ;;  %v21018_v33 = vld [vmem:[%s30062_s4 + $0x1c8] ss:$16 sps:$4 sm:$0xff]  }
 0x266   : > { %3957 = vmatpush1.bf16.msra.mxu0 %v20946_v43  ;;  %v21021_v43 = vld [vmem:[%s30062_s4 + $0x500] ss:$16 sps:$4 sm:$0xff]  }
 0x267   : > { %3958 = vmatprep.subr.bf16.mxu0 %v20954_v5  ;;  %v21029_v5 = vld [vmem:[%s30062_s4 + $0x2ec] ss:$16 sps:$4 sm:$0xff]  }
 0x268   : > { %3910 = vmatpush1.bf16.msra.mxu1 %v20949_v8  ;;  %v21026_v8 = vld [vmem:[%s30062_s4 + $0x1ac] ss:$16 sps:$4 sm:$0xff]  }
 0x269   : > { %3911 = vmatprep.subr.bf16.mxu1 %v20957_v11  ;;  %v21024_v11 = vld [vmem:[%s30062_s4 + $0x1a8] ss:$16 sps:$4 sm:$0xff]  }
 0x26a   : > { %3959 = vmatpush1.bf16.msra.mxu0 %v20952_v51  ;;  %v21027_v51 = vld [vmem:[%s30062_s4 + $0x2e8] ss:$16 sps:$4 sm:$0xff]  }
 0x26b   : > { %3960 = vmatprep.subr.bf16.mxu0 %v20960_v58  ;;  %v21035_v58 = vld [vmem:[%s30062_s4 + $0x2cc] ss:$16 sps:$4 sm:$0xff]  }
 0x26c   : > { %3912 = vmatpush1.bf16.msra.mxu1 %v20955_v17  ;;  %v21032_v17 = vld [vmem:[%s30062_s4 + $0x18c] ss:$16 sps:$4 sm:$0xff]  }
 0x26d   : > { %3913 = vmatprep.subr.bf16.mxu1 %v20963_v55  ;;  %v21030_v55 = vld [vmem:[%s30062_s4 + $0x188] ss:$16 sps:$4 sm:$0xff]  }
 0x26e   : > { %3961 = vmatpush1.bf16.msra.mxu0 %v20958_v12  ;;  %v21033_v12 = vld [vmem:[%s30062_s4 + $0x2c8] ss:$16 sps:$4 sm:$0xff]  }
 0x26f   : > { %3989 = vmatprep.subr.bf16.mxu0 %v20966_v53  ;;  %v21036_v53 = vld [vmem:[%s30062_s4 + $0x168] ss:$16 sps:$4 sm:$0xff]  }
 0x270   : > { %3914 = vmatpush1.bf16.msra.mxu1 %v20961_v19  ;;  %v21038_v19 = vld [vmem:[%s30062_s4 + $0x16c] ss:$16 sps:$4 sm:$0xff]  }
 0x271   : > { %3915 = vmatprep.subr.bf16.mxu1 %v20969_v18  ;;  %3979 = vmatmul.mubr.bf16.vlgmr.msra.gmra.mxu0 %v24432_v60  ;;  %v21039_v18 = vld [vmem:[%s30062_s4 + $0x2a8] ss:$16 sps:$4 sm:$0xff]  }
 0x272   : > { %3990 = vmatpush1.bf16.msra.mxu0 %v20964_v57  ;;  %4021 = vmatprep.mubr.bf16.mxu0 %v24344_v32  ;;  %v21047_v57 = vld [vmem:[%s30062_s4 + $0x28c] ss:$16 sps:$4 sm:$0xff]  }
 0x273   : > { %3991 = vmatprep.subr.bf16.mxu0 %v20972_v61  ;;  %v21045_v61 = vld [vmem:[%s30062_s4 + $0x288] ss:$16 sps:$4 sm:$0xff]  }
 0x274   : > { %3916 = vmatpush1.bf16.msra.mxu1 %v20967_v1  ;;  %v21042_v1 = vld [vmem:[%s30062_s4 + $0x148] ss:$16 sps:$4 sm:$0xff]  }
 0x275   : > { %3917 = vmatprep.subr.bf16.mxu1 %v20975_v62  ;;  %v21050_v62 = vld [vmem:[%s30062_s4 + $0x12c] ss:$16 sps:$4 sm:$0xff]  }
 0x276   : > { %3992 = vmatpush1.bf16.msra.mxu0 %v20970_v34  ;;  %v21053_v34 = vld [vmem:[%s30062_s4 + $0x26c] ss:$16 sps:$4 sm:$0xff]  }
 0x277   : > { %3993 = vmatprep.subr.bf16.mxu0 %v20978_v20  ;;  %v21051_v20 = vld [vmem:[%s30062_s4 + $0x268] ss:$16 sps:$4 sm:$0xff]  }
 0x278   : > { %3918 = vmatpush1.bf16.msra.mxu1 %v20973_v54  ;;  %v21048_v54 = vld [vmem:[%s30062_s4 + $0x128] ss:$16 sps:$4 sm:$0xff]  }
 0x279   : > { %3919 = vmatprep.subr.bf16.mxu1 %v20981_v49  ;;  %v21056_v49 = vld [vmem:[%s30062_s4 + $0x10c] ss:$16 sps:$4 sm:$0xff]  }
 0x27a   : > { %3994 = vmatpush1.bf16.msra.mxu0 %v20976_v23  ;;  %v21059_v23 = vld [vmem:[%s30062_s4 + $0x24c] ss:$16 sps:$4 sm:$0xff]  }
 0x27b   : > { %3995 = vmatprep.subr.bf16.mxu0 %v20984_v31  ;;  %v21057_v31 = vld [vmem:[%s30062_s4 + $0x248] ss:$16 sps:$4 sm:$0xff]  }
 0x27c   : > { %3920 = vmatpush2.bf16.msra.mxu1 %v20979_v63  ;;  %v21054_v63 = vld [vmem:[%s30062_s4 + $0x108] ss:$16 sps:$4 sm:$0xff]  }
 0x27d   : > { %3921 = vmatprep.subr.bf16.mxu1 %v20987_v28  ;;  %v21062_v28 = vld [vmem:[%s30062_s4 + $0x4ec] ss:$16 sps:$4 sm:$0xff]  }
 0x27e   : > { %3996 = vmatpush1.bf16.msra.mxu0 %v20982_v36  ;;  %v21065_v36 = vld [vmem:[%s30062_s4 + $0x22c] ss:$16 sps:$4 sm:$0xff]  }
 0x27f   : > { %3997 = vmatprep.subr.bf16.mxu0 %v20990_v40  ;;  %v21063_v40 = vld [vmem:[%s30062_s4 + $0x228] ss:$16 sps:$4 sm:$0xff]  }
 0x280   : > { %3922 = vmatpush2.bf16.msra.mxu1 %v20985_v27  ;;  %v21060_v27 = vld [vmem:[%s30062_s4 + $0x4e8] ss:$16 sps:$4 sm:$0xff]  }
 0x281   : > { %3923 = vmatprep.subr.bf16.mxu1 %v20993_v41  ;;  %v21068_v41 = vld [vmem:[%s30062_s4 + $0x4cc] ss:$16 sps:$4 sm:$0xff]  }
 0x282   : > { %3998 = vmatpush1.bf16.msra.mxu0 %v20988_v39  ;;  %v21071_v39 = vld [vmem:[%s30062_s4 + $0x20c] ss:$16 sps:$4 sm:$0xff]  }
 0x283   : > { %3999 = vmatprep.subr.bf16.mxu0 %v20996_v42  ;;  %v21069_v42 = vld [vmem:[%s30062_s4 + $0x208] ss:$16 sps:$4 sm:$0xff]  }
 0x284   : > { %3924 = vmatpush2.bf16.msra.mxu1 %v20991_v3  ;;  %v21066_v3 = vld [vmem:[%s30062_s4 + $0x4c8] ss:$16 sps:$4 sm:$0xff]  }
 0x285   : > { %3925 = vmatprep.subr.bf16.mxu1 %v20999_v2  ;;  %v21074_v2 = vld [vmem:[%s30062_s4 + $0x4ac] ss:$16 sps:$4 sm:$0xff]  }
 0x286   : > { %4000 = vmatpush1.bf16.msra.mxu0 %v20994_v0  ;;  %v21077_v0 = vld [vmem:[%s30062_s4 + $0x3ec] ss:$16 sps:$4 sm:$0xff]  }
 0x287   : > { %4001 = vmatprep.subr.bf16.mxu0 %v21002_v6  ;;  %v21075_v6 = vld [vmem:[%s30062_s4 + $0x3e8] ss:$16 sps:$4 sm:$0xff]  }
 0x288   : > { %3926 = vmatpush2.bf16.msra.mxu1 %v20997_v16  ;;  %v21072_v16 = vld [vmem:[%s30062_s4 + $0x4a8] ss:$16 sps:$4 sm:$0xff]  }
 0x289   : > { %3927 = vmatprep.subr.bf16.mxu1 %v21005_v38  ;;  %v21080_v38 = vld [vmem:[%s30062_s4 + $0x48c] ss:$16 sps:$4 sm:$0xff]  }
 0x28a   : > { %4002 = vmatpush1.bf16.msra.mxu0 %v21000_v50  ;;  %v21083_v50 = vld [vmem:[%s30062_s4 + $0x3cc] ss:$16 sps:$4 sm:$0xff]  }
 0x28b   : > { %4003 = vmatprep.subr.bf16.mxu0 %v21008_v21  ;;  %v21081_v21 = vld [vmem:[%s30062_s4 + $0x3c8] ss:$16 sps:$4 sm:$0xff]  }
 0x28c   : > { %3928 = vmatpush2.bf16.msra.mxu1 %v21003_v45  ;;  %v21078_v45 = vld [vmem:[%s30062_s4 + $0x488] ss:$16 sps:$4 sm:$0xff]  }
 0x28d   : > { %3929 = vmatprep.subr.bf16.mxu1 %v21011_v52  ;;  %v21086_v52 = vld [vmem:[%s30062_s4 + $0x46c] ss:$16 sps:$4 sm:$0xff]  }
 0x28e   : > { %4004 = vmatpush1.bf16.msra.mxu0 %v21006_v10  ;;  %v21089_v10 = vld [vmem:[%s30062_s4 + $0x3ac] ss:$16 sps:$4 sm:$0xff]  }
 0x28f   : > { %4005 = vmatprep.subr.bf16.mxu0 %v21014_v59  ;;  %v21087_v59 = vld [vmem:[%s30062_s4 + $0x3a8] ss:$16 sps:$4 sm:$0xff]  }
 0x290   : > { %3930 = vmatpush2.bf16.msra.mxu1 %v21009_v47  ;;  %v21084_v47 = vld [vmem:[%s30062_s4 + $0x468] ss:$16 sps:$4 sm:$0xff]  }
 0x291   : > { %3931 = vmatprep.subr.bf16.mxu1 %v21017_v25  ;;  %v21092_v25 = vld [vmem:[%s30062_s4 + $0x44c] ss:$16 sps:$4 sm:$0xff]  }
 0x292   : > { %4006 = vmatpush2.bf16.msra.mxu0 %v21012_v44  ;;  %v21095_v44 = vld [vmem:[%s30062_s4 + $0x38c] ss:$16 sps:$4 sm:$0xff]  }
 0x293   : > { %4007 = vmatprep.subr.bf16.mxu0 %v21020_v46  ;;  %v21093_v46 = vld [vmem:[%s30062_s4 + $0x388] ss:$16 sps:$4 sm:$0xff]  }
 0x294   : > { %3932 = vmatpush2.bf16.msra.mxu1 %v21015_v7  ;;  %v21090_v7 = vld [vmem:[%s30062_s4 + $0x448] ss:$16 sps:$4 sm:$0xff]  }
 0x295   : > { %3933 = vmatprep.subr.bf16.mxu1 %v21023_v29  ;;  %v21098_v29 = vld [vmem:[%s30062_s4 + $0x42c] ss:$16 sps:$4 sm:$0xff]  }
 0x296   : > { %4008 = vmatpush2.bf16.msra.mxu0 %v21018_v33  ;;  %v21101_v33 = vld [vmem:[%s30062_s4 + $0x36c] ss:$16 sps:$4 sm:$0xff]  }
 0x297   : > { %4009 = vmatprep.subr.bf16.mxu0 %v21026_v8  ;;  %v21099_v8 = vld [vmem:[%s30062_s4 + $0x368] ss:$16 sps:$4 sm:$0xff]  }
 0x298   : > { %3934 = vmatpush2.bf16.msra.mxu1 %v21021_v43  ;;  %v21096_v43 = vld [vmem:[%s30062_s4 + $0x428] ss:$16 sps:$4 sm:$0xff]  }
 0x299   : > { %4032 = vmatprep.subr.bf16.mxu1 %v21029_v5  ;;  %v21104_v5 = vld [vmem:[%s30062_s4 + $0x40c] ss:$16 sps:$4 sm:$0xff]  }
 0x29a   : > { %4010 = vmatpush2.bf16.msra.mxu0 %v21024_v11  ;;  %v21107_v11 = vld [vmem:[%s30062_s4 + $0x34c] ss:$16 sps:$4 sm:$0xff]  }
 0x29b   : > { %3936 = vmatmul.mubr.bf16.vlgmr.msra.gmra.mxu1 %v24369_v56  ;;  %4011 = vmatprep.subr.bf16.mxu0 %v21032_v17  ;;  %v21105_v17 = vld [vmem:[%s30062_s4 + $0x348] ss:$16 sps:$4 sm:$0xff]  }
 0x29c   : > { %4033 = vmatpush1.bf16.msra.mxu1 %v21027_v51  ;;  %4064 = vmatprep.mubr.bf16.mxu1 %v24317_v24  ;;  %v21102_v51 = vld [vmem:[%s30062_s4 + $0x408] ss:$16 sps:$4 sm:$0xff]  }
 0x29d   : > { %4034 = vmatprep.subr.bf16.mxu1 %v21035_v58  ;;  %v21110_v58 = vld [vmem:[%s30062_s4 + $0x5ec] ss:$16 sps:$4 sm:$0xff]  }
 0x29e   : > { %4012 = vmatpush2.bf16.msra.mxu0 %v21030_v55  ;;  %v21113_v55 = vld [vmem:[%s30062_s4 + $0x32c] ss:$16 sps:$4 sm:$0xff]  }
 0x29f   : > { %4013 = vmatprep.subr.bf16.mxu0 %v21038_v19  ;;  %v21111_v19 = vld [vmem:[%s30062_s4 + $0x328] ss:$16 sps:$4 sm:$0xff]  }
 0x2a0   : > { %4035 = vmatpush1.bf16.msra.mxu1 %v21033_v12  ;;  %v21108_v12 = vld [vmem:[%s30062_s4 + $0x5e8] ss:$16 sps:$4 sm:$0xff]  }
 0x2a1   : > { %4036 = vmatprep.subr.bf16.mxu1 %v21041_v15  ;;  %v21116_v15 = vld [vmem:[%s30062_s4 + $0x5cc] ss:$16 sps:$4 sm:$0xff]  }
 0x2a2   : > { %4014 = vmatpush2.bf16.msra.mxu0 %v21036_v53  ;;  %v21119_v53 = vld [vmem:[%s30062_s4 + $0x30c] ss:$16 sps:$4 sm:$0xff]  }
 0x2a3   : > { %4015 = vmatprep.subr.bf16.mxu0 %v21044_v26  ;;  %v21117_v26 = vld [vmem:[%s30062_s4 + $0x308] ss:$16 sps:$4 sm:$0xff]  }
 0x2a4   : > { %4037 = vmatpush1.bf16.msra.mxu1 %v21039_v18  ;;  %v21114_v18 = vld [vmem:[%s30062_s4 + $0x5c8] ss:$16 sps:$4 sm:$0xff]  }
 0x2a5   : > { %4038 = vmatprep.subr.bf16.mxu1 %v21047_v57  ;;  %v21122_v57 = vld [vmem:[%s30062_s4 + $0x5ac] ss:$16 sps:$4 sm:$0xff]  }
 0x2a6   : > { %4016 = vmatpush2.bf16.msra.mxu0 %v21042_v1  ;;  %v21125_v1 = vld [vmem:[%s30062_s4 + $0x6ec] ss:$16 sps:$4 sm:$0xff]  }
 0x2a7   : > { %4017 = vmatprep.subr.bf16.mxu0 %v21050_v62  ;;  %v21123_v62 = vld [vmem:[%s30062_s4 + $0x6e8] ss:$16 sps:$4 sm:$0xff]  }
 0x2a8   : > { %4039 = vmatpush1.bf16.msra.mxu1 %v21045_v61  ;;  %v21120_v61 = vld [vmem:[%s30062_s4 + $0x5a8] ss:$16 sps:$4 sm:$0xff]  }
 0x2a9   : > { %4040 = vmatprep.subr.bf16.mxu1 %v21053_v34  ;;  %v21128_v34 = vld [vmem:[%s30062_s4 + $0x58c] ss:$16 sps:$4 sm:$0xff]  }
 0x2aa   : > { %4018 = vmatpush2.bf16.msra.mxu0 %v21048_v54  ;;  %v21131_v54 = vld [vmem:[%s30062_s4 + $0x6cc] ss:$16 sps:$4 sm:$0xff]  }
 0x2ab   : > { %4019 = vmatprep.subr.bf16.mxu0 %v21056_v49  ;;  %v21129_v49 = vld [vmem:[%s30062_s4 + $0x6c8] ss:$16 sps:$4 sm:$0xff]  }
 0x2ac   : > { %4041 = vmatpush1.bf16.msra.mxu1 %v21051_v20  ;;  %v21126_v20 = vld [vmem:[%s30062_s4 + $0x588] ss:$16 sps:$4 sm:$0xff]  }
 0x2ad   : > { %4042 = vmatprep.subr.bf16.mxu1 %v21059_v23  ;;  %v21134_v23 = vld [vmem:[%s30062_s4 + $0x56c] ss:$16 sps:$4 sm:$0xff]  }
 0x2ae   : > { %4020 = vmatpush2.bf16.msra.mxu0 %v21054_v63  ;;  %v21137_v63 = vld [vmem:[%s30062_s4 + $0x6ac] ss:$16 sps:$4 sm:$0xff]  }
 0x2af   : > { %4075 = vmatprep.subr.bf16.mxu0 %v21062_v28  ;;  %v21135_v28 = vld [vmem:[%s30062_s4 + $0x6a8] ss:$16 sps:$4 sm:$0xff]  }
 0x2b0   : > { %4043 = vmatpush1.bf16.msra.mxu1 %v21057_v31  ;;  %v21132_v31 = vld [vmem:[%s30062_s4 + $0x568] ss:$16 sps:$4 sm:$0xff]  }
 0x2b1   : > { %4044 = vmatprep.subr.bf16.mxu1 %v21065_v36  ;;  %4022 = vmatmul.mubr.bf16.vlgmr.msra.gmra.mxu0 %v24352_v4  ;;  %v21140_v36 = vld [vmem:[%s30062_s4 + $0x54c] ss:$16 sps:$4 sm:$0xff]  }
 0x2b2   : > { %4076 = vmatpush1.bf16.msra.mxu0 %v21060_v27  ;;  %4107 = vmatprep.mubr.bf16.mxu0 %v24377_v9  ;;  %v21143_v27 = vld [vmem:[%s30062_s4 + $0x68c] ss:$16 sps:$4 sm:$0xff]  }
 0x2b3   : > { %4077 = vmatprep.subr.bf16.mxu0 %v21068_v41  ;;  %v21141_v41 = vld [vmem:[%s30062_s4 + $0x688] ss:$16 sps:$4 sm:$0xff]  }
 0x2b4   : > { %4045 = vmatpush1.bf16.msra.mxu1 %v21063_v40  ;;  %v21138_v40 = vld [vmem:[%s30062_s4 + $0x548] ss:$16 sps:$4 sm:$0xff]  }
 0x2b5   : > { %4046 = vmatprep.subr.bf16.mxu1 %v21071_v39  ;;  %v21146_v39 = vld [vmem:[%s30062_s4 + $0x52c] ss:$16 sps:$4 sm:$0xff]  }
 0x2b6   : > { %4078 = vmatpush1.bf16.msra.mxu0 %v21066_v3  ;;  %v21149_v3 = vld [vmem:[%s30062_s4 + $0x66c] ss:$16 sps:$4 sm:$0xff]  }
 0x2b7   : > { %4079 = vmatprep.subr.bf16.mxu0 %v21074_v2  ;;  %v21147_v2 = vld [vmem:[%s30062_s4 + $0x668] ss:$16 sps:$4 sm:$0xff]  }
 0x2b8   : > { %4047 = vmatpush1.bf16.msra.mxu1 %v21069_v42  ;;  %v21144_v42 = vld [vmem:[%s30062_s4 + $0x528] ss:$16 sps:$4 sm:$0xff]  }
 0x2b9   : > { %4048 = vmatprep.subr.bf16.mxu1 %v21077_v0  ;;  %v21152_v0 = vld [vmem:[%s30062_s4 + $0x50c] ss:$16 sps:$4 sm:$0xff]  }
 0x2ba   : > { %4080 = vmatpush1.bf16.msra.mxu0 %v21072_v16  ;;  %v21155_v16 = vld [vmem:[%s30062_s4 + $0x64c] ss:$16 sps:$4 sm:$0xff]  }
 0x2bb   : > { %4081 = vmatprep.subr.bf16.mxu0 %v21080_v38  ;;  %v21153_v38 = vld [vmem:[%s30062_s4 + $0x648] ss:$16 sps:$4 sm:$0xff]  }
 0x2bc   : > { %4049 = vmatpush2.bf16.msra.mxu1 %v21075_v6  ;;  %v21150_v6 = vld [vmem:[%s30062_s4 + $0x508] ss:$16 sps:$4 sm:$0xff]  }
 0x2bd   : > { %4050 = vmatprep.subr.bf16.mxu1 %v21083_v50  ;;  %v21158_v50 = vld [vmem:[%s30062_s4 + $0x9e4] ss:$16 sps:$4 sm:$0xff]  }
 0x2be   : > { %4082 = vmatpush1.bf16.msra.mxu0 %v21078_v45  ;;  %v21161_v45 = vld [vmem:[%s30062_s4 + $0x62c] ss:$16 sps:$4 sm:$0xff]  }
 0x2bf   : > { %4083 = vmatprep.subr.bf16.mxu0 %v21086_v52  ;;  %v21159_v52 = vld [vmem:[%s30062_s4 + $0x628] ss:$16 sps:$4 sm:$0xff]  }
 0x2c0   : > { %4051 = vmatpush2.bf16.msra.mxu1 %v21081_v21  ;;  %v21156_v21 = vld [vmem:[%s30062_s4 + $0x9e0] ss:$16 sps:$4 sm:$0xff]  }
 0x2c1   : > { %4052 = vmatprep.subr.bf16.mxu1 %v21089_v10  ;;  %v21164_v10 = vld [vmem:[%s30062_s4 + $0x9c4] ss:$16 sps:$4 sm:$0xff]  }
 0x2c2   : > { %4084 = vmatpush1.bf16.msra.mxu0 %v21084_v47  ;;  %v21167_v47 = vld [vmem:[%s30062_s4 + $0x60c] ss:$16 sps:$4 sm:$0xff]  }
 0x2c3   : > { %4085 = vmatprep.subr.bf16.mxu0 %v21092_v25  ;;  %v21165_v25 = vld [vmem:[%s30062_s4 + $0x608] ss:$16 sps:$4 sm:$0xff]  }
 0x2c4   : > { %4053 = vmatpush2.bf16.msra.mxu1 %v21087_v59  ;;  %v21162_v59 = vld [vmem:[%s30062_s4 + $0x9c0] ss:$16 sps:$4 sm:$0xff]  }
 0x2c5   : > { %4054 = vmatprep.subr.bf16.mxu1 %v21095_v44  ;;  %v21170_v44 = vld [vmem:[%s30062_s4 + $0x9a4] ss:$16 sps:$4 sm:$0xff]  }
 0x2c6   : > { %4086 = vmatpush1.bf16.msra.mxu0 %v21090_v7  ;;  %v21173_v7 = vld [vmem:[%s30062_s4 + $0x7e4] ss:$16 sps:$4 sm:$0xff]  }
 0x2c7   : > { %4087 = vmatprep.subr.bf16.mxu0 %v21098_v29  ;;  %v21171_v29 = vld [vmem:[%s30062_s4 + $0x7e0] ss:$16 sps:$4 sm:$0xff]  }
 0x2c8   : > { %4055 = vmatpush2.bf16.msra.mxu1 %v21093_v46  ;;  %v21168_v46 = vld [vmem:[%s30062_s4 + $0x9a0] ss:$16 sps:$4 sm:$0xff]  }
 0x2c9   : > { %4056 = vmatprep.subr.bf16.mxu1 %v21101_v33  ;;  %v21176_v33 = vld [vmem:[%s30062_s4 + $0x984] ss:$16 sps:$4 sm:$0xff]  }
 0x2ca   : > { %4088 = vmatpush1.bf16.msra.mxu0 %v21096_v43  ;;  %v21179_v43 = vld [vmem:[%s30062_s4 + $0x7c4] ss:$16 sps:$4 sm:$0xff]  }
 0x2cb   : > { %4089 = vmatprep.subr.bf16.mxu0 %v21104_v5  ;;  %v21177_v5 = vld [vmem:[%s30062_s4 + $0x7c0] ss:$16 sps:$4 sm:$0xff]  }
 0x2cc   : > { %4057 = vmatpush2.bf16.msra.mxu1 %v21099_v8  ;;  %v21174_v8 = vld [vmem:[%s30062_s4 + $0x980] ss:$16 sps:$4 sm:$0xff]  }
 0x2cd   : > { %4058 = vmatprep.subr.bf16.mxu1 %v21107_v11  ;;  %v21182_v11 = vld [vmem:[%s30062_s4 + $0x964] ss:$16 sps:$4 sm:$0xff]  }
 0x2ce   : > { %4090 = vmatpush1.bf16.msra.mxu0 %v21102_v51  ;;  %v21185_v51 = vld [vmem:[%s30062_s4 + $0x7a4] ss:$16 sps:$4 sm:$0xff]  }
 0x2cf   : > { %4091 = vmatprep.subr.bf16.mxu0 %v21110_v58  ;;  %v21183_v58 = vld [vmem:[%s30062_s4 + $0x7a0] ss:$16 sps:$4 sm:$0xff]  }
 0x2d0   : > { %4059 = vmatpush2.bf16.msra.mxu1 %v21105_v17  ;;  %v21180_v17 = vld [vmem:[%s30062_s4 + $0x960] ss:$16 sps:$4 sm:$0xff]  }
 0x2d1   : > { %4060 = vmatprep.subr.bf16.mxu1 %v21113_v55  ;;  %v21188_v55 = vld [vmem:[%s30062_s4 + $0x944] ss:$16 sps:$4 sm:$0xff]  }
 0x2d2   : > { %4092 = vmatpush2.bf16.msra.mxu0 %v21108_v12  ;;  %v21191_v12 = vld [vmem:[%s30062_s4 + $0x784] ss:$16 sps:$4 sm:$0xff]  }
 0x2d3   : > { %4093 = vmatprep.subr.bf16.mxu0 %v21116_v15  ;;  %v21189_v15 = vld [vmem:[%s30062_s4 + $0x780] ss:$16 sps:$4 sm:$0xff]  }
 0x2d4   : > { %4061 = vmatpush2.bf16.msra.mxu1 %v21111_v19  ;;  %v21186_v19 = vld [vmem:[%s30062_s4 + $0x940] ss:$16 sps:$4 sm:$0xff]  }
 0x2d5   : > { %4062 = vmatprep.subr.bf16.mxu1 %v21119_v53  ;;  %v21194_v53 = vld [vmem:[%s30062_s4 + $0x924] ss:$16 sps:$4 sm:$0xff]  }
 0x2d6   : > { %4094 = vmatpush2.bf16.msra.mxu0 %v21114_v18  ;;  %v21197_v18 = vld [vmem:[%s30062_s4 + $0x764] ss:$16 sps:$4 sm:$0xff]  }
 0x2d7   : > { %4095 = vmatprep.subr.bf16.mxu0 %v21122_v57  ;;  %v21195_v57 = vld [vmem:[%s30062_s4 + $0x760] ss:$16 sps:$4 sm:$0xff]  }
 0x2d8   : > { %4063 = vmatpush2.bf16.msra.mxu1 %v21117_v26  ;;  %v21192_v26 = vld [vmem:[%s30062_s4 + $0x920] ss:$16 sps:$4 sm:$0xff]  }
 0x2d9   : > { %4118 = vmatprep.subr.bf16.mxu1 %v21125_v1  ;;  %v21200_v1 = vld [vmem:[%s30062_s4 + $0x904] ss:$16 sps:$4 sm:$0xff]  }
 0x2da   : > { %4096 = vmatpush2.bf16.msra.mxu0 %v21120_v61  ;;  %v21203_v61 = vld [vmem:[%s30062_s4 + $0x744] ss:$16 sps:$4 sm:$0xff]  }
 0x2db   : > { %4065 = vmatmul.mubr.bf16.vlgmr.msra.gmra.mxu1 %v24322_v22  ;;  %4097 = vmatprep.subr.bf16.mxu0 %v21128_v34  ;;  %v21201_v34 = vld [vmem:[%s30062_s4 + $0x740] ss:$16 sps:$4 sm:$0xff]  }
 0x2dc   : > { %4119 = vmatpush1.bf16.msra.mxu1 %v21123_v62  ;;  %4150 = vmatprep.mubr.bf16.mxu1 %v30109_v14  ;;  %v21198_v62 = vld [vmem:[%s30062_s4 + $0x900] ss:$16 sps:$4 sm:$0xff]  }
 0x2dd   : > { %4120 = vmatprep.subr.bf16.mxu1 %v21131_v54  ;;  %v21206_v54 = vld [vmem:[%s30062_s4 + $0xae4] ss:$16 sps:$4 sm:$0xff]  }
 0x2de   : > { %4098 = vmatpush2.bf16.msra.mxu0 %v21126_v20  ;;  %v21209_v20 = vld [vmem:[%s30062_s4 + $0x724] ss:$16 sps:$4 sm:$0xff]  }
 0x2df   : > { %4099 = vmatprep.subr.bf16.mxu0 %v21134_v23  ;;  %v21207_v23 = vld [vmem:[%s30062_s4 + $0x720] ss:$16 sps:$4 sm:$0xff]  }
 0x2e0   : > { %4121 = vmatpush1.bf16.msra.mxu1 %v21129_v49  ;;  %v21204_v49 = vld [vmem:[%s30062_s4 + $0xae0] ss:$16 sps:$4 sm:$0xff]  }
 0x2e1   : > { %4122 = vmatprep.subr.bf16.mxu1 %v21137_v63  ;;  %v21212_v63 = vld [vmem:[%s30062_s4 + $0xac4] ss:$16 sps:$4 sm:$0xff]  }
 0x2e2   : > { %4100 = vmatpush2.bf16.msra.mxu0 %v21132_v31  ;;  %v21215_v31 = vld [vmem:[%s30062_s4 + $0x704] ss:$16 sps:$4 sm:$0xff]  }
 0x2e3   : > { %4101 = vmatprep.subr.bf16.mxu0 %v21140_v36  ;;  %v21213_v36 = vld [vmem:[%s30062_s4 + $0x700] ss:$16 sps:$4 sm:$0xff]  }
 0x2e4   : > { %4123 = vmatpush1.bf16.msra.mxu1 %v21135_v28  ;;  %v21210_v28 = vld [vmem:[%s30062_s4 + $0xac0] ss:$16 sps:$4 sm:$0xff]  }
 0x2e5   : > { %4124 = vmatprep.subr.bf16.mxu1 %v21143_v27  ;;  %v21218_v27 = vld [vmem:[%s30062_s4 + $0xaa4] ss:$16 sps:$4 sm:$0xff]  }
 0x2e6   : > { %4102 = vmatpush2.bf16.msra.mxu0 %v21138_v40  ;;  %v21221_v40 = vld [vmem:[%s30062_s4 + $0x8e4] ss:$16 sps:$4 sm:$0xff]  }
 0x2e7   : > { %4103 = vmatprep.subr.bf16.mxu0 %v21146_v39  ;;  %v21219_v39 = vld [vmem:[%s30062_s4 + $0x8e0] ss:$16 sps:$4 sm:$0xff]  }
 0x2e8   : > { %4125 = vmatpush1.bf16.msra.mxu1 %v21141_v41  ;;  %v21216_v41 = vld [vmem:[%s30062_s4 + $0xaa0] ss:$16 sps:$4 sm:$0xff]  }
 0x2e9   : > { %4126 = vmatprep.subr.bf16.mxu1 %v21149_v3  ;;  %v21224_v3 = vld [vmem:[%s30062_s4 + $0xa84] ss:$16 sps:$4 sm:$0xff]  }
 0x2ea   : > { %4104 = vmatpush2.bf16.msra.mxu0 %v21144_v42  ;;  %v21227_v42 = vld [vmem:[%s30062_s4 + $0x8c4] ss:$16 sps:$4 sm:$0xff]  }
 0x2eb   : > { %4105 = vmatprep.subr.bf16.mxu0 %v21152_v0  ;;  %v21225_v0 = vld [vmem:[%s30062_s4 + $0x8c0] ss:$16 sps:$4 sm:$0xff]  }
 0x2ec   : > { %4127 = vmatpush1.bf16.msra.mxu1 %v21147_v2  ;;  %v21222_v2 = vld [vmem:[%s30062_s4 + $0xa80] ss:$16 sps:$4 sm:$0xff]  }
 0x2ed   : > { %4128 = vmatprep.subr.bf16.mxu1 %v21155_v16  ;;  %v21230_v16 = vld [vmem:[%s30062_s4 + $0xa64] ss:$16 sps:$4 sm:$0xff]  }
 0x2ee   : > { %4106 = vmatpush2.bf16.msra.mxu0 %v21150_v6  ;;  %v21233_v6 = vld [vmem:[%s30062_s4 + $0x8a4] ss:$16 sps:$4 sm:$0xff]  }
 0x2ef   : > { %5549 = vmatprep.subr.bf16.mxu0 %v21158_v50  ;;  %v21231_v50 = vld [vmem:[%s30062_s4 + $0x8a0] ss:$16 sps:$4 sm:$0xff]  }
 0x2f0   : > { %4129 = vmatpush1.bf16.msra.mxu1 %v21153_v38  ;;  %v21228_v38 = vld [vmem:[%s30062_s4 + $0xa60] ss:$16 sps:$4 sm:$0xff]  }
 0x2f1   : > { %4130 = vmatprep.subr.bf16.mxu1 %v21161_v45  ;;  %4108 = vmatmul.mubr.bf16.vlgmr.msra.gmra.mxu0 %v24369_v56  ;;  %v21236_v45 = vld [vmem:[%s30062_s4 + $0xa44] ss:$16 sps:$4 sm:$0xff]  }
 0x2f2   : > { %5550 = vmatpush1.bf16.msra.mxu0 %v21156_v21  ;;  %5581 = vmatprep.mubr.bf16.mxu0 %v24317_v24  ;;  %v21239_v21 = vld [vmem:[%s30062_s4 + $0x884] ss:$16 sps:$4 sm:$0xff]  }
 0x2f3   : > { %5551 = vmatprep.subr.bf16.mxu0 %v21164_v10  ;;  %v21237_v10 = vld [vmem:[%s30062_s4 + $0x880] ss:$16 sps:$4 sm:$0xff]  }
 0x2f4   : > { %4131 = vmatpush1.bf16.msra.mxu1 %v21159_v52  ;;  %v21234_v52 = vld [vmem:[%s30062_s4 + $0xa40] ss:$16 sps:$4 sm:$0xff]  }
 0x2f5   : > { %4132 = vmatprep.subr.bf16.mxu1 %v21167_v47  ;;  %v21242_v47 = vld [vmem:[%s30062_s4 + $0xa24] ss:$16 sps:$4 sm:$0xff]  }
 0x2f6   : > { %5552 = vmatpush1.bf16.msra.mxu0 %v21162_v59  ;;  %v21245_v59 = vld [vmem:[%s30062_s4 + $0x864] ss:$16 sps:$4 sm:$0xff]  }
 0x2f7   : > { %5553 = vmatprep.subr.bf16.mxu0 %v21170_v44  ;;  %v21243_v44 = vld [vmem:[%s30062_s4 + $0x860] ss:$16 sps:$4 sm:$0xff]  }
 0x2f8   : > { %4133 = vmatpush1.bf16.msra.mxu1 %v21165_v25  ;;  %v21240_v25 = vld [vmem:[%s30062_s4 + $0xa20] ss:$16 sps:$4 sm:$0xff]  }
 0x2f9   : > { %5506 = vmatprep.subr.bf16.mxu1 %v21173_v7  ;;  %v21248_v7 = vld [vmem:[%s30062_s4 + $0xa04] ss:$16 sps:$4 sm:$0xff]  }
 0x2fa   : > { %5554 = vmatpush1.bf16.msra.mxu0 %v21168_v46  ;;  %v21251_v46 = vld [vmem:[%s30062_s4 + $0x844] ss:$16 sps:$4 sm:$0xff]  }
 0x2fb   : > { %4151 = vmatmul.mubr.bf16.vlgmr.msra.gmra.mxu1 %v24432_v60  ;;  %5555 = vmatprep.subr.bf16.mxu0 %v21176_v33  ;;  %v21249_v33 = vld [vmem:[%s30062_s4 + $0x840] ss:$16 sps:$4 sm:$0xff]  }
 0x2fc   : > { %5507 = vmatpush1.bf16.msra.mxu1 %v21171_v29  ;;  %5538 = vmatprep.mubr.bf16.mxu1 %v24344_v32  ;;  %v21246_v29 = vld [vmem:[%s30062_s4 + $0xa00] ss:$16 sps:$4 sm:$0xff]  }
 0x2fd   : > { %5508 = vmatprep.subr.bf16.mxu1 %v21179_v43  ;;  %v21254_v43 = vld [vmem:[%s30062_s4 + $0xde4] ss:$16 sps:$4 sm:$0xff]  }
 0x2fe   : > { %5556 = vmatpush1.bf16.msra.mxu0 %v21174_v8  ;;  %v21257_v8 = vld [vmem:[%s30062_s4 + $0x824] ss:$16 sps:$4 sm:$0xff]  }
 0x2ff   : > { %5557 = vmatprep.subr.bf16.mxu0 %v21182_v11  ;;  %v21255_v11 = vld [vmem:[%s30062_s4 + $0x820] ss:$16 sps:$4 sm:$0xff]  }
 0x300   : > { %5509 = vmatpush1.bf16.msra.mxu1 %v21177_v5  ;;  %v21252_v5 = vld [vmem:[%s30062_s4 + $0xde0] ss:$16 sps:$4 sm:$0xff]  }
 0x301   : > { %5510 = vmatprep.subr.bf16.mxu1 %v21185_v51  ;;  %v21260_v51 = vld [vmem:[%s30062_s4 + $0xdc4] ss:$16 sps:$4 sm:$0xff]  }
 0x302   : > { %5558 = vmatpush1.bf16.msra.mxu0 %v21180_v17  ;;  %v21263_v17 = vld [vmem:[%s30062_s4 + $0x804] ss:$16 sps:$4 sm:$0xff]  }
 0x303   : > { %5559 = vmatprep.subr.bf16.mxu0 %v21188_v55  ;;  %v21261_v55 = vld [vmem:[%s30062_s4 + $0x800] ss:$16 sps:$4 sm:$0xff]  }
 0x304   : > { %5511 = vmatpush1.bf16.msra.mxu1 %v21183_v58  ;;  %v21258_v58 = vld [vmem:[%s30062_s4 + $0xdc0] ss:$16 sps:$4 sm:$0xff]  }
 0x305   : > { %5512 = vmatprep.subr.bf16.mxu1 %v21191_v12  ;;  %v21266_v12 = vld [vmem:[%s30062_s4 + $0xda4] ss:$16 sps:$4 sm:$0xff]  }
 0x306   : > { %5560 = vmatpush1.bf16.msra.mxu0 %v21186_v19  ;;  %v21269_v19 = vld [vmem:[%s30062_s4 + $0xbe4] ss:$16 sps:$4 sm:$0xff]  }
 0x307   : > { %5561 = vmatprep.subr.bf16.mxu0 %v21194_v53  ;;  %v21267_v53 = vld [vmem:[%s30062_s4 + $0xbe0] ss:$16 sps:$4 sm:$0xff]  }
 0x308   : > { %5513 = vmatpush1.bf16.msra.mxu1 %v21189_v15  ;;  %v21264_v15 = vld [vmem:[%s30062_s4 + $0xda0] ss:$16 sps:$4 sm:$0xff]  }
 0x309   : > { %5514 = vmatprep.subr.bf16.mxu1 %v21197_v18  ;;  %v21272_v18 = vld [vmem:[%s30062_s4 + $0xd84] ss:$16 sps:$4 sm:$0xff]  }
 0x30a   : > { %5562 = vmatpush1.bf16.msra.mxu0 %v21192_v26  ;;  %v21275_v26 = vld [vmem:[%s30062_s4 + $0xbc4] ss:$16 sps:$4 sm:$0xff]  }
 0x30b   : > { %5563 = vmatprep.subr.bf16.mxu0 %v21200_v1  ;;  %v21273_v1 = vld [vmem:[%s30062_s4 + $0xbc0] ss:$16 sps:$4 sm:$0xff]  }
 0x30c   : > { %5515 = vmatpush1.bf16.msra.mxu1 %v21195_v57  ;;  %v21270_v57 = vld [vmem:[%s30062_s4 + $0xd80] ss:$16 sps:$4 sm:$0xff]  }
 0x30d   : > { %5516 = vmatprep.subr.bf16.mxu1 %v21203_v61  ;;  %v21278_v61 = vld [vmem:[%s30062_s4 + $0xd64] ss:$16 sps:$4 sm:$0xff]  }
 0x30e   : > { %5564 = vmatpush1.bf16.msra.mxu0 %v21198_v62  ;;  %v21281_v62 = vld [vmem:[%s30062_s4 + $0xba4] ss:$16 sps:$4 sm:$0xff]  }
 0x30f   : > { %5565 = vmatprep.subr.bf16.mxu0 %v21206_v54  ;;  %v21279_v54 = vld [vmem:[%s30062_s4 + $0xba0] ss:$16 sps:$4 sm:$0xff]  }
 0x310   : > { %5517 = vmatpush1.bf16.msra.mxu1 %v21201_v34  ;;  %v21276_v34 = vld [vmem:[%s30062_s4 + $0xd60] ss:$16 sps:$4 sm:$0xff]  }
 0x311   : > { %5518 = vmatprep.subr.bf16.mxu1 %v21209_v20  ;;  %v21284_v20 = vld [vmem:[%s30062_s4 + $0xd44] ss:$16 sps:$4 sm:$0xff]  }
 0x312   : > { %5566 = vmatpush2.bf16.msra.mxu0 %v21204_v49  ;;  %v21287_v49 = vld [vmem:[%s30062_s4 + $0xb84] ss:$16 sps:$4 sm:$0xff]  }
 0x313   : > { %5567 = vmatprep.subr.bf16.mxu0 %v21212_v63  ;;  %v21285_v63 = vld [vmem:[%s30062_s4 + $0xb80] ss:$16 sps:$4 sm:$0xff]  }
 0x314   : > { %5519 = vmatpush1.bf16.msra.mxu1 %v21207_v23  ;;  %v21282_v23 = vld [vmem:[%s30062_s4 + $0xd40] ss:$16 sps:$4 sm:$0xff]  }
 0x315   : > { %5520 = vmatprep.subr.bf16.mxu1 %v21215_v31  ;;  %v21290_v31 = vld [vmem:[%s30062_s4 + $0xd24] ss:$16 sps:$4 sm:$0xff]  }
 0x316   : > { %5568 = vmatpush2.bf16.msra.mxu0 %v21210_v28  ;;  %v21293_v28 = vld [vmem:[%s30062_s4 + $0xb64] ss:$16 sps:$4 sm:$0xff]  }
 0x317   : > { %5569 = vmatprep.subr.bf16.mxu0 %v21218_v27  ;;  %v21291_v27 = vld [vmem:[%s30062_s4 + $0xb60] ss:$16 sps:$4 sm:$0xff]  }
 0x318   : > { %5521 = vmatpush1.bf16.msra.mxu1 %v21213_v36  ;;  %v21288_v36 = vld [vmem:[%s30062_s4 + $0xd20] ss:$16 sps:$4 sm:$0xff]  }
 0x319   : > { %5522 = vmatprep.subr.bf16.mxu1 %v21221_v40  ;;  %v21296_v40 = vld [vmem:[%s30062_s4 + $0xd04] ss:$16 sps:$4 sm:$0xff]  }
 0x31a   : > { %5570 = vmatpush2.bf16.msra.mxu0 %v21216_v41  ;;  %v21299_v41 = vld [vmem:[%s30062_s4 + $0xb44] ss:$16 sps:$4 sm:$0xff]  }
 0x31b   : > { %5571 = vmatprep.subr.bf16.mxu0 %v21224_v3  ;;  %v21297_v3 = vld [vmem:[%s30062_s4 + $0xb40] ss:$16 sps:$4 sm:$0xff]  }
 0x31c   : > { %5523 = vmatpush2.bf16.msra.mxu1 %v21219_v39  ;;  %v21294_v39 = vld [vmem:[%s30062_s4 + $0xd00] ss:$16 sps:$4 sm:$0xff]  }
 0x31d   : > { %5524 = vmatprep.subr.bf16.mxu1 %v21227_v42  ;;  %v21302_v42 = vld [vmem:[%s30062_s4 + $0x7ec] ss:$16 sps:$4 sm:$0xff]  }
 0x31e   : > { %5572 = vmatpush2.bf16.msra.mxu0 %v21222_v2  ;;  %v21305_v2 = vld [vmem:[%s30062_s4 + $0xb24] ss:$16 sps:$4 sm:$0xff]  }
 0x31f   : > { %5573 = vmatprep.subr.bf16.mxu0 %v21230_v16  ;;  %v21303_v16 = vld [vmem:[%s30062_s4 + $0xb20] ss:$16 sps:$4 sm:$0xff]  }
 0x320   : > { %5525 = vmatpush2.bf16.msra.mxu1 %v21225_v0  ;;  %v21300_v0 = vld [vmem:[%s30062_s4 + $0x7e8] ss:$16 sps:$4 sm:$0xff]  }
 0x321   : > { %5526 = vmatprep.subr.bf16.mxu1 %v21233_v6  ;;  %v21308_v6 = vld [vmem:[%s30062_s4 + $0x7cc] ss:$16 sps:$4 sm:$0xff]  }
 0x322   : > { %5574 = vmatpush2.bf16.msra.mxu0 %v21228_v38  ;;  %v21311_v38 = vld [vmem:[%s30062_s4 + $0xb04] ss:$16 sps:$4 sm:$0xff]  }
 0x323   : > { %5575 = vmatprep.subr.bf16.mxu0 %v21236_v45  ;;  %v21309_v45 = vld [vmem:[%s30062_s4 + $0xb00] ss:$16 sps:$4 sm:$0xff]  }
 0x324   : > { %5527 = vmatpush2.bf16.msra.mxu1 %v21231_v50  ;;  %v21306_v50 = vld [vmem:[%s30062_s4 + $0x7c8] ss:$16 sps:$4 sm:$0xff]  }
 0x325   : > { %5528 = vmatprep.subr.bf16.mxu1 %v21239_v21  ;;  %v21314_v21 = vld [vmem:[%s30062_s4 + $0x7ac] ss:$16 sps:$4 sm:$0xff]  }
 0x326   : > { %5576 = vmatpush2.bf16.msra.mxu0 %v21234_v52  ;;  %v21317_v52 = vld [vmem:[%s30062_s4 + $0xce4] ss:$16 sps:$4 sm:$0xff]  }
 0x327   : > { %5577 = vmatprep.subr.bf16.mxu0 %v21242_v47  ;;  %v21315_v47 = vld [vmem:[%s30062_s4 + $0xce0] ss:$16 sps:$4 sm:$0xff]  }
 0x328   : > { %5529 = vmatpush2.bf16.msra.mxu1 %v21237_v10  ;;  %v21312_v10 = vld [vmem:[%s30062_s4 + $0x7a8] ss:$16 sps:$4 sm:$0xff]  }
 0x329   : > { %5530 = vmatprep.subr.bf16.mxu1 %v21245_v59  ;;  %v21323_v59 = vld [vmem:[%s30062_s4 + $0xcc4] ss:$16 sps:$4 sm:$0xff]  }
 0x32a   : > { %5578 = vmatpush2.bf16.msra.mxu0 %v21240_v25  ;;  %v21318_v25 = vld [vmem:[%s30062_s4 + $0x788] ss:$16 sps:$4 sm:$0xff]  }
 0x32b   : > { %5579 = vmatprep.subr.bf16.mxu0 %v21248_v7  ;;  %v21326_v7 = vld [vmem:[%s30062_s4 + $0x76c] ss:$16 sps:$4 sm:$0xff]  }
 0x32c   : > { %5531 = vmatpush2.bf16.msra.mxu1 %v21243_v44  ;;  %v21321_v44 = vld [vmem:[%s30062_s4 + $0xcc0] ss:$16 sps:$4 sm:$0xff]  }
 0x32d   : > { %5532 = vmatprep.subr.bf16.mxu1 %v21251_v46  ;;  %v21329_v46 = vld [vmem:[%s30062_s4 + $0xca4] ss:$16 sps:$4 sm:$0xff]  }
 0x32e   : > { %5580 = vmatpush2.bf16.msra.mxu0 %v21246_v29  ;;  %v21324_v29 = vld [vmem:[%s30062_s4 + $0x768] ss:$16 sps:$4 sm:$0xff]  }
 0x32f   : > { %5635 = vmatprep.subr.bf16.mxu0 %v21254_v43  ;;  %v21332_v43 = vld [vmem:[%s30062_s4 + $0x74c] ss:$16 sps:$4 sm:$0xff]  }
 0x330   : > { %5533 = vmatpush2.bf16.msra.mxu1 %v21249_v33  ;;  %v21327_v33 = vld [vmem:[%s30062_s4 + $0xca0] ss:$16 sps:$4 sm:$0xff]  }
 0x331   : > { %5534 = vmatprep.subr.bf16.mxu1 %v21257_v8  ;;  %5582 = vmatmul.mubr.bf16.vlgmr.msra.gmra.mxu0 %v24322_v22  ;;  %v21335_v8 = vld [vmem:[%s30062_s4 + $0xc84] ss:$16 sps:$4 sm:$0xff]  }
 0x332   : > { %5636 = vmatpush1.bf16.msra.mxu0 %v21252_v5  ;;  %5667 = vmatprep.mubr.bf16.mxu0 %v30109_v14  ;;  %v21330_v5 = vld [vmem:[%s30062_s4 + $0x748] ss:$16 sps:$4 sm:$0xff]  }
 0x333   : > { %5637 = vmatprep.subr.bf16.mxu0 %v21260_v51  ;;  %v21338_v51 = vld [vmem:[%s30062_s4 + $0x72c] ss:$16 sps:$4 sm:$0xff]  }
 0x334   : > { %5535 = vmatpush2.bf16.msra.mxu1 %v21255_v11  ;;  %v21333_v11 = vld [vmem:[%s30062_s4 + $0xc80] ss:$16 sps:$4 sm:$0xff]  }
 0x335   : > { %5536 = vmatprep.subr.bf16.mxu1 %v21263_v17  ;;  %v21341_v17 = vld [vmem:[%s30062_s4 + $0xc64] ss:$16 sps:$4 sm:$0xff]  }
 0x336   : > { %5638 = vmatpush1.bf16.msra.mxu0 %v21258_v58  ;;  %v21336_v58 = vld [vmem:[%s30062_s4 + $0x728] ss:$16 sps:$4 sm:$0xff]  }
 0x337   : > { %5639 = vmatprep.subr.bf16.mxu0 %v21266_v12  ;;  %v21344_v12 = vld [vmem:[%s30062_s4 + $0x70c] ss:$16 sps:$4 sm:$0xff]  }
 0x338   : > { %5537 = vmatpush2.bf16.msra.mxu1 %v21261_v55  ;;  %v21339_v55 = vld [vmem:[%s30062_s4 + $0xc60] ss:$16 sps:$4 sm:$0xff]  }
 0x339   : > { %5592 = vmatprep.subr.bf16.mxu1 %v21269_v19  ;;  %v21347_v19 = vld [vmem:[%s30062_s4 + $0xc44] ss:$16 sps:$4 sm:$0xff]  }
 0x33a   : > { %5640 = vmatpush1.bf16.msra.mxu0 %v21264_v15  ;;  %v21342_v15 = vld [vmem:[%s30062_s4 + $0x708] ss:$16 sps:$4 sm:$0xff]  }
 0x33b   : > { %5539 = vmatmul.mubr.bf16.vlgmr.msra.gmra.mxu1 %v24352_v4  ;;  %5641 = vmatprep.subr.bf16.mxu0 %v21272_v18  ;;  %v21350_v18 = vld [vmem:[%s30062_s4 + $0x8ec] ss:$16 sps:$4 sm:$0xff]  }
 0x33c   : > { %5593 = vmatpush1.bf16.msra.mxu1 %v21267_v53  ;;  %5624 = vmatprep.mubr.bf16.mxu1 %v24377_v9  ;;  %v21345_v53 = vld [vmem:[%s30062_s4 + $0xc40] ss:$16 sps:$4 sm:$0xff]  }
 0x33d   : > { %5594 = vmatprep.subr.bf16.mxu1 %v21275_v26  ;;  %v21353_v26 = vld [vmem:[%s30062_s4 + $0xc24] ss:$16 sps:$4 sm:$0xff]  }
 0x33e   : > { %5642 = vmatpush1.bf16.msra.mxu0 %v21270_v57  ;;  %v21348_v57 = vld [vmem:[%s30062_s4 + $0x8e8] ss:$16 sps:$4 sm:$0xff]  }
 0x33f   : > { %5643 = vmatprep.subr.bf16.mxu0 %v21278_v61  ;;  %v21356_v61 = vld [vmem:[%s30062_s4 + $0x8cc] ss:$16 sps:$4 sm:$0xff]  }
 0x340   : > { %5595 = vmatpush1.bf16.msra.mxu1 %v21273_v1  ;;  %v21351_v1 = vld [vmem:[%s30062_s4 + $0xc20] ss:$16 sps:$4 sm:$0xff]  }
 0x341   : > { %5596 = vmatprep.subr.bf16.mxu1 %v21281_v62  ;;  %v21359_v62 = vld [vmem:[%s30062_s4 + $0xc04] ss:$16 sps:$4 sm:$0xff]  }
 0x342   : > { %5644 = vmatpush1.bf16.msra.mxu0 %v21276_v34  ;;  %v21354_v34 = vld [vmem:[%s30062_s4 + $0x8c8] ss:$16 sps:$4 sm:$0xff]  }
 0x343   : > { %5645 = vmatprep.subr.bf16.mxu0 %v21284_v20  ;;  %v21362_v20 = vld [vmem:[%s30062_s4 + $0x8ac] ss:$16 sps:$4 sm:$0xff]  }
 0x344   : > { %5597 = vmatpush1.bf16.msra.mxu1 %v21279_v54  ;;  %v21357_v54 = vld [vmem:[%s30062_s4 + $0xc00] ss:$16 sps:$4 sm:$0xff]  }
 0x345   : > { %5598 = vmatprep.subr.bf16.mxu1 %v21287_v49  ;;  %v21365_v49 = vld [vmem:[%s30062_s4 + $0x9ec] ss:$16 sps:$4 sm:$0xff]  }
 0x346   : > { %5646 = vmatpush1.bf16.msra.mxu0 %v21282_v23  ;;  %v21360_v23 = vld [vmem:[%s30062_s4 + $0x8a8] ss:$16 sps:$4 sm:$0xff]  }
 0x347   : > { %5647 = vmatprep.subr.bf16.mxu0 %v21290_v31  ;;  %v21368_v31 = vld [vmem:[%s30062_s4 + $0x88c] ss:$16 sps:$4 sm:$0xff]  }
 0x348   : > { %5599 = vmatpush1.bf16.msra.mxu1 %v21285_v63  ;;  %v21363_v63 = vld [vmem:[%s30062_s4 + $0x9e8] ss:$16 sps:$4 sm:$0xff]  }
 0x349   : > { %5600 = vmatprep.subr.bf16.mxu1 %v21293_v28  ;;  %v21371_v28 = vld [vmem:[%s30062_s4 + $0x9cc] ss:$16 sps:$4 sm:$0xff]  }
 0x34a   : > { %5648 = vmatpush1.bf16.msra.mxu0 %v21288_v36  ;;  %v21366_v36 = vld [vmem:[%s30062_s4 + $0x888] ss:$16 sps:$4 sm:$0xff]  }
 0x34b   : > { %5649 = vmatprep.subr.bf16.mxu0 %v21296_v40  ;;  %v21374_v40 = vld [vmem:[%s30062_s4 + $0x86c] ss:$16 sps:$4 sm:$0xff]  }
 0x34c   : > { %5601 = vmatpush1.bf16.msra.mxu1 %v21291_v27  ;;  %v21369_v27 = vld [vmem:[%s30062_s4 + $0x9c8] ss:$16 sps:$4 sm:$0xff]  }
 0x34d   : > { %5602 = vmatprep.subr.bf16.mxu1 %v21299_v41  ;;  %v25259_v41 = vpop.f32.mrf.mxu0 }
 0x34e   : > { %5650 = vmatpush1.bf16.msra.mxu0 %v21294_v39  ;;  %v21377_v39 = vld [vmem:[%s30062_s4 + $0x9ac] ss:$16 sps:$4 sm:$0xff]  }
 0x34f   : > { %5678 = vmatprep.subr.bf16.mxu0 %v21302_v42  ;;  %v21375_v42 = vld [vmem:[%s30062_s4 + $0x9a8] ss:$16 sps:$4 sm:$0xff]  }
 0x350   : > { %5603 = vmatpush1.bf16.msra.mxu1 %v21297_v3  ;;  %v21372_v3 = vld [vmem:[%s30062_s4 + $0x868] ss:$16 sps:$4 sm:$0xff]  }
 0x351   : > { %5604 = vmatprep.subr.bf16.mxu1 %v21305_v2  ;;  %5668 = vmatmul.mubr.bf16.vlgmr.msra.gmra.mxu0 %v24432_v60  ;;  %v21380_v2 = vld [vmem:[%s30062_s4 + $0x84c] ss:$16 sps:$4 sm:$0xff]  }
 0x352   : > { %5679 = vmatpush1.bf16.msra.mxu0 %v21300_v0  ;;  %5710 = vmatprep.mubr.bf16.mxu0 %v24344_v32  ;;  %v21320_v32 = vld [vmem:[%s30062_s4 + $0x78c] ss:$16 sps:$4 sm:$0xff]   ;;  %v25275_v0 = vpop.f32.mrf.mxu0 }
 0x353   : > { %5680 = vmatprep.subr.bf16.mxu0 %v21308_v6  ;;  %v21378_v6 = vld [vmem:[%s30062_s4 + $0x848] ss:$16 sps:$4 sm:$0xff]  }
 0x354   : > { %5605 = vmatpush1.bf16.msra.mxu1 %v21303_v16  ;;  %v25277_v16 = vpop.f32.mrf.mxu1 }
 0x355   : > { %5606 = vmatprep.subr.bf16.mxu1 %v21311_v38  ;;  %v21381_v38 = vld [vmem:[%s30062_s4 + $0x988] ss:$16 sps:$4 sm:$0xff]  }
 0x356   : > { %5681 = vmatpush1.bf16.msra.mxu0 %v21306_v50  ;;  %v21386_v50 = vld [vmem:[%s30062_s4 + $0x82c] ss:$16 sps:$4 sm:$0xff]  }
 0x357   : > { %5682 = vmatprep.subr.bf16.mxu0 %v21314_v21  ;;  %v25293_v21 = vpop.f32.mrf.mxu1 }
 0x358   : > { %5607 = vmatpush1.bf16.msra.mxu1 %v21309_v45  ;;  %v25291_v45 = vpop.f32.mrf.mxu0 }
 0x359   : > { %5608 = vmatprep.subr.bf16.mxu1 %v21317_v52  ;;  %v21389_v52 = vld [vmem:[%s30062_s4 + $0x96c] ss:$16 sps:$4 sm:$0xff]  }
 0x35a   : > { %5683 = vmatpush1.bf16.msra.mxu0 %v21312_v10  ;;  %v21384_v10 = vld [vmem:[%s30062_s4 + $0x828] ss:$16 sps:$4 sm:$0xff]  }
 0x35b   : > { %5684 = vmatprep.subr.bf16.mxu0 %v21320_v32  ;;  %v21392_v32 = vld [vmem:[%s30062_s4 + $0x80c] ss:$16 sps:$4 sm:$0xff]  }
 0x35c   : > { %5609 = vmatpush2.bf16.msra.mxu1 %v21315_v47  ;;  %v21387_v47 = vld [vmem:[%s30062_s4 + $0x968] ss:$16 sps:$4 sm:$0xff]  }
 0x35d   : > { %5610 = vmatprep.subr.bf16.mxu1 %v21323_v59  ;;  %v25307_v59 = vpop.f32.mrf.mxu0 }
 0x35e   : > { %5685 = vmatpush1.bf16.msra.mxu0 %v21318_v25  ;;  %v25309_v25 = vpop.f32.mrf.mxu1 }
 0x35f   : > { %5686 = vmatprep.subr.bf16.mxu0 %v21326_v7  ;;  %v25314_v7 = vpop.f32.mrf.mxu0 }
 0x360   : > { %5611 = vmatpush2.bf16.msra.mxu1 %v21321_v44  ;;  %v21395_v44 = vld [vmem:[%s30062_s4 + $0x94c] ss:$16 sps:$4 sm:$0xff]  }
 0x361   : > { %5612 = vmatprep.subr.bf16.mxu1 %v21329_v46  ;;  %v21390_v46 = vld [vmem:[%s30062_s4 + $0x808] ss:$16 sps:$4 sm:$0xff]  }
 0x362   : > { %5687 = vmatpush1.bf16.msra.mxu0 %v21324_v29  ;;  %v21393_v29 = vld [vmem:[%s30062_s4 + $0x948] ss:$16 sps:$4 sm:$0xff]  }
 0x363   : > { %5688 = vmatprep.subr.bf16.mxu0 %v21332_v43  ;;  %v25325_v43 = vpop.f32.mrf.mxu1 }
 0x364   : > { %5613 = vmatpush2.bf16.msra.mxu1 %v21327_v33  ;;  %v21398_v33 = vld [vmem:[%s30062_s4 + $0xbec] ss:$16 sps:$4 sm:$0xff]  }
 0x365   : > { %5614 = vmatprep.subr.bf16.mxu1 %v21335_v8  ;;  %v21401_v8 = vld [vmem:[%s30062_s4 + $0x92c] ss:$16 sps:$4 sm:$0xff]  }
 0x366   : > { %5689 = vmatpush1.bf16.msra.mxu0 %v21330_v5  ;;  %v25330_v5 = vpop.f32.mrf.mxu0 }
 0x367   : > { %5690 = vmatprep.subr.bf16.mxu0 %v21338_v51  ;;  %v21396_v51 = vld [vmem:[%s30062_s4 + $0xbe8] ss:$16 sps:$4 sm:$0xff]  }
 0x368   : > { %5615 = vmatpush2.bf16.msra.mxu1 %v21333_v11  ;;  %v25332_v11 = vpop.f32.mrf.mxu1 }
 0x369   : > { %5616 = vmatprep.subr.bf16.mxu1 %v21341_v17  ;;  %v21399_v17 = vld [vmem:[%s30062_s4 + $0x928] ss:$16 sps:$4 sm:$0xff]  }
 0x36a   : > { %5691 = vmatpush1.bf16.msra.mxu0 %v21336_v58  ;;  %v21404_v58 = vld [vmem:[%s30062_s4 + $0xbcc] ss:$16 sps:$4 sm:$0xff]  }
 0x36b   : > { %5692 = vmatprep.subr.bf16.mxu0 %v21344_v12  ;;  %v25346_v12 = vpop.f32.mrf.mxu0 }
 0x36c   : > { %5617 = vmatpush2.bf16.msra.mxu1 %v21339_v55  ;;  %v21407_v55 = vld [vmem:[%s30062_s4 + $0x90c] ss:$16 sps:$4 sm:$0xff]  }
 0x36d   : > { %5618 = vmatprep.subr.bf16.mxu1 %v21347_v19  ;;  %v25348_v19 = vpop.f32.mrf.mxu1 }
 0x36e   : > { %5693 = vmatpush1.bf16.msra.mxu0 %v21342_v15  ;;  %v21402_v15 = vld [vmem:[%s30062_s4 + $0xbc8] ss:$16 sps:$4 sm:$0xff]  }
 0x36f   : > { %5694 = vmatprep.subr.bf16.mxu0 %v21350_v18  ;;  %v21410_v18 = vld [vmem:[%s30062_s4 + $0xbac] ss:$16 sps:$4 sm:$0xff]  }
 0x370   : > { %5619 = vmatpush2.bf16.msra.mxu1 %v21345_v53  ;;  %v21405_v53 = vld [vmem:[%s30062_s4 + $0x908] ss:$16 sps:$4 sm:$0xff]  }
 0x371   : > { %5620 = vmatprep.subr.bf16.mxu1 %v21353_v26  ;;  %v25361_v26 = vpop.f32.mrf.mxu0 }
 0x372   : > { %5695 = vmatpush2.bf16.msra.mxu0 %v21348_v57  ;;  %v25363_v57 = vpop.f32.mrf.mxu1 }
 0x373   : > { %5696 = vmatprep.subr.bf16.mxu0 %v21356_v61  ;;  %v21411_v61 = vld [vmem:[%s30062_s4 + $0xae8] ss:$16 sps:$4 sm:$0xff]  }
 0x374   : > { %5621 = vmatpush2.bf16.msra.mxu1 %v21351_v1  ;;  %v4023_v1 = vpop.f32.mrf.mxu0 }
 0x375   : > { %5622 = vmatprep.subr.bf16.mxu1 %v21359_v62  ;;  %v21416_v62 = vld [vmem:[%s30062_s4 + $0xb8c] ss:$16 sps:$4 sm:$0xff]  }
 0x376   : > { %5697 = vmatpush2.bf16.msra.mxu0 %v21354_v34  ;;  %v25377_v34 = vpop.f32.mrf.mxu1 }
 0x377   : > { %5698 = vmatprep.subr.bf16.mxu0 %v21362_v20  ;;  %v4025_v20 = vpop.f32.mrf.mxu0 }
 0x378   : > { %5623 = vmatpush2.bf16.msra.mxu1 %v21357_v54  ;;  %v21419_v54 = vld [vmem:[%s30062_s4 + $0xacc] ss:$16 sps:$4 sm:$0xff]  }
 0x379   : > { %5721 = vmatprep.subr.bf16.mxu1 %v21365_v49 }
 0x37a   : > { %5699 = vmatpush2.bf16.msra.mxu0 %v21360_v23  ;;  %v21414_v23 = vld [vmem:[%s30062_s4 + $0xb88] ss:$16 sps:$4 sm:$0xff]  }
 0x37b   : > { %5625 = vmatmul.mubr.bf16.vlgmr.msra.gmra.mxu1 %v24369_v56  ;;  %5700 = vmatprep.subr.bf16.mxu0 %v21368_v31  ;;  %v21417_v31 = vld [vmem:[%s30062_s4 + $0xac8] ss:$16 sps:$4 sm:$0xff]  }
 0x37c   : > { %5722 = vmatpush1.bf16.msra.mxu1 %v21363_v63  ;;  %5753 = vmatprep.mubr.bf16.mxu1 %v24317_v24  ;;  %v21383_v24 = vld [vmem:[%s30062_s4 + $0x98c] ss:$16 sps:$4 sm:$0xff]  }
 0x37d   : > { %5723 = vmatprep.subr.bf16.mxu1 %v21371_v28  ;;  %v21422_v28 = vld [vmem:[%s30062_s4 + $0xb6c] ss:$16 sps:$4 sm:$0xff]  }
 0x37e   : > { %5701 = vmatpush2.bf16.msra.mxu0 %v21366_v36 }
 0x37f   : > { %5702 = vmatprep.subr.bf16.mxu0 %v21374_v40 }
 0x380   : > { %5724 = vmatpush1.bf16.msra.mxu1 %v21369_v27  ;;  %v21425_v27 = vld [vmem:[%s30062_s4 + $0xaac] ss:$16 sps:$4 sm:$0xff]  }
 0x381   : > { %5725 = vmatprep.subr.bf16.mxu1 %v21377_v39  ;;  %v4027_v39 = vpop.f32.mrf.mxu0 }
 0x382   : > { %5703 = vmatpush2.bf16.msra.mxu0 %v21372_v3 }
 0x383   : > { %5704 = vmatprep.subr.bf16.mxu0 %v21380_v2 }
 0x384   : > { %5726 = vmatpush1.bf16.msra.mxu1 %v21375_v42  ;;  %v21420_v42 = vld [vmem:[%s30062_s4 + $0xb68] ss:$16 sps:$4 sm:$0xff]  }
 0x385   : > { %5727 = vmatprep.subr.bf16.mxu1 %v21383_v24  ;;  %v21423_v24 = vld [vmem:[%s30062_s4 + $0xaa8] ss:$16 sps:$4 sm:$0xff]  }
 0x386   : > { %5705 = vmatpush2.bf16.msra.mxu0 %v21378_v6  ;;  %v21428_v6 = vld [vmem:[%s30062_s4 + $0xb4c] ss:$16 sps:$4 sm:$0xff]  }
 0x387   : > { %5706 = vmatprep.subr.bf16.mxu0 %v21386_v50  ;;  %v21426_v50 = vld [vmem:[%s30062_s4 + $0xb48] ss:$16 sps:$4 sm:$0xff]  }
 0x388   : > { %5728 = vmatpush1.bf16.msra.mxu1 %v21381_v38  ;;  %v21431_v38 = vld [vmem:[%s30062_s4 + $0xa8c] ss:$16 sps:$4 sm:$0xff]  }
 0x389   : > { %5729 = vmatprep.subr.bf16.mxu1 %v21389_v52  ;;  %v21429_v52 = vld [vmem:[%s30062_s4 + $0xa88] ss:$16 sps:$4 sm:$0xff]  }
 0x38a   : > { %5707 = vmatpush2.bf16.msra.mxu0 %v21384_v10  ;;  %v21434_v10 = vld [vmem:[%s30062_s4 + $0xb2c] ss:$16 sps:$4 sm:$0xff]  }
 0x38b   : > { %5708 = vmatprep.subr.bf16.mxu0 %v21392_v32  ;;  %v21432_v32 = vld [vmem:[%s30062_s4 + $0xb28] ss:$16 sps:$4 sm:$0xff]  }
 0x38c   : > { %5730 = vmatpush1.bf16.msra.mxu1 %v21387_v47  ;;  %v21437_v47 = vld [vmem:[%s30062_s4 + $0xa6c] ss:$16 sps:$4 sm:$0xff]  }
 0x38d   : > { %5731 = vmatprep.subr.bf16.mxu1 %v21395_v44  ;;  %v21435_v44 = vld [vmem:[%s30062_s4 + $0xa68] ss:$16 sps:$4 sm:$0xff]  }
 0x38e   : > { %5709 = vmatpush2.bf16.msra.mxu0 %v21390_v46  ;;  %v21440_v46 = vld [vmem:[%s30062_s4 + $0xb0c] ss:$16 sps:$4 sm:$0xff]  }
 0x38f   : > { %5764 = vmatprep.subr.bf16.mxu0 %v21398_v33  ;;  %v21438_v33 = vld [vmem:[%s30062_s4 + $0xb08] ss:$16 sps:$4 sm:$0xff]  }
 0x390   : > { %5732 = vmatpush1.bf16.msra.mxu1 %v21393_v29  ;;  %v21443_v29 = vld [vmem:[%s30062_s4 + $0xa4c] ss:$16 sps:$4 sm:$0xff]  }
 0x391   : > { %5733 = vmatprep.subr.bf16.mxu1 %v21401_v8  ;;  %5711 = vmatmul.mubr.bf16.vlgmr.msra.gmra.mxu0 %v24352_v4  ;;  %v21413_v4 = vld [vmem:[%s30062_s4 + $0xaec] ss:$16 sps:$4 sm:$0xff]   ;;  %v21441_v8 = vld [vmem:[%s30062_s4 + $0xa48] ss:$16 sps:$4 sm:$0xff]  }
 0x392   : > { %5765 = vmatpush1.bf16.msra.mxu0 %v21396_v51  ;;  %5796 = vmatprep.mubr.bf16.mxu0 %v24377_v9  ;;  %v21408_v9 = vld [vmem:[%s30062_s4 + $0xba8] ss:$16 sps:$4 sm:$0xff]   ;;  %v21446_v51 = vld [vmem:[%s30062_s4 + $0xcec] ss:$16 sps:$4 sm:$0xff]  }
 0x393   : > { %5766 = vmatprep.subr.bf16.mxu0 %v21404_v58  ;;  %v21444_v58 = vld [vmem:[%s30062_s4 + $0xce8] ss:$16 sps:$4 sm:$0xff]  }
 0x394   : > { %5734 = vmatpush1.bf16.msra.mxu1 %v21399_v17  ;;  %v21449_v17 = vld [vmem:[%s30062_s4 + $0xa2c] ss:$16 sps:$4 sm:$0xff]  }
 0x395   : > { %5735 = vmatprep.subr.bf16.mxu1 %v21407_v55  ;;  %v25445_v55 = vpop.f32.mrf.mxu0 }
 0x396   : > { %5767 = vmatpush1.bf16.msra.mxu0 %v21402_v15  ;;  %v21447_v15 = vld [vmem:[%s30062_s4 + $0xa28] ss:$16 sps:$4 sm:$0xff]  }
 0x397   : > { %5768 = vmatprep.subr.bf16.mxu0 %v21410_v18  ;;  %v21455_v18 = vld [vmem:[%s30062_s4 + $0xa0c] ss:$16 sps:$4 sm:$0xff]  }
 0x398   : > { %5736 = vmatpush1.bf16.msra.mxu1 %v21405_v53  ;;  %v21452_v53 = vld [vmem:[%s30062_s4 + $0xccc] ss:$16 sps:$4 sm:$0xff]  }
 0x399   : > { %5737 = vmatprep.subr.bf16.mxu1 %v21413_v4 }
 0x39a   : > { %5769 = vmatpush1.bf16.msra.mxu0 %v21408_v9  ;;  %v21450_v9 = vld [vmem:[%s30062_s4 + $0xcc8] ss:$16 sps:$4 sm:$0xff]  }
 0x39b   : > { %v4066_v49 = vpop.f32.mrf.mxu1  ;;  %5770 = vmatprep.subr.bf16.mxu0 %v21416_v62  ;;  %v21453_v62 = vld [vmem:[%s30062_s4 + $0xa08] ss:$16 sps:$4 sm:$0xff]  }
 0x39c   : > { %v4067_v63 = vadd.f32 %v4066_v49, %v4023_v1  ;;  %5738 = vmatpush2.bf16.msra.mxu1 %v21411_v61  ;;  %v21461_v49 = vld [vmem:[%s30062_s4 + $0xdec] ss:$16 sps:$4 sm:$0xff]  }
 0x39d   : > { %v4068_v36 = vpop.f32.mrf.mxu1  ;;  %5739 = vmatprep.subr.bf16.mxu1 %v21419_v54  ;;  %v21458_v54 = vld [vmem:[%s30062_s4 + $0xcac] ss:$16 sps:$4 sm:$0xff]  }
 0x39e   : > { %v4069_v40 = vadd.f32 %v4068_v36, %v4025_v20  ;;  %5771 = vmatpush1.bf16.msra.mxu0 %v21414_v23  ;;  %v21464_v36 = vld [vmem:[%s30062_s4 + $0xc8c] ss:$16 sps:$4 sm:$0xff]  }
 0x39f   : > { %v4070_v3 = vpop.f32.mrf.mxu1  ;;  %5772 = vmatprep.subr.bf16.mxu0 %v21422_v28  ;;  %v21459_v28 = vld [vmem:[%s30062_s4 + $0xde8] ss:$16 sps:$4 sm:$0xff]  }
 0x3a0   : > { %v4071_v2 = vadd.f32 %v4070_v3, %v4027_v39  ;;  %5740 = vmatpush2.bf16.msra.mxu1 %v21417_v31  ;;  %v21456_v31 = vld [vmem:[%s30062_s4 + $0xca8] ss:$16 sps:$4 sm:$0xff]  }
 0x3a1   : > { %5741 = vmatprep.subr.bf16.mxu1 %v21425_v27  ;;  %v25477_v27 = vpop.f32.mrf.mxu1  ;;  %v21462_v3 = vld [vmem:[%s30062_s4 + $0xc88] ss:$16 sps:$4 sm:$0xff]  }
 0x3a2   : > { %5773 = vmatpush1.bf16.msra.mxu0 %v21420_v42 }
 0x3a3   : > { %5774 = vmatprep.subr.bf16.mxu0 %v21428_v6 }
 0x3a4   : > { %5742 = vmatpush2.bf16.msra.mxu1 %v21423_v24  ;;  %v21470_v24 = vld [vmem:[%s30062_s4 + $0xc6c] ss:$16 sps:$4 sm:$0xff]  }
 0x3a5   : > { %5743 = vmatprep.subr.bf16.mxu1 %v21431_v38 }
 0x3a6   : > { %5775 = vmatpush1.bf16.msra.mxu0 %v21426_v50 }
 0x3a7   : > { %5776 = vmatprep.subr.bf16.mxu0 %v21434_v10 }
 0x3a8   : > { %5744 = vmatpush2.bf16.msra.mxu1 %v21429_v52  ;;  %v21468_v52 = vld [vmem:[%s30062_s4 + $0xc68] ss:$16 sps:$4 sm:$0xff]  }
 0x3a9   : > { %5745 = vmatprep.subr.bf16.mxu1 %v21437_v47  ;;  %v21471_v47 = vld [vmem:[%s30062_s4 + $0xda8] ss:$16 sps:$4 sm:$0xff]  }
 0x3aa   : > { %5777 = vmatpush1.bf16.msra.mxu0 %v21432_v32  ;;  %v21476_v32 = vld [vmem:[%s30062_s4 + $0xc4c] ss:$16 sps:$4 sm:$0xff]  }
 0x3ab   : > { %5778 = vmatprep.subr.bf16.mxu0 %v21440_v46  ;;  %v21474_v46 = vld [vmem:[%s30062_s4 + $0xc48] ss:$16 sps:$4 sm:$0xff]  }
 0x3ac   : > { %5746 = vmatpush2.bf16.msra.mxu1 %v21435_v44  ;;  %v21479_v44 = vld [vmem:[%s30062_s4 + $0xd8c] ss:$16 sps:$4 sm:$0xff]  }
 0x3ad   : > { %5747 = vmatprep.subr.bf16.mxu1 %v21443_v29  ;;  %v21477_v29 = vld [vmem:[%s30062_s4 + $0xd88] ss:$16 sps:$4 sm:$0xff]  }
 0x3ae   : > { %5779 = vmatpush1.bf16.msra.mxu0 %v21438_v33  ;;  %v21482_v33 = vld [vmem:[%s30062_s4 + $0xc2c] ss:$16 sps:$4 sm:$0xff]  }
 0x3af   : > { %5780 = vmatprep.subr.bf16.mxu0 %v21446_v51  ;;  %v21480_v51 = vld [vmem:[%s30062_s4 + $0xc28] ss:$16 sps:$4 sm:$0xff]  }
 0x3b0   : > { %5748 = vmatpush2.bf16.msra.mxu1 %v21441_v8  ;;  %v21485_v8 = vld [vmem:[%s30062_s4 + $0xd6c] ss:$16 sps:$4 sm:$0xff]  }
 0x3b1   : > { %5749 = vmatprep.subr.bf16.mxu1 %v21449_v17  ;;  %v4109_v4 = vpop.f32.mrf.mxu0  ;;  %v21483_v17 = vld [vmem:[%s30062_s4 + $0xd68] ss:$16 sps:$4 sm:$0xff]  }
 0x3b2   : > { %v4110_v1 = vadd.f32 %v4109_v4, %v4067_v63  ;;  %5781 = vmatpush2.bf16.msra.mxu0 %v21444_v58  ;;  %v21488_v58 = vld [vmem:[%s30062_s4 + $0xc0c] ss:$16 sps:$4 sm:$0xff]  }
 0x3b3   : > { %v4111_v61 = vpop.f32.mrf.mxu0  ;;  %5782 = vmatprep.subr.bf16.mxu0 %v21452_v53  ;;  %v21486_v53 = vld [vmem:[%s30062_s4 + $0xc08] ss:$16 sps:$4 sm:$0xff]   ;;  %v21494_v4 = vld [vmem:[%s30062_s4 + $0xd2c] ss:$16 sps:$4 sm:$0xff]  }
 0x3b4   : > { %5750 = vmatpush2.bf16.msra.mxu1 %v21447_v15  ;;  %v4112_v20 = vadd.f32 %v4111_v61, %v4069_v40  ;;  %v21467_v40 = vld [vmem:[%s30062_s4 + $0xdcc] ss:$16 sps:$4 sm:$0xff]   ;;  %v21495_v61 = vld [vmem:[%s30062_s4 + $0xd08] ss:$16 sps:$4 sm:$0xff]  }
 0x3b5   : > { %5751 = vmatprep.subr.bf16.mxu1 %v21455_v18  ;;  %v4113_v23 = vpop.f32.mrf.mxu0  ;;  %v21491_v15 = vld [vmem:[%s30062_s4 + $0xd4c] ss:$16 sps:$4 sm:$0xff]   ;;  %v21489_v18 = vld [vmem:[%s30062_s4 + $0xd48] ss:$16 sps:$4 sm:$0xff]  }
 0x3b6   : > { %v4114_v63 = vadd.f32 %v4113_v23, %v4071_v2  ;;  %5783 = vmatpush2.bf16.msra.mxu0 %v21450_v9  ;;  %v21465_v2 = vld [vmem:[%s30062_s4 + $0xdc8] ss:$16 sps:$4 sm:$0xff]   ;;  %v21497_v9 = vld [vmem:[%s30062_s4 + $0xd0c] ss:$16 sps:$4 sm:$0xff]  }
 0x3b7   : > { %5784 = vmatprep.subr.bf16.mxu0 %v21458_v54 }
 0x3b8   : > { %5752 = vmatpush2.bf16.msra.mxu1 %v21453_v62  ;;  %v25560_v62 = vpop.f32.mrf.mxu0 }
 0x3b9   : > { %5807 = vmatprep.subr.bf16.mxu1 %v21461_v49 }
 0x3ba   : > { %5785 = vmatpush2.bf16.msra.mxu0 %v21456_v31 }
 0x3bb   : > { %v4152_v39 = vpop.f32.mrf.mxu1  ;;  %5754 = vmatmul.mubr.bf16.vlgmr.msra.gmra.mxu1 %v24322_v22  ;;  %5786 = vmatprep.subr.bf16.mxu0 %v21464_v36  ;;  %v21473_v22 = vld [vmem:[%s30062_s4 + $0xdac] ss:$16 sps:$4 sm:$0xff]  }
 0x3bc   : > { %v25486_v42 = vadd.f32 %v4152_v39, %v4110_v1  ;;  %5808 = vmatpush1.bf16.msra.mxu1 %v21459_v28  ;;  %5839 = vmatprep.mubr.bf16.mxu1 %v30109_v14  ;;  %v21492_v1 = vld [vmem:[%s30062_s4 + $0xd28] ss:$16 sps:$4 sm:$0xff]  }
 0x3bd   : > { %v4154_v6 = vpop.f32.mrf.mxu1  ;;  %5809 = vmatprep.subr.bf16.mxu1 %v21467_v40 }
 0x3be   : > { %v25498_v38 = vadd.f32 %v4154_v6, %v4112_v20  ;;  %5787 = vmatpush2.bf16.msra.mxu0 %v21462_v3  ;;  %v3895_v3 = vadd.f32 %v25259_v41, %v25277_v16 }
 0x3bf   : > { %v4156_v50 = vpop.f32.mrf.mxu1  ;;  %5788 = vmatprep.subr.bf16.mxu0 %v21470_v24  ;;  %v3899_v24 = vadd.f32 %v25291_v45, %v25309_v25 }
 0x3c0   : > { %v25503_v10 = vadd.f32 %v4156_v50, %v4114_v63  ;;  %5810 = vmatpush1.bf16.msra.mxu1 %v21465_v2  ;;  %v3897_v50 = vadd.f32 %v25275_v0, %v25293_v21 }
 0x3c1   : > { %5811 = vmatprep.subr.bf16.mxu1 %v21473_v22  ;;  %v25562_v20 = vpop.f32.mrf.mxu1 }
 0x3c2   : > { %5789 = vmatpush2.bf16.msra.mxu0 %v21468_v52  ;;  %v3938_v52 = vadd.f32 %v25332_v11, %v3895_v3  ;;  %v3940_v16 = vadd.f32 %v25348_v19, %v3897_v50  ;;  %v21520_v3 = vld [vmem:[%s30063_s5 + $0x65c] ss:$28 sps:$4 sm:$0xff]   ;;  %v21529_v50 = vld [vmem:[%s30063_s5 + $0x934] ss:$28 sps:$4 sm:$0xff]  }
 0x3c3   : > { %5790 = vmatprep.subr.bf16.mxu0 %v21476_v32  ;;  %v3901_v32 = vadd.f32 %v25307_v59, %v25325_v43 }
 0x3c4   : > { %5812 = vmatpush1.bf16.msra.mxu1 %v21471_v47  ;;  %v3981_v0 = vadd.f32 %v25314_v7, %v3938_v52  ;;  %v21527_v52 = vld [vmem:[%s30063_s5 + $0x930] ss:$28 sps:$4 sm:$0xff]  }
 0x3c5   : > { %5813 = vmatprep.subr.bf16.mxu1 %v21479_v44  ;;  %v3942_v44 = vadd.f32 %v25363_v57, %v3899_v24  ;;  %v3944_v45 = vadd.f32 %v25377_v34, %v3901_v32  ;;  %v3983_v57 = vadd.f32 %v25330_v5, %v3940_v16  ;;  %v25591_v5 = vld [vmem:[%s30067_s9] sm:$0x7f]   ;;  %v21530_v32 = vld [vmem:[%s30063_s5 + $0x8f8] ss:$28 sps:$4 sm:$0xff]  }
 0x3c6   : > { %5791 = vmatpush2.bf16.msra.mxu0 %v21474_v46  ;;  %v21521_v24 = vld [vmem:[%s30063_s5 + $0x620] ss:$28 sps:$4 sm:$0xff]   ;;  %v21536_v16 = vld [vmem:[%s30063_s5 + $0x888] ss:$28 sps:$4 sm:$0xff]  }
 0x3c7   : > { %5792 = vmatprep.subr.bf16.mxu0 %v21482_v33  ;;  %v3985_v11 = vadd.f32 %v25346_v12, %v3942_v44  ;;  %v3987_v19 = vadd.f32 %v25361_v26, %v3944_v45  ;;  %v21501_v12 = vld [vmem:[%s30063_s5 + $0x7ac] ss:$28 sps:$4 sm:$0xff]   ;;  %v21535_v44 = vld [vmem:[%s30063_s5 + $0x8c4] ss:$28 sps:$4 sm:$0xff]  }
 0x3c8   : > { %5814 = vmatpush1.bf16.msra.mxu1 %v21477_v29  ;;  %v25604_v26 = vld [vmem:[%s30067_s9 + $0x8] sm:$0x7f]  }
 0x3c9   : > { %5815 = vmatprep.subr.bf16.mxu1 %v21485_v8  ;;  %v21539_v45 = vld [vmem:[%s30063_s5 + $0x850] ss:$28 sps:$4 sm:$0xff]  }
 0x3ca   : > { %5793 = vmatpush2.bf16.msra.mxu0 %v21480_v51 }
 0x3cb   : > { %5794 = vmatprep.subr.bf16.mxu0 %v21488_v58 }
 0x3cc   : > { %5816 = vmatpush1.bf16.msra.mxu1 %v21483_v17 }
 0x3cd   : > { %5817 = vmatprep.subr.bf16.mxu1 %v21491_v15 }
 0x3ce   : > { %5795 = vmatpush2.bf16.msra.mxu0 %v21486_v53 }
 0x3d0   : > { %5818 = vmatpush1.bf16.msra.mxu1 %v21489_v18 }
 0x3d1   : > { %5819 = vmatprep.subr.bf16.mxu1 %v21494_v4  ;;  %5797 = vmatmul.mubr.bf16.vlgmr.msra.gmra.mxu0 %v24369_v56 }
 0x3d2   : > { %5961 = vmatprep.mubr.bf16.mxu0 %v30109_v14 }
 0x3d4   : > { %5820 = vmatpush1.bf16.msra.mxu1 %v21492_v1 }
 0x3d5   : > { %5821 = vmatprep.subr.bf16.mxu1 %v21497_v9 }
 0x3d8   : > { %5822 = vmatpush1.bf16.msra.mxu1 %v21495_v61  ;;  %v21499_v61 = vld [vmem:[%s30063_s5 + $0x7a8] ss:$28 sps:$4 sm:$0xff]  }
 0x3db   : > { %5840 = vmatmul.mubr.bf16.vlgmr.msra.gmra.mxu1 %v24432_v60 }
 0x3dc   : > { %5918 = vmatprep.mubr.bf16.mxu1 %v30109_v14 }
 0x3f1   : > { %v5583_v54 = vpop.f32.mrf.mxu0 }
 0x3f3   : > { %v5585_v49 = vpop.f32.mrf.mxu0 }
 0x3f5   : > { %v5587_v23 = vpop.f32.mrf.mxu0 }
 0x3f7   : > { %v5589_v31 = vpop.f32.mrf.mxu0 }
 0x3fb   : > { %v5540_v56 = vpop.f32.mrf.mxu1 }
 0x3fc   : > { %v5584_v39 = vadd.f32 %v5583_v54, %v5540_v56  ;;  %v21505_v54 = vld [vmem:[%s30063_s5 + $0x774] ss:$28 sps:$4 sm:$0xff]   ;;  %v21508_v56 = vld [vmem:[%s30063_s5 + $0x73c] ss:$28 sps:$4 sm:$0xff]  }
 0x3fd   : > { %v5542_v63 = vpop.f32.mrf.mxu1 }
 0x3fe   : > { %v5586_v6 = vadd.f32 %v5585_v49, %v5542_v63  ;;  %v21503_v49 = vld [vmem:[%s30063_s5 + $0x770] ss:$28 sps:$4 sm:$0xff]   ;;  %v21511_v63 = vld [vmem:[%s30063_s5 + $0x704] ss:$28 sps:$4 sm:$0xff]  }
 0x3ff   : > { %v5544_v28 = vpop.f32.mrf.mxu1 }
 0x400   : > { %v5588_v46 = vadd.f32 %v5587_v23, %v5544_v28  ;;  %v21506_v23 = vld [vmem:[%s30063_s5 + $0x738] ss:$28 sps:$4 sm:$0xff]   ;;  %v21514_v28 = vld [vmem:[%s30063_s5 + $0x6cc] ss:$28 sps:$4 sm:$0xff]  }
 0x401   : > { %v5546_v40 = vpop.f32.mrf.mxu1 }
 0x402   : > { %v5590_v25 = vadd.f32 %v5589_v31, %v5546_v40  ;;  %v21509_v31 = vld [vmem:[%s30063_s5 + $0x700] ss:$28 sps:$4 sm:$0xff]   ;;  %v21517_v40 = vld [vmem:[%s30063_s5 + $0x694] ss:$28 sps:$4 sm:$0xff]  }
 0x411   : > { %v5669_v36 = vpop.f32.mrf.mxu0 }
 0x413   : > { %v5671_v60 = vpop.f32.mrf.mxu0 }
 0x415   : > { %v5673_v29 = vpop.f32.mrf.mxu0 }
 0x417   : > { %v5675_v58 = vpop.f32.mrf.mxu0 }
 0x43b   : > { %v5626_v2 = vpop.f32.mrf.mxu1 }
 0x43c   : > { %v5627_v22 = vadd.f32 %v5626_v2, %v5584_v39  ;;  %v21515_v39 = vld [vmem:[%s30063_s5 + $0x690] ss:$28 sps:$4 sm:$0xff]   ;;  %v21523_v2 = vld [vmem:[%s30063_s5 + $0x624] ss:$28 sps:$4 sm:$0xff]  }
 0x43d   : > { %v5628_v47 = vpop.f32.mrf.mxu1 }
 0x43e   : > { %v5629_v41 = vadd.f32 %v5628_v47, %v5586_v6  ;;  %v5670_v8 = vadd.f32 %v5669_v36, %v5627_v22  ;;  %v21512_v36 = vld [vmem:[%s30063_s5 + $0x6c8] ss:$28 sps:$4 sm:$0xff]   ;;  %v21532_v47 = vld [vmem:[%s30063_s5 + $0x8fc] ss:$28 sps:$4 sm:$0xff]  }
 0x43f   : > { %v5630_v33 = vpop.f32.mrf.mxu1  ;;  %v21526_v6 = vld [vmem:[%s30063_s5 + $0x96c] ss:$28 sps:$4 sm:$0xff]  }
 0x440   : > { %v5631_v51 = vadd.f32 %v5630_v33, %v5588_v46  ;;  %v5672_v17 = vadd.f32 %v5671_v60, %v5629_v41  ;;  %v5850_v15 = vmax.f32 %v3981_v0, %v5670_v8  ;;  %v21518_v60 = vld [vmem:[%s30063_s5 + $0x658] ss:$28 sps:$4 sm:$0xff]   ;;  %v21524_v22 = vld [vmem:[%s30063_s5 + $0x968] ss:$28 sps:$4 sm:$0xff]   ;;  %v21533_v46 = vld [vmem:[%s30063_s5 + $0x8c0] ss:$28 sps:$4 sm:$0xff]  }
 0x441   : > { %v5632_v21 = vpop.f32.mrf.mxu1  ;;  %v21538_v41 = vld [vmem:[%s30063_s5 + $0x88c] ss:$28 sps:$4 sm:$0xff]   ;;  %v21541_v33 = vld [vmem:[%s30063_s5 + $0x854] ss:$28 sps:$4 sm:$0xff]   ;;  %v21544_v8 = vld [vmem:[%s30063_s5 + $0x81c] ss:$28 sps:$4 sm:$0xff]  }
 0x442   : > { %v5674_v59 = vadd.f32 %v5673_v29, %v5631_v51  ;;  %v5633_v43 = vadd.f32 %v5632_v21, %v5590_v25  ;;  %v5851_v34 = vmax.f32 %v3983_v57, %v5672_v17  ;;  %v21542_v51 = vld [vmem:[%s30063_s5 + $0x818] ss:$28 sps:$4 sm:$0xff]   ;;  %v21547_v21 = vld [vmem:[%s30063_s5 + $0x7e4] ss:$28 sps:$4 sm:$0xff]  }
 0x443   : > { %v21545_v17 = vld [vmem:[%s30063_s5 + $0x7e0] ss:$28 sps:$4 sm:$0xff]  }
 0x444   : > { %v5854_v53 = vmax.f32 %v3985_v11, %v5674_v59  ;;  %v5676_v18 = vadd.f32 %v5675_v58, %v5633_v43  ;;  %v21550_v43 = vld [vmem:[%s30063_s5 + $0xb34] ss:$28 sps:$4 sm:$0xff]  }
 0x446   : > { %v25580_v4 = vpack.c.bf16 %v5854_v53, %v5850_v15  ;;  %v5855_v1 = vmax.f32 %v3987_v19, %v5676_v18  ;;  %v21548_v19 = vld [vmem:[%s30063_s5 + $0xb30] ss:$28 sps:$4 sm:$0xff]   ;;  %v21553_v15 = vld [vmem:[%s30063_s5 + $0xafc] ss:$28 sps:$4 sm:$0xff]  }
 0x448   : > { %v25582_v9 = vpack.c.bf16 %v5855_v1, %v5851_v34  ;;  %v5875_v7 = vsel %vm1496_vm3, %v25580_v4, 0  ;;  %v21551_v34 = vld [vmem:[%s30063_s5 + $0xaf8] ss:$28 sps:$4 sm:$0xff]   ;;  %v21556_v1 = vld [vmem:[%s30063_s5 + $0xac4] ss:$28 sps:$4 sm:$0xff]  }
 0x44a   : > { %17950 = vmatprep.subr.msk.bf16.mxu1 %vm1496_vm3, %v25582_v9 }
 0x44b   : > { %5901 = vmatpush1.bf16.msra.mxu1 %v5875_v7 }
 0x44c   : > { %17957 = vmatprep.subr.msk.bf16.mxu1 %vm1496_vm3, %v25582_v9 }
 0x44e   : > { %17951 = vmatmul.mubr.msk.bf16.vlgmr.msra.gmra.mxu1 %vm5869_vm7, %v25591_v5 }
 0x44f   : > { %5998 = vmatpush1.bf16.msra.mxu1 %v5875_v7  ;;  %6015 = vmatprep.mubr.bf16.mxu1 %v30109_v14 }
 0x450   : > { %7533 = vmatprep.subr.bf16.mxu1 %v21501_v12 }
 0x451   : > { %v5712_v29 = vpop.f32.mrf.mxu0 }
 0x453   : > { %v5714_v25 = vpop.f32.mrf.mxu0 }
 0x455   : > { %v5716_v0 = vpop.f32.mrf.mxu0 }
 0x456   : > { %17958 = vmatmul.mubr.msk.bf16.vlgmr.msra.gmra.mxu1 %vm5869_vm7, %v25604_v26 }
 0x457   : > { %7534 = vmatpush1.bf16.msra.mxu1 %v21499_v61  ;;  %7565 = vmatprep.mubr.bf16.mxu1 %v25582_v9  ;;  %v5718_v59 = vpop.f32.mrf.mxu0 }
 0x458   : > { %7535 = vmatprep.subr.bf16.mxu1 %v21505_v54 }
 0x45b   : > { %7536 = vmatpush1.bf16.msra.mxu1 %v21503_v49  ;;  %v21554_v49 = vld [vmem:[%s30063_s5 + $0xac0] ss:$28 sps:$4 sm:$0xff]  }
 0x45c   : > { %7537 = vmatprep.subr.bf16.mxu1 %v21508_v56 }
 0x45f   : > { %7538 = vmatpush1.bf16.msra.mxu1 %v21506_v23 }
 0x460   : > { %7539 = vmatprep.subr.bf16.mxu1 %v21511_v63 }
 0x463   : > { %7540 = vmatpush1.bf16.msra.mxu1 %v21509_v31  ;;  %v21559_v31 = vld [vmem:[%s30063_s5 + $0xa8c] ss:$28 sps:$4 sm:$0xff]  }
 0x464   : > { %7541 = vmatprep.subr.bf16.mxu1 %v21514_v28  ;;  %v4073_v28 = vadd.f32 %v25477_v27, %v25445_v55  ;;  %v21562_v55 = vld [vmem:[%s30063_s5 + $0xa54] ss:$28 sps:$4 sm:$0xff]  }
 0x467   : > { %7542 = vmatpush1.bf16.msra.mxu1 %v21512_v36 }
 0x468   : > { %7543 = vmatprep.subr.bf16.mxu1 %v21517_v40 }
 0x46b   : > { %7544 = vmatpush1.bf16.msra.mxu1 %v21515_v39 }
 0x46c   : > { %7545 = vmatprep.subr.bf16.mxu1 %v21520_v3 }
 0x46f   : > { %7546 = vmatpush1.bf16.msra.mxu1 %v21518_v60 }
 0x470   : > { %7547 = vmatprep.subr.bf16.mxu1 %v21523_v2 }
 0x473   : > { %7548 = vmatpush1.bf16.msra.mxu1 %v21521_v24 }
 0x474   : > { %7549 = vmatprep.subr.bf16.mxu1 %v21526_v6  ;;  %v21557_v6 = vld [vmem:[%s30063_s5 + $0xa88] ss:$28 sps:$4 sm:$0xff]  }
 0x477   : > { %7550 = vmatpush2.bf16.msra.mxu1 %v21524_v22  ;;  %v4116_v22 = vadd.f32 %v25560_v62, %v4073_v28  ;;  %v21560_v62 = vld [vmem:[%s30063_s5 + $0xa50] ss:$28 sps:$4 sm:$0xff]  }
 0x478   : > { %7551 = vmatprep.subr.bf16.mxu1 %v21529_v50  ;;  %v21613_v28 = vld [vmem:[%s30063_s5 + $0x74c] ss:$28 sps:$4 sm:$0xff]  }
 0x47b   : > { %7552 = vmatpush2.bf16.msra.mxu1 %v21527_v52  ;;  %v5755_v11 = vpop.f32.mrf.mxu1 }
 0x47c   : > { %7553 = vmatprep.subr.bf16.mxu1 %v21532_v47  ;;  %v5756_v61 = vadd.f32 %v5755_v11, %v5712_v29  ;;  %v21580_v11 = vld [vmem:[%s30063_s5 + $0xaf4] ss:$28 sps:$4 sm:$0xff]  }
 0x47d   : > { %v5757_v57 = vpop.f32.mrf.mxu1 }
 0x47e   : > { %v5758_v56 = vadd.f32 %v5757_v57, %v5714_v25  ;;  %v21574_v25 = vld [vmem:[%s30063_s5 + $0xb2c] ss:$28 sps:$4 sm:$0xff]   ;;  %v21586_v57 = vld [vmem:[%s30063_s5 + $0xabc] ss:$28 sps:$4 sm:$0xff]  }
 0x47f   : > { %7554 = vmatpush2.bf16.msra.mxu1 %v21530_v32  ;;  %v5759_v53 = vpop.f32.mrf.mxu1  ;;  %v4159_v32 = vadd.f32 %v25562_v20, %v4116_v22  ;;  %v21565_v20 = vld [vmem:[%s30063_s5 + $0xa1c] ss:$28 sps:$4 sm:$0xff]   ;;  %v21620_v22 = vld [vmem:[%s30063_s5 + $0xc08] ss:$28 sps:$4 sm:$0xff]  }
 0x480   : > { %7555 = vmatprep.subr.bf16.mxu1 %v21535_v44  ;;  %v5760_v23 = vadd.f32 %v5759_v53, %v5716_v0  ;;  %v21569_v0 = vld [vmem:[%s30063_s5 + $0x9a8] ss:$28 sps:$4 sm:$0xff]   ;;  %v21587_v53 = vld [vmem:[%s30063_s5 + $0xba0] ss:$28 sps:$4 sm:$0xff]  }
 0x481   : > { %v5761_v7 = vpop.f32.mrf.mxu1 }
 0x482   : > { %v5762_v39 = vadd.f32 %v5761_v7, %v5718_v59  ;;  %v21583_v59 = vld [vmem:[%s30063_s5 + $0xbdc] ss:$28 sps:$4 sm:$0xff]   ;;  %v21593_v7 = vld [vmem:[%s30063_s5 + $0xb68] ss:$28 sps:$4 sm:$0xff]  }
 0x483   : > { %7556 = vmatpush2.bf16.msra.mxu1 %v21533_v46 }
 0x484   : > { %7557 = vmatprep.subr.bf16.mxu1 %v21538_v41 }
 0x487   : > { %7558 = vmatpush2.bf16.msra.mxu1 %v21536_v16 }
 0x488   : > { %7559 = vmatprep.subr.bf16.mxu1 %v21541_v33 }
 0x48b   : > { %7560 = vmatpush2.bf16.msra.mxu1 %v21539_v45  ;;  %v21568_v45 = vld [vmem:[%s30063_s5 + $0x9e4] ss:$28 sps:$4 sm:$0xff]  }
 0x48c   : > { %7561 = vmatprep.subr.bf16.mxu1 %v21544_v8  ;;  %v21566_v8 = vld [vmem:[%s30063_s5 + $0x9e0] ss:$28 sps:$4 sm:$0xff]  }
 0x48f   : > { %7562 = vmatpush2.bf16.msra.mxu1 %v21542_v51  ;;  %v21571_v51 = vld [vmem:[%s30063_s5 + $0x9ac] ss:$28 sps:$4 sm:$0xff]  }
 0x490   : > { %7563 = vmatprep.subr.bf16.mxu1 %v21547_v21  ;;  %v21577_v21 = vld [vmem:[%s30063_s5 + $0xc14] ss:$28 sps:$4 sm:$0xff]  }
 0x491   : > { %v5798_v58 = vpop.f32.mrf.mxu0 }
 0x492   : > { %v5799_v63 = vadd.f32 %v5798_v58, %v5756_v61  ;;  %v21589_v58 = vld [vmem:[%s30063_s5 + $0xba4] ss:$28 sps:$4 sm:$0xff]  }
 0x493   : > { %7564 = vmatpush2.bf16.msra.mxu1 %v21545_v17  ;;  %v5800_v18 = vpop.f32.mrf.mxu0  ;;  %v21575_v17 = vld [vmem:[%s30063_s5 + $0xc10] ss:$28 sps:$4 sm:$0xff]   ;;  %v21596_v61 = vld [vmem:[%s30063_s5 + $0xa48] ss:$28 sps:$4 sm:$0xff]  }
 0x494   : > { %7662 = vmatprep.subr.bf16.mxu1 %v21550_v43  ;;  %v5801_v3 = vadd.f32 %v5800_v18, %v5758_v56  ;;  %v21578_v43 = vld [vmem:[%s30063_s5 + $0xaf0] ss:$28 sps:$4 sm:$0xff]   ;;  %v21607_v56 = vld [vmem:[%s30063_s5 + $0x784] ss:$28 sps:$4 sm:$0xff]  }
 0x495   : > { %v5802_v12 = vpop.f32.mrf.mxu0  ;;  %v21595_v18 = vld [vmem:[%s30063_s5 + $0xb6c] ss:$28 sps:$4 sm:$0xff]  }
 0x496   : > { %7566 = vmatmul.mubr.bf16.vlgmr.msra.gmra.mxu1 %v25580_v4  ;;  %v5803_v60 = vadd.f32 %v5802_v12, %v5760_v23  ;;  %v21601_v12 = vld [vmem:[%s30063_s5 + $0x7bc] ss:$28 sps:$4 sm:$0xff]   ;;  %v21602_v23 = vld [vmem:[%s30063_s5 + $0xa10] ss:$28 sps:$4 sm:$0xff]  }
 0x497   : > { %7663 = vmatpush1.bf16.msra.mxu1 %v21548_v19  ;;  %v5804_v36 = vpop.f32.mrf.mxu0  ;;  %v21584_v19 = vld [vmem:[%s30063_s5 + $0xab8] ss:$28 sps:$4 sm:$0xff]  }
 0x498   : > { %7664 = vmatprep.subr.bf16.mxu1 %v21553_v15  ;;  %v5805_v50 = vadd.f32 %v5804_v36, %v5762_v39  ;;  %v21592_v15 = vld [vmem:[%s30063_s5 + $0xa84] ss:$28 sps:$4 sm:$0xff]   ;;  %v21608_v36 = vld [vmem:[%s30063_s5 + $0x9d8] ss:$28 sps:$4 sm:$0xff]  }
 0x499   : > { %v21611_v39 = vld [vmem:[%s30063_s5 + $0x748] ss:$28 sps:$4 sm:$0xff]  }
 0x49b   : > { %7665 = vmatpush1.bf16.msra.mxu1 %v21551_v34  ;;  %v5841_v54 = vpop.f32.mrf.mxu1  ;;  %v21590_v34 = vld [vmem:[%s30063_s5 + $0xa80] ss:$28 sps:$4 sm:$0xff]  }
 0x49c   : > { %7666 = vmatprep.subr.bf16.mxu1 %v21556_v1  ;;  %v5842_v2 = vadd.f32 %v5841_v54, %v5799_v63  ;;  %v21598_v1 = vld [vmem:[%s30063_s5 + $0xa4c] ss:$28 sps:$4 sm:$0xff]   ;;  %v21604_v54 = vld [vmem:[%s30063_s5 + $0xa14] ss:$28 sps:$4 sm:$0xff]   ;;  %v21610_v63 = vld [vmem:[%s30063_s5 + $0x9dc] ss:$28 sps:$4 sm:$0xff]  }
 0x49d   : > { %v5843_v40 = vpop.f32.mrf.mxu1 }
 0x49e   : > { %v5844_v52 = vadd.f32 %v5843_v40, %v5801_v3  ;;  %v5852_v44 = vmax.f32 %v25486_v42, %v5842_v2  ;;  %v21616_v40 = vld [vmem:[%s30063_s5 + $0x9a4] ss:$28 sps:$4 sm:$0xff]   ;;  %v21619_v3 = vld [vmem:[%s30063_s5 + $0x714] ss:$28 sps:$4 sm:$0xff]   ;;  %v21622_v2 = vld [vmem:[%s30063_s5 + $0xc0c] ss:$28 sps:$4 sm:$0xff]  }
 0x49f   : > { %7667 = vmatpush1.bf16.msra.mxu1 %v21554_v49  ;;  %v5845_v24 = vpop.f32.mrf.mxu1  ;;  %v21599_v49 = vld [vmem:[%s30063_s5 + $0x7b8] ss:$28 sps:$4 sm:$0xff]  }
 0x4a0   : > { %v5846_v47 = vadd.f32 %v5845_v24, %v5803_v60  ;;  %7668 = vmatprep.subr.bf16.mxu1 %v21559_v31  ;;  %v5853_v16 = vmax.f32 %v25498_v38, %v5844_v52  ;;  %v21605_v31 = vld [vmem:[%s30063_s5 + $0x780] ss:$28 sps:$4 sm:$0xff]   ;;  %v21617_v24 = vld [vmem:[%s30063_s5 + $0x710] ss:$28 sps:$4 sm:$0xff]   ;;  %v21623_v52 = vld [vmem:[%s30063_s5 + $0x6d8] ss:$28 sps:$4 sm:$0xff]  }
 0x4a1   : > { %v5847_v27 = vpop.f32.mrf.mxu1  ;;  %v21614_v60 = vld [vmem:[%s30063_s5 + $0x9a0] ss:$28 sps:$4 sm:$0xff]  }
 0x4a2   : > { %v5856_v46 = vmax.f32 %v25503_v10, %v5846_v47  ;;  %v5848_v41 = vadd.f32 %v5847_v27, %v5805_v50  ;;  %v21563_v10 = vld [vmem:[%s30063_s5 + $0xa18] ss:$28 sps:$4 sm:$0xff]   ;;  %v21631_v47 = vld [vmem:[%s30063_s5 + $0x6a4] ss:$28 sps:$4 sm:$0xff]  }
 0x4a3   : > { %7669 = vmatpush1.bf16.msra.mxu1 %v21557_v6  ;;  %v21625_v6 = vld [vmem:[%s30063_s5 + $0x6dc] ss:$28 sps:$4 sm:$0xff]   ;;  %v21628_v50 = vld [vmem:[%s30063_s5 + $0xbd4] ss:$28 sps:$4 sm:$0xff]  }
 0x4a4   : > { %v25740_v29 = vpack.c.bf16 %v5856_v46, %v5852_v44  ;;  %v5857_v33 = vmax.f32 %v4159_v32, %v5848_v41  ;;  %7670 = vmatprep.subr.bf16.mxu1 %v21562_v55  ;;  %v21626_v55 = vld [vmem:[%s30063_s5 + $0xbd0] ss:$28 sps:$4 sm:$0xff]   ;;  %v21634_v27 = vld [vmem:[%s30063_s5 + $0xb9c] ss:$28 sps:$4 sm:$0xff]   ;;  %v21640_v41 = vld [vmem:[%s30063_s5 + $0xb64] ss:$28 sps:$4 sm:$0xff]  }
 0x4a5   : > { %v21629_v32 = vld [vmem:[%s30063_s5 + $0x6a0] ss:$28 sps:$4 sm:$0xff]   ;;  %v21637_v44 = vld [vmem:[%s30063_s5 + $0x66c] ss:$28 sps:$4 sm:$0xff]   ;;  %v21632_v46 = vld [vmem:[%s30063_s5 + $0xb98] ss:$28 sps:$4 sm:$0xff]  }
 0x4a6   : > { %v25745_v42 = vpack.c.bf16 %v5857_v33, %v5853_v16  ;;  %v5881_v38 = vsel %vm1496_vm3, %v25740_v29, 0  ;;  %v21643_v16 = vld [vmem:[%s30063_s5 + $0x634] ss:$28 sps:$4 sm:$0xff]   ;;  %v21638_v33 = vld [vmem:[%s30063_s5 + $0xb60] ss:$28 sps:$4 sm:$0xff]  }
 0x4a7   : > { %7671 = vmatpush1.bf16.msra.mxu1 %v21560_v62  ;;  %v21635_v62 = vld [vmem:[%s30063_s5 + $0x668] ss:$28 sps:$4 sm:$0xff]  }
 0x4a8   : > { %17952 = vmatprep.subr.msk.bf16.mxu0 %vm1496_vm3, %v25745_v42  ;;  %18382 = vmatprep.mubr.msk.bf16.mxu1 %vm7530_vm8, %v25745_v42 }
 0x4a9   : > { %5944 = vmatpush1.bf16.msra.mxu0 %v5881_v38  ;;  %7672 = vmatprep.subr.bf16.mxu1 %v21565_v20  ;;  %v21646_v20 = vld [vmem:[%s30063_s5 + $0x7b4] ss:$28 sps:$4 sm:$0xff]  }
 0x4aa   : > { %17959 = vmatprep.subr.msk.bf16.mxu0 %vm1496_vm3, %v25745_v42 }
 0x4ab   : > { %7673 = vmatpush1.bf16.msra.mxu1 %v21563_v10  ;;  %v21641_v10 = vld [vmem:[%s30063_s5 + $0x630] ss:$28 sps:$4 sm:$0xff]  }
 0x4ac   : > { %17953 = vmatmul.mubr.msk.bf16.vlgmr.msra.gmra.mxu0 %vm5869_vm7, %v25591_v5  ;;  %7674 = vmatprep.subr.bf16.mxu1 %v21568_v45  ;;  %v21572_v5 = vld [vmem:[%s30063_s5 + $0xb28] ss:$28 sps:$4 sm:$0xff]   ;;  %v21644_v45 = vld [vmem:[%s30063_s5 + $0x7b0] ss:$28 sps:$4 sm:$0xff]  }
 0x4ad   : > { %6041 = vmatpush1.bf16.msra.mxu0 %v5881_v38  ;;  %6058 = vmatprep.mubr.bf16.mxu0 %v30109_v14  ;;  %v21649_v38 = vld [vmem:[%s30063_s5 + $0x97c] ss:$28 sps:$4 sm:$0xff]  }
 0x4ae   : > { %7576 = vmatprep.subr.bf16.mxu0 %v21574_v25  ;;  %v21652_v25 = vld [vmem:[%s30063_s5 + $0x77c] ss:$28 sps:$4 sm:$0xff]  }
 0x4af   : > { %7675 = vmatpush1.bf16.msra.mxu1 %v21566_v8  ;;  %v21647_v8 = vld [vmem:[%s30063_s5 + $0x978] ss:$28 sps:$4 sm:$0xff]  }
 0x4b0   : > { %7676 = vmatprep.subr.bf16.mxu1 %v21571_v51  ;;  %v21655_v51 = vld [vmem:[%s30063_s5 + $0x944] ss:$28 sps:$4 sm:$0xff]  }
 0x4b3   : > { %7677 = vmatpush1.bf16.msra.mxu1 %v21569_v0  ;;  %v21650_v0 = vld [vmem:[%s30063_s5 + $0x778] ss:$28 sps:$4 sm:$0xff]  }
 0x4b4   : > { %17960 = vmatmul.mubr.msk.bf16.vlgmr.msra.gmra.mxu0 %vm5869_vm7, %v25604_v26  ;;  %7686 = vmatprep.subr.bf16.mxu1 %v21577_v21  ;;  %v21581_v26 = vld [vmem:[%s30063_s5 + $0xbd8] ss:$28 sps:$4 sm:$0xff]   ;;  %v21658_v21 = vld [vmem:[%s30063_s5 + $0x744] ss:$28 sps:$4 sm:$0xff]  }
 0x4b5   : > { %7577 = vmatpush1.bf16.msra.mxu0 %v21572_v5  ;;  %18381 = vmatprep.mubr.msk.bf16.mxu0 %vm7530_vm8, %v25745_v42  ;;  %v21653_v5 = vld [vmem:[%s30063_s5 + $0x940] ss:$28 sps:$4 sm:$0xff]  }
 0x4b6   : > { %7578 = vmatprep.subr.bf16.mxu0 %v21580_v11  ;;  %v21661_v11 = vld [vmem:[%s30063_s5 + $0x90c] ss:$28 sps:$4 sm:$0xff]  }
 0x4b7   : > { %7687 = vmatpush2.bf16.msra.mxu1 %v21575_v17  ;;  %v21656_v17 = vld [vmem:[%s30063_s5 + $0x740] ss:$28 sps:$4 sm:$0xff]  }
 0x4b8   : > { %7688 = vmatprep.subr.bf16.mxu1 %v21583_v59  ;;  %v21664_v59 = vld [vmem:[%s30063_s5 + $0x70c] ss:$28 sps:$4 sm:$0xff]  }
 0x4b9   : > { %7579 = vmatpush1.bf16.msra.mxu0 %v21578_v43  ;;  %v21659_v43 = vld [vmem:[%s30063_s5 + $0x908] ss:$28 sps:$4 sm:$0xff]  }
 0x4ba   : > { %7580 = vmatprep.subr.bf16.mxu0 %v21586_v57  ;;  %v21667_v57 = vld [vmem:[%s30063_s5 + $0x8d4] ss:$28 sps:$4 sm:$0xff]  }
 0x4bb   : > { %7689 = vmatpush2.bf16.msra.mxu1 %v21581_v26  ;;  %v21662_v26 = vld [vmem:[%s30063_s5 + $0x708] ss:$28 sps:$4 sm:$0xff]  }
 0x4bc   : > { %7690 = vmatprep.subr.bf16.mxu1 %v21589_v58  ;;  %v21670_v58 = vld [vmem:[%s30063_s5 + $0x6d4] ss:$28 sps:$4 sm:$0xff]  }
 0x4bd   : > { %7581 = vmatpush1.bf16.msra.mxu0 %v21584_v19  ;;  %v21665_v19 = vld [vmem:[%s30063_s5 + $0x8d0] ss:$28 sps:$4 sm:$0xff]  }
 0x4be   : > { %7582 = vmatprep.subr.bf16.mxu0 %v21592_v15  ;;  %v21673_v15 = vld [vmem:[%s30063_s5 + $0x89c] ss:$28 sps:$4 sm:$0xff]  }
 0x4bf   : > { %7691 = vmatpush2.bf16.msra.mxu1 %v21587_v53  ;;  %v21668_v53 = vld [vmem:[%s30063_s5 + $0x6d0] ss:$28 sps:$4 sm:$0xff]  }
 0x4c0   : > { %7692 = vmatprep.subr.bf16.mxu1 %v21595_v18  ;;  %v21676_v18 = vld [vmem:[%s30063_s5 + $0x69c] ss:$28 sps:$4 sm:$0xff]  }
 0x4c1   : > { %7583 = vmatpush1.bf16.msra.mxu0 %v21590_v34  ;;  %v21671_v34 = vld [vmem:[%s30063_s5 + $0x898] ss:$28 sps:$4 sm:$0xff]  }
 0x4c2   : > { %7584 = vmatprep.subr.bf16.mxu0 %v21598_v1  ;;  %v21679_v1 = vld [vmem:[%s30063_s5 + $0x864] ss:$28 sps:$4 sm:$0xff]  }
 0x4c3   : > { %7693 = vmatpush2.bf16.msra.mxu1 %v21593_v7  ;;  %v21674_v7 = vld [vmem:[%s30063_s5 + $0x698] ss:$28 sps:$4 sm:$0xff]  }
 0x4c4   : > { %7705 = vmatprep.subr.bf16.mxu1 %v21601_v12  ;;  %v21682_v12 = vld [vmem:[%s30063_s5 + $0x664] ss:$28 sps:$4 sm:$0xff]  }
 0x4c5   : > { %7585 = vmatpush1.bf16.msra.mxu0 %v21596_v61  ;;  %v21677_v61 = vld [vmem:[%s30063_s5 + $0x860] ss:$28 sps:$4 sm:$0xff]  }
 0x4c6   : > { %7695 = vmatmul.mubr.bf16.vlgmr.msra.gmra.mxu1 %v25740_v29  ;;  %7586 = vmatprep.subr.bf16.mxu0 %v21604_v54  ;;  %v21685_v54 = vld [vmem:[%s30063_s5 + $0x82c] ss:$28 sps:$4 sm:$0xff]  }
 0x4c7   : > { %7706 = vmatpush1.bf16.msra.mxu1 %v21599_v49  ;;  %7737 = vmatprep.mubr.bf16.mxu1 %v25582_v9  ;;  %v21680_v49 = vld [vmem:[%s30063_s5 + $0x660] ss:$28 sps:$4 sm:$0xff]  }
 0x4c8   : > { %7707 = vmatprep.subr.bf16.mxu1 %v21607_v56  ;;  %v21688_v56 = vld [vmem:[%s30063_s5 + $0x62c] ss:$28 sps:$4 sm:$0xff]  }
 0x4c9   : > { %7587 = vmatpush1.bf16.msra.mxu0 %v21602_v23  ;;  %v21683_v23 = vld [vmem:[%s30063_s5 + $0x828] ss:$28 sps:$4 sm:$0xff]  }
 0x4ca   : > { %7588 = vmatprep.subr.bf16.mxu0 %v21610_v63  ;;  %v21691_v63 = vld [vmem:[%s30063_s5 + $0x7f4] ss:$28 sps:$4 sm:$0xff]  }
 0x4cb   : > { %7708 = vmatpush1.bf16.msra.mxu1 %v21605_v31  ;;  %v21686_v31 = vld [vmem:[%s30063_s5 + $0x628] ss:$28 sps:$4 sm:$0xff]  }
 0x4cc   : > { %7709 = vmatprep.subr.bf16.mxu1 %v21613_v28  ;;  %v21694_v28 = vld [vmem:[%s30063_s5 + $0x974] ss:$28 sps:$4 sm:$0xff]  }
 0x4cd   : > { %7589 = vmatpush1.bf16.msra.mxu0 %v21608_v36  ;;  %v21689_v36 = vld [vmem:[%s30063_s5 + $0x7f0] ss:$28 sps:$4 sm:$0xff]  }
 0x4ce   : > { %7590 = vmatprep.subr.bf16.mxu0 %v21616_v40  ;;  %v21692_v40 = vld [vmem:[%s30063_s5 + $0x970] ss:$28 sps:$4 sm:$0xff]  }
 0x4cf   : > { %7710 = vmatpush1.bf16.msra.mxu1 %v21611_v39  ;;  %v21698_v39 = vld [vmem:[%s30063_s5 + $0x93c] ss:$28 sps:$4 sm:$0xff]  }
 0x4d0   : > { %7711 = vmatprep.subr.bf16.mxu1 %v21619_v3  ;;  %v21695_v3 = vld [vmem:[%s30063_s5 + $0xb40] ss:$28 sps:$4 sm:$0xff]  }
 0x4d1   : > { %7591 = vmatpush1.bf16.msra.mxu0 %v21614_v60  ;;  %v21696_v60 = vld [vmem:[%s30063_s5 + $0x938] ss:$28 sps:$4 sm:$0xff]  }
 0x4d2   : > { %7600 = vmatprep.subr.bf16.mxu0 %v21622_v2  ;;  %v21702_v2 = vld [vmem:[%s30063_s5 + $0x904] ss:$28 sps:$4 sm:$0xff]  }
 0x4d3   : > { %7712 = vmatpush1.bf16.msra.mxu1 %v21617_v24  ;;  %v21699_v24 = vld [vmem:[%s30063_s5 + $0xb08] ss:$28 sps:$4 sm:$0xff]  }
 0x4d4   : > { %7713 = vmatprep.subr.bf16.mxu1 %v21625_v6  ;;  %v21700_v6 = vld [vmem:[%s30063_s5 + $0x900] ss:$28 sps:$4 sm:$0xff]  }
 0x4d5   : > { %7601 = vmatpush2.bf16.msra.mxu0 %v21620_v22  ;;  %v21706_v22 = vld [vmem:[%s30063_s5 + $0x8cc] ss:$28 sps:$4 sm:$0xff]  }
 0x4d6   : > { %7602 = vmatprep.subr.bf16.mxu0 %v21628_v50  ;;  %v21703_v50 = vld [vmem:[%s30063_s5 + $0xad0] ss:$28 sps:$4 sm:$0xff]  }
 0x4d7   : > { %7714 = vmatpush1.bf16.msra.mxu1 %v21623_v52  ;;  %v21704_v52 = vld [vmem:[%s30063_s5 + $0x8c8] ss:$28 sps:$4 sm:$0xff]  }
 0x4d8   : > { %7715 = vmatprep.subr.bf16.mxu1 %v21631_v47  ;;  %v21710_v47 = vld [vmem:[%s30063_s5 + $0x894] ss:$28 sps:$4 sm:$0xff]  }
 0x4d9   : > { %7603 = vmatpush2.bf16.msra.mxu0 %v21626_v55 }
 0x4da   : > { %7604 = vmatprep.subr.bf16.mxu0 %v21634_v27  ;;  %v21707_v27 = vld [vmem:[%s30063_s5 + $0xa98] ss:$28 sps:$4 sm:$0xff]  }
 0x4db   : > { %7716 = vmatpush1.bf16.msra.mxu1 %v21629_v32 }
 0x4dc   : > { %7717 = vmatprep.subr.bf16.mxu1 %v21637_v44  ;;  %v21708_v44 = vld [vmem:[%s30063_s5 + $0x890] ss:$28 sps:$4 sm:$0xff]  }
 0x4dd   : > { %7605 = vmatpush2.bf16.msra.mxu0 %v21632_v46  ;;  %v21714_v46 = vld [vmem:[%s30063_s5 + $0x85c] ss:$28 sps:$4 sm:$0xff]  }
 0x4de   : > { %7606 = vmatprep.subr.bf16.mxu0 %v21640_v41 }
 0x4df   : > { %7718 = vmatpush1.bf16.msra.mxu1 %v21635_v62  ;;  %v21711_v62 = vld [vmem:[%s30063_s5 + $0xa60] ss:$28 sps:$4 sm:$0xff]  }
 0x4e0   : > { %7719 = vmatprep.subr.bf16.mxu1 %v21643_v16 }
 0x4e1   : > { %7607 = vmatpush2.bf16.msra.mxu0 %v21638_v33 }
 0x4e2   : > { %7619 = vmatprep.subr.bf16.mxu0 %v21646_v20  ;;  %v21712_v20 = vld [vmem:[%s30063_s5 + $0x858] ss:$28 sps:$4 sm:$0xff]  }
 0x4e3   : > { %7720 = vmatpush1.bf16.msra.mxu1 %v21641_v10  ;;  %v21718_v10 = vld [vmem:[%s30063_s5 + $0x824] ss:$28 sps:$4 sm:$0xff]  }
 0x4e4   : > { %7609 = vmatmul.mubr.bf16.vlgmr.msra.gmra.mxu0 %v25740_v29  ;;  %7721 = vmatprep.subr.bf16.mxu1 %v21649_v38 }
 0x4e5   : > { %7620 = vmatpush1.bf16.msra.mxu0 %v21644_v45  ;;  %7651 = vmatprep.mubr.bf16.mxu0 %v25582_v9  ;;  %v21715_v45 = vld [vmem:[%s30063_s5 + $0xa28] ss:$28 sps:$4 sm:$0xff]  }
 0x4e6   : > { %7621 = vmatprep.subr.bf16.mxu0 %v21652_v25 }
 0x4e7   : > { %7722 = vmatpush2.bf16.msra.mxu1 %v21647_v8  ;;  %v21716_v8 = vld [vmem:[%s30063_s5 + $0x820] ss:$28 sps:$4 sm:$0xff]  }
 0x4e8   : > { %7723 = vmatprep.subr.bf16.mxu1 %v21655_v51  ;;  %v21722_v51 = vld [vmem:[%s30063_s5 + $0x7ec] ss:$28 sps:$4 sm:$0xff]  }
 0x4e9   : > { %7622 = vmatpush1.bf16.msra.mxu0 %v21650_v0 }
 0x4ea   : > { %7623 = vmatprep.subr.bf16.mxu0 %v21658_v21  ;;  %v21719_v21 = vld [vmem:[%s30063_s5 + $0x9f0] ss:$28 sps:$4 sm:$0xff]  }
 0x4eb   : > { %7724 = vmatpush2.bf16.msra.mxu1 %v21653_v5 }
 0x4ec   : > { %7725 = vmatprep.subr.bf16.mxu1 %v21661_v11  ;;  %v21720_v11 = vld [vmem:[%s30063_s5 + $0x7e8] ss:$28 sps:$4 sm:$0xff]  }
 0x4ed   : > { %7624 = vmatpush1.bf16.msra.mxu0 %v21656_v17  ;;  %v21726_v17 = vld [vmem:[%s30063_s5 + $0xb3c] ss:$28 sps:$4 sm:$0xff]  }
 0x4ee   : > { %7625 = vmatprep.subr.bf16.mxu0 %v21664_v59  ;;  %v21723_v59 = vld [vmem:[%s30063_s5 + $0x9b8] ss:$28 sps:$4 sm:$0xff]  }
 0x4ef   : > { %7726 = vmatpush2.bf16.msra.mxu1 %v21659_v43  ;;  %v21724_v43 = vld [vmem:[%s30063_s5 + $0xb38] ss:$28 sps:$4 sm:$0xff]  }
 0x4f0   : > { %7727 = vmatprep.subr.bf16.mxu1 %v21667_v57  ;;  %v21730_v57 = vld [vmem:[%s30063_s5 + $0xb04] ss:$28 sps:$4 sm:$0xff]  }
 0x4f1   : > { %7626 = vmatpush1.bf16.msra.mxu0 %v21662_v26  ;;  %v21727_v26 = vld [vmem:[%s30063_s5 + $0xc20] ss:$28 sps:$4 sm:$0xff]  }
 0x4f2   : > { %7627 = vmatprep.subr.bf16.mxu0 %v21670_v58  ;;  %v21728_v58 = vld [vmem:[%s30063_s5 + $0xb00] ss:$28 sps:$4 sm:$0xff]  }
 0x4f3   : > { %7728 = vmatpush2.bf16.msra.mxu1 %v21665_v19  ;;  %v21734_v19 = vld [vmem:[%s30063_s5 + $0xacc] ss:$28 sps:$4 sm:$0xff]  }
 0x4f4   : > { %7729 = vmatprep.subr.bf16.mxu1 %v21673_v15  ;;  %v21731_v15 = vld [vmem:[%s30063_s5 + $0xbe8] ss:$28 sps:$4 sm:$0xff]  }
 0x4f5   : > { %7628 = vmatpush1.bf16.msra.mxu0 %v21668_v53  ;;  %v21738_v53 = vld [vmem:[%s30063_s5 + $0xa94] ss:$28 sps:$4 sm:$0xff]  }
 0x4f6   : > { %7629 = vmatprep.subr.bf16.mxu0 %v21676_v18  ;;  %v21735_v18 = vld [vmem:[%s30063_s5 + $0xbb0] ss:$28 sps:$4 sm:$0xff]  }
 0x4f7   : > { %7730 = vmatpush2.bf16.msra.mxu1 %v21671_v34  ;;  %v21736_v34 = vld [vmem:[%s30063_s5 + $0xa90] ss:$28 sps:$4 sm:$0xff]  }
 0x4f8   : > { %7731 = vmatprep.subr.bf16.mxu1 %v21679_v1  ;;  %v21742_v1 = vld [vmem:[%s30063_s5 + $0xa5c] ss:$28 sps:$4 sm:$0xff]  }
 0x4f9   : > { %7630 = vmatpush1.bf16.msra.mxu0 %v21674_v7  ;;  %v21739_v7 = vld [vmem:[%s30063_s5 + $0xb78] ss:$28 sps:$4 sm:$0xff]  }
 0x4fa   : > { %7631 = vmatprep.subr.bf16.mxu0 %v21682_v12  ;;  %v21757_v12 = vld [vmem:[%s30063_s5 + $0x50c] ss:$28 sps:$4 sm:$0xff]  }
 0x4fb   : > { %7732 = vmatpush2.bf16.msra.mxu1 %v21677_v61  ;;  %v21740_v61 = vld [vmem:[%s30063_s5 + $0xa58] ss:$28 sps:$4 sm:$0xff]  }
 0x4fc   : > { %7733 = vmatprep.subr.bf16.mxu1 %v21685_v54  ;;  %v21745_v54 = vld [vmem:[%s30063_s5 + $0xa24] ss:$28 sps:$4 sm:$0xff]  }
 0x4fd   : > { %7632 = vmatpush1.bf16.msra.mxu0 %v21680_v49  ;;  %v21755_v49 = vld [vmem:[%s30063_s5 + $0x508] ss:$28 sps:$4 sm:$0xff]  }
 0x4fe   : > { %7633 = vmatprep.subr.bf16.mxu0 %v21688_v56  ;;  %v21763_v56 = vld [vmem:[%s30063_s5 + $0x4d4] ss:$28 sps:$4 sm:$0xff]  }
 0x4ff   : > { %7734 = vmatpush2.bf16.msra.mxu1 %v21683_v23  ;;  %v21743_v23 = vld [vmem:[%s30063_s5 + $0xa20] ss:$28 sps:$4 sm:$0xff]  }
 0x500   : > { %7735 = vmatprep.subr.bf16.mxu1 %v21691_v63  ;;  %v21748_v63 = vld [vmem:[%s30063_s5 + $0x9ec] ss:$28 sps:$4 sm:$0xff]  }
 0x501   : > { %7634 = vmatpush1.bf16.msra.mxu0 %v21686_v31  ;;  %v21761_v31 = vld [vmem:[%s30063_s5 + $0x4d0] ss:$28 sps:$4 sm:$0xff]  }
 0x502   : > { %7635 = vmatprep.subr.bf16.mxu0 %v21694_v28  ;;  %v21769_v28 = vld [vmem:[%s30063_s5 + $0x49c] ss:$28 sps:$4 sm:$0xff]  }
 0x503   : > { %7736 = vmatpush2.bf16.msra.mxu1 %v21689_v36  ;;  %v21746_v36 = vld [vmem:[%s30063_s5 + $0x9e8] ss:$28 sps:$4 sm:$0xff]  }
 0x504   : > { %7832 = vmatprep.subr.bf16.mxu1 %v30109_v14 }
 0x505   : > { %7636 = vmatpush2.bf16.msra.mxu0 %v21692_v40  ;;  %v21751_v40 = vld [vmem:[%s30063_s5 + $0x9b4] ss:$28 sps:$4 sm:$0xff]  }
 0x506   : > { %7738 = vmatmul.mubr.bf16.vlgmr.msra.gmra.mxu1 %v25580_v4  ;;  %7637 = vmatprep.subr.bf16.mxu0 %v21698_v39  ;;  %v21767_v39 = vld [vmem:[%s30063_s5 + $0x498] ss:$28 sps:$4 sm:$0xff]  }
 0x507   : > { %7833 = vmatpush1.bf16.msra.mxu1 %v21695_v3  ;;  %18384 = vmatprep.mubr.msk.bf16.mxu1 %vm7530_vm8, %v25745_v42  ;;  %v21775_v3 = vld [vmem:[%s30063_s5 + $0x464] ss:$28 sps:$4 sm:$0xff]  }
 0x508   : > { %7834 = vmatprep.subr.bf16.mxu1 %v30109_v14 }
 0x509   : > { %7638 = vmatpush2.bf16.msra.mxu0 %v21696_v60  ;;  %v21749_v60 = vld [vmem:[%s30063_s5 + $0x9b0] ss:$28 sps:$4 sm:$0xff]  }
 0x50a   : > { %7639 = vmatprep.subr.bf16.mxu0 %v21702_v2  ;;  %v21754_v2 = vld [vmem:[%s30063_s5 + $0xc1c] ss:$28 sps:$4 sm:$0xff]  }
 0x50b   : > { %7835 = vmatpush1.bf16.msra.mxu1 %v21699_v24  ;;  %v21773_v24 = vld [vmem:[%s30063_s5 + $0x460] ss:$28 sps:$4 sm:$0xff]  }
 0x50c   : > { %7836 = vmatprep.subr.bf16.mxu1 %v30109_v14 }
 0x50d   : > { %7640 = vmatpush2.bf16.msra.mxu0 %v21700_v6  ;;  %v21780_v6 = vld [vmem:[%s30063_s5 + $0x42c] ss:$28 sps:$4 sm:$0xff]  }
 0x50e   : > { %7641 = vmatprep.subr.bf16.mxu0 %v21706_v22  ;;  %v5920_v55 = vpop.f32.mrf.mxu1  ;;  %v21752_v22 = vld [vmem:[%s30063_s5 + $0xc18] ss:$28 sps:$4 sm:$0xff]  }
 0x50f   : > { %7837 = vmatpush1.bf16.msra.mxu1 %v21703_v50  ;;  %v21760_v50 = vld [vmem:[%s30063_s5 + $0xbe4] ss:$28 sps:$4 sm:$0xff]  }
 0x510   : > { %7838 = vmatprep.subr.bf16.mxu1 %v30109_v14  ;;  %v26067_v32 = vpop.f32.mrf.mxu1 }
 0x511   : > { %7642 = vmatpush2.bf16.msra.mxu0 %v21704_v52  ;;  %v21778_v52 = vld [vmem:[%s30063_s5 + $0x428] ss:$28 sps:$4 sm:$0xff]  }
 0x512   : > { %7643 = vmatprep.subr.bf16.mxu0 %v21710_v47  ;;  %v5924_v41 = vpop.f32.mrf.mxu1  ;;  %v21785_v47 = vld [vmem:[%s30063_s5 + $0x3f4] ss:$28 sps:$4 sm:$0xff]  }
 0x513   : > { %7839 = vmatpush1.bf16.msra.mxu1 %v21707_v27  ;;  %v26078_v16 = vpack.c.bf16 %v5924_v41, %v5920_v55  ;;  %v21758_v55 = vld [vmem:[%s30063_s5 + $0xbe0] ss:$28 sps:$4 sm:$0xff]   ;;  %v21766_v27 = vld [vmem:[%s30063_s5 + $0xbac] ss:$28 sps:$4 sm:$0xff]  }
 0x514   : > { %7840 = vmatprep.subr.bf16.mxu1 %v30109_v14  ;;  %v26081_v33 = vpop.f32.mrf.mxu1  ;;  %v21764_v41 = vld [vmem:[%s30063_s5 + $0xba8] ss:$28 sps:$4 sm:$0xff]  }
 0x515   : > { %7644 = vmatpush2.bf16.msra.mxu0 %v21708_v44  ;;  %v21783_v44 = vld [vmem:[%s30063_s5 + $0x3f0] ss:$28 sps:$4 sm:$0xff]  }
 0x516   : > { %7645 = vmatprep.subr.bf16.mxu0 %v21714_v46  ;;  %v6017_v38 = vpop.f32.mrf.mxu1  ;;  %v21790_v46 = vld [vmem:[%s30063_s5 + $0x3bc] ss:$28 sps:$4 sm:$0xff]  }
 0x517   : > { %7841 = vmatpush1.bf16.msra.mxu1 %v21711_v62  ;;  %v21772_v62 = vld [vmem:[%s30063_s5 + $0xb74] ss:$28 sps:$4 sm:$0xff]  }
 0x518   : > { %7842 = vmatprep.subr.bf16.mxu1 %v30109_v14  ;;  %v26093_v25 = vpop.f32.mrf.mxu1 }
 0x519   : > { %7646 = vmatpush2.bf16.msra.mxu0 %v21712_v20  ;;  %v21788_v20 = vld [vmem:[%s30063_s5 + $0x3b8] ss:$28 sps:$4 sm:$0xff]  }
 0x51a   : > { %7647 = vmatprep.subr.bf16.mxu0 %v21718_v10  ;;  %v6021_v0 = vpop.f32.mrf.mxu1  ;;  %v21795_v10 = vld [vmem:[%s30063_s5 + $0x384] ss:$28 sps:$4 sm:$0xff]  }
 0x51b   : > { %7843 = vmatpush1.bf16.msra.mxu1 %v21715_v45  ;;  %v26104_v5 = vpack.c.bf16 %v6021_v0, %v6017_v38  ;;  %v21770_v38 = vld [vmem:[%s30063_s5 + $0xb70] ss:$28 sps:$4 sm:$0xff]   ;;  %v21776_v45 = vld [vmem:[%s30063_s5 + $0x980] ss:$28 sps:$4 sm:$0xff]  }
 0x51c   : > { %7844 = vmatprep.subr.bf16.mxu1 %v30109_v14  ;;  %v21777_v0 = vld [vmem:[%s30063_s5 + $0x7c0] ss:$28 sps:$4 sm:$0xff]  }
 0x51d   : > { %7648 = vmatpush2.bf16.msra.mxu0 %v21716_v8  ;;  %v21793_v8 = vld [vmem:[%s30063_s5 + $0x380] ss:$28 sps:$4 sm:$0xff]  }
 0x51e   : > { %7649 = vmatprep.subr.bf16.mxu0 %v21722_v51  ;;  %v21800_v51 = vld [vmem:[%s30063_s5 + $0x5ec] ss:$28 sps:$4 sm:$0xff]  }
 0x51f   : > { %7845 = vmatpush1.bf16.msra.mxu1 %v21719_v21  ;;  %v21781_v21 = vld [vmem:[%s30063_s5 + $0x948] ss:$28 sps:$4 sm:$0xff]  }
 0x520   : > { %7846 = vmatprep.subr.bf16.mxu1 %v30109_v14 }
 0x521   : > { %7650 = vmatpush2.bf16.msra.mxu0 %v21720_v11  ;;  %v21798_v11 = vld [vmem:[%s30063_s5 + $0x5e8] ss:$28 sps:$4 sm:$0xff]  }
 0x522   : > { %7748 = vmatprep.subr.bf16.mxu0 %v21726_v17  ;;  %v21805_v17 = vld [vmem:[%s30063_s5 + $0x5b4] ss:$28 sps:$4 sm:$0xff]  }
 0x523   : > { %7847 = vmatpush1.bf16.msra.mxu1 %v21723_v59  ;;  %v21782_v59 = vld [vmem:[%s30063_s5 + $0x788] ss:$28 sps:$4 sm:$0xff]  }
 0x524   : > { %7652 = vmatmul.mubr.bf16.vlgmr.msra.gmra.mxu0 %v25580_v4  ;;  %7856 = vmatprep.subr.bf16.mxu1 %v30109_v14 }
 0x525   : > { %7749 = vmatpush1.bf16.msra.mxu0 %v21724_v43  ;;  %18383 = vmatprep.mubr.msk.bf16.mxu0 %vm7530_vm8, %v25745_v42  ;;  %v21732_v42 = vld [vmem:[%s30063_s5 + $0xac8] ss:$28 sps:$4 sm:$0xff]   ;;  %v21786_v43 = vld [vmem:[%s30063_s5 + $0x910] ss:$28 sps:$4 sm:$0xff]  }
 0x526   : > { %7750 = vmatprep.subr.bf16.mxu0 %v21730_v57  ;;  %v21810_v57 = vld [vmem:[%s30063_s5 + $0x57c] ss:$28 sps:$4 sm:$0xff]  }
 0x527   : > { %7857 = vmatpush2.bf16.msra.mxu1 %v21727_v26  ;;  %v21791_v26 = vld [vmem:[%s30063_s5 + $0x8d8] ss:$28 sps:$4 sm:$0xff]  }
 0x528   : > { %7858 = vmatprep.subr.bf16.mxu1 %v30109_v14 }
 0x529   : > { %7751 = vmatpush1.bf16.msra.mxu0 %v21728_v58  ;;  %v21808_v58 = vld [vmem:[%s30063_s5 + $0x578] ss:$28 sps:$4 sm:$0xff]  }
 0x52a   : > { %7752 = vmatprep.subr.bf16.mxu0 %v21734_v19  ;;  %v21815_v19 = vld [vmem:[%s30063_s5 + $0x544] ss:$28 sps:$4 sm:$0xff]  }
 0x52b   : > { %7859 = vmatpush2.bf16.msra.mxu1 %v21731_v15  ;;  %v21792_v15 = vld [vmem:[%s30063_s5 + $0x718] ss:$28 sps:$4 sm:$0xff]  }
 0x52c   : > { %7860 = vmatprep.subr.bf16.mxu1 %v30109_v14 }
 0x52d   : > { %7753 = vmatpush1.bf16.msra.mxu0 %v21732_v42  ;;  %v21796_v42 = vld [vmem:[%s30063_s5 + $0x8a0] ss:$28 sps:$4 sm:$0xff]  }
 0x52e   : > { %7754 = vmatprep.subr.bf16.mxu0 %v21738_v53  ;;  %v21813_v53 = vld [vmem:[%s30063_s5 + $0x540] ss:$28 sps:$4 sm:$0xff]  }
 0x52f   : > { %7861 = vmatpush2.bf16.msra.mxu1 %v21735_v18  ;;  %v21821_v18 = vld [vmem:[%s30063_s5 + $0x514] ss:$28 sps:$4 sm:$0xff]  }
 0x530   : > { %7862 = vmatprep.subr.bf16.mxu1 %v30109_v14 }
 0x531   : > { %7755 = vmatpush1.bf16.msra.mxu0 %v21736_v34  ;;  %v21797_v34 = vld [vmem:[%s30063_s5 + $0x6e0] ss:$28 sps:$4 sm:$0xff]  }
 0x532   : > { %7756 = vmatprep.subr.bf16.mxu0 %v21742_v1  ;;  %v21801_v1 = vld [vmem:[%s30063_s5 + $0x868] ss:$28 sps:$4 sm:$0xff]  }
 0x533   : > { %7863 = vmatpush2.bf16.msra.mxu1 %v21739_v7  ;;  %v21802_v7 = vld [vmem:[%s30063_s5 + $0x6a8] ss:$28 sps:$4 sm:$0xff]  }
 0x534   : > { %8927 = vmatprep.subr.bf16.mxu1 %v21757_v12  ;;  %v21806_v12 = vld [vmem:[%s30063_s5 + $0x830] ss:$28 sps:$4 sm:$0xff]  }
 0x535   : > { %7757 = vmatpush1.bf16.msra.mxu0 %v21740_v61  ;;  %v21807_v61 = vld [vmem:[%s30063_s5 + $0x670] ss:$28 sps:$4 sm:$0xff]  }
 0x536   : > { %7865 = vmatmul.mubr.bf16.vlgmr.msra.gmra.mxu1 %v25740_v29  ;;  %7758 = vmatprep.subr.bf16.mxu0 %v21745_v54  ;;  %v21811_v54 = vld [vmem:[%s30063_s5 + $0x7f8] ss:$28 sps:$4 sm:$0xff]  }
 0x537   : > { %8928 = vmatpush1.bf16.msra.mxu1 %v21755_v49 }
 0x538   : > { %8929 = vmatprep.subr.bf16.mxu1 %v21763_v56  ;;  %v21812_v56 = vld [vmem:[%s30063_s5 + $0x638] ss:$28 sps:$4 sm:$0xff]  }
 0x539   : > { %7759 = vmatpush1.bf16.msra.mxu0 %v21743_v23 }
 0x53a   : > { %7760 = vmatprep.subr.bf16.mxu0 %v21748_v63  ;;  %v21818_v63 = vld [vmem:[%s30063_s5 + $0x18c] ss:$28 sps:$4 sm:$0xff]  }
 0x53b   : > { %8930 = vmatpush1.bf16.msra.mxu1 %v21761_v31 }
 0x53c   : > { %8931 = vmatprep.subr.bf16.mxu1 %v21769_v28  ;;  %v21816_v28 = vld [vmem:[%s30063_s5 + $0x188] ss:$28 sps:$4 sm:$0xff]  }
 0x53d   : > { %7761 = vmatpush1.bf16.msra.mxu0 %v21746_v36 }
 0x53e   : > { %7762 = vmatprep.subr.bf16.mxu0 %v21751_v40  ;;  %v21824_v40 = vld [vmem:[%s30063_s5 + $0x154] ss:$28 sps:$4 sm:$0xff]  }
 0x53f   : > { %8932 = vmatpush1.bf16.msra.mxu1 %v21767_v39  ;;  %v26342_v39 = vpack.c.bf16 %v26081_v33, %v26067_v32  ;;  %v21827_v32 = vld [vmem:[%s30063_s5 + $0x4dc] ss:$28 sps:$4 sm:$0xff]  }
 0x540   : > { %8933 = vmatprep.subr.bf16.mxu1 %v21775_v3  ;;  %v21825_v33 = vld [vmem:[%s30063_s5 + $0x4d8] ss:$28 sps:$4 sm:$0xff]  }
 0x541   : > { %7763 = vmatpush1.bf16.msra.mxu0 %v21749_v60  ;;  %v21819_v60 = vld [vmem:[%s30063_s5 + $0x510] ss:$28 sps:$4 sm:$0xff]  }
 0x542   : > { %7772 = vmatprep.subr.bf16.mxu0 %v21754_v2 }
 0x543   : > { %8934 = vmatpush1.bf16.msra.mxu1 %v21773_v24  ;;  %v21822_v24 = vld [vmem:[%s30063_s5 + $0x150] ss:$28 sps:$4 sm:$0xff]  }
 0x544   : > { %8935 = vmatprep.subr.bf16.mxu1 %v21780_v6  ;;  %v21828_v6 = vld [vmem:[%s30063_s5 + $0x118] ss:$28 sps:$4 sm:$0xff]  }
 0x545   : > { %7773 = vmatpush2.bf16.msra.mxu0 %v21752_v22  ;;  %v21833_v22 = vld [vmem:[%s30063_s5 + $0x4a4] ss:$28 sps:$4 sm:$0xff]  }
 0x546   : > { %7774 = vmatprep.subr.bf16.mxu0 %v21760_v50  ;;  %v21836_v50 = vld [vmem:[%s30063_s5 + $0xe4] ss:$28 sps:$4 sm:$0xff]  }
 0x547   : > { %8936 = vmatpush1.bf16.msra.mxu1 %v21778_v52  ;;  %v21831_v52 = vld [vmem:[%s30063_s5 + $0x4a0] ss:$28 sps:$4 sm:$0xff]  }
 0x548   : > { %8937 = vmatprep.subr.bf16.mxu1 %v21785_v47  ;;  %v21834_v47 = vld [vmem:[%s30063_s5 + $0xe0] ss:$28 sps:$4 sm:$0xff]  }
 0x549   : > { %7775 = vmatpush2.bf16.msra.mxu0 %v21758_v55  ;;  %v21839_v55 = vld [vmem:[%s30063_s5 + $0x46c] ss:$28 sps:$4 sm:$0xff]  }
 0x54a   : > { %7776 = vmatprep.subr.bf16.mxu0 %v21766_v27  ;;  %v21842_v27 = vld [vmem:[%s30063_s5 + $0xac] ss:$28 sps:$4 sm:$0xff]  }
 0x54b   : > { %8938 = vmatpush1.bf16.msra.mxu1 %v21783_v44  ;;  %v21837_v44 = vld [vmem:[%s30063_s5 + $0x468] ss:$28 sps:$4 sm:$0xff]  }
 0x54c   : > { %8939 = vmatprep.subr.bf16.mxu1 %v21790_v46  ;;  %v21840_v46 = vld [vmem:[%s30063_s5 + $0xa8] ss:$28 sps:$4 sm:$0xff]  }
 0x54d   : > { %7777 = vmatpush2.bf16.msra.mxu0 %v21764_v41  ;;  %v21845_v41 = vld [vmem:[%s30063_s5 + $0x434] ss:$28 sps:$4 sm:$0xff]  }
 0x54e   : > { %7778 = vmatprep.subr.bf16.mxu0 %v21772_v62  ;;  %v21848_v62 = vld [vmem:[%s30063_s5 + $0x74] ss:$28 sps:$4 sm:$0xff]  }
 0x54f   : > { %8940 = vmatpush1.bf16.msra.mxu1 %v21788_v20  ;;  %v21843_v20 = vld [vmem:[%s30063_s5 + $0x430] ss:$28 sps:$4 sm:$0xff]  }
 0x550   : > { %8941 = vmatprep.subr.bf16.mxu1 %v21795_v10  ;;  %v21846_v10 = vld [vmem:[%s30063_s5 + $0x70] ss:$28 sps:$4 sm:$0xff]  }
 0x551   : > { %7779 = vmatpush2.bf16.msra.mxu0 %v21770_v38  ;;  %v21851_v38 = vld [vmem:[%s30063_s5 + $0x3fc] ss:$28 sps:$4 sm:$0xff]  }
 0x552   : > { %20277 = vmatprep.subr.bf16.mxu0 %v21776_v45  ;;  %v21854_v45 = vld [vmem:[%s30063_s5 + $0x3c] ss:$28 sps:$4 sm:$0xff]  }
 0x553   : > { %8942 = vmatpush1.bf16.msra.mxu1 %v21793_v8  ;;  %v21849_v8 = vld [vmem:[%s30063_s5 + $0x3f8] ss:$28 sps:$4 sm:$0xff]  }
 0x554   : > { %7781 = vmatmul.mubr.bf16.vlgmr.msra.gmra.mxu0 %v25740_v29  ;;  %8951 = vmatprep.subr.bf16.mxu1 %v21800_v51  ;;  %v21803_v29 = vld [vmem:[%s30063_s5 + $0x5b0] ss:$28 sps:$4 sm:$0xff]   ;;  %v21852_v51 = vld [vmem:[%s30063_s5 + $0x38] ss:$28 sps:$4 sm:$0xff]  }
 0x555   : > { %20278 = vmatpush3.bf16.msra.mxu0 %v21777_v0  ;;  %7823 = vmatprep.mubr.bf16.mxu0 %v25582_v9  ;;  %v21787_v9 = vld [vmem:[%s30063_s5 + $0x750] ss:$28 sps:$4 sm:$0xff]   ;;  %v21857_v0 = vld [vmem:[%s30063_s5 + $0x3c4] ss:$28 sps:$4 sm:$0xff]  }
 0x556   : > { %20279 = vmatprep.subr.bf16.mxu0 %v21781_v21  ;;  %v21860_v21 = vld [vmem:[%s30063_s5 + $0x4] ss:$28 sps:$4 sm:$0xff]  }
 0x557   : > { %8952 = vmatpush2.bf16.msra.mxu1 %v21798_v11  ;;  %v21855_v11 = vld [vmem:[%s30063_s5 + $0x3c0] ss:$28 sps:$4 sm:$0xff]  }
 0x558   : > { %8953 = vmatprep.subr.bf16.mxu1 %v21805_v17  ;;  %v21858_v17 = vld [vmem:[%s30063_s5] ss:$28 sps:$4 sm:$0xff]  }
 0x559   : > { %20280 = vmatpush3.bf16.msra.mxu0 %v21782_v59  ;;  %v21863_v59 = vld [vmem:[%s30063_s5 + $0x38c] ss:$28 sps:$4 sm:$0xff]  }
 0x55a   : > { %20281 = vmatprep.subr.bf16.mxu0 %v21786_v43  ;;  %v21866_v43 = vld [vmem:[%s30063_s5 + $0x34c] ss:$28 sps:$4 sm:$0xff]  }
 0x55b   : > { %8954 = vmatpush2.bf16.msra.mxu1 %v21803_v29  ;;  %v21861_v29 = vld [vmem:[%s30063_s5 + $0x388] ss:$28 sps:$4 sm:$0xff]  }
 0x55c   : > { %8955 = vmatprep.subr.bf16.mxu1 %v21810_v57  ;;  %v21864_v57 = vld [vmem:[%s30063_s5 + $0x348] ss:$28 sps:$4 sm:$0xff]  }
 0x55d   : > { %20282 = vmatpush3.bf16.msra.mxu0 %v21787_v9  ;;  %v21869_v9 = vld [vmem:[%s30063_s5 + $0x5f4] ss:$28 sps:$4 sm:$0xff]  }
 0x55e   : > { %20283 = vmatprep.subr.bf16.mxu0 %v21791_v26  ;;  %v21872_v26 = vld [vmem:[%s30063_s5 + $0x314] ss:$28 sps:$4 sm:$0xff]  }
 0x55f   : > { %8956 = vmatpush2.bf16.msra.mxu1 %v21808_v58  ;;  %v21867_v58 = vld [vmem:[%s30063_s5 + $0x5f0] ss:$28 sps:$4 sm:$0xff]  }
 0x560   : > { %8957 = vmatprep.subr.bf16.mxu1 %v21815_v19  ;;  %v21870_v19 = vld [vmem:[%s30063_s5 + $0x310] ss:$28 sps:$4 sm:$0xff]  }
 0x561   : > { %20284 = vmatpush3.bf16.msra.mxu0 %v21792_v15  ;;  %v21875_v15 = vld [vmem:[%s30063_s5 + $0x5bc] ss:$28 sps:$4 sm:$0xff]  }
 0x562   : > { %20285 = vmatprep.subr.bf16.mxu0 %v21796_v42  ;;  %v21878_v42 = vld [vmem:[%s30063_s5 + $0x2dc] ss:$28 sps:$4 sm:$0xff]  }
 0x563   : > { %8958 = vmatpush2.bf16.msra.mxu1 %v21813_v53  ;;  %v21873_v53 = vld [vmem:[%s30063_s5 + $0x5b8] ss:$28 sps:$4 sm:$0xff]  }
 0x564   : > { %9013 = vmatprep.subr.bf16.mxu1 %v21821_v18  ;;  %v21876_v18 = vld [vmem:[%s30063_s5 + $0x2d8] ss:$28 sps:$4 sm:$0xff]  }
 0x565   : > { %20286 = vmatpush3.bf16.msra.mxu0 %v21797_v34  ;;  %v21881_v34 = vld [vmem:[%s30063_s5 + $0x584] ss:$28 sps:$4 sm:$0xff]  }
 0x566   : > { %20287 = vmatprep.subr.bf16.mxu0 %v21801_v1  ;;  %v21884_v1 = vld [vmem:[%s30063_s5 + $0x2a4] ss:$28 sps:$4 sm:$0xff]  }
 0x569   : > { %20288 = vmatpush3.bf16.msra.mxu0 %v21802_v7  ;;  %v21879_v7 = vld [vmem:[%s30063_s5 + $0x580] ss:$28 sps:$4 sm:$0xff]  }
 0x56a   : > { %20289 = vmatprep.subr.bf16.mxu0 %v21806_v12  ;;  %v21882_v12 = vld [vmem:[%s30063_s5 + $0x2a0] ss:$28 sps:$4 sm:$0xff]  }
 0x56c   : > { %v5963_v49 = vpop.f32.mrf.mxu0 }
 0x56d   : > { %20290 = vmatpush3.bf16.msra.mxu0 %v21807_v61  ;;  %v21887_v61 = vld [vmem:[%s30063_s5 + $0x54c] ss:$28 sps:$4 sm:$0xff]  }
 0x56e   : > { %v5965_v23 = vpop.f32.mrf.mxu0  ;;  %20291 = vmatprep.subr.bf16.mxu0 %v21811_v54  ;;  %v21890_v54 = vld [vmem:[%s30063_s5 + $0x26c] ss:$28 sps:$4 sm:$0xff]  }
 0x570   : > { %v5967_v31 = vpop.f32.mrf.mxu0 }
 0x571   : > { %20292 = vmatpush3.bf16.msra.mxu0 %v21812_v56  ;;  %v26350_v2 = vpack.c.bf16 %v5967_v31, %v5963_v49  ;;  %v21885_v49 = vld [vmem:[%s30063_s5 + $0x548] ss:$28 sps:$4 sm:$0xff]   ;;  %v21891_v31 = vld [vmem:[%s30063_s5 + $0x198] ss:$28 sps:$4 sm:$0xff]  }
 0x572   : > { %v5969_v36 = vpop.f32.mrf.mxu0  ;;  %8884 = vmatprep.subr.bf16.mxu0 %v21818_v63  ;;  %v21888_v56 = vld [vmem:[%s30063_s5 + $0x268] ss:$28 sps:$4 sm:$0xff]   ;;  %v21896_v63 = vld [vmem:[%s30063_s5 + $0x234] ss:$28 sps:$4 sm:$0xff]  }
 0x573   : > { %v26344_v3 = vpack.c.bf16 %v5969_v36, %v5965_v23  ;;  %v21893_v23 = vld [vmem:[%s30063_s5 + $0x19c] ss:$28 sps:$4 sm:$0xff]   ;;  %v21899_v36 = vld [vmem:[%s30063_s5 + $0x164] ss:$28 sps:$4 sm:$0xff]  }
 0x574   : > { %7824 = vmatmul.mubr.bf16.vlgmr.msra.gmra.mxu0 %v25580_v4  ;;  %v21830_v4 = vld [vmem:[%s30063_s5 + $0x11c] ss:$28 sps:$4 sm:$0xff]  }
 0x575   : > { %8885 = vmatpush1.bf16.msra.mxu0 %v21816_v28  ;;  %8916 = vmatprep.mubr.bf16.mxu0 %v26342_v39  ;;  %v21894_v28 = vld [vmem:[%s30063_s5 + $0x230] ss:$28 sps:$4 sm:$0xff]  }
 0x576   : > { %18581 = vmatprep.mubr.msk.bf16.mxu1 %vm7530_vm8, %v26344_v3  ;;  %8886 = vmatprep.subr.bf16.mxu0 %v21824_v40  ;;  %v21902_v40 = vld [vmem:[%s30063_s5 + $0x1fc] ss:$28 sps:$4 sm:$0xff]  }
 0x577   : > { %8960 = vmatmul.mubr.bf16.vlgmr.msra.gmra.mxu1 %v26350_v2 }
 0x578   : > { %9014 = vmatpush1.bf16.msra.mxu1 %v21819_v60  ;;  %18582 = vmatprep.mubr.msk.bf16.mxu1 %vm7530_vm8, %v26344_v3  ;;  %v21897_v60 = vld [vmem:[%s30063_s5 + $0x160] ss:$28 sps:$4 sm:$0xff]  }
 0x579   : > { %8887 = vmatpush1.bf16.msra.mxu0 %v21822_v24  ;;  %9015 = vmatprep.subr.bf16.mxu1 %v21827_v32  ;;  %v21900_v24 = vld [vmem:[%s30063_s5 + $0x1f8] ss:$28 sps:$4 sm:$0xff]   ;;  %v21905_v32 = vld [vmem:[%s30063_s5 + $0x12c] ss:$28 sps:$4 sm:$0xff]  }
 0x57a   : > { %8888 = vmatprep.subr.bf16.mxu0 %v21830_v4  ;;  %v21908_v4 = vld [vmem:[%s30063_s5 + $0x1c4] ss:$28 sps:$4 sm:$0xff]  }
 0x57c   : > { %9016 = vmatpush1.bf16.msra.mxu1 %v21825_v33  ;;  %v21903_v33 = vld [vmem:[%s30063_s5 + $0x128] ss:$28 sps:$4 sm:$0xff]  }
 0x57d   : > { %8889 = vmatpush1.bf16.msra.mxu0 %v21828_v6  ;;  %9017 = vmatprep.subr.bf16.mxu1 %v21833_v22  ;;  %v21906_v6 = vld [vmem:[%s30063_s5 + $0x1c0] ss:$28 sps:$4 sm:$0xff]   ;;  %v21911_v22 = vld [vmem:[%s30063_s5 + $0xf4] ss:$28 sps:$4 sm:$0xff]  }
 0x57e   : > { %8890 = vmatprep.subr.bf16.mxu0 %v21836_v50  ;;  %v21914_v50 = vld [vmem:[%s30063_s5 + $0x194] ss:$28 sps:$4 sm:$0xff]  }
 0x580   : > { %9018 = vmatpush1.bf16.msra.mxu1 %v21831_v52  ;;  %v21909_v52 = vld [vmem:[%s30063_s5 + $0xf0] ss:$28 sps:$4 sm:$0xff]  }
 0x581   : > { %8891 = vmatpush1.bf16.msra.mxu0 %v21834_v47  ;;  %9019 = vmatprep.subr.bf16.mxu1 %v21839_v55  ;;  %v21912_v47 = vld [vmem:[%s30063_s5 + $0x190] ss:$28 sps:$4 sm:$0xff]   ;;  %v21917_v55 = vld [vmem:[%s30063_s5 + $0xbc] ss:$28 sps:$4 sm:$0xff]  }
 0x582   : > { %8892 = vmatprep.subr.bf16.mxu0 %v21842_v27  ;;  %v21920_v27 = vld [vmem:[%s30063_s5 + $0x15c] ss:$28 sps:$4 sm:$0xff]  }
 0x584   : > { %9020 = vmatpush1.bf16.msra.mxu1 %v21837_v44  ;;  %v21915_v44 = vld [vmem:[%s30063_s5 + $0xb8] ss:$28 sps:$4 sm:$0xff]  }
 0x585   : > { %8893 = vmatpush1.bf16.msra.mxu0 %v21840_v46  ;;  %9021 = vmatprep.subr.bf16.mxu1 %v21845_v41  ;;  %v21918_v46 = vld [vmem:[%s30063_s5 + $0x158] ss:$28 sps:$4 sm:$0xff]   ;;  %v21923_v41 = vld [vmem:[%s30063_s5 + $0x84] ss:$28 sps:$4 sm:$0xff]  }
 0x586   : > { %8894 = vmatprep.subr.bf16.mxu0 %v21848_v62  ;;  %v21926_v62 = vld [vmem:[%s30063_s5 + $0x124] ss:$28 sps:$4 sm:$0xff]  }
 0x588   : > { %9022 = vmatpush1.bf16.msra.mxu1 %v21843_v20  ;;  %v21921_v20 = vld [vmem:[%s30063_s5 + $0x80] ss:$28 sps:$4 sm:$0xff]  }
 0x589   : > { %8895 = vmatpush1.bf16.msra.mxu0 %v21846_v10  ;;  %9023 = vmatprep.subr.bf16.mxu1 %v21851_v38  ;;  %v21924_v10 = vld [vmem:[%s30063_s5 + $0x120] ss:$28 sps:$4 sm:$0xff]   ;;  %v21929_v38 = vld [vmem:[%s30063_s5 + $0x4c] ss:$28 sps:$4 sm:$0xff]  }
 0x58a   : > { %8896 = vmatprep.subr.bf16.mxu0 %v21854_v45  ;;  %v21932_v45 = vld [vmem:[%s30063_s5 + $0xec] ss:$28 sps:$4 sm:$0xff]  }
 0x58c   : > { %9024 = vmatpush1.bf16.msra.mxu1 %v21849_v8  ;;  %v21927_v8 = vld [vmem:[%s30063_s5 + $0x48] ss:$28 sps:$4 sm:$0xff]  }
 0x58d   : > { %8897 = vmatpush1.bf16.msra.mxu0 %v21852_v51  ;;  %9025 = vmatprep.subr.bf16.mxu1 %v21857_v0  ;;  %v21930_v51 = vld [vmem:[%s30063_s5 + $0xe8] ss:$28 sps:$4 sm:$0xff]   ;;  %v21935_v0 = vld [vmem:[%s30063_s5 + $0x14] ss:$28 sps:$4 sm:$0xff]  }
 0x58e   : > { %8898 = vmatprep.subr.bf16.mxu0 %v21860_v21  ;;  %v21938_v21 = vld [vmem:[%s30063_s5 + $0xb4] ss:$28 sps:$4 sm:$0xff]  }
 0x590   : > { %9026 = vmatpush1.bf16.msra.mxu1 %v21855_v11  ;;  %v21933_v11 = vld [vmem:[%s30063_s5 + $0x10] ss:$28 sps:$4 sm:$0xff]  }
 0x591   : > { %8899 = vmatpush1.bf16.msra.mxu0 %v21858_v17  ;;  %9027 = vmatprep.subr.bf16.mxu1 %v21863_v59  ;;  %v21936_v17 = vld [vmem:[%s30063_s5 + $0xb0] ss:$28 sps:$4 sm:$0xff]   ;;  %v21941_v59 = vld [vmem:[%s30063_s5 + $0x35c] ss:$28 sps:$4 sm:$0xff]  }
 0x592   : > { %8900 = vmatprep.subr.bf16.mxu0 %v21866_v43  ;;  %v21944_v43 = vld [vmem:[%s30063_s5 + $0x7c] ss:$28 sps:$4 sm:$0xff]  }
 0x594   : > { %9028 = vmatpush1.bf16.msra.mxu1 %v21861_v29  ;;  %v21939_v29 = vld [vmem:[%s30063_s5 + $0x358] ss:$28 sps:$4 sm:$0xff]  }
 0x595   : > { %8901 = vmatpush2.bf16.msra.mxu0 %v21864_v57  ;;  %9037 = vmatprep.subr.bf16.mxu1 %v21869_v9  ;;  %v21942_v57 = vld [vmem:[%s30063_s5 + $0x78] ss:$28 sps:$4 sm:$0xff]   ;;  %v21947_v9 = vld [vmem:[%s30063_s5 + $0x324] ss:$28 sps:$4 sm:$0xff]  }
 0x596   : > { %8902 = vmatprep.subr.bf16.mxu0 %v21872_v26  ;;  %v21950_v26 = vld [vmem:[%s30063_s5 + $0x44] ss:$28 sps:$4 sm:$0xff]  }
 0x598   : > { %9038 = vmatpush2.bf16.msra.mxu1 %v21867_v58  ;;  %v26611_v58 = vpop.f32.mrf.mxu1 }
 0x599   : > { %8903 = vmatpush2.bf16.msra.mxu0 %v21870_v19  ;;  %9039 = vmatprep.subr.bf16.mxu1 %v21875_v15  ;;  %v21945_v19 = vld [vmem:[%s30063_s5 + $0x320] ss:$28 sps:$4 sm:$0xff]  }
 0x59a   : > { %8904 = vmatprep.subr.bf16.mxu0 %v21878_v42  ;;  %v21948_v15 = vld [vmem:[%s30063_s5 + $0x40] ss:$28 sps:$4 sm:$0xff]   ;;  %v21953_v42 = vld [vmem:[%s30063_s5 + $0x2ec] ss:$28 sps:$4 sm:$0xff]  }
 0x59c   : > { %9040 = vmatpush2.bf16.msra.mxu1 %v21873_v53  ;;  %v21956_v53 = vld [vmem:[%s30063_s5 + $0xc] ss:$28 sps:$4 sm:$0xff]  }
 0x59d   : > { %8905 = vmatpush2.bf16.msra.mxu0 %v21876_v18  ;;  %9041 = vmatprep.subr.bf16.mxu1 %v21881_v34  ;;  %v26625_v18 = vpop.f32.mrf.mxu1  ;;  %v21951_v34 = vld [vmem:[%s30063_s5 + $0x2e8] ss:$28 sps:$4 sm:$0xff]  }
 0x59e   : > { %8906 = vmatprep.subr.bf16.mxu0 %v21884_v1  ;;  %v21954_v1 = vld [vmem:[%s30063_s5 + $0x8] ss:$28 sps:$4 sm:$0xff]  }
 0x5a0   : > { %9042 = vmatpush2.bf16.msra.mxu1 %v21879_v7  ;;  %v21959_v7 = vld [vmem:[%s30063_s5 + $0x2b4] ss:$28 sps:$4 sm:$0xff]  }
 0x5a1   : > { %8907 = vmatpush2.bf16.msra.mxu0 %v21882_v12  ;;  %9043 = vmatprep.subr.bf16.mxu1 %v21887_v61  ;;  %v21962_v12 = vld [vmem:[%s30063_s5 + $0x354] ss:$28 sps:$4 sm:$0xff]   ;;  %v26639_v61 = vpop.f32.mrf.mxu1 }
 0x5a2   : > { %8908 = vmatprep.subr.bf16.mxu0 %v21890_v54  ;;  %v21957_v54 = vld [vmem:[%s30063_s5 + $0x2b0] ss:$28 sps:$4 sm:$0xff]  }
 0x5a4   : > { %9044 = vmatpush2.bf16.msra.mxu1 %v21885_v49  ;;  %v21960_v49 = vld [vmem:[%s30063_s5 + $0x350] ss:$28 sps:$4 sm:$0xff]  }
 0x5a5   : > { %8909 = vmatpush2.bf16.msra.mxu0 %v21888_v56  ;;  %9056 = vmatprep.subr.bf16.mxu1 %v21893_v23  ;;  %v21965_v56 = vld [vmem:[%s30063_s5 + $0x27c] ss:$28 sps:$4 sm:$0xff]  }
 0x5a6   : > { %8910 = vmatprep.subr.bf16.mxu0 %v21896_v63  ;;  %v21968_v23 = vld [vmem:[%s30063_s5 + $0x31c] ss:$28 sps:$4 sm:$0xff]   ;;  %v26653_v63 = vpop.f32.mrf.mxu1 }
 0x5a7   : > { %9046 = vmatmul.mubr.bf16.vlgmr.msra.gmra.mxu1 %v26350_v2 }
 0x5a8   : > { %9057 = vmatpush1.bf16.msra.mxu1 %v21891_v31  ;;  %9088 = vmatprep.mubr.bf16.mxu1 %v26342_v39  ;;  %v21963_v31 = vld [vmem:[%s30063_s5 + $0x278] ss:$28 sps:$4 sm:$0xff]  }
 0x5a9   : > { %8911 = vmatpush2.bf16.msra.mxu0 %v21894_v28  ;;  %9058 = vmatprep.subr.bf16.mxu1 %v21899_v36  ;;  %v21966_v28 = vld [vmem:[%s30063_s5 + $0x318] ss:$28 sps:$4 sm:$0xff]   ;;  %v21971_v36 = vld [vmem:[%s30063_s5 + $0x244] ss:$28 sps:$4 sm:$0xff]  }
 0x5aa   : > { %8912 = vmatprep.subr.bf16.mxu0 %v21902_v40  ;;  %v21974_v40 = vld [vmem:[%s30063_s5 + $0x2e4] ss:$28 sps:$4 sm:$0xff]  }
 0x5ac   : > { %9059 = vmatpush1.bf16.msra.mxu1 %v21897_v60  ;;  %v26667_v60 = vpop.f32.mrf.mxu1 }
 0x5ad   : > { %8913 = vmatpush2.bf16.msra.mxu0 %v21900_v24  ;;  %9060 = vmatprep.subr.bf16.mxu1 %v21905_v32  ;;  %v21969_v24 = vld [vmem:[%s30063_s5 + $0x240] ss:$28 sps:$4 sm:$0xff]  }
 0x5ae   : > { %8914 = vmatprep.subr.bf16.mxu0 %v21908_v4  ;;  %v21972_v32 = vld [vmem:[%s30063_s5 + $0x2e0] ss:$28 sps:$4 sm:$0xff]   ;;  %v21977_v4 = vld [vmem:[%s30063_s5 + $0x20c] ss:$28 sps:$4 sm:$0xff]  }
 0x5b0   : > { %9061 = vmatpush1.bf16.msra.mxu1 %v21903_v33  ;;  %v26678_v33 = vpop.f32.mrf.mxu1 }
 0x5b1   : > { %8915 = vmatpush2.bf16.msra.mxu0 %v21906_v6  ;;  %9062 = vmatprep.subr.bf16.mxu1 %v21911_v22  ;;  %v21980_v6 = vld [vmem:[%s30063_s5 + $0x2ac] ss:$28 sps:$4 sm:$0xff]  }
 0x5b2   : > { %8970 = vmatprep.subr.bf16.mxu0 %v21914_v50  ;;  %v21975_v22 = vld [vmem:[%s30063_s5 + $0x208] ss:$28 sps:$4 sm:$0xff]  }
 0x5b3   : > { %v21978_v50 = vld [vmem:[%s30063_s5 + $0x2a8] ss:$28 sps:$4 sm:$0xff]  }
 0x5b4   : > { %9063 = vmatpush1.bf16.msra.mxu1 %v21909_v52  ;;  %8917 = vmatmul.mubr.bf16.vlgmr.msra.gmra.mxu0 %v26078_v16  ;;  %v21983_v52 = vld [vmem:[%s30063_s5 + $0x1d4] ss:$28 sps:$4 sm:$0xff]  }
 0x5b5   : > { %8971 = vmatpush1.bf16.msra.mxu0 %v21912_v47  ;;  %9002 = vmatprep.mubr.bf16.mxu0 %v26342_v39  ;;  %v26692_v47 = vpop.f32.mrf.mxu1 }
 0x5b6   : > { %9064 = vmatprep.subr.bf16.mxu1 %v21917_v55  ;;  %8972 = vmatprep.subr.bf16.mxu0 %v21920_v27  ;;  %v21986_v55 = vld [vmem:[%s30063_s5 + $0x274] ss:$28 sps:$4 sm:$0xff]  }
 0x5b7   : > { %v21981_v27 = vld [vmem:[%s30063_s5 + $0x1d0] ss:$28 sps:$4 sm:$0xff]  }
 0x5b8   : > { %9065 = vmatpush1.bf16.msra.mxu1 %v21915_v44  ;;  %v21984_v44 = vld [vmem:[%s30063_s5 + $0x270] ss:$28 sps:$4 sm:$0xff]  }
 0x5b9   : > { %8973 = vmatpush1.bf16.msra.mxu0 %v21918_v46  ;;  %9066 = vmatprep.subr.bf16.mxu1 %v21923_v41  ;;  %v26703_v46 = vpop.f32.mrf.mxu1  ;;  %v21990_v41 = vld [vmem:[%s30063_s5 + $0x23c] ss:$28 sps:$4 sm:$0xff]  }
 0x5ba   : > { %8974 = vmatprep.subr.bf16.mxu0 %v21926_v62  ;;  %v21987_v62 = vld [vmem:[%s30063_s5 + $0x520] ss:$28 sps:$4 sm:$0xff]  }
 0x5bc   : > { %9067 = vmatpush1.bf16.msra.mxu1 %v21921_v20  ;;  %v21988_v20 = vld [vmem:[%s30063_s5 + $0x238] ss:$28 sps:$4 sm:$0xff]  }
 0x5bd   : > { %8975 = vmatpush1.bf16.msra.mxu0 %v21924_v10  ;;  %9068 = vmatprep.subr.bf16.mxu1 %v21929_v38  ;;  %v26715_v10 = vpop.f32.mrf.mxu1  ;;  %v21994_v38 = vld [vmem:[%s30063_s5 + $0x204] ss:$28 sps:$4 sm:$0xff]  }
 0x5be   : > { %8976 = vmatprep.subr.bf16.mxu0 %v21932_v45 }
 0x5c0   : > { %9069 = vmatpush1.bf16.msra.mxu1 %v21927_v8  ;;  %v21991_v8 = vld [vmem:[%s30063_s5 + $0x4e8] ss:$28 sps:$4 sm:$0xff]  }
 0x5c1   : > { %8977 = vmatpush1.bf16.msra.mxu0 %v21930_v51  ;;  %9070 = vmatprep.subr.bf16.mxu1 %v21935_v0  ;;  %v21992_v51 = vld [vmem:[%s30063_s5 + $0x200] ss:$28 sps:$4 sm:$0xff]   ;;  %v21998_v0 = vld [vmem:[%s30063_s5 + $0x1cc] ss:$28 sps:$4 sm:$0xff]  }
 0x5c2   : > { %8978 = vmatprep.subr.bf16.mxu0 %v21938_v21 }
 0x5c4   : > { %9071 = vmatpush1.bf16.msra.mxu1 %v21933_v11  ;;  %v21995_v11 = vld [vmem:[%s30063_s5 + $0x4b0] ss:$28 sps:$4 sm:$0xff]  }
 0x5c5   : > { %8979 = vmatpush1.bf16.msra.mxu0 %v21936_v17  ;;  %9072 = vmatprep.subr.bf16.mxu1 %v21941_v59  ;;  %v21996_v17 = vld [vmem:[%s30063_s5 + $0x1c8] ss:$28 sps:$4 sm:$0xff]   ;;  %v22002_v59 = vld [vmem:[%s30063_s5 + $0x51c] ss:$28 sps:$4 sm:$0xff]  }
 0x5c6   : > { %8980 = vmatprep.subr.bf16.mxu0 %v21944_v43  ;;  %v26721_v45 = vpop.f32.mrf.mxu1 }
 0x5c8   : > { %9073 = vmatpush2.bf16.msra.mxu1 %v21939_v29  ;;  %v26735_v21 = vpop.f32.mrf.mxu1  ;;  %v21999_v29 = vld [vmem:[%s30063_s5 + $0x478] ss:$28 sps:$4 sm:$0xff]  }
 0x5c9   : > { %8981 = vmatpush1.bf16.msra.mxu0 %v21942_v57  ;;  %9074 = vmatprep.subr.bf16.mxu1 %v21947_v9  ;;  %v22000_v57 = vld [vmem:[%s30063_s5 + $0x518] ss:$28 sps:$4 sm:$0xff]   ;;  %v22006_v9 = vld [vmem:[%s30063_s5 + $0x4e4] ss:$28 sps:$4 sm:$0xff]  }
 0x5ca   : > { %8982 = vmatprep.subr.bf16.mxu0 %v21950_v26  ;;  %v26747_v43 = vpop.f32.mrf.mxu1 }
 0x5cc   : > { %9075 = vmatpush2.bf16.msra.mxu1 %v21945_v19  ;;  %v26759_v26 = vpop.f32.mrf.mxu1  ;;  %v22003_v19 = vld [vmem:[%s30063_s5 + $0x440] ss:$28 sps:$4 sm:$0xff]  }
 0x5cd   : > { %8983 = vmatpush1.bf16.msra.mxu0 %v21948_v15  ;;  %9076 = vmatprep.subr.bf16.mxu1 %v21953_v42  ;;  %v22004_v15 = vld [vmem:[%s30063_s5 + $0x4e0] ss:$28 sps:$4 sm:$0xff]  }
 0x5ce   : > { %8984 = vmatprep.subr.bf16.mxu0 %v21956_v53  ;;  %v22010_v53 = vld [vmem:[%s30063_s5 + $0x4ac] ss:$28 sps:$4 sm:$0xff]  }
 0x5d0   : > { %9077 = vmatpush2.bf16.msra.mxu1 %v21951_v34 }
 0x5d1   : > { %8985 = vmatpush1.bf16.msra.mxu0 %v21954_v1  ;;  %9078 = vmatprep.subr.bf16.mxu1 %v21959_v7  ;;  %v22007_v1 = vld [vmem:[%s30063_s5 + $0x408] ss:$28 sps:$4 sm:$0xff]  }
 0x5d2   : > { %8986 = vmatprep.subr.bf16.mxu0 %v21962_v12  ;;  %v22014_v12 = vld [vmem:[%s30063_s5 + $0x474] ss:$28 sps:$4 sm:$0xff]  }
 0x5d4   : > { %9079 = vmatpush2.bf16.msra.mxu1 %v21957_v54  ;;  %v26788_v54 = vpop.f32.mrf.mxu0 }
 0x5d5   : > { %8987 = vmatpush2.bf16.msra.mxu0 %v21960_v49  ;;  %9080 = vmatprep.subr.bf16.mxu1 %v21965_v56  ;;  %v22011_v56 = vld [vmem:[%s30063_s5 + $0x3d0] ss:$28 sps:$4 sm:$0xff]  }
 0x5d6   : > { %8988 = vmatprep.subr.bf16.mxu0 %v21968_v23  ;;  %v22012_v23 = vld [vmem:[%s30063_s5 + $0x470] ss:$28 sps:$4 sm:$0xff]  }
 0x5d8   : > { %9081 = vmatpush2.bf16.msra.mxu1 %v21963_v31  ;;  %v22018_v31 = vld [vmem:[%s30063_s5 + $0x43c] ss:$28 sps:$4 sm:$0xff]  }
 0x5d9   : > { %8989 = vmatpush2.bf16.msra.mxu0 %v21966_v28  ;;  %9082 = vmatprep.subr.bf16.mxu1 %v21971_v36  ;;  %v6062_v28 = vpop.f32.mrf.mxu0  ;;  %v22015_v36 = vld [vmem:[%s30063_s5 + $0x398] ss:$28 sps:$4 sm:$0xff]  }
 0x5da   : > { %8990 = vmatprep.subr.bf16.mxu0 %v21974_v40  ;;  %v22016_v40 = vld [vmem:[%s30063_s5 + $0x438] ss:$28 sps:$4 sm:$0xff]  }
 0x5dc   : > { %9083 = vmatpush2.bf16.msra.mxu1 %v21969_v24  ;;  %v22022_v24 = vld [vmem:[%s30063_s5 + $0x404] ss:$28 sps:$4 sm:$0xff]  }
 0x5dd   : > { %8991 = vmatpush2.bf16.msra.mxu0 %v21972_v32  ;;  %9084 = vmatprep.subr.bf16.mxu1 %v21977_v4  ;;  %v26810_v32 = vpop.f32.mrf.mxu0  ;;  %v22019_v4 = vld [vmem:[%s30063_s5 + $0x600] ss:$28 sps:$4 sm:$0xff]  }
 0x5de   : > { %8992 = vmatprep.subr.bf16.mxu0 %v21980_v6  ;;  %v22020_v6 = vld [vmem:[%s30063_s5 + $0x400] ss:$28 sps:$4 sm:$0xff]  }
 0x5e0   : > { %9085 = vmatpush2.bf16.msra.mxu1 %v21975_v22  ;;  %v22026_v22 = vld [vmem:[%s30063_s5 + $0x3cc] ss:$28 sps:$4 sm:$0xff]  }
 0x5e1   : > { %8993 = vmatpush2.bf16.msra.mxu0 %v21978_v50  ;;  %9086 = vmatprep.subr.bf16.mxu1 %v21983_v52  ;;  %v6066_v50 = vpop.f32.mrf.mxu0  ;;  %v22023_v52 = vld [vmem:[%s30063_s5 + $0x5c8] ss:$28 sps:$4 sm:$0xff]  }
 0x5e2   : > { %8994 = vmatprep.subr.bf16.mxu0 %v21986_v55  ;;  %v22024_v55 = vld [vmem:[%s30063_s5 + $0x3c8] ss:$28 sps:$4 sm:$0xff]  }
 0x5e4   : > { %9087 = vmatpush2.bf16.msra.mxu1 %v21981_v27  ;;  %v26829_v27 = vpop.f32.mrf.mxu0 }
 0x5e5   : > { %8995 = vmatpush2.bf16.msra.mxu0 %v21984_v44  ;;  %9183 = vmatprep.subr.bf16.mxu1 %v30109_v14  ;;  %v22030_v44 = vld [vmem:[%s30063_s5 + $0x394] ss:$28 sps:$4 sm:$0xff]  }
 0x5e6   : > { %8996 = vmatprep.subr.bf16.mxu0 %v21990_v41  ;;  %v22027_v41 = vld [vmem:[%s30063_s5 + $0x590] ss:$28 sps:$4 sm:$0xff]  }
 0x5e7   : > { %9089 = vmatmul.mubr.bf16.vlgmr.msra.gmra.mxu1 %v26078_v16 }
 0x5e8   : > { %9184 = vmatpush1.bf16.msra.mxu1 %v21987_v62  ;;  %18584 = vmatprep.mubr.msk.bf16.mxu1 %vm7530_vm8, %v26344_v3  ;;  %v22028_v62 = vld [vmem:[%s30063_s5 + $0x390] ss:$28 sps:$4 sm:$0xff]  }
 0x5e9   : > { %8997 = vmatpush2.bf16.msra.mxu0 %v21988_v20  ;;  %9185 = vmatprep.subr.bf16.mxu1 %v30109_v14  ;;  %v26841_v20 = vpop.f32.mrf.mxu0 }
 0x5ea   : > { %8998 = vmatprep.subr.bf16.mxu0 %v21994_v38  ;;  %v22034_v38 = vld [vmem:[%s30063_s5 + $0x5fc] ss:$28 sps:$4 sm:$0xff]  }
 0x5ec   : > { %9186 = vmatpush1.bf16.msra.mxu1 %v21991_v8  ;;  %v22031_v8 = vld [vmem:[%s30063_s5 + $0x558] ss:$28 sps:$4 sm:$0xff]  }
 0x5ed   : > { %8999 = vmatpush2.bf16.msra.mxu0 %v21992_v51  ;;  %9187 = vmatprep.subr.bf16.mxu1 %v30109_v14  ;;  %v22032_v51 = vld [vmem:[%s30063_s5 + $0x5f8] ss:$28 sps:$4 sm:$0xff]  }
 0x5ee   : > { %9000 = vmatprep.subr.bf16.mxu0 %v21998_v0  ;;  %v22037_v0 = vld [vmem:[%s30063_s5 + $0x114c] ss:$28 sps:$4 sm:$0xff]  }
 0x5f0   : > { %9188 = vmatpush1.bf16.msra.mxu1 %v21995_v11  ;;  %v26856_v11 = vpop.f32.mrf.mxu0 }
 0x5f1   : > { %9001 = vmatpush2.bf16.msra.mxu0 %v21996_v17  ;;  %9189 = vmatprep.subr.bf16.mxu1 %v30109_v14  ;;  %v22040_v17 = vld [vmem:[%s30063_s5 + $0x5c4] ss:$28 sps:$4 sm:$0xff]  }
 0x5f2   : > { %9099 = vmatprep.subr.bf16.mxu0 %v22002_v59  ;;  %v22035_v59 = vld [vmem:[%s30063_s5 + $0x1148] ss:$28 sps:$4 sm:$0xff]  }
 0x5f4   : > { %9190 = vmatpush1.bf16.msra.mxu1 %v21999_v29  ;;  %9003 = vmatmul.mubr.bf16.vlgmr.msra.gmra.mxu0 %v26078_v16  ;;  %v22038_v29 = vld [vmem:[%s30063_s5 + $0x5c0] ss:$28 sps:$4 sm:$0xff]  }
 0x5f5   : > { %9100 = vmatpush1.bf16.msra.mxu0 %v22000_v57  ;;  %18583 = vmatprep.mubr.msk.bf16.mxu0 %vm7530_vm8, %v26344_v3  ;;  %v22008_v3 = vld [vmem:[%s30063_s5 + $0x4a8] ss:$28 sps:$4 sm:$0xff]   ;;  %v22043_v57 = vld [vmem:[%s30063_s5 + $0x1114] ss:$28 sps:$4 sm:$0xff]  }
 0x5f6   : > { %v26770_v42 = vpop.f32.mrf.mxu1  ;;  %9191 = vmatprep.subr.bf16.mxu1 %v30109_v14  ;;  %9101 = vmatprep.subr.bf16.mxu0 %v22006_v9  ;;  %v26870_v9 = vpack.c.bf16 %v6066_v50, %v6062_v28  ;;  %v22056_v28 = vld [vmem:[%s30063_s5 + $0x360] ss:$28 sps:$4 sm:$0xff]   ;;  %v22058_v50 = vld [vmem:[%s30063_s5 + $0x1068] ss:$28 sps:$4 sm:$0xff]  }
 0x5f8   : > { %9192 = vmatpush1.bf16.msra.mxu1 %v22003_v19  ;;  %v7868_v34 = vpop.f32.mrf.mxu1  ;;  %v26872_v19 = vpop.f32.mrf.mxu0 }
 0x5f9   : > { %9102 = vmatpush1.bf16.msra.mxu0 %v22004_v15  ;;  %9193 = vmatprep.subr.bf16.mxu1 %v30109_v14  ;;  %v22046_v15 = vld [vmem:[%s30063_s5 + $0x58c] ss:$28 sps:$4 sm:$0xff]  }
 0x5fa   : > { %v26783_v7 = vpop.f32.mrf.mxu1  ;;  %9103 = vmatprep.subr.bf16.mxu0 %v22010_v53  ;;  %v26878_v53 = vpop.f32.mrf.mxu0  ;;  %v22041_v34 = vld [vmem:[%s30063_s5 + $0x1110] ss:$28 sps:$4 sm:$0xff]  }
 0x5fc   : > { %9194 = vmatpush1.bf16.msra.mxu1 %v22007_v1  ;;  %v7871_v49 = vpop.f32.mrf.mxu1  ;;  %v22044_v1 = vld [vmem:[%s30063_s5 + $0x588] ss:$28 sps:$4 sm:$0xff]  }
 0x5fd   : > { %9104 = vmatpush1.bf16.msra.mxu0 %v22008_v3  ;;  %9195 = vmatprep.subr.bf16.mxu1 %v30109_v14  ;;  %v22049_v3 = vld [vmem:[%s30063_s5 + $0x10dc] ss:$28 sps:$4 sm:$0xff]   ;;  %v26894_v49 = vpop.f32.mrf.mxu0 }
 0x5fe   : > { %9105 = vmatprep.subr.bf16.mxu0 %v22014_v12  ;;  %v22052_v12 = vld [vmem:[%s30063_s5 + $0x554] ss:$28 sps:$4 sm:$0xff]  }
 0x600   : > { %9196 = vmatpush1.bf16.msra.mxu1 %v22011_v56  ;;  %v22047_v56 = vld [vmem:[%s30063_s5 + $0x10d8] ss:$28 sps:$4 sm:$0xff]  }
 0x601   : > { %9106 = vmatpush1.bf16.msra.mxu0 %v22012_v23  ;;  %9197 = vmatprep.subr.bf16.mxu1 %v30109_v14  ;;  %v22050_v23 = vld [vmem:[%s30063_s5 + $0x550] ss:$28 sps:$4 sm:$0xff]  }
 0x602   : > { %9107 = vmatprep.subr.bf16.mxu0 %v22018_v31  ;;  %v22055_v31 = vld [vmem:[%s30063_s5 + $0x10a4] ss:$28 sps:$4 sm:$0xff]  }
 0x604   : > { %9198 = vmatpush1.bf16.msra.mxu1 %v22015_v36  ;;  %v26908_v36 = vpop.f32.mrf.mxu0 }
 0x605   : > { %9108 = vmatpush1.bf16.msra.mxu0 %v22016_v40  ;;  %9207 = vmatprep.subr.bf16.mxu1 %v30109_v14  ;;  %v22053_v40 = vld [vmem:[%s30063_s5 + $0x10a0] ss:$28 sps:$4 sm:$0xff]  }
 0x606   : > { %9109 = vmatprep.subr.bf16.mxu0 %v22022_v24  ;;  %v22057_v24 = vld [vmem:[%s30063_s5 + $0x1a0] ss:$28 sps:$4 sm:$0xff]  }
 0x608   : > { %9208 = vmatpush2.bf16.msra.mxu1 %v22019_v4  ;;  %v22060_v4 = vld [vmem:[%s30063_s5 + $0x106c] ss:$28 sps:$4 sm:$0xff]  }
 0x609   : > { %9110 = vmatpush1.bf16.msra.mxu0 %v22020_v6  ;;  %9209 = vmatprep.subr.bf16.mxu1 %v30109_v14  ;;  %v22061_v6 = vld [vmem:[%s30063_s5 + $0x328] ss:$28 sps:$4 sm:$0xff]  }
 0x60a   : > { %9111 = vmatprep.subr.bf16.mxu0 %v22026_v22  ;;  %v26922_v22 = vpop.f32.mrf.mxu0 }
 0x60c   : > { %9210 = vmatpush2.bf16.msra.mxu1 %v22023_v52  ;;  %v22062_v52 = vld [vmem:[%s30063_s5 + $0x168] ss:$28 sps:$4 sm:$0xff]  }
 0x60d   : > { %9112 = vmatpush1.bf16.msra.mxu0 %v22024_v55  ;;  %9211 = vmatprep.subr.bf16.mxu1 %v30109_v14  ;;  %v22065_v55 = vld [vmem:[%s30063_s5 + $0x1034] ss:$28 sps:$4 sm:$0xff]  }
 0x60e   : > { %9113 = vmatprep.subr.bf16.mxu0 %v22030_v44 }
 0x610   : > { %9212 = vmatpush2.bf16.msra.mxu1 %v22027_v41  ;;  %v22067_v41 = vld [vmem:[%s30063_s5 + $0x130] ss:$28 sps:$4 sm:$0xff]  }
 0x611   : > { %9114 = vmatpush1.bf16.msra.mxu0 %v22028_v62  ;;  %9213 = vmatprep.subr.bf16.mxu1 %v30109_v14  ;;  %v22070_v62 = vld [vmem:[%s30063_s5 + $0xffc] ss:$28 sps:$4 sm:$0xff]  }
 0x612   : > { %9123 = vmatprep.subr.bf16.mxu0 %v22034_v38 }
 0x614   : > { %9214 = vmatpush2.bf16.msra.mxu1 %v22031_v8  ;;  %v26935_v44 = vpop.f32.mrf.mxu0  ;;  %v22071_v8 = vld [vmem:[%s30063_s5 + $0x2b8] ss:$28 sps:$4 sm:$0xff]  }
 0x615   : > { %9124 = vmatpush2.bf16.msra.mxu0 %v22032_v51  ;;  %10507 = vmatprep.subr.bf16.mxu1 %v22037_v0  ;;  %v22068_v51 = vld [vmem:[%s30063_s5 + $0xff8] ss:$28 sps:$4 sm:$0xff]  }
 0x616   : > { %9125 = vmatprep.subr.bf16.mxu0 %v22040_v17  ;;  %v26949_v38 = vpop.f32.mrf.mxu0  ;;  %v22072_v0 = vld [vmem:[%s30063_s5 + $0xf8] ss:$28 sps:$4 sm:$0xff]   ;;  %v22075_v17 = vld [vmem:[%s30063_s5 + $0xfc4] ss:$28 sps:$4 sm:$0xff]  }
 0x617   : > { %9216 = vmatmul.mubr.bf16.vlgmr.msra.gmra.mxu1 %v26350_v2 }
 0x618   : > { %10508 = vmatpush1.bf16.msra.mxu1 %v22035_v59  ;;  %19005 = vmatprep.mubr.msk.bf16.mxu1 %vm7530_vm8, %v26870_v9  ;;  %v26963_v59 = vpop.f32.mrf.mxu0 }
 0x619   : > { %9126 = vmatpush2.bf16.msra.mxu0 %v22038_v29  ;;  %10509 = vmatprep.subr.bf16.mxu1 %v22043_v57  ;;  %v22076_v29 = vld [vmem:[%s30063_s5 + $0x280] ss:$28 sps:$4 sm:$0xff]  }
 0x61a   : > { %9127 = vmatprep.subr.bf16.mxu0 %v22046_v15  ;;  %v22073_v57 = vld [vmem:[%s30063_s5 + $0xfc0] ss:$28 sps:$4 sm:$0xff]  }
 0x61b   : > { %v22077_v15 = vld [vmem:[%s30063_s5 + $0xc0] ss:$28 sps:$4 sm:$0xff]  }
 0x61c   : > { %10510 = vmatpush1.bf16.msra.mxu1 %v22041_v34  ;;  %v22080_v34 = vld [vmem:[%s30063_s5 + $0x122c] ss:$28 sps:$4 sm:$0xff]  }
 0x61d   : > { %9128 = vmatpush2.bf16.msra.mxu0 %v22044_v1  ;;  %10511 = vmatprep.subr.bf16.mxu1 %v22049_v3  ;;  %v26977_v1 = vpop.f32.mrf.mxu0  ;;  %v22081_v3 = vld [vmem:[%s30063_s5 + $0x248] ss:$28 sps:$4 sm:$0xff]  }
 0x61e   : > { %9129 = vmatprep.subr.bf16.mxu0 %v22052_v12 }
 0x620   : > { %10512 = vmatpush1.bf16.msra.mxu1 %v22047_v56  ;;  %v22078_v56 = vld [vmem:[%s30063_s5 + $0x1228] ss:$28 sps:$4 sm:$0xff]  }
 0x621   : > { %9130 = vmatpush2.bf16.msra.mxu0 %v22050_v23  ;;  %10513 = vmatprep.subr.bf16.mxu1 %v22055_v31  ;;  %v22082_v23 = vld [vmem:[%s30063_s5 + $0x88] ss:$28 sps:$4 sm:$0xff]   ;;  %v22085_v31 = vld [vmem:[%s30063_s5 + $0x11f4] ss:$28 sps:$4 sm:$0xff]  }
 0x622   : > { %20299 = vmatprep.subr.bf16.mxu0 %v22056_v28 }
 0x624   : > { %10514 = vmatpush1.bf16.msra.mxu1 %v22053_v40  ;;  %9132 = vmatmul.mubr.bf16.vlgmr.msra.gmra.mxu0 %v26350_v2  ;;  %v22066_v2 = vld [vmem:[%s30063_s5 + $0x2f0] ss:$28 sps:$4 sm:$0xff]  }
 0x625   : > { %20300 = vmatpush3.bf16.msra.mxu0 %v22057_v24  ;;  %9174 = vmatprep.mubr.bf16.mxu0 %v26342_v39  ;;  %v22063_v39 = vld [vmem:[%s30063_s5 + $0x1030] ss:$28 sps:$4 sm:$0xff]  }
 0x626   : > { %10515 = vmatprep.subr.bf16.mxu1 %v22060_v4  ;;  %20301 = vmatprep.subr.bf16.mxu0 %v22061_v6  ;;  %v22086_v40 = vld [vmem:[%s30063_s5 + $0x210] ss:$28 sps:$4 sm:$0xff]  }
 0x627   : > { %v22083_v4 = vld [vmem:[%s30063_s5 + $0x11f0] ss:$28 sps:$4 sm:$0xff]  }
 0x628   : > { %10516 = vmatpush1.bf16.msra.mxu1 %v22058_v50  ;;  %v22087_v6 = vld [vmem:[%s30063_s5 + $0x50] ss:$28 sps:$4 sm:$0xff]   ;;  %v22090_v50 = vld [vmem:[%s30063_s5 + $0x11bc] ss:$28 sps:$4 sm:$0xff]  }
 0x629   : > { %20302 = vmatpush3.bf16.msra.mxu0 %v22062_v52  ;;  %10517 = vmatprep.subr.bf16.mxu1 %v22065_v55  ;;  %v22091_v52 = vld [vmem:[%s30063_s5 + $0x1d8] ss:$28 sps:$4 sm:$0xff]  }
 0x62a   : > { %20303 = vmatprep.subr.bf16.mxu0 %v22066_v2  ;;  %v22088_v55 = vld [vmem:[%s30063_s5 + $0x11b8] ss:$28 sps:$4 sm:$0xff]  }
 0x62b   : > { %v22092_v2 = vld [vmem:[%s30063_s5 + $0x18] ss:$28 sps:$4 sm:$0xff]  }
 0x62c   : > { %10518 = vmatpush1.bf16.msra.mxu1 %v22063_v39  ;;  %v22095_v39 = vld [vmem:[%s30063_s5 + $0x1184] ss:$28 sps:$4 sm:$0xff]  }
 0x62d   : > { %20304 = vmatpush3.bf16.msra.mxu0 %v22067_v41  ;;  %10519 = vmatprep.subr.bf16.mxu1 %v22070_v62  ;;  %v22098_v41 = vld [vmem:[%s30063_s5 + $0xdcc] ss:$28 sps:$4 sm:$0xff]   ;;  %v22093_v62 = vld [vmem:[%s30063_s5 + $0x1180] ss:$28 sps:$4 sm:$0xff]  }
 0x62e   : > { %20305 = vmatprep.subr.bf16.mxu0 %v22071_v8  ;;  %v22096_v8 = vld [vmem:[%s30063_s5 + $0xdc8] ss:$28 sps:$4 sm:$0xff]  }
 0x630   : > { %10520 = vmatpush1.bf16.msra.mxu1 %v22068_v51  ;;  %v22101_v51 = vld [vmem:[%s30063_s5 + $0x1154] ss:$28 sps:$4 sm:$0xff]  }
 0x631   : > { %20306 = vmatpush3.bf16.msra.mxu0 %v22072_v0  ;;  %10521 = vmatprep.subr.bf16.mxu1 %v22075_v17  ;;  %v22104_v0 = vld [vmem:[%s30063_s5 + $0xd94] ss:$28 sps:$4 sm:$0xff]   ;;  %v27034_v17 = vpack.c.bf16 %v26611_v58, %v26093_v25  ;;  %v22107_v25 = vld [vmem:[%s30063_s5 + $0x111c] ss:$28 sps:$4 sm:$0xff]  }
 0x632   : > { %20307 = vmatprep.subr.bf16.mxu0 %v22076_v29  ;;  %v22099_v29 = vld [vmem:[%s30063_s5 + $0x1150] ss:$28 sps:$4 sm:$0xff]   ;;  %v22105_v58 = vld [vmem:[%s30063_s5 + $0x1118] ss:$28 sps:$4 sm:$0xff]  }
 0x634   : > { %10522 = vmatpush1.bf16.msra.mxu1 %v22073_v57  ;;  %v20293_v12 = vpop.f32.mrf.mxu0  ;;  %v27042_v57 = vpack.c.bf16 %v26810_v32, %v26788_v54  ;;  %v22108_v54 = vld [vmem:[%s30063_s5 + $0xd58] ss:$28 sps:$4 sm:$0xff]   ;;  %v22113_v32 = vld [vmem:[%s30063_s5 + $0x10e4] ss:$28 sps:$4 sm:$0xff]  }
 0x635   : > { %20308 = vmatpush3.bf16.msra.mxu0 %v22077_v15  ;;  %10531 = vmatprep.subr.bf16.mxu1 %v22080_v34  ;;  %v22102_v15 = vld [vmem:[%s30063_s5 + $0xd90] ss:$28 sps:$4 sm:$0xff]   ;;  %v22116_v34 = vld [vmem:[%s30063_s5 + $0xd24] ss:$28 sps:$4 sm:$0xff]  }
 0x636   : > { %v20294_v28 = vpop.f32.mrf.mxu0  ;;  %20309 = vmatprep.subr.bf16.mxu0 %v22081_v3  ;;  %v22111_v3 = vld [vmem:[%s30063_s5 + $0x10e0] ss:$28 sps:$4 sm:$0xff]  }
 0x637   : > { %v26994_v24 = vadd.f32 %v20294_v28, %v20293_v12  ;;  %v22114_v12 = vld [vmem:[%s30063_s5 + $0xd20] ss:$28 sps:$4 sm:$0xff]   ;;  %v22120_v28 = vld [vmem:[%s30063_s5 + $0xce8] ss:$28 sps:$4 sm:$0xff]  }
 0x638   : > { %10532 = vmatpush2.bf16.msra.mxu1 %v22078_v56  ;;  %v22119_v56 = vld [vmem:[%s30063_s5 + $0x10ac] ss:$28 sps:$4 sm:$0xff]  }
 0x639   : > { %20310 = vmatpush3.bf16.msra.mxu0 %v22082_v23  ;;  %10533 = vmatprep.subr.bf16.mxu1 %v22085_v31  ;;  %v22122_v23 = vld [vmem:[%s30063_s5 + $0xcec] ss:$28 sps:$4 sm:$0xff]  }
 0x63a   : > { %20311 = vmatprep.subr.bf16.mxu0 %v22086_v40  ;;  %v22117_v31 = vld [vmem:[%s30063_s5 + $0x10a8] ss:$28 sps:$4 sm:$0xff]   ;;  %v22125_v40 = vld [vmem:[%s30063_s5 + $0x1074] ss:$28 sps:$4 sm:$0xff]  }
 0x63c   : > { %10534 = vmatpush2.bf16.msra.mxu1 %v22083_v4  ;;  %v22128_v4 = vld [vmem:[%s30063_s5 + $0xcb4] ss:$28 sps:$4 sm:$0xff]  }
 0x63d   : > { %20312 = vmatpush3.bf16.msra.mxu0 %v22087_v6  ;;  %10535 = vmatprep.subr.bf16.mxu1 %v22090_v50  ;;  %v22123_v6 = vld [vmem:[%s30063_s5 + $0x1070] ss:$28 sps:$4 sm:$0xff]  }
 0x63e   : > { %20313 = vmatprep.subr.bf16.mxu0 %v22091_v52  ;;  %v22126_v50 = vld [vmem:[%s30063_s5 + $0xcb0] ss:$28 sps:$4 sm:$0xff]   ;;  %v22131_v52 = vld [vmem:[%s30063_s5 + $0x103c] ss:$28 sps:$4 sm:$0xff]  }
 0x640   : > { %10536 = vmatpush2.bf16.msra.mxu1 %v22088_v55  ;;  %v22134_v55 = vld [vmem:[%s30063_s5 + $0xc7c] ss:$28 sps:$4 sm:$0xff]  }
 0x641   : > { %20314 = vmatpush3.bf16.msra.mxu0 %v22092_v2  ;;  %10537 = vmatprep.subr.bf16.mxu1 %v22095_v39  ;;  %v22129_v2 = vld [vmem:[%s30063_s5 + $0x1038] ss:$28 sps:$4 sm:$0xff]  }
 0x642   : > { %10464 = vmatprep.subr.bf16.mxu0 %v22098_v41  ;;  %v22132_v39 = vld [vmem:[%s30063_s5 + $0xc78] ss:$28 sps:$4 sm:$0xff]   ;;  %v22137_v41 = vld [vmem:[%s30063_s5 + $0x1004] ss:$28 sps:$4 sm:$0xff]  }
 0x644   : > { %10538 = vmatpush2.bf16.msra.mxu1 %v22093_v62  ;;  %9175 = vmatmul.mubr.bf16.vlgmr.msra.gmra.mxu0 %v26078_v16  ;;  %v22110_v16 = vld [vmem:[%s30063_s5 + $0xd5c] ss:$28 sps:$4 sm:$0xff]   ;;  %v22140_v62 = vld [vmem:[%s30063_s5 + $0xc44] ss:$28 sps:$4 sm:$0xff]  }
 0x645   : > { %10465 = vmatpush1.bf16.msra.mxu0 %v22096_v8  ;;  %10496 = vmatprep.mubr.bf16.mxu0 %v27034_v17  ;;  %v22135_v8 = vld [vmem:[%s30063_s5 + $0x1000] ss:$28 sps:$4 sm:$0xff]  }
 0x646   : > { %10593 = vmatprep.subr.bf16.mxu1 %v22101_v51  ;;  %10466 = vmatprep.subr.bf16.mxu0 %v22104_v0  ;;  %v22138_v51 = vld [vmem:[%s30063_s5 + $0xc40] ss:$28 sps:$4 sm:$0xff]   ;;  %v22143_v0 = vld [vmem:[%s30063_s5 + $0xfcc] ss:$28 sps:$4 sm:$0xff]  }
 0x647   : > { %10540 = vmatmul.mubr.bf16.vlgmr.msra.gmra.mxu1 %v27042_v57 }
 0x648   : > { %10594 = vmatpush1.bf16.msra.mxu1 %v22099_v29  ;;  %19006 = vmatprep.mubr.msk.bf16.mxu1 %vm7530_vm8, %v26870_v9  ;;  %v22146_v29 = vld [vmem:[%s30063_s5 + $0xf8c] ss:$28 sps:$4 sm:$0xff]  }
 0x649   : > { %10467 = vmatpush1.bf16.msra.mxu0 %v22102_v15  ;;  %10595 = vmatprep.subr.bf16.mxu1 %v22107_v25  ;;  %v22141_v15 = vld [vmem:[%s30063_s5 + $0xfc8] ss:$28 sps:$4 sm:$0xff]  }
 0x64a   : > { %10468 = vmatprep.subr.bf16.mxu0 %v22110_v16  ;;  %v22144_v25 = vld [vmem:[%s30063_s5 + $0xf88] ss:$28 sps:$4 sm:$0xff]   ;;  %v22149_v16 = vld [vmem:[%s30063_s5 + $0x1234] ss:$28 sps:$4 sm:$0xff]  }
 0x64c   : > { %10596 = vmatpush1.bf16.msra.mxu1 %v22105_v58  ;;  %v22152_v58 = vld [vmem:[%s30063_s5 + $0xf54] ss:$28 sps:$4 sm:$0xff]  }
 0x64d   : > { %10469 = vmatpush1.bf16.msra.mxu0 %v22108_v54  ;;  %10597 = vmatprep.subr.bf16.mxu1 %v22113_v32  ;;  %v22147_v54 = vld [vmem:[%s30063_s5 + $0x1230] ss:$28 sps:$4 sm:$0xff]  }
 0x64e   : > { %10470 = vmatprep.subr.bf16.mxu0 %v22116_v34  ;;  %v22150_v32 = vld [vmem:[%s30063_s5 + $0xf50] ss:$28 sps:$4 sm:$0xff]   ;;  %v22155_v34 = vld [vmem:[%s30063_s5 + $0x11fc] ss:$28 sps:$4 sm:$0xff]  }
 0x650   : > { %10598 = vmatpush1.bf16.msra.mxu1 %v22111_v3  ;;  %v22158_v3 = vld [vmem:[%s30063_s5 + $0xf1c] ss:$28 sps:$4 sm:$0xff]  }
 0x651   : > { %10471 = vmatpush1.bf16.msra.mxu0 %v22114_v12  ;;  %10599 = vmatprep.subr.bf16.mxu1 %v22119_v56  ;;  %v22153_v12 = vld [vmem:[%s30063_s5 + $0x11f8] ss:$28 sps:$4 sm:$0xff]  }
 0x652   : > { %10472 = vmatprep.subr.bf16.mxu0 %v22122_v23  ;;  %v22156_v56 = vld [vmem:[%s30063_s5 + $0xf18] ss:$28 sps:$4 sm:$0xff]   ;;  %v22161_v23 = vld [vmem:[%s30063_s5 + $0x11c4] ss:$28 sps:$4 sm:$0xff]  }
 0x654   : > { %10600 = vmatpush1.bf16.msra.mxu1 %v22117_v31  ;;  %v22164_v31 = vld [vmem:[%s30063_s5 + $0xee4] ss:$28 sps:$4 sm:$0xff]  }
 0x655   : > { %10473 = vmatpush1.bf16.msra.mxu0 %v22120_v28  ;;  %10601 = vmatprep.subr.bf16.mxu1 %v22125_v40  ;;  %v22159_v28 = vld [vmem:[%s30063_s5 + $0x11c0] ss:$28 sps:$4 sm:$0xff]  }
 0x656   : > { %10474 = vmatprep.subr.bf16.mxu0 %v22128_v4  ;;  %v22162_v40 = vld [vmem:[%s30063_s5 + $0xee0] ss:$28 sps:$4 sm:$0xff]   ;;  %v22167_v4 = vld [vmem:[%s30063_s5 + $0x118c] ss:$28 sps:$4 sm:$0xff]  }
 0x658   : > { %10602 = vmatpush1.bf16.msra.mxu1 %v22123_v6  ;;  %v27174_v6 = vpop.f32.mrf.mxu0 }
 0x659   : > { %10475 = vmatpush1.bf16.msra.mxu0 %v22126_v50  ;;  %10603 = vmatprep.subr.bf16.mxu1 %v22131_v52  ;;  %v22170_v50 = vld [vmem:[%s30063_s5 + $0xeac] ss:$28 sps:$4 sm:$0xff]  }
 0x65a   : > { %10476 = vmatprep.subr.bf16.mxu0 %v22134_v55  ;;  %v22165_v52 = vld [vmem:[%s30063_s5 + $0x1188] ss:$28 sps:$4 sm:$0xff]  }
 0x65b   : > { %v22168_v55 = vld [vmem:[%s30063_s5 + $0xea8] ss:$28 sps:$4 sm:$0xff]  }
 0x65c   : > { %10604 = vmatpush1.bf16.msra.mxu1 %v22129_v2  ;;  %v22173_v2 = vld [vmem:[%s30063_s5 + $0xddc] ss:$28 sps:$4 sm:$0xff]  }
 0x65d   : > { %10477 = vmatpush1.bf16.msra.mxu0 %v22132_v39  ;;  %10605 = vmatprep.subr.bf16.mxu1 %v22137_v41  ;;  %v27188_v39 = vpop.f32.mrf.mxu0  ;;  %v22176_v41 = vld [vmem:[%s30063_s5 + $0xe74] ss:$28 sps:$4 sm:$0xff]  }
 0x65e   : > { %10478 = vmatprep.subr.bf16.mxu0 %v22140_v62  ;;  %v7611_v62 = vadd.f32 %v26829_v27, %v26625_v18  ;;  %v22179_v18 = vld [vmem:[%s30063_s5 + $0xda4] ss:$28 sps:$4 sm:$0xff]  }
 0x660   : > { %10606 = vmatpush1.bf16.msra.mxu1 %v22135_v8  ;;  %v8961_v8 = vpop.f32.mrf.mxu1 }
 0x661   : > { %10479 = vmatpush1.bf16.msra.mxu0 %v22138_v51  ;;  %10607 = vmatprep.subr.bf16.mxu1 %v22143_v0  ;;  %v22171_v0 = vld [vmem:[%s30063_s5 + $0xdd8] ss:$28 sps:$4 sm:$0xff]  }
 0x662   : > { %10480 = vmatprep.subr.bf16.mxu0 %v22146_v29  ;;  %v7613_v29 = vadd.f32 %v26841_v20, %v26639_v61  ;;  %v8963_v20 = vpop.f32.mrf.mxu1 }
 0x664   : > { %10608 = vmatpush1.bf16.msra.mxu1 %v22141_v15 }
 0x665   : > { %10481 = vmatpush2.bf16.msra.mxu0 %v22144_v25  ;;  %10617 = vmatprep.subr.bf16.mxu1 %v22149_v16  ;;  %v22174_v25 = vld [vmem:[%s30063_s5 + $0xe70] ss:$28 sps:$4 sm:$0xff]   ;;  %v22182_v16 = vld [vmem:[%s30063_s5 + $0xe3c] ss:$28 sps:$4 sm:$0xff]  }
 0x666   : > { %10482 = vmatprep.subr.bf16.mxu0 %v22152_v58 }
 0x668   : > { %10618 = vmatpush2.bf16.msra.mxu1 %v22147_v54  ;;  %v22177_v54 = vld [vmem:[%s30063_s5 + $0xda0] ss:$28 sps:$4 sm:$0xff]  }
 0x669   : > { %10483 = vmatpush2.bf16.msra.mxu0 %v22150_v32  ;;  %10619 = vmatprep.subr.bf16.mxu1 %v22155_v34  ;;  %v22180_v34 = vld [vmem:[%s30063_s5 + $0xe38] ss:$28 sps:$4 sm:$0xff]  }
 0x66a   : > { %10484 = vmatprep.subr.bf16.mxu0 %v22158_v3  ;;  %v22185_v3 = vld [vmem:[%s30063_s5 + $0xd6c] ss:$28 sps:$4 sm:$0xff]  }
 0x66c   : > { %10620 = vmatpush2.bf16.msra.mxu1 %v22153_v12  ;;  %v22188_v12 = vld [vmem:[%s30063_s5 + $0xe04] ss:$28 sps:$4 sm:$0xff]  }
 0x66d   : > { %10485 = vmatpush2.bf16.msra.mxu0 %v22156_v56  ;;  %10621 = vmatprep.subr.bf16.mxu1 %v22161_v23  ;;  %v22183_v56 = vld [vmem:[%s30063_s5 + $0xd68] ss:$28 sps:$4 sm:$0xff]   ;;  %v22186_v23 = vld [vmem:[%s30063_s5 + $0xe00] ss:$28 sps:$4 sm:$0xff]  }
 0x66e   : > { %10486 = vmatprep.subr.bf16.mxu0 %v22164_v31  ;;  %v22191_v31 = vld [vmem:[%s30063_s5 + $0xd34] ss:$28 sps:$4 sm:$0xff]  }
 0x670   : > { %10622 = vmatpush2.bf16.msra.mxu1 %v22159_v28  ;;  %v22194_v28 = vld [vmem:[%s30063_s5 + $0xdd4] ss:$28 sps:$4 sm:$0xff]  }
 0x671   : > { %10487 = vmatpush2.bf16.msra.mxu0 %v22162_v40  ;;  %10623 = vmatprep.subr.bf16.mxu1 %v22167_v4  ;;  %v22189_v40 = vld [vmem:[%s30063_s5 + $0xd30] ss:$28 sps:$4 sm:$0xff]  }
 0x672   : > { %10488 = vmatprep.subr.bf16.mxu0 %v22170_v50  ;;  %v22192_v4 = vld [vmem:[%s30063_s5 + $0xdd0] ss:$28 sps:$4 sm:$0xff]   ;;  %v22197_v50 = vld [vmem:[%s30063_s5 + $0xcfc] ss:$28 sps:$4 sm:$0xff]  }
 0x674   : > { %10624 = vmatpush2.bf16.msra.mxu1 %v22165_v52  ;;  %v8918_v51 = vpop.f32.mrf.mxu0  ;;  %v22200_v52 = vld [vmem:[%s30063_s5 + $0xd9c] ss:$28 sps:$4 sm:$0xff]  }
 0x675   : > { %v8919_v15 = vadd.f32 %v8918_v51, %v7611_v62  ;;  %10489 = vmatpush2.bf16.msra.mxu0 %v22168_v55  ;;  %10636 = vmatprep.subr.bf16.mxu1 %v22173_v2  ;;  %v22195_v55 = vld [vmem:[%s30063_s5 + $0xcf8] ss:$28 sps:$4 sm:$0xff]   ;;  %v22206_v62 = vld [vmem:[%s30063_s5 + $0xd64] ss:$28 sps:$4 sm:$0xff]  }
 0x676   : > { %v8920_v27 = vpop.f32.mrf.mxu0  ;;  %10490 = vmatprep.subr.bf16.mxu0 %v22176_v41  ;;  %v22198_v2 = vld [vmem:[%s30063_s5 + $0xd98] ss:$28 sps:$4 sm:$0xff]   ;;  %v22203_v41 = vld [vmem:[%s30063_s5 + $0xcc4] ss:$28 sps:$4 sm:$0xff]  }
 0x677   : > { %v27209_v58 = vadd.f32 %v8961_v8, %v8919_v15  ;;  %v8921_v61 = vadd.f32 %v8920_v27, %v7613_v29  ;;  %10626 = vmatmul.mubr.bf16.vlgmr.msra.gmra.mxu1 %v27042_v57  ;;  %v22201_v8 = vld [vmem:[%s30063_s5 + $0xcc0] ss:$28 sps:$4 sm:$0xff]   ;;  %v22212_v29 = vld [vmem:[%s30063_s5 + $0xd2c] ss:$28 sps:$4 sm:$0xff]   ;;  %v22218_v27 = vld [vmem:[%s30063_s5 + $0xcf4] ss:$28 sps:$4 sm:$0xff]  }
 0x678   : > { %10637 = vmatpush1.bf16.msra.mxu1 %v22171_v0  ;;  %10668 = vmatprep.mubr.bf16.mxu1 %v27034_v17  ;;  %v22204_v51 = vld [vmem:[%s30063_s5 + $0xd60] ss:$28 sps:$4 sm:$0xff]   ;;  %v22209_v0 = vld [vmem:[%s30063_s5 + $0xc8c] ss:$28 sps:$4 sm:$0xff]  }
 0x679   : > { %v27216_v32 = vadd.f32 %v8963_v20, %v8921_v61  ;;  %10491 = vmatpush2.bf16.msra.mxu0 %v22174_v25  ;;  %10638 = vmatprep.subr.bf16.mxu1 %v22179_v18  ;;  %v22207_v15 = vld [vmem:[%s30063_s5 + $0xc88] ss:$28 sps:$4 sm:$0xff]   ;;  %v22215_v18 = vld [vmem:[%s30063_s5 + $0xc54] ss:$28 sps:$4 sm:$0xff]   ;;  %v22221_v20 = vld [vmem:[%s30063_s5 + $0xf9c] ss:$28 sps:$4 sm:$0xff]  }
 0x67a   : > { %10492 = vmatprep.subr.bf16.mxu0 %v22182_v16  ;;  %v22210_v25 = vld [vmem:[%s30063_s5 + $0xd28] ss:$28 sps:$4 sm:$0xff]   ;;  %v22213_v16 = vld [vmem:[%s30063_s5 + $0xc50] ss:$28 sps:$4 sm:$0xff]  }
 0x67b   : > { %v22216_v61 = vld [vmem:[%s30063_s5 + $0xcf0] ss:$28 sps:$4 sm:$0xff]  }
 0x67c   : > { %10639 = vmatpush1.bf16.msra.mxu1 %v22177_v54  ;;  %v22224_v54 = vld [vmem:[%s30063_s5 + $0xcbc] ss:$28 sps:$4 sm:$0xff]  }
 0x67d   : > { %10493 = vmatpush2.bf16.msra.mxu0 %v22180_v34  ;;  %10640 = vmatprep.subr.bf16.mxu1 %v22185_v3  ;;  %v27301_v34 = vpop.f32.mrf.mxu1  ;;  %v22219_v3 = vld [vmem:[%s30063_s5 + $0xf98] ss:$28 sps:$4 sm:$0xff]  }
 0x67e   : > { %10494 = vmatprep.subr.bf16.mxu0 %v22188_v12  ;;  %v22222_v12 = vld [vmem:[%s30063_s5 + $0xcb8] ss:$28 sps:$4 sm:$0xff]  }
 0x680   : > { %10641 = vmatpush1.bf16.msra.mxu1 %v22183_v56  ;;  %v22227_v56 = vld [vmem:[%s30063_s5 + $0xf64] ss:$28 sps:$4 sm:$0xff]  }
 0x681   : > { %10495 = vmatpush2.bf16.msra.mxu0 %v22186_v23  ;;  %10642 = vmatprep.subr.bf16.mxu1 %v22191_v31  ;;  %v22230_v23 = vld [vmem:[%s30063_s5 + $0xc84] ss:$28 sps:$4 sm:$0xff]   ;;  %v27315_v31 = vpop.f32.mrf.mxu1 }
 0x682   : > { %10550 = vmatprep.subr.bf16.mxu0 %v22194_v28  ;;  %v22225_v28 = vld [vmem:[%s30063_s5 + $0xf60] ss:$28 sps:$4 sm:$0xff]  }
 0x684   : > { %10643 = vmatpush1.bf16.msra.mxu1 %v22189_v40  ;;  %10497 = vmatmul.mubr.bf16.vlgmr.msra.gmra.mxu0 %v26104_v5  ;;  %v27320_v40 = vpop.f32.mrf.mxu1 }
 0x685   : > { %10551 = vmatpush1.bf16.msra.mxu0 %v22192_v4  ;;  %10582 = vmatprep.mubr.bf16.mxu0 %v27034_v17  ;;  %v22228_v4 = vld [vmem:[%s30063_s5 + $0xc80] ss:$28 sps:$4 sm:$0xff]  }
 0x686   : > { %10644 = vmatprep.subr.bf16.mxu1 %v22197_v50  ;;  %10552 = vmatprep.subr.bf16.mxu0 %v22200_v52  ;;  %v22233_v50 = vld [vmem:[%s30063_s5 + $0xf2c] ss:$28 sps:$4 sm:$0xff]  }
 0x687   : > { %v22236_v52 = vld [vmem:[%s30063_s5 + $0xc4c] ss:$28 sps:$4 sm:$0xff]  }
 0x688   : > { %10645 = vmatpush1.bf16.msra.mxu1 %v22195_v55  ;;  %v22231_v55 = vld [vmem:[%s30063_s5 + $0xf28] ss:$28 sps:$4 sm:$0xff]  }
 0x689   : > { %10553 = vmatpush1.bf16.msra.mxu0 %v22198_v2  ;;  %10646 = vmatprep.subr.bf16.mxu1 %v22203_v41  ;;  %v27334_v2 = vpop.f32.mrf.mxu1  ;;  %v22234_v41 = vld [vmem:[%s30063_s5 + $0xc48] ss:$28 sps:$4 sm:$0xff]  }
 0x68a   : > { %10554 = vmatprep.subr.bf16.mxu0 %v22206_v62  ;;  %v22239_v62 = vld [vmem:[%s30063_s5 + $0xef4] ss:$28 sps:$4 sm:$0xff]  }
 0x68c   : > { %10647 = vmatpush1.bf16.msra.mxu1 %v22201_v8  ;;  %v22242_v8 = vld [vmem:[%s30063_s5 + $0xf94] ss:$28 sps:$4 sm:$0xff]  }
 0x68d   : > { %10555 = vmatpush1.bf16.msra.mxu0 %v22204_v51  ;;  %10648 = vmatprep.subr.bf16.mxu1 %v22209_v0  ;;  %v22237_v51 = vld [vmem:[%s30063_s5 + $0xef0] ss:$28 sps:$4 sm:$0xff]   ;;  %v27348_v0 = vpop.f32.mrf.mxu1 }
 0x68e   : > { %10556 = vmatprep.subr.bf16.mxu0 %v22212_v29  ;;  %v22240_v29 = vld [vmem:[%s30063_s5 + $0xf90] ss:$28 sps:$4 sm:$0xff]  }
 0x690   : > { %10649 = vmatpush1.bf16.msra.mxu1 %v22207_v15  ;;  %v22245_v15 = vld [vmem:[%s30063_s5 + $0xebc] ss:$28 sps:$4 sm:$0xff]  }
 0x691   : > { %10557 = vmatpush1.bf16.msra.mxu0 %v22210_v25  ;;  %10650 = vmatprep.subr.bf16.mxu1 %v22215_v18  ;;  %v22248_v25 = vld [vmem:[%s30063_s5 + $0xf5c] ss:$28 sps:$4 sm:$0xff]  }
 0x692   : > { %10558 = vmatprep.subr.bf16.mxu0 %v22218_v27  ;;  %v22243_v18 = vld [vmem:[%s30063_s5 + $0xeb8] ss:$28 sps:$4 sm:$0xff]   ;;  %v27362_v27 = vpop.f32.mrf.mxu1 }
 0x694   : > { %10651 = vmatpush1.bf16.msra.mxu1 %v22213_v16  ;;  %v22246_v16 = vld [vmem:[%s30063_s5 + $0xf58] ss:$28 sps:$4 sm:$0xff]  }
 0x695   : > { %10559 = vmatpush1.bf16.msra.mxu0 %v22216_v61  ;;  %10652 = vmatprep.subr.bf16.mxu1 %v22221_v20  ;;  %v22251_v61 = vld [vmem:[%s30063_s5 + $0xe84] ss:$28 sps:$4 sm:$0xff]   ;;  %v7783_v20 = vadd.f32 %v26935_v44, %v26721_v45  ;;  %v22257_v44 = vld [vmem:[%s30063_s5 + $0xe4c] ss:$28 sps:$4 sm:$0xff]  }
 0x696   : > { %10560 = vmatprep.subr.bf16.mxu0 %v22224_v54  ;;  %v22254_v54 = vld [vmem:[%s30063_s5 + $0xf24] ss:$28 sps:$4 sm:$0xff]  }
 0x697   : > { %v22252_v45 = vld [vmem:[%s30063_s5 + $0xf20] ss:$28 sps:$4 sm:$0xff]  }
 0x698   : > { %10653 = vmatpush2.bf16.msra.mxu1 %v22219_v3 }
 0x699   : > { %10561 = vmatpush1.bf16.msra.mxu0 %v22222_v12  ;;  %10654 = vmatprep.subr.bf16.mxu1 %v22227_v56  ;;  %v7785_v12 = vadd.f32 %v26949_v38, %v26735_v21  ;;  %v7787_v21 = vadd.f32 %v26963_v59, %v26747_v43  ;;  %v22258_v43 = vld [vmem:[%s30063_s5 + $0xee8] ss:$28 sps:$4 sm:$0xff]   ;;  %v22263_v59 = vld [vmem:[%s30063_s5 + $0xe14] ss:$28 sps:$4 sm:$0xff]  }
 0x69a   : > { %10562 = vmatprep.subr.bf16.mxu0 %v22230_v23  ;;  %v22249_v23 = vld [vmem:[%s30063_s5 + $0xe80] ss:$28 sps:$4 sm:$0xff]  }
 0x69c   : > { %10655 = vmatpush2.bf16.msra.mxu1 %v22225_v28 }
 0x69d   : > { %10563 = vmatpush1.bf16.msra.mxu0 %v22228_v4  ;;  %10656 = vmatprep.subr.bf16.mxu1 %v22233_v50  ;;  %v22260_v4 = vld [vmem:[%s30063_s5 + $0xeec] ss:$28 sps:$4 sm:$0xff]  }
 0x69e   : > { %10564 = vmatprep.subr.bf16.mxu0 %v22236_v52  ;;  %v7789_v52 = vadd.f32 %v26977_v1, %v26759_v26  ;;  %v22266_v1 = vld [vmem:[%s30063_s5 + $0xeb4] ss:$28 sps:$4 sm:$0xff]  }
 0x6a0   : > { %10657 = vmatpush2.bf16.msra.mxu1 %v22231_v55 }
 0x6a1   : > { %10565 = vmatpush1.bf16.msra.mxu0 %v22234_v41  ;;  %10658 = vmatprep.subr.bf16.mxu1 %v22239_v62  ;;  %v22255_v41 = vld [vmem:[%s30063_s5 + $0xe48] ss:$28 sps:$4 sm:$0xff]  }
 0x6a2   : > { %10566 = vmatprep.subr.bf16.mxu0 %v22242_v8  ;;  %v27408_v8 = vpop.f32.mrf.mxu0 }
 0x6a4   : > { %10659 = vmatpush2.bf16.msra.mxu1 %v22237_v51  ;;  %v22261_v51 = vld [vmem:[%s30063_s5 + $0xe10] ss:$28 sps:$4 sm:$0xff]  }
 0x6a5   : > { %10567 = vmatpush2.bf16.msra.mxu0 %v22240_v29  ;;  %10660 = vmatprep.subr.bf16.mxu1 %v22245_v15  ;;  %v22264_v29 = vld [vmem:[%s30063_s5 + $0xeb0] ss:$28 sps:$4 sm:$0xff]   ;;  %v27421_v15 = vpop.f32.mrf.mxu0 }
 0x6a6   : > { %10568 = vmatprep.subr.bf16.mxu0 %v22248_v25  ;;  %v22270_v25 = vld [vmem:[%s30063_s5 + $0xe7c] ss:$28 sps:$4 sm:$0xff]  }
 0x6a7   : > { %v9090_v3 = vpop.f32.mrf.mxu1 }
 0x6a8   : > { %v27377_v56 = vadd.f32 %v9090_v3, %v7783_v20  ;;  %10661 = vmatpush2.bf16.msra.mxu1 %v22243_v18  ;;  %v7697_v18 = vadd.f32 %v26678_v33, %v26878_v53  ;;  %v7699_v20 = vadd.f32 %v26692_v47, %v26894_v49  ;;  %v22268_v3 = vld [vmem:[%s30063_s5 + $0xe78] ss:$28 sps:$4 sm:$0xff]   ;;  %v22274_v33 = vld [vmem:[%s30063_s5 + $0xe44] ss:$28 sps:$4 sm:$0xff]   ;;  %v7701_v53 = vadd.f32 %v26703_v46, %v26908_v36 }
 0x6a9   : > { %v9092_v28 = vpop.f32.mrf.mxu1  ;;  %10569 = vmatpush2.bf16.msra.mxu0 %v22246_v16  ;;  %10662 = vmatprep.subr.bf16.mxu1 %v22251_v61  ;;  %v22267_v61 = vld [vmem:[%s30063_s5 + $0x1160] ss:$28 sps:$4 sm:$0xff]   ;;  %v22271_v49 = vld [vmem:[%s30063_s5 + $0x1128] ss:$28 sps:$4 sm:$0xff]  }
 0x6aa   : > { %v27390_v38 = vadd.f32 %v9092_v28, %v7785_v12  ;;  %10570 = vmatprep.subr.bf16.mxu0 %v22254_v54  ;;  %v7703_v28 = vadd.f32 %v26715_v10, %v26922_v22  ;;  %v22272_v46 = vld [vmem:[%s30063_s5 + $0xe40] ss:$28 sps:$4 sm:$0xff]   ;;  %v22275_v10 = vld [vmem:[%s30063_s5 + $0x10f0] ss:$28 sps:$4 sm:$0xff]  }
 0x6ab   : > { %v9094_v50 = vpop.f32.mrf.mxu1 }
 0x6ac   : > { %v27397_v55 = vadd.f32 %v9094_v50, %v7787_v21  ;;  %10663 = vmatpush2.bf16.msra.mxu1 %v22249_v23  ;;  %v22282_v50 = vld [vmem:[%s30063_s5 + $0x115c] ss:$28 sps:$4 sm:$0xff]  }
 0x6ad   : > { %v9096_v62 = vpop.f32.mrf.mxu1  ;;  %10571 = vmatpush2.bf16.msra.mxu0 %v22252_v45  ;;  %10664 = vmatprep.subr.bf16.mxu1 %v22257_v44  ;;  %v22278_v44 = vld [vmem:[%s30063_s5 + $0xe0c] ss:$28 sps:$4 sm:$0xff]  }
 0x6ae   : > { %v27410_v26 = vadd.f32 %v9096_v62, %v7789_v52  ;;  %10572 = vmatprep.subr.bf16.mxu0 %v22260_v4  ;;  %v22276_v4 = vld [vmem:[%s30063_s5 + $0xe08] ss:$28 sps:$4 sm:$0xff]   ;;  %v22279_v52 = vld [vmem:[%s30063_s5 + $0x10b8] ss:$28 sps:$4 sm:$0xff]   ;;  %v22283_v62 = vld [vmem:[%s30063_s5 + $0x1080] ss:$28 sps:$4 sm:$0xff]  }
 0x6b0   : > { %10665 = vmatpush2.bf16.msra.mxu1 %v22255_v41  ;;  %v22286_v41 = vld [vmem:[%s30063_s5 + $0x1124] ss:$28 sps:$4 sm:$0xff]  }
 0x6b1   : > { %10573 = vmatpush2.bf16.msra.mxu0 %v22258_v43  ;;  %10666 = vmatprep.subr.bf16.mxu1 %v22263_v59  ;;  %v22284_v43 = vld [vmem:[%s30063_s5 + $0x1120] ss:$28 sps:$4 sm:$0xff]   ;;  %v22290_v59 = vld [vmem:[%s30063_s5 + $0x10ec] ss:$28 sps:$4 sm:$0xff]  }
 0x6b2   : > { %10574 = vmatprep.subr.bf16.mxu0 %v22266_v1  ;;  %v22287_v1 = vld [vmem:[%s30063_s5 + $0x1048] ss:$28 sps:$4 sm:$0xff]  }
 0x6b4   : > { %10667 = vmatpush2.bf16.msra.mxu1 %v22261_v51  ;;  %v9004_v16 = vpop.f32.mrf.mxu0  ;;  %v22294_v51 = vld [vmem:[%s30063_s5 + $0x10b4] ss:$28 sps:$4 sm:$0xff]  }
 0x6b5   : > { %v27433_v54 = vadd.f32 %v9004_v16, %v7697_v18  ;;  %10575 = vmatpush2.bf16.msra.mxu0 %v22264_v29  ;;  %10763 = vmatprep.subr.bf16.mxu1 %v30109_v14  ;;  %v22291_v29 = vld [vmem:[%s30063_s5 + $0x1010] ss:$28 sps:$4 sm:$0xff]   ;;  %v22298_v18 = vld [vmem:[%s30063_s5 + $0x107c] ss:$28 sps:$4 sm:$0xff]  }
 0x6b6   : > { %v9006_v12 = vpop.f32.mrf.mxu0  ;;  %10576 = vmatprep.subr.bf16.mxu0 %v22270_v25  ;;  %v22292_v25 = vld [vmem:[%s30063_s5 + $0x10b0] ss:$28 sps:$4 sm:$0xff]   ;;  %v22295_v16 = vld [vmem:[%s30063_s5 + $0xfd8] ss:$28 sps:$4 sm:$0xff]  }
 0x6b7   : > { %v27444_v23 = vadd.f32 %v9006_v12, %v7699_v20  ;;  %10669 = vmatmul.mubr.bf16.vlgmr.msra.gmra.mxu1 %v26104_v5  ;;  %v22302_v20 = vld [vmem:[%s30063_s5 + $0x1044] ss:$28 sps:$4 sm:$0xff]  }
 0x6b8   : > { %10764 = vmatpush1.bf16.msra.mxu1 %v22267_v61  ;;  %19008 = vmatprep.mubr.msk.bf16.mxu1 %vm7530_vm8, %v26870_v9  ;;  %v9008_v47 = vpop.f32.mrf.mxu0  ;;  %v22296_v61 = vld [vmem:[%s30063_s5 + $0x1078] ss:$28 sps:$4 sm:$0xff]   ;;  %v22300_v12 = vld [vmem:[%s30063_s5 + $0x1040] ss:$28 sps:$4 sm:$0xff]  }
 0x6b9   : > { %v27454_v45 = vadd.f32 %v9008_v47, %v7701_v53  ;;  %10577 = vmatpush2.bf16.msra.mxu0 %v22268_v3  ;;  %10765 = vmatprep.subr.bf16.mxu1 %v30109_v14  ;;  %v22299_v3 = vld [vmem:[%s30063_s5 + $0x1240] ss:$28 sps:$4 sm:$0xff]   ;;  %v22303_v47 = vld [vmem:[%s30063_s5 + $0x1208] ss:$28 sps:$4 sm:$0xff]  }
 0x6ba   : > { %v9010_v36 = vpop.f32.mrf.mxu0  ;;  %10578 = vmatprep.subr.bf16.mxu0 %v22274_v33  ;;  %v22306_v33 = vld [vmem:[%s30063_s5 + $0x100c] ss:$28 sps:$4 sm:$0xff]  }
 0x6bb   : > { %v9011_v21 = vadd.f32 %v9010_v36, %v7703_v28  ;;  %v22304_v28 = vld [vmem:[%s30063_s5 + $0x1008] ss:$28 sps:$4 sm:$0xff]  }
 0x6bc   : > { %10766 = vmatpush1.bf16.msra.mxu1 %v22271_v49 }
 0x6bd   : > { %v27467_v22 = vadd.f32 %v27362_v27, %v9011_v21  ;;  %10579 = vmatpush2.bf16.msra.mxu0 %v22272_v46  ;;  %10767 = vmatprep.subr.bf16.mxu1 %v30109_v14  ;;  %v22280_v27 = vld [vmem:[%s30063_s5 + $0x1158] ss:$28 sps:$4 sm:$0xff]  }
 0x6be   : > { %10580 = vmatprep.subr.bf16.mxu0 %v22278_v44  ;;  %v22310_v46 = vld [vmem:[%s30063_s5 + $0xfd4] ss:$28 sps:$4 sm:$0xff]  }
 0x6bf   : > { %v22307_v44 = vld [vmem:[%s30063_s5 + $0x11d0] ss:$28 sps:$4 sm:$0xff]  }
 0x6c0   : > { %10768 = vmatpush1.bf16.msra.mxu1 %v22275_v10  ;;  %v22308_v10 = vld [vmem:[%s30063_s5 + $0xfd0] ss:$28 sps:$4 sm:$0xff]  }
 0x6c1   : > { %10581 = vmatpush2.bf16.msra.mxu0 %v22276_v4  ;;  %10769 = vmatprep.subr.bf16.mxu1 %v30109_v14  ;;  %v22314_v4 = vld [vmem:[%s30063_s5 + $0x123c] ss:$28 sps:$4 sm:$0xff]  }
 0x6c2   : > { %10679 = vmatprep.subr.bf16.mxu0 %v22282_v50  ;;  %v22311_v50 = vld [vmem:[%s30063_s5 + $0x1198] ss:$28 sps:$4 sm:$0xff]  }
 0x6c4   : > { %10770 = vmatpush1.bf16.msra.mxu1 %v22279_v52  ;;  %10583 = vmatmul.mubr.bf16.vlgmr.msra.gmra.mxu0 %v26104_v5  ;;  %v22312_v52 = vld [vmem:[%s30063_s5 + $0x1238] ss:$28 sps:$4 sm:$0xff]  }
 0x6c5   : > { %10680 = vmatpush1.bf16.msra.mxu0 %v22280_v27  ;;  %19007 = vmatprep.mubr.msk.bf16.mxu0 %vm7530_vm8, %v26870_v9  ;;  %v22288_v9 = vld [vmem:[%s30063_s5 + $0x10e8] ss:$28 sps:$4 sm:$0xff]  }
 0x6c6   : > { %10771 = vmatprep.subr.bf16.mxu1 %v30109_v14  ;;  %10681 = vmatprep.subr.bf16.mxu0 %v22286_v41  ;;  %v22317_v27 = vld [vmem:[%s30063_s5 + $0x1204] ss:$28 sps:$4 sm:$0xff]  }
 0x6c8   : > { %10772 = vmatpush1.bf16.msra.mxu1 %v22283_v62 }
 0x6c9   : > { %10682 = vmatpush1.bf16.msra.mxu0 %v22284_v43  ;;  %10773 = vmatprep.subr.bf16.mxu1 %v30109_v14  ;;  %v22315_v43 = vld [vmem:[%s30063_s5 + $0x1200] ss:$28 sps:$4 sm:$0xff]  }
 0x6ca   : > { %10683 = vmatprep.subr.bf16.mxu0 %v22290_v59 }
 0x6cc   : > { %10774 = vmatpush1.bf16.msra.mxu1 %v22287_v1  ;;  %v22320_v1 = vld [vmem:[%s30063_s5 + $0x11cc] ss:$28 sps:$4 sm:$0xff]  }
 0x6cd   : > { %10684 = vmatpush1.bf16.msra.mxu0 %v22288_v9  ;;  %10775 = vmatprep.subr.bf16.mxu1 %v30109_v14 }
 0x6ce   : > { %10685 = vmatprep.subr.bf16.mxu0 %v22294_v51 }
 0x6d0   : > { %10776 = vmatpush1.bf16.msra.mxu1 %v22291_v29  ;;  %v22318_v29 = vld [vmem:[%s30063_s5 + $0x11c8] ss:$28 sps:$4 sm:$0xff]  }
 0x6d1   : > { %10686 = vmatpush1.bf16.msra.mxu0 %v22292_v25  ;;  %10777 = vmatprep.subr.bf16.mxu1 %v30109_v14 }
 0x6d2   : > { %10687 = vmatprep.subr.bf16.mxu0 %v22298_v18 }
 0x6d4   : > { %10778 = vmatpush1.bf16.msra.mxu1 %v22295_v16  ;;  %v22324_v16 = vld [vmem:[%s30063_s5 + $0xfa0] ss:$28 sps:$4 sm:$0xff]  }
 0x6d5   : > { %10688 = vmatpush1.bf16.msra.mxu0 %v22296_v61  ;;  %10787 = vmatprep.subr.bf16.mxu1 %v30109_v14  ;;  %v22325_v61 = vld [vmem:[%s30063_s5 + $0xde0] ss:$28 sps:$4 sm:$0xff]  }
 0x6d6   : > { %10689 = vmatprep.subr.bf16.mxu0 %v22302_v20  ;;  %v22327_v20 = vld [vmem:[%s30063_s5 + $0xda8] ss:$28 sps:$4 sm:$0xff]  }
 0x6d7   : > { %v27539_v53 = vpop.f32.mrf.mxu1 }
 0x6d8   : > { %10788 = vmatpush2.bf16.msra.mxu1 %v22299_v3  ;;  %v22328_v3 = vld [vmem:[%s30063_s5 + $0xf30] ss:$28 sps:$4 sm:$0xff]  }
 0x6d9   : > { %v9219_v49 = vpop.f32.mrf.mxu1  ;;  %10690 = vmatpush1.bf16.msra.mxu0 %v22300_v12  ;;  %10789 = vmatprep.subr.bf16.mxu1 %v30109_v14  ;;  %v22329_v12 = vld [vmem:[%s30063_s5 + $0xd70] ss:$28 sps:$4 sm:$0xff]  }
 0x6da   : > { %10691 = vmatprep.subr.bf16.mxu0 %v22306_v33  ;;  %v22332_v33 = vld [vmem:[%s30063_s5 + $0xec0] ss:$28 sps:$4 sm:$0xff]   ;;  %v22334_v49 = vld [vmem:[%s30063_s5 + $0xe88] ss:$28 sps:$4 sm:$0xff]  }
 0x6db   : > { %v27551_v36 = vpop.f32.mrf.mxu1 }
 0x6dc   : > { %10790 = vmatpush2.bf16.msra.mxu1 %v22303_v47  ;;  %v22333_v47 = vld [vmem:[%s30063_s5 + $0xd00] ss:$28 sps:$4 sm:$0xff]  }
 0x6dd   : > { %v9222_v21 = vpop.f32.mrf.mxu1  ;;  %10692 = vmatpush1.bf16.msra.mxu0 %v22304_v28  ;;  %10791 = vmatprep.subr.bf16.mxu1 %v30109_v14 }
 0x6de   : > { %10693 = vmatprep.subr.bf16.mxu0 %v22310_v46  ;;  %v22335_v46 = vld [vmem:[%s30063_s5 + $0xcc8] ss:$28 sps:$4 sm:$0xff]   ;;  %v22336_v21 = vld [vmem:[%s30063_s5 + $0xe50] ss:$28 sps:$4 sm:$0xff]  }
 0x6e0   : > { %10792 = vmatpush2.bf16.msra.mxu1 %v22307_v44 }
 0x6e1   : > { %10694 = vmatpush1.bf16.msra.mxu0 %v22308_v10  ;;  %10793 = vmatprep.subr.bf16.mxu1 %v30109_v14  ;;  %v7867_v10 = vadd.f32 %v26994_v24, %v26770_v42 }
 0x6e2   : > { %10703 = vmatprep.subr.bf16.mxu0 %v22314_v4  ;;  %v20298_v4 = vadd.f32 %v27188_v39, %v27174_v6  ;;  %v22339_v39 = vld [vmem:[%s30063_s5 + $0xc58] ss:$28 sps:$4 sm:$0xff]  }
 0x6e4   : > { %10794 = vmatpush2.bf16.msra.mxu1 %v22311_v50  ;;  %v9133_v41 = vpop.f32.mrf.mxu0 }
 0x6e5   : > { %v27574_v62 = vadd.f32 %v9133_v41, %v27377_v56  ;;  %10704 = vmatpush2.bf16.msra.mxu0 %v22312_v52  ;;  %v22337_v41 = vld [vmem:[%s30063_s5 + $0xc90] ss:$28 sps:$4 sm:$0xff]  }
 0x6e6   : > { %v9135_v59 = vpop.f32.mrf.mxu0  ;;  %10705 = vmatprep.subr.bf16.mxu0 %v22317_v27 }
 0x6e7   : > { %v27583_v9 = vadd.f32 %v9135_v59, %v27390_v38  ;;  %10796 = vmatmul.mubr.bf16.vlgmr.msra.gmra.mxu1 %v27042_v57  ;;  %v22323_v38 = vld [vmem:[%s30063_s5 + $0x1194] ss:$28 sps:$4 sm:$0xff]  }
 0x6e8   : > { %v9137_v51 = vpop.f32.mrf.mxu0  ;;  %11115 = vmatprep.mubr.bf16.mxu1 %v30109_v14  ;;  %v22338_v59 = vld [vmem:[%s30063_s5 + $0xe18] ss:$28 sps:$4 sm:$0xff]  }
 0x6e9   : > { %v27588_v56 = vadd.f32 %v9137_v51, %v27397_v55  ;;  %10706 = vmatpush2.bf16.msra.mxu0 %v22315_v43  ;;  %v22321_v55 = vld [vmem:[%s30063_s5 + $0x1190] ss:$28 sps:$4 sm:$0xff]  }
 0x6ea   : > { %v9139_v25 = vpop.f32.mrf.mxu0  ;;  %10707 = vmatprep.subr.bf16.mxu0 %v22320_v1  ;;  %v7870_v1 = vadd.f32 %v20298_v4, %v26783_v7 }
 0x6eb   : > { %v27597_v18 = vadd.f32 %v9139_v25, %v27410_v26  ;;  %v22326_v26 = vld [vmem:[%s30063_s5 + $0xf68] ss:$28 sps:$4 sm:$0xff]  }
 0x6ed   : > { %10708 = vmatpush2.bf16.msra.mxu0 %v22318_v29 }
 0x6ee   : > { %10709 = vmatprep.subr.bf16.mxu0 %v22323_v38  ;;  %v27670_v38 = vld [vmem:[%s30064_s6] sm:$0xff] }
 0x6f1   : > { %10710 = vmatpush2.bf16.msra.mxu0 %v22321_v55 }
 0x6f2   : > { %20321 = vmatprep.subr.bf16.mxu0 %v22324_v16 }
 0x6f4   : > { %10712 = vmatmul.mubr.bf16.vlgmr.msra.gmra.mxu0 %v27042_v57  ;;  %v22330_v57 = vld [vmem:[%s30063_s5 + $0xef8] ss:$28 sps:$4 sm:$0xff]  }
 0x6f5   : > { %20322 = vmatpush3.bf16.msra.mxu0 %v22325_v61  ;;  %10754 = vmatprep.mubr.bf16.mxu0 %v27034_v17  ;;  %v22331_v17 = vld [vmem:[%s30063_s5 + $0xd38] ss:$28 sps:$4 sm:$0xff]  }
 0x6f6   : > { %20323 = vmatprep.subr.bf16.mxu0 %v22326_v26 }
 0x6f9   : > { %20324 = vmatpush3.bf16.msra.mxu0 %v22327_v20 }
 0x6fa   : > { %20325 = vmatprep.subr.bf16.mxu0 %v22328_v3 }
 0x6fd   : > { %20326 = vmatpush3.bf16.msra.mxu0 %v22329_v12 }
 0x6fe   : > { %20327 = vmatprep.subr.bf16.mxu0 %v22330_v57 }
 0x701   : > { %20328 = vmatpush3.bf16.msra.mxu0 %v22331_v17 }
 0x702   : > { %20329 = vmatprep.subr.bf16.mxu0 %v22332_v33 }
 0x704   : > { %v20315_v28 = vpop.f32.mrf.mxu0 }
 0x705   : > { %20330 = vmatpush3.bf16.msra.mxu0 %v22333_v47 }
 0x706   : > { %v20316_v44 = vpop.f32.mrf.mxu0  ;;  %20331 = vmatprep.subr.bf16.mxu0 %v22334_v49 }
 0x707   : > { %v20317_v50 = vadd.f32 %v20316_v44, %v20315_v28  ;;  %v10541_v7 = vpop.f32.mrf.mxu1 }
 0x708   : > { %v20318_v52 = vpop.f32.mrf.mxu0 }
 0x709   : > { %v9177_v27 = vadd.f32 %v20317_v50, %v7867_v10  ;;  %20332 = vmatpush3.bf16.msra.mxu0 %v22335_v46  ;;  %v10543_v29 = vpop.f32.mrf.mxu1 }
 0x70a   : > { %v20319_v43 = vpop.f32.mrf.mxu0  ;;  %20333 = vmatprep.subr.bf16.mxu0 %v22336_v21 }
 0x70b   : > { %v27655_v42 = vadd.f32 %v27539_v53, %v9177_v27  ;;  %v20320_v24 = vadd.f32 %v20319_v43, %v20318_v52  ;;  %v7615_v53 = vadd.f32 %v26856_v11, %v26653_v63  ;;  %v30116_v63 = vsub.s32 0, %v23937_v30  ;;  %v27697_v43 = vld [vmem:[%s30065_s7 + $0x4] sm:$0xf] }
 0x70d   : > { %v9180_v6 = vadd.f32 %v20320_v24, %v7870_v1  ;;  %20334 = vmatpush3.bf16.msra.mxu0 %v22337_v41  ;;  %v8923_v55 = vadd.f32 %v27408_v8, %v7615_v53  ;;  %v10823_v11 = vrot.slane %v27670_v38, %v30116_v63  ;;  %v9050_v53 = vadd.f32 %v27334_v2, %v27444_v23 }
 0x70e   : > { %20335 = vmatprep.subr.bf16.mxu0 %v22338_v59 }
 0x70f   : > { %v27661_v51 = vadd.f32 %v27551_v36, %v9180_v6  ;;  %v7617_v36 = vadd.f32 %v26872_v19, %v26667_v60  ;;  %v8966_v57 = vadd.f32 %v27301_v34, %v8923_v55  ;;  %v30117_v60 = vsub.s32 1, %v23937_v30 }
 0x710   : > { %v9048_v6 = vadd.f32 %v27320_v40, %v27433_v54 }
 0x711   : > { %20336 = vmatpush3.bf16.msra.mxu0 %v22339_v39  ;;  %v8925_v26 = vadd.f32 %v27421_v15, %v7617_v36  ;;  %v10827_v19 = vrot.slane %v27670_v38, %v30117_v60  ;;  %v30118_v36 = vsub.s32 2, %v23937_v30 }
 0x713   : > { %v8968_v15 = vadd.f32 %v27315_v31, %v8925_v26  ;;  %v27692_v31 = vld [vmem:[%s30065_s7] sm:$0xf]  ;;  %v10831_v55 = vrot.slane %v27670_v38, %v30118_v36 }
 0x714   : > { %10755 = vmatmul.mubr.bf16.vlgmr.msra.gmra.mxu0 %v26104_v5  ;;  %v10545_v5 = vpop.f32.mrf.mxu1 }
 0x715   : > { %10947 = vmatprep.mubr.bf16.mxu0 %v30109_v14 }
 0x716   : > { %v10547_v33 = vpop.f32.mrf.mxu1 }
 0x737   : > { %v10627_v59 = vpop.f32.mrf.mxu1 }
 0x739   : > { %v10629_v1 = vpop.f32.mrf.mxu1 }
 0x744   : > { %v10498_v25 = vpop.f32.mrf.mxu0 }
 0x745   : > { %v10542_v16 = vadd.f32 %v10541_v7, %v10498_v25  ;;  %v10631_v7 = vpop.f32.mrf.mxu1 }
 0x746   : > { %v10500_v61 = vpop.f32.mrf.mxu0 }
 0x747   : > { %v10804_v20 = vadd.f32 %v10542_v16, %v27209_v58  ;;  %v10544_v3 = vadd.f32 %v10543_v29, %v10500_v61  ;;  %v9052_v61 = vadd.f32 %v27348_v0, %v27454_v45  ;;  %v10633_v63 = vpop.f32.mrf.mxu1 }
 0x748   : > { %v10502_v12 = vpop.f32.mrf.mxu0 }
 0x749   : > { %v10805_v17 = vadd.f32 %v10544_v3, %v27216_v32  ;;  %v10546_v8 = vadd.f32 %v10545_v5, %v10502_v12  ;;  %v10855_v58 = vadd.f32 %v10823_v11, %v10804_v20  ;;  %v30119_v20 = vsub.s32 3, %v23937_v30  ;;  %v22363_v30 = vld [vmem:[%s30066_s8 + $0x4] ss:$16 sps:$4 sm:$0xff]  }
 0x74a   : > { %v10504_v47 = vpop.f32.mrf.mxu0 }
 0x74b   : > { %v10811_v49 = vadd.f32 %v10546_v8, %v8966_v57  ;;  %v10548_v28 = vadd.f32 %v10547_v33, %v10504_v47  ;;  %v10856_v46 = vadd.f32 %v10827_v19, %v10805_v17  ;;  %v10869_v10 = vmax.f32 %v10855_v58, 0.0 }
 0x74c   : > { %v10835_v40 = vrot.slane %v27670_v38, %v30119_v20  ;;  %v22343_v20 = vld [vmem:[%s30066_s8 + $0xc0] ss:$16 sps:$4 sm:$0xff]  }
 0x74d   : > { %v10862_v44 = vadd.f32 %v10823_v11, %v10811_v49  ;;  %v10812_v21 = vadd.f32 %v10548_v28, %v8968_v15  ;;  %v10870_v50 = vmax.f32 %v10856_v46, 0.0 }
 0x74f   : > { %v10876_v4 = vmax.f32 %v10862_v44, 0.0  ;;  %v10863_v34 = vadd.f32 %v10827_v19, %v10812_v21 }
 0x751   : > { %v10877_v32 = vmax.f32 %v10863_v34, 0.0  ;;  %v10884_v52 = vpack.c.bf16 %v10876_v4, %v10869_v10 }
 0x753   : > { %v10885_v27 = vpack.c.bf16 %v10877_v32, %v10870_v50  ;;  %v10895_v41 = vsel %vm1496_vm3, %v10884_v52, 0  ;;  %v10839_v52 = vrot.slane %v27670_v38, %v1981_v48 }
 0x755   : > { %19009 = vmatprep.subr.msk.bf16.mxu0 %vm1496_vm3, %v10885_v27  ;;  %19017 = vmatprep.subr.msk.bf16.mxu1 %vm1496_vm3, %v10885_v27 }
 0x756   : > { %10930 = vmatpush1.bf16.msra.mxu0 %v10895_v41  ;;  %11098 = vmatpush1.bf16.msra.mxu1 %v10895_v41 }
 0x759   : > { %19010 = vmatmul.mubr.msk.bf16.vlgmr.msra.gmra.mxu0 %vm5869_vm7, %v27692_v31  ;;  %19018 = vmatmul.mubr.msk.bf16.vlgmr.msra.gmra.mxu1 %vm5869_vm7, %v27697_v43 }
 0x75a   : > { %10988 = vmatprep.mubr.bf16.mxu0 %v30109_v14  ;;  %11197 = vmatprep.mubr.bf16.mxu1 %v30109_v14 }
 0x777   : > { %v10670_v58 = vpop.f32.mrf.mxu1 }
 0x784   : > { %v10584_v24 = vpop.f32.mrf.mxu0 }
 0x785   : > { %v10628_v39 = vadd.f32 %v10627_v59, %v10584_v24 }
 0x786   : > { %v10586_v29 = vpop.f32.mrf.mxu0 }
 0x787   : > { %v10806_v25 = vadd.f32 %v10628_v39, %v9048_v6  ;;  %v10630_v16 = vadd.f32 %v10629_v1, %v10586_v29  ;;  %v10843_v1 = vrot.slane %v27670_v38, %v1985_v37  ;;  %v22342_v37 = vld [vmem:[%s30066_s8 + $0xe4] ss:$16 sps:$4 sm:$0xff]  }
 0x788   : > { %v10588_v5 = vpop.f32.mrf.mxu0 }
 0x789   : > { %v10807_v26 = vadd.f32 %v10630_v16, %v9050_v53  ;;  %v10632_v54 = vadd.f32 %v10631_v7, %v10588_v5  ;;  %v10857_v3 = vadd.f32 %v10831_v55, %v10806_v25 }
 0x78a   : > { %v10590_v11 = vpop.f32.mrf.mxu0 }
 0x78b   : > { %v10813_v2 = vadd.f32 %v10632_v54, %v9052_v61  ;;  %v10634_v23 = vadd.f32 %v10633_v63, %v10590_v11  ;;  %v10858_v12 = vadd.f32 %v10835_v40, %v10807_v26  ;;  %v10871_v60 = vmax.f32 %v10857_v3, 0.0  ;;  %v22345_v26 = vld [vmem:[%s30066_s8 + $0xc4] ss:$16 sps:$4 sm:$0xff]   ;;  %v22346_v54 = vld [vmem:[%s30066_s8 + $0xa0] ss:$16 sps:$4 sm:$0xff]  }
 0x78c   : > { %v22351_v63 = vld [vmem:[%s30066_s8 + $0x84] ss:$16 sps:$4 sm:$0xff]   ;;  %v22349_v11 = vld [vmem:[%s30066_s8 + $0x80] ss:$16 sps:$4 sm:$0xff]  }
 0x78d   : > { %v10864_v57 = vadd.f32 %v10831_v55, %v10813_v2  ;;  %v10814_v17 = vadd.f32 %v10634_v23, %v27467_v22  ;;  %v10872_v33 = vmax.f32 %v10858_v12, 0.0  ;;  %v10672_v22 = vpop.f32.mrf.mxu1  ;;  %v22354_v3 = vld [vmem:[%s30066_s8 + $0x64] ss:$16 sps:$4 sm:$0xff]   ;;  %v22352_v12 = vld [vmem:[%s30066_s8 + $0x60] ss:$16 sps:$4 sm:$0xff]  }
 0x78f   : > { %v10878_v19 = vmax.f32 %v10864_v57, 0.0  ;;  %v10865_v8 = vadd.f32 %v10835_v40, %v10814_v17  ;;  %v10674_v49 = vpop.f32.mrf.mxu1  ;;  %v22348_v40 = vld [vmem:[%s30066_s8 + $0xa4] ss:$16 sps:$4 sm:$0xff]  }
 0x790   : > { %v22357_v17 = vld [vmem:[%s30066_s8 + $0x44] ss:$16 sps:$4 sm:$0xff]  }
 0x791   : > { %v10879_v0 = vmax.f32 %v10865_v8, 0.0  ;;  %v10886_v45 = vpack.c.bf16 %v10878_v19, %v10871_v60  ;;  %v10676_v28 = vpop.f32.mrf.mxu1 }
 0x793   : > { %v27718_v47 = vpack.c.bf16 %v10879_v0, %v10872_v33  ;;  %v27723_v15 = vsel %vm1496_vm3, %v10886_v45, 0  ;;  %v22355_v33 = vld [vmem:[%s30066_s8 + $0x40] ss:$16 sps:$4 sm:$0xff]   ;;  %v10847_v45 = vrot.slane %v27670_v38, %v1989_v13 }
 0x794   : > { %v22361_v38 = vld [vmem:[%s30066_s8] ss:$16 sps:$4 sm:$0xff]  }
 0x795   : > { %19011 = vmatprep.subr.msk.bf16.mxu0 %vm1496_vm3, %v27718_v47 }
 0x796   : > { %10971 = vmatpush1.bf16.msra.mxu0 %v27723_v15 }
 0x799   : > { %19012 = vmatmul.mubr.msk.bf16.vlgmr.msra.gmra.mxu0 %vm5869_vm7, %v27692_v31 }
 0x79a   : > { %11029 = vmatprep.mubr.bf16.mxu0 %v30109_v14 }
 0x7a7   : > { %v10797_v46 = vpop.f32.mrf.mxu1 }
 0x7a9   : > { %v10799_v44 = vpop.f32.mrf.mxu1 }
 0x7ab   : > { %v27729_v21 = vpop.f32.mrf.mxu1 }
 0x7ad   : > { %v10802_v10 = vpop.f32.mrf.mxu1 }
 0x7ae   : > { %v22366_v10 = vld [vmem:[%s30066_s8 + $0x1e4] ss:$16 sps:$4 sm:$0xff]  }
 0x7b4   : > { %v10713_v4 = vpop.f32.mrf.mxu0 }
 0x7b5   : > { %v10714_v34 = vadd.f32 %v10713_v4, %v10670_v58 }
 0x7b6   : > { %v10715_v50 = vpop.f32.mrf.mxu0 }
 0x7b7   : > { %v10808_v32 = vadd.f32 %v10714_v34, %v27574_v62  ;;  %v10716_v27 = vadd.f32 %v10715_v50, %v10672_v22  ;;  %v22360_v22 = vld [vmem:[%s30066_s8 + $0x24] ss:$16 sps:$4 sm:$0xff]  }
 0x7b8   : > { %v10717_v41 = vpop.f32.mrf.mxu0  ;;  %v22369_v50 = vld [vmem:[%s30066_s8 + $0x1c4] ss:$16 sps:$4 sm:$0xff]  }
 0x7b9   : > { %v10809_v59 = vadd.f32 %v10716_v27, %v27583_v9  ;;  %v10718_v24 = vadd.f32 %v10717_v41, %v10674_v49  ;;  %v10859_v39 = vadd.f32 %v10839_v52, %v10808_v32  ;;  %v22367_v32 = vld [vmem:[%s30066_s8 + $0x1c0] ss:$16 sps:$4 sm:$0xff]   ;;  %v22423_v27 = vld [vmem:[%s30066_s8 + $0x2e4] ss:$16 sps:$4 sm:$0xff]  }
 0x7ba   : > { %v10719_v6 = vpop.f32.mrf.mxu0  ;;  %v22378_v41 = vld [vmem:[%s30066_s8 + $0x164] ss:$16 sps:$4 sm:$0xff]  }
 0x7bb   : > { %v10815_v7 = vadd.f32 %v10718_v24, %v27588_v56  ;;  %v10720_v29 = vadd.f32 %v10719_v6, %v10676_v28  ;;  %v10860_v53 = vadd.f32 %v10843_v1, %v10809_v59  ;;  %v10873_v36 = vmax.f32 %v10859_v39, 0.0  ;;  %v22358_v28 = vld [vmem:[%s30066_s8 + $0x20] ss:$16 sps:$4 sm:$0xff]   ;;  %v22429_v6 = vld [vmem:[%s30066_s8 + $0x2c4] ss:$16 sps:$4 sm:$0xff]  }
 0x7bc   : > { %v22376_v59 = vld [vmem:[%s30066_s8 + $0x160] ss:$16 sps:$4 sm:$0xff]  }
 0x7bd   : > { %v10866_v62 = vadd.f32 %v10839_v52, %v10815_v7  ;;  %v10816_v25 = vadd.f32 %v10720_v29, %v27597_v18  ;;  %v10874_v16 = vmax.f32 %v10860_v53, 0.0  ;;  %v22340_v18 = vld [vmem:[%s30066_s8 + $0xe0] ss:$16 sps:$4 sm:$0xff]   ;;  %v22372_v52 = vld [vmem:[%s30066_s8 + $0x1a4] ss:$16 sps:$4 sm:$0xff]  }
 0x7be   : > { %v22421_v24 = vld [vmem:[%s30066_s8 + $0x2e0] ss:$16 sps:$4 sm:$0xff]   ;;  %v22384_v7 = vld [vmem:[%s30066_s8 + $0x124] ss:$16 sps:$4 sm:$0xff]  }
 0x7bf   : > { %v10880_v48 = vmax.f32 %v10866_v62, 0.0  ;;  %v10867_v55 = vadd.f32 %v10843_v1, %v10816_v25  ;;  %v22381_v1 = vld [vmem:[%s30066_s8 + $0x144] ss:$16 sps:$4 sm:$0xff]   ;;  %v22379_v39 = vld [vmem:[%s30066_s8 + $0x140] ss:$16 sps:$4 sm:$0xff]  }
 0x7c0   : > { %v22427_v29 = vld [vmem:[%s30066_s8 + $0x2c0] ss:$16 sps:$4 sm:$0xff]   ;;  %v22435_v53 = vld [vmem:[%s30066_s8 + $0x2a4] ss:$16 sps:$4 sm:$0xff]  }
 0x7c1   : > { %v10881_v5 = vmax.f32 %v10867_v55, 0.0  ;;  %v10888_v9 = vpack.c.bf16 %v10880_v48, %v10873_v36  ;;  %v22387_v62 = vld [vmem:[%s30066_s8 + $0x104] ss:$16 sps:$4 sm:$0xff]   ;;  %v22433_v25 = vld [vmem:[%s30066_s8 + $0x2a0] ss:$16 sps:$4 sm:$0xff]  }
 0x7c2   : > { %v22441_v36 = vld [vmem:[%s30066_s8 + $0x284] ss:$16 sps:$4 sm:$0xff]   ;;  %v22385_v48 = vld [vmem:[%s30066_s8 + $0x100] ss:$16 sps:$4 sm:$0xff]  }
 0x7c3   : > { %v10889_v61 = vpack.c.bf16 %v10881_v5, %v10874_v16  ;;  %v10907_v56 = vsel %vm1496_vm3, %v10888_v9, 0  ;;  %v22390_v55 = vld [vmem:[%s30066_s8 + $0x4e4] ss:$16 sps:$4 sm:$0xff]   ;;  %v22439_v16 = vld [vmem:[%s30066_s8 + $0x280] ss:$16 sps:$4 sm:$0xff]  }
 0x7c4   : > { %v22447_v5 = vld [vmem:[%s30066_s8 + $0x264] ss:$16 sps:$4 sm:$0xff]   ;;  %v22445_v9 = vld [vmem:[%s30066_s8 + $0x260] ss:$16 sps:$4 sm:$0xff]  }
 0x7c5   : > { %19013 = vmatprep.subr.msk.bf16.mxu0 %vm1496_vm3, %v10889_v61  ;;  %19021 = vmatprep.subr.msk.bf16.mxu1 %vm1496_vm3, %v10889_v61  ;;  %v22453_v61 = vld [vmem:[%s30066_s8 + $0x244] ss:$16 sps:$4 sm:$0xff]  }
 0x7c6   : > { %11012 = vmatpush1.bf16.msra.mxu0 %v10907_v56  ;;  %11180 = vmatpush1.bf16.msra.mxu1 %v10907_v56  ;;  %v22459_v56 = vld [vmem:[%s30066_s8 + $0x224] ss:$16 sps:$4 sm:$0xff]  }
 0x7c7   : > { %20574 = vmatprep.subr.bf16.mxu0 %v23279_v35  ;;  %12604 = vmatprep.subr.bf16.mxu1 %v22342_v37  ;;  %v22451_v37 = vld [vmem:[%s30066_s8 + $0x240] ss:$16 sps:$4 sm:$0xff]  }
 0x7c9   : > { %19014 = vmatmul.mubr.msk.bf16.vlgmr.msra.gmra.mxu0 %vm5869_vm7, %v27692_v31  ;;  %19022 = vmatmul.mubr.msk.bf16.vlgmr.msra.gmra.mxu1 %vm5869_vm7, %v27697_v43 }
 0x7ca   : > { %20576 = vmatprep.mubr.msk.bf16.mxu0 %vm23280_vm6, %v23279_v35  ;;  %12605 = vmatpush1.bf16.msra.mxu1 %v22340_v18  ;;  %v22457_v18 = vld [vmem:[%s30066_s8 + $0x220] ss:$16 sps:$4 sm:$0xff]  }
 0x7cb   : > { %12606 = vmatprep.subr.bf16.mxu1 %v22345_v26  ;;  %v22465_v26 = vld [vmem:[%s30066_s8 + $0x204] ss:$16 sps:$4 sm:$0xff]  }
 0x7ce   : > { %12607 = vmatpush1.bf16.msra.mxu1 %v22343_v20  ;;  %v22463_v20 = vld [vmem:[%s30066_s8 + $0x200] ss:$16 sps:$4 sm:$0xff]  }
 0x7cf   : > { %12608 = vmatprep.subr.bf16.mxu1 %v22348_v40 }
 0x7d2   : > { %12609 = vmatpush1.bf16.msra.mxu1 %v22346_v54 }
 0x7d3   : > { %12610 = vmatprep.subr.bf16.mxu1 %v22351_v63  ;;  %v22471_v63 = vld [vmem:[%s30066_s8 + $0x3e4] ss:$16 sps:$4 sm:$0xff]  }
 0x7d4   : > { %v20337_v2 = vpop.f32.mrf.mxu0 }
 0x7d6   : > { %v20338_v23 = vpop.f32.mrf.mxu0  ;;  %12611 = vmatpush1.bf16.msra.mxu1 %v22349_v11 }
 0x7d7   : > { %v20339_v57 = vadd.f32 %v20338_v23, %v20337_v2  ;;  %12612 = vmatprep.subr.bf16.mxu1 %v22354_v3  ;;  %v22469_v3 = vld [vmem:[%s30066_s8 + $0x3e0] ss:$16 sps:$4 sm:$0xff]  }
 0x7d8   : > { %v20340_v60 = vpop.f32.mrf.mxu0 }
 0x7d9   : > { %v10798_v19 = vadd.f32 %v20339_v57, %v10797_v46 }
 0x7da   : > { %v20341_v8 = vpop.f32.mrf.mxu0  ;;  %12613 = vmatpush1.bf16.msra.mxu1 %v22352_v12 }
 0x7db   : > { %v10810_v0 = vadd.f32 %v10798_v19, %v27655_v42  ;;  %v20342_v58 = vadd.f32 %v20341_v8, %v20340_v60  ;;  %12614 = vmatprep.subr.bf16.mxu1 %v22357_v17  ;;  %v22477_v19 = vld [vmem:[%s30066_s8 + $0x3c4] ss:$16 sps:$4 sm:$0xff]  }
 0x7dd   : > { %v10801_v49 = vadd.f32 %v20342_v58, %v27729_v21  ;;  %v10861_v46 = vadd.f32 %v10847_v45, %v10810_v0  ;;  %v22475_v0 = vld [vmem:[%s30066_s8 + $0x3c0] ss:$16 sps:$4 sm:$0xff]  }
 0x7de   : > { %12615 = vmatpush1.bf16.msra.mxu1 %v22355_v33  ;;  %v22388_v33 = vld [vmem:[%s30066_s8 + $0x4e0] ss:$16 sps:$4 sm:$0xff]  }
 0x7df   : > { %v10817_v42 = vadd.f32 %v10801_v49, %v27661_v51  ;;  %12616 = vmatprep.subr.bf16.mxu1 %v22360_v22  ;;  %v10875_v44 = vmax.f32 %v10861_v46, 0.0  ;;  %v22364_v51 = vld [vmem:[%s30066_s8 + $0x1e0] ss:$16 sps:$4 sm:$0xff]   ;;  %v22483_v49 = vld [vmem:[%s30066_s8 + $0x3a4] ss:$16 sps:$4 sm:$0xff]  }
 0x7e0   : > { %v22481_v46 = vld [vmem:[%s30066_s8 + $0x3a0] ss:$16 sps:$4 sm:$0xff]  }
 0x7e1   : > { %v10868_v13 = vadd.f32 %v10847_v45, %v10817_v42  ;;  %v22393_v45 = vld [vmem:[%s30066_s8 + $0x4c4] ss:$16 sps:$4 sm:$0xff]  }
 0x7e2   : > { %12617 = vmatpush1.bf16.msra.mxu1 %v22358_v28  ;;  %v22391_v28 = vld [vmem:[%s30066_s8 + $0x4c0] ss:$16 sps:$4 sm:$0xff]   ;;  %v22396_v42 = vld [vmem:[%s30066_s8 + $0x4a4] ss:$16 sps:$4 sm:$0xff]  }
 0x7e3   : > { %v10882_v21 = vmax.f32 %v10868_v13, 0.0  ;;  %12618 = vmatprep.subr.bf16.mxu1 %v22363_v30  ;;  %v22489_v30 = vld [vmem:[%s30066_s8 + $0x384] ss:$16 sps:$4 sm:$0xff]   ;;  %v22394_v13 = vld [vmem:[%s30066_s8 + $0x4a0] ss:$16 sps:$4 sm:$0xff]  }
 0x7e5   : > { %v10890_v4 = vpack.c.bf16 %v10882_v21, %v10875_v44  ;;  %v22399_v44 = vld [vmem:[%s30066_s8 + $0x484] ss:$16 sps:$4 sm:$0xff]  }
 0x7e6   : > { %12619 = vmatpush1.bf16.msra.mxu1 %v22361_v38  ;;  %v22487_v38 = vld [vmem:[%s30066_s8 + $0x380] ss:$16 sps:$4 sm:$0xff]   ;;  %v22495_v21 = vld [vmem:[%s30066_s8 + $0x364] ss:$16 sps:$4 sm:$0xff]  }
 0x7e7   : > { %v10913_v34 = vsel %vm1496_vm3, %v10890_v4, 0  ;;  %12620 = vmatprep.subr.bf16.mxu1 %v22366_v10  ;;  %v22397_v10 = vld [vmem:[%s30066_s8 + $0x480] ss:$16 sps:$4 sm:$0xff]  }
 0x7e8   : > { %20575 = vmatpush3.bf16.msra.mxu0 %v10913_v34  ;;  %v22493_v4 = vld [vmem:[%s30066_s8 + $0x360] ss:$16 sps:$4 sm:$0xff]  }
 0x7e9   : > { %19019 = vmatprep.subr.msk.bf16.mxu0 %vm1496_vm3, %v27718_v47  ;;  %v22370_v47 = vld [vmem:[%s30066_s8 + $0x1a0] ss:$16 sps:$4 sm:$0xff]  }
 0x7ea   : > { %12621 = vmatpush2.bf16.msra.mxu1 %v22364_v51  ;;  %v22402_v51 = vld [vmem:[%s30066_s8 + $0x464] ss:$16 sps:$4 sm:$0xff]  }
 0x7eb   : > { %20577 = vmatmul.mubr.msk.bf16.vlgmr.msra.gmra.mxu0 %vm5869_vm7, %v27692_v31  ;;  %12622 = vmatprep.subr.bf16.mxu1 %v22369_v50  ;;  %v22375_v31 = vld [vmem:[%s30066_s8 + $0x184] ss:$16 sps:$4 sm:$0xff]   ;;  %v22400_v50 = vld [vmem:[%s30066_s8 + $0x460] ss:$16 sps:$4 sm:$0xff]  }
 0x7ec   : > { %11139 = vmatpush1.bf16.msra.mxu0 %v27723_v15  ;;  %11156 = vmatprep.mubr.bf16.mxu0 %v30109_v14  ;;  %v22373_v15 = vld [vmem:[%s30066_s8 + $0x180] ss:$16 sps:$4 sm:$0xff]  }
 0x7ed   : > { %20580 = vmatprep.subr.bf16.mxu0 %v23279_v35 }
 0x7ee   : > { %12623 = vmatpush2.bf16.msra.mxu1 %v22367_v32  ;;  %v22499_v32 = vld [vmem:[%s30066_s8 + $0x340] ss:$16 sps:$4 sm:$0xff]  }
 0x7ef   : > { %12624 = vmatprep.subr.bf16.mxu1 %v22372_v52  ;;  %v22405_v52 = vld [vmem:[%s30066_s8 + $0x444] ss:$16 sps:$4 sm:$0xff]  }
 0x7f2   : > { %12625 = vmatpush2.bf16.msra.mxu1 %v22370_v47  ;;  %v22507_v47 = vld [vmem:[%s30066_s8 + $0x324] ss:$16 sps:$4 sm:$0xff]  }
 0x7f3   : > { %19020 = vmatmul.mubr.msk.bf16.vlgmr.msra.gmra.mxu0 %vm5869_vm7, %v27697_v43  ;;  %12626 = vmatprep.subr.bf16.mxu1 %v22375_v31  ;;  %v22403_v31 = vld [vmem:[%s30066_s8 + $0x440] ss:$16 sps:$4 sm:$0xff]  }
 0x7f4   : > { %20581 = vmatpush3.bf16.msra.mxu0 %v10913_v34  ;;  %20582 = vmatprep.mubr.msk.bf16.mxu0 %vm23280_vm6, %v23279_v35  ;;  %v22501_v34 = vld [vmem:[%s30066_s8 + $0x344] ss:$16 sps:$4 sm:$0xff]  }
 0x7f5   : > { %12645 = vmatprep.subr.bf16.mxu0 %v22423_v27  ;;  %v22505_v27 = vld [vmem:[%s30066_s8 + $0x320] ss:$16 sps:$4 sm:$0xff]  }
 0x7f6   : > { %12627 = vmatpush2.bf16.msra.mxu1 %v22373_v15  ;;  %v22408_v15 = vld [vmem:[%s30066_s8 + $0x424] ss:$16 sps:$4 sm:$0xff]  }
 0x7f7   : > { %12628 = vmatprep.subr.bf16.mxu1 %v22378_v41  ;;  %v22513_v41 = vld [vmem:[%s30066_s8 + $0x304] ss:$16 sps:$4 sm:$0xff]  }
 0x7fa   : > { %12629 = vmatpush2.bf16.msra.mxu1 %v22376_v59  ;;  %v22406_v59 = vld [vmem:[%s30066_s8 + $0x420] ss:$16 sps:$4 sm:$0xff]  }
 0x7fb   : > { %20583 = vmatmul.mubr.msk.bf16.vlgmr.msra.gmra.mxu0 %vm5869_vm7, %v27697_v43  ;;  %12630 = vmatprep.subr.bf16.mxu1 %v22381_v1  ;;  %v22382_v43 = vld [vmem:[%s30066_s8 + $0x120] ss:$16 sps:$4 sm:$0xff]  }
 0x7fc   : > { %12646 = vmatpush1.bf16.msra.mxu0 %v22421_v24  ;;  %v22511_v1 = vld [vmem:[%s30066_s8 + $0x300] ss:$16 sps:$4 sm:$0xff]   ;;  %v22411_v24 = vld [vmem:[%s30066_s8 + $0x404] ss:$16 sps:$4 sm:$0xff]  }
 0x7fd   : > { %12647 = vmatprep.subr.bf16.mxu0 %v22429_v6  ;;  %v22519_v6 = vld [vmem:[%s30066_s8 + $0x6e4] ss:$16 sps:$4 sm:$0xff]  }
 0x7fe   : > { %12631 = vmatpush2.bf16.msra.mxu1 %v22379_v39  ;;  %v22409_v39 = vld [vmem:[%s30066_s8 + $0x400] ss:$16 sps:$4 sm:$0xff]  }
 0x7ff   : > { %12632 = vmatprep.subr.bf16.mxu1 %v22384_v7  ;;  %v22414_v7 = vld [vmem:[%s30066_s8 + $0x5e4] ss:$16 sps:$4 sm:$0xff]  }
 0x800   : > { %12648 = vmatpush1.bf16.msra.mxu0 %v22427_v29  ;;  %v22412_v29 = vld [vmem:[%s30066_s8 + $0x5e0] ss:$16 sps:$4 sm:$0xff]  }
 0x801   : > { %12649 = vmatprep.subr.bf16.mxu0 %v22435_v53  ;;  %v22417_v53 = vld [vmem:[%s30066_s8 + $0x5c4] ss:$16 sps:$4 sm:$0xff]  }
 0x802   : > { %12633 = vmatpush2.bf16.msra.mxu1 %v22382_v43  ;;  %v22415_v43 = vld [vmem:[%s30066_s8 + $0x5c0] ss:$16 sps:$4 sm:$0xff]  }
 0x803   : > { %12634 = vmatprep.subr.bf16.mxu1 %v22387_v62  ;;  %v22420_v62 = vld [vmem:[%s30066_s8 + $0x5a4] ss:$16 sps:$4 sm:$0xff]  }
 0x804   : > { %12650 = vmatpush1.bf16.msra.mxu0 %v22433_v25  ;;  %v22418_v25 = vld [vmem:[%s30066_s8 + $0x5a0] ss:$16 sps:$4 sm:$0xff]  }
 0x805   : > { %12651 = vmatprep.subr.bf16.mxu0 %v22441_v36  ;;  %v22426_v36 = vld [vmem:[%s30066_s8 + $0x584] ss:$16 sps:$4 sm:$0xff]  }
 0x806   : > { %12635 = vmatpush2.bf16.msra.mxu1 %v22385_v48  ;;  %v22424_v48 = vld [vmem:[%s30066_s8 + $0x580] ss:$16 sps:$4 sm:$0xff]  }
 0x807   : > { %12686 = vmatprep.subr.bf16.mxu1 %v22390_v55  ;;  %v22432_v55 = vld [vmem:[%s30066_s8 + $0x564] ss:$16 sps:$4 sm:$0xff]  }
 0x808   : > { %12652 = vmatpush1.bf16.msra.mxu0 %v22439_v16  ;;  %v22430_v16 = vld [vmem:[%s30066_s8 + $0x560] ss:$16 sps:$4 sm:$0xff]  }
 0x809   : > { %12653 = vmatprep.subr.bf16.mxu0 %v22447_v5  ;;  %v22438_v5 = vld [vmem:[%s30066_s8 + $0x544] ss:$16 sps:$4 sm:$0xff]  }
 0x80c   : > { %12654 = vmatpush1.bf16.msra.mxu0 %v22445_v9  ;;  %v22436_v9 = vld [vmem:[%s30066_s8 + $0x540] ss:$16 sps:$4 sm:$0xff]  }
 0x80d   : > { %12655 = vmatprep.subr.bf16.mxu0 %v22453_v61  ;;  %v22444_v61 = vld [vmem:[%s30066_s8 + $0x524] ss:$16 sps:$4 sm:$0xff]  }
 0x810   : > { %12656 = vmatpush1.bf16.msra.mxu0 %v22451_v37  ;;  %v22442_v37 = vld [vmem:[%s30066_s8 + $0x520] ss:$16 sps:$4 sm:$0xff]  }
 0x811   : > { %12657 = vmatprep.subr.bf16.mxu0 %v22459_v56  ;;  %v22450_v56 = vld [vmem:[%s30066_s8 + $0x504] ss:$16 sps:$4 sm:$0xff]  }
 0x814   : > { %12658 = vmatpush1.bf16.msra.mxu0 %v22457_v18 }
 0x815   : > { %12659 = vmatprep.subr.bf16.mxu0 %v22465_v26  ;;  %v22448_v26 = vld [vmem:[%s30066_s8 + $0x500] ss:$16 sps:$4 sm:$0xff]  }
 0x818   : > { %12660 = vmatpush1.bf16.msra.mxu0 %v22463_v20 }
 0x819   : > { %v10949_v40 = vpop.f32.mrf.mxu0  ;;  %v11117_v54 = vpop.f32.mrf.mxu1  ;;  %12661 = vmatprep.subr.bf16.mxu0 %v22471_v63 }
 0x81a   : > { %v11246_v11 = vmax.f32 %v10949_v40, %v11117_v54  ;;  %v22456_v40 = vld [vmem:[%s30066_s8 + $0x2ec] ss:$16 sps:$4 sm:$0xff]  }
 0x81b   : > { %v10951_v2 = vpop.f32.mrf.mxu0  ;;  %v11119_v23 = vpop.f32.mrf.mxu1 }
 0x81c   : > { %v11247_v12 = vmax.f32 %v10951_v2, %v11119_v23  ;;  %12662 = vmatpush2.bf16.msra.mxu0 %v22469_v3  ;;  %v27924_v57 = vpack.c.bf16 %v11246_v11, %v11246_v11 }
 0x81d   : > { %v10953_v17 = vpop.f32.mrf.mxu0  ;;  %v11121_v60 = vpop.f32.mrf.mxu1  ;;  %12663 = vmatprep.subr.bf16.mxu0 %v22477_v19 }
 0x81e   : > { %v27929_v8 = vpack.c.bf16 %v11247_v12, %v11247_v12 }
 0x81f   : > { %v10954_v58 = vpop.f32.mrf.mxu0  ;;  %v11122_v22 = vpop.f32.mrf.mxu1 }
 0x820   : > { %12636 = vmatprep.mubr.bf16.mxu1 %v27929_v8  ;;  %12664 = vmatpush2.bf16.msra.mxu0 %v22475_v0  ;;  %v22462_v58 = vld [vmem:[%s30066_s8 + $0x2cc] ss:$16 sps:$4 sm:$0xff]  }
 0x821   : > { %12637 = vmatmul.mubr.bf16.vlgmr.msra.gmra.mxu1 %v27924_v57  ;;  %12665 = vmatprep.subr.bf16.mxu0 %v22483_v49 }
 0x822   : > { %12687 = vmatpush1.bf16.msra.mxu1 %v22388_v33 }
 0x823   : > { %12688 = vmatprep.subr.bf16.mxu1 %v22393_v45  ;;  %v22454_v45 = vld [vmem:[%s30066_s8 + $0x2e8] ss:$16 sps:$4 sm:$0xff]  }
 0x824   : > { %12666 = vmatpush2.bf16.msra.mxu0 %v22481_v46  ;;  %v22468_v46 = vld [vmem:[%s30066_s8 + $0x2ac] ss:$16 sps:$4 sm:$0xff]  }
 0x825   : > { %12667 = vmatprep.subr.bf16.mxu0 %v22489_v30  ;;  %v22474_v30 = vld [vmem:[%s30066_s8 + $0x28c] ss:$16 sps:$4 sm:$0xff]  }
 0x826   : > { %12689 = vmatpush1.bf16.msra.mxu1 %v22391_v28  ;;  %v22460_v28 = vld [vmem:[%s30066_s8 + $0x2c8] ss:$16 sps:$4 sm:$0xff]  }
 0x827   : > { %12690 = vmatprep.subr.bf16.mxu1 %v22396_v42  ;;  %v22466_v42 = vld [vmem:[%s30066_s8 + $0x2a8] ss:$16 sps:$4 sm:$0xff]  }
 0x828   : > { %12668 = vmatpush2.bf16.msra.mxu0 %v22487_v38  ;;  %v22480_v38 = vld [vmem:[%s30066_s8 + $0x26c] ss:$16 sps:$4 sm:$0xff]  }
 0x829   : > { %12669 = vmatprep.subr.bf16.mxu0 %v22495_v21  ;;  %v22486_v21 = vld [vmem:[%s30066_s8 + $0x24c] ss:$16 sps:$4 sm:$0xff]  }
 0x82a   : > { %12691 = vmatpush1.bf16.msra.mxu1 %v22394_v13  ;;  %v22472_v13 = vld [vmem:[%s30066_s8 + $0x288] ss:$16 sps:$4 sm:$0xff]  }
 0x82b   : > { %12692 = vmatprep.subr.bf16.mxu1 %v22399_v44  ;;  %v22478_v44 = vld [vmem:[%s30066_s8 + $0x268] ss:$16 sps:$4 sm:$0xff]  }
 0x82c   : > { %12670 = vmatpush2.bf16.msra.mxu0 %v22493_v4  ;;  %v22492_v4 = vld [vmem:[%s30066_s8 + $0x22c] ss:$16 sps:$4 sm:$0xff]  }
 0x82d   : > { %12671 = vmatprep.subr.bf16.mxu0 %v22501_v34  ;;  %v22498_v34 = vld [vmem:[%s30066_s8 + $0x20c] ss:$16 sps:$4 sm:$0xff]  }
 0x82e   : > { %12693 = vmatpush1.bf16.msra.mxu1 %v22397_v10  ;;  %v22484_v10 = vld [vmem:[%s30066_s8 + $0x248] ss:$16 sps:$4 sm:$0xff]  }
 0x82f   : > { %12694 = vmatprep.subr.bf16.mxu1 %v22402_v51  ;;  %v22490_v51 = vld [vmem:[%s30066_s8 + $0x228] ss:$16 sps:$4 sm:$0xff]  }
 0x830   : > { %12672 = vmatpush2.bf16.msra.mxu0 %v22499_v32 }
 0x831   : > { %12673 = vmatprep.subr.bf16.mxu0 %v22507_v47 }
 0x832   : > { %12695 = vmatpush1.bf16.msra.mxu1 %v22400_v50  ;;  %v22496_v50 = vld [vmem:[%s30066_s8 + $0x208] ss:$16 sps:$4 sm:$0xff]  }
 0x833   : > { %12696 = vmatprep.subr.bf16.mxu1 %v22405_v52  ;;  %v22504_v52 = vld [vmem:[%s30066_s8 + $0x3ec] ss:$16 sps:$4 sm:$0xff]  }
 0x834   : > { %12674 = vmatpush2.bf16.msra.mxu0 %v22505_v27 }
 0x835   : > { %12675 = vmatprep.subr.bf16.mxu0 %v22513_v41 }
 0x836   : > { %12697 = vmatpush1.bf16.msra.mxu1 %v22403_v31  ;;  %v22502_v31 = vld [vmem:[%s30066_s8 + $0x3e8] ss:$16 sps:$4 sm:$0xff]  }
 0x837   : > { %12698 = vmatprep.subr.bf16.mxu1 %v22408_v15  ;;  %v22510_v15 = vld [vmem:[%s30066_s8 + $0x3cc] ss:$16 sps:$4 sm:$0xff]  }
 0x838   : > { %12676 = vmatpush2.bf16.msra.mxu0 %v22511_v1 }
 0x839   : > { %12727 = vmatprep.subr.bf16.mxu0 %v22519_v6 }
 0x83a   : > { %12699 = vmatpush1.bf16.msra.mxu1 %v22406_v59  ;;  %v22508_v59 = vld [vmem:[%s30066_s8 + $0x3c8] ss:$16 sps:$4 sm:$0xff]  }
 0x83b   : > { %12700 = vmatprep.subr.bf16.mxu1 %v22411_v24  ;;  %v22516_v24 = vld [vmem:[%s30066_s8 + $0x3ac] ss:$16 sps:$4 sm:$0xff]  }
 0x83e   : > { %12701 = vmatpush1.bf16.msra.mxu1 %v22409_v39 }
 0x83f   : > { %12702 = vmatprep.subr.bf16.mxu1 %v22414_v7 }
 0x842   : > { %12703 = vmatpush2.bf16.msra.mxu1 %v22412_v29  ;;  %v22514_v29 = vld [vmem:[%s30066_s8 + $0x3a8] ss:$16 sps:$4 sm:$0xff]  }
 0x843   : > { %12704 = vmatprep.subr.bf16.mxu1 %v22417_v53 }
 0x846   : > { %12705 = vmatpush2.bf16.msra.mxu1 %v22415_v43 }
 0x847   : > { %12706 = vmatprep.subr.bf16.mxu1 %v22420_v62  ;;  %v22517_v62 = vld [vmem:[%s30066_s8 + $0x6e0] ss:$16 sps:$4 sm:$0xff]  }
 0x84a   : > { %12707 = vmatpush2.bf16.msra.mxu1 %v22418_v25  ;;  %v22522_v25 = vld [vmem:[%s30066_s8 + $0x38c] ss:$16 sps:$4 sm:$0xff]  }
 0x84b   : > { %12708 = vmatprep.subr.bf16.mxu1 %v22426_v36 }
 0x84e   : > { %12709 = vmatpush2.bf16.msra.mxu1 %v22424_v48 }
 0x84f   : > { %12710 = vmatprep.subr.bf16.mxu1 %v22432_v55  ;;  %v22525_v55 = vld [vmem:[%s30066_s8 + $0x6c4] ss:$16 sps:$4 sm:$0xff]  }
 0x852   : > { %12711 = vmatpush2.bf16.msra.mxu1 %v22430_v16  ;;  %v22520_v16 = vld [vmem:[%s30066_s8 + $0x388] ss:$16 sps:$4 sm:$0xff]  }
 0x853   : > { %12712 = vmatprep.subr.bf16.mxu1 %v22438_v5 }
 0x856   : > { %12713 = vmatpush2.bf16.msra.mxu1 %v22436_v9  ;;  %v22528_v9 = vld [vmem:[%s30066_s8 + $0x36c] ss:$16 sps:$4 sm:$0xff]  }
 0x857   : > { %12714 = vmatprep.subr.bf16.mxu1 %v22444_v61  ;;  %v22523_v61 = vld [vmem:[%s30066_s8 + $0x6c0] ss:$16 sps:$4 sm:$0xff]  }
 0x859   : > { %v28065_v18 = vpop.f32.mrf.mxu0 }
 0x85a   : > { %12715 = vmatpush2.bf16.msra.mxu1 %v22442_v37  ;;  %v22531_v37 = vld [vmem:[%s30066_s8 + $0x6a4] ss:$16 sps:$4 sm:$0xff]  }
 0x85b   : > { %v28070_v20 = vpop.f32.mrf.mxu0  ;;  %12716 = vmatprep.subr.bf16.mxu1 %v22450_v56 }
 0x85d   : > { %v10994_v54 = vpop.f32.mrf.mxu0 }
 0x85e   : > { %12717 = vmatpush2.bf16.msra.mxu1 %v22448_v26  ;;  %v22534_v26 = vld [vmem:[%s30066_s8 + $0x34c] ss:$16 sps:$4 sm:$0xff]   ;;  %v22537_v54 = vld [vmem:[%s30066_s8 + $0x684] ss:$16 sps:$4 sm:$0xff]  }
 0x85f   : > { %v10995_v63 = vpop.f32.mrf.mxu0  ;;  %12809 = vmatprep.subr.bf16.mxu1 %v22456_v40  ;;  %v22529_v40 = vld [vmem:[%s30066_s8 + $0x6a0] ss:$16 sps:$4 sm:$0xff]  }
 0x889   : > { %v11031_v11 = vpop.f32.mrf.mxu0  ;;  %v11199_v3 = vpop.f32.mrf.mxu1 }
 0x88a   : > { %v11250_v2 = vmax.f32 %v11031_v11, %v11199_v3  ;;  %v22532_v11 = vld [vmem:[%s30066_s8 + $0x348] ss:$16 sps:$4 sm:$0xff]   ;;  %v22540_v3 = vld [vmem:[%s30066_s8 + $0x32c] ss:$16 sps:$4 sm:$0xff]  }
 0x88b   : > { %v11033_v23 = vpop.f32.mrf.mxu0  ;;  %v11201_v12 = vpop.f32.mrf.mxu1 }
 0x88c   : > { %v11251_v17 = vmax.f32 %v11033_v23, %v11201_v12  ;;  %v28075_v60 = vpack.c.bf16 %v11250_v2, %v11250_v2  ;;  %v22535_v2 = vld [vmem:[%s30066_s8 + $0x680] ss:$16 sps:$4 sm:$0xff]   ;;  %v22543_v23 = vld [vmem:[%s30066_s8 + $0x664] ss:$16 sps:$4 sm:$0xff]   ;;  %v22538_v12 = vld [vmem:[%s30066_s8 + $0x328] ss:$16 sps:$4 sm:$0xff]  }
 0x88d   : > { %v11035_v19 = vpop.f32.mrf.mxu0  ;;  %v11203_v33 = vpop.f32.mrf.mxu1 }
 0x88e   : > { %v28077_v0 = vpack.c.bf16 %v11251_v17, %v11251_v17  ;;  %v22546_v17 = vld [vmem:[%s30066_s8 + $0x30c] ss:$16 sps:$4 sm:$0xff]   ;;  %v22541_v19 = vld [vmem:[%s30066_s8 + $0x660] ss:$16 sps:$4 sm:$0xff]   ;;  %v22549_v33 = vld [vmem:[%s30066_s8 + $0x644] ss:$16 sps:$4 sm:$0xff]  }
 0x88f   : > { %v11036_v22 = vpop.f32.mrf.mxu0  ;;  %v11204_v49 = vpop.f32.mrf.mxu1 }
 0x890   : > { %12718 = vmatprep.mubr.bf16.mxu1 %v28077_v0  ;;  %v22547_v22 = vld [vmem:[%s30066_s8 + $0x640] ss:$16 sps:$4 sm:$0xff]   ;;  %v22555_v49 = vld [vmem:[%s30066_s8 + $0x624] ss:$16 sps:$4 sm:$0xff]  }
 0x891   : > { %12719 = vmatmul.mubr.bf16.vlgmr.msra.gmra.mxu1 %v28075_v60 }
 0x892   : > { %12810 = vmatpush1.bf16.msra.mxu1 %v22454_v45  ;;  %v22544_v45 = vld [vmem:[%s30066_s8 + $0x308] ss:$16 sps:$4 sm:$0xff]  }
 0x893   : > { %12811 = vmatprep.subr.bf16.mxu1 %v22462_v58  ;;  %v22552_v58 = vld [vmem:[%s30066_s8 + $0x6ec] ss:$16 sps:$4 sm:$0xff]  }
 0x896   : > { %12812 = vmatpush1.bf16.msra.mxu1 %v22460_v28  ;;  %v22550_v28 = vld [vmem:[%s30066_s8 + $0x6e8] ss:$16 sps:$4 sm:$0xff]  }
 0x897   : > { %12813 = vmatprep.subr.bf16.mxu1 %v22468_v46  ;;  %v22558_v46 = vld [vmem:[%s30066_s8 + $0x6cc] ss:$16 sps:$4 sm:$0xff]  }
 0x89a   : > { %12814 = vmatpush1.bf16.msra.mxu1 %v22466_v42  ;;  %v22553_v42 = vld [vmem:[%s30066_s8 + $0x620] ss:$16 sps:$4 sm:$0xff]  }
 0x89b   : > { %12815 = vmatprep.subr.bf16.mxu1 %v22474_v30  ;;  %v22561_v30 = vld [vmem:[%s30066_s8 + $0x604] ss:$16 sps:$4 sm:$0xff]  }
 0x89e   : > { %12816 = vmatpush1.bf16.msra.mxu1 %v22472_v13  ;;  %v22556_v13 = vld [vmem:[%s30066_s8 + $0x6c8] ss:$16 sps:$4 sm:$0xff]  }
 0x89f   : > { %12817 = vmatprep.subr.bf16.mxu1 %v22480_v38  ;;  %v22564_v38 = vld [vmem:[%s30066_s8 + $0x6ac] ss:$16 sps:$4 sm:$0xff]  }
 0x8a2   : > { %12818 = vmatpush1.bf16.msra.mxu1 %v22478_v44  ;;  %v22559_v44 = vld [vmem:[%s30066_s8 + $0x600] ss:$16 sps:$4 sm:$0xff]  }
 0x8a3   : > { %12819 = vmatprep.subr.bf16.mxu1 %v22486_v21 }
 0x8a6   : > { %12820 = vmatpush1.bf16.msra.mxu1 %v22484_v10  ;;  %v22567_v10 = vld [vmem:[%s30066_s8 + $0xec] ss:$16 sps:$4 sm:$0xff]  }
 0x8a7   : > { %12821 = vmatprep.subr.bf16.mxu1 %v22492_v4  ;;  %v22562_v4 = vld [vmem:[%s30066_s8 + $0x6a8] ss:$16 sps:$4 sm:$0xff]  }
 0x8aa   : > { %12822 = vmatpush1.bf16.msra.mxu1 %v22490_v51  ;;  %v22570_v51 = vld [vmem:[%s30066_s8 + $0x68c] ss:$16 sps:$4 sm:$0xff]  }
 0x8ab   : > { %v28126_v32 = vpop.f32.mrf.mxu0  ;;  %12823 = vmatprep.subr.bf16.mxu1 %v22498_v34  ;;  %v22565_v34 = vld [vmem:[%s30066_s8 + $0xe8] ss:$16 sps:$4 sm:$0xff]  }
 0x8ad   : > { %v20578_v47 = vpop.f32.mrf.mxu0 }
 0x8ae   : > { %12824 = vmatpush1.bf16.msra.mxu1 %v22496_v50  ;;  %v22576_v47 = vld [vmem:[%s30066_s8 + $0x66c] ss:$16 sps:$4 sm:$0xff]  }
 0x8af   : > { %v11075_v27 = vpop.f32.mrf.mxu0  ;;  %12825 = vmatprep.subr.bf16.mxu1 %v22504_v52  ;;  %v22568_v52 = vld [vmem:[%s30066_s8 + $0x688] ss:$16 sps:$4 sm:$0xff]  }
 0x8b0   : > { %v22579_v27 = vld [vmem:[%s30066_s8 + $0xac] ss:$16 sps:$4 sm:$0xff]  }
 0x8b1   : > { %v20579_v41 = vpop.f32.mrf.mxu0 }
 0x8b2   : > { %12826 = vmatpush2.bf16.msra.mxu1 %v22502_v31  ;;  %v22571_v31 = vld [vmem:[%s30066_s8 + $0xc8] ss:$16 sps:$4 sm:$0xff]   ;;  %v22582_v41 = vld [vmem:[%s30066_s8 + $0x64c] ss:$16 sps:$4 sm:$0xff]  }
 0x8b3   : > { %v11158_v1 = vpop.f32.mrf.mxu0  ;;  %12827 = vmatprep.subr.bf16.mxu1 %v22510_v15  ;;  %v22574_v15 = vld [vmem:[%s30066_s8 + $0x668] ss:$16 sps:$4 sm:$0xff]  }
 0x8b4   : > { %v11248_v6 = vmax.f32 %v28065_v18, %v11158_v1  ;;  %v22526_v18 = vld [vmem:[%s30066_s8 + $0x368] ss:$16 sps:$4 sm:$0xff]   ;;  %v22585_v1 = vld [vmem:[%s30066_s8 + $0x8c] ss:$16 sps:$4 sm:$0xff]  }
 0x8b5   : > { %v11160_v39 = vpop.f32.mrf.mxu0 }
 0x8b6   : > { %v11249_v7 = vmax.f32 %v28070_v20, %v11160_v39  ;;  %12828 = vmatpush2.bf16.msra.mxu1 %v22508_v59  ;;  %v28156_v36 = vpack.c.bf16 %v11248_v6, %v11248_v6  ;;  %v22577_v59 = vld [vmem:[%s30066_s8 + $0xa8] ss:$16 sps:$4 sm:$0xff]   ;;  %v22588_v39 = vld [vmem:[%s30066_s8 + $0x62c] ss:$16 sps:$4 sm:$0xff]  }
 0x8b7   : > { %v11162_v53 = vpop.f32.mrf.mxu0  ;;  %12829 = vmatprep.subr.bf16.mxu1 %v22516_v24  ;;  %v22580_v6 = vld [vmem:[%s30066_s8 + $0x648] ss:$16 sps:$4 sm:$0xff]  }
 0x8b8   : > { %v28148_v43 = vpack.c.bf16 %v11249_v7, %v11249_v7  ;;  %v22591_v53 = vld [vmem:[%s30066_s8 + $0x6c] ss:$16 sps:$4 sm:$0xff]  }
 0x8b9   : > { %v11163_v48 = vpop.f32.mrf.mxu0 }
 0x8ba   : > { %12830 = vmatpush2.bf16.msra.mxu1 %v22514_v29  ;;  %12677 = vmatprep.mubr.bf16.mxu0 %v28148_v43  ;;  %v22583_v29 = vld [vmem:[%s30066_s8 + $0x88] ss:$16 sps:$4 sm:$0xff]   ;;  %v22594_v48 = vld [vmem:[%s30066_s8 + $0x60c] ss:$16 sps:$4 sm:$0xff]  }
 0x8bb   : > { %12841 = vmatprep.mubr.bf16.mxu1 %v28148_v43  ;;  %v11240_v5 = vpop.f32.mrf.mxu0  ;;  %12678 = vmatmul.mubr.bf16.vlgmr.msra.gmra.mxu0 %v28156_v36 }
 0x8bc   : > { %12728 = vmatpush1.bf16.msra.mxu0 %v22517_v62  ;;  %12831 = vmatprep.subr.bf16.mxu1 %v22522_v25  ;;  %v11252_v21 = vmax.f32 %v28126_v32, %v11240_v5  ;;  %v22573_v32 = vld [vmem:[%s30066_s8 + $0xcc] ss:$16 sps:$4 sm:$0xff]   ;;  %v22586_v25 = vld [vmem:[%s30066_s8 + $0x628] ss:$16 sps:$4 sm:$0xff]  }
 0x8bd   : > { %12729 = vmatprep.subr.bf16.mxu0 %v22525_v55  ;;  %v20584_v56 = vpop.f32.mrf.mxu0  ;;  %12759 = vmatprep.mubr.bf16.mxu0 %v30109_v14  ;;  %v22597_v5 = vld [vmem:[%s30066_s8 + $0x4c] ss:$16 sps:$4 sm:$0xff]  }
 0x8be   : > { %12832 = vmatpush2.bf16.msra.mxu1 %v22520_v16  ;;  %v28261_v50 = vpack.c.bf16 %v11252_v21, %v11252_v21  ;;  %v22589_v16 = vld [vmem:[%s30066_s8 + $0x68] ss:$16 sps:$4 sm:$0xff]   ;;  %v22603_v56 = vld [vmem:[%s30066_s8 + $0x2c] ss:$16 sps:$4 sm:$0xff]   ;;  %v22642_v21 = vld [vmem:[%s30066_s8 + $0x704] ss:$16 sps:$4 sm:$0xff]  }
 0x8bf   : > { %12833 = vmatprep.subr.bf16.mxu1 %v22528_v9  ;;  %v11243_v20 = vpop.f32.mrf.mxu0  ;;  %v22592_v9 = vld [vmem:[%s30066_s8 + $0x608] ss:$16 sps:$4 sm:$0xff]  }
 0x8c0   : > { %12730 = vmatpush1.bf16.msra.mxu0 %v22523_v61  ;;  %v22600_v61 = vld [vmem:[%s30066_s8 + $0x7e4] ss:$16 sps:$4 sm:$0xff]   ;;  %v22601_v20 = vld [vmem:[%s30066_s8 + $0x28] ss:$16 sps:$4 sm:$0xff]  }
 0x8c1   : > { %12731 = vmatprep.subr.bf16.mxu0 %v22531_v37  ;;  %v20585_v63 = vpop.f32.mrf.mxu0  ;;  %v22595_v37 = vld [vmem:[%s30066_s8 + $0x48] ss:$16 sps:$4 sm:$0xff]  }
 0x8c2   : > { %12834 = vmatpush2.bf16.msra.mxu1 %v22526_v18  ;;  %v22598_v18 = vld [vmem:[%s30066_s8 + $0x7e0] ss:$16 sps:$4 sm:$0xff]   ;;  %v22612_v63 = vld [vmem:[%s30066_s8 + $0x7a4] ss:$16 sps:$4 sm:$0xff]  }
 0x8c3   : > { %12835 = vmatprep.subr.bf16.mxu1 %v22534_v26  ;;  %v22606_v26 = vld [vmem:[%s30066_s8 + $0x7c4] ss:$16 sps:$4 sm:$0xff]  }
 0x8c4   : > { %12732 = vmatpush1.bf16.msra.mxu0 %v22529_v40  ;;  %v22609_v40 = vld [vmem:[%s30066_s8 + $0xc] ss:$16 sps:$4 sm:$0xff]  }
 0x8c5   : > { %12733 = vmatprep.subr.bf16.mxu0 %v22537_v54  ;;  %v22604_v54 = vld [vmem:[%s30066_s8 + $0x7c0] ss:$16 sps:$4 sm:$0xff]  }
 0x8c6   : > { %12836 = vmatpush2.bf16.msra.mxu1 %v22532_v11  ;;  %v22607_v11 = vld [vmem:[%s30066_s8 + $0x8] ss:$16 sps:$4 sm:$0xff]  }
 0x8c7   : > { %12837 = vmatprep.subr.bf16.mxu1 %v22540_v3  ;;  %v22615_v3 = vld [vmem:[%s30066_s8 + $0x1ec] ss:$16 sps:$4 sm:$0xff]  }
 0x8c8   : > { %12734 = vmatpush1.bf16.msra.mxu0 %v22535_v2  ;;  %v22610_v2 = vld [vmem:[%s30066_s8 + $0x7a0] ss:$16 sps:$4 sm:$0xff]  }
 0x8c9   : > { %12735 = vmatprep.subr.bf16.mxu0 %v22543_v23  ;;  %v22618_v23 = vld [vmem:[%s30066_s8 + $0x784] ss:$16 sps:$4 sm:$0xff]  }
 0x8ca   : > { %12838 = vmatpush2.bf16.msra.mxu1 %v22538_v12  ;;  %v22613_v12 = vld [vmem:[%s30066_s8 + $0x1e8] ss:$16 sps:$4 sm:$0xff]  }
 0x8cb   : > { %12839 = vmatprep.subr.bf16.mxu1 %v22546_v17  ;;  %v22621_v17 = vld [vmem:[%s30066_s8 + $0x1cc] ss:$16 sps:$4 sm:$0xff]  }
 0x8cc   : > { %12736 = vmatpush1.bf16.msra.mxu0 %v22541_v19  ;;  %v22616_v19 = vld [vmem:[%s30066_s8 + $0x780] ss:$16 sps:$4 sm:$0xff]  }
 0x8cd   : > { %12737 = vmatprep.subr.bf16.mxu0 %v22549_v33  ;;  %v22624_v33 = vld [vmem:[%s30066_s8 + $0x764] ss:$16 sps:$4 sm:$0xff]  }
 0x8ce   : > { %12840 = vmatpush2.bf16.msra.mxu1 %v22544_v45  ;;  %v22619_v45 = vld [vmem:[%s30066_s8 + $0x1c8] ss:$16 sps:$4 sm:$0xff]  }
 0x8cf   : > { %12891 = vmatprep.subr.bf16.mxu1 %v22552_v58  ;;  %v22627_v58 = vld [vmem:[%s30066_s8 + $0x1ac] ss:$16 sps:$4 sm:$0xff]  }
 0x8d0   : > { %12738 = vmatpush1.bf16.msra.mxu0 %v22547_v22  ;;  %v22622_v22 = vld [vmem:[%s30066_s8 + $0x760] ss:$16 sps:$4 sm:$0xff]  }
 0x8d1   : > { %12842 = vmatmul.mubr.bf16.vlgmr.msra.gmra.mxu1 %v28156_v36  ;;  %12739 = vmatprep.subr.bf16.mxu0 %v22555_v49  ;;  %v22630_v49 = vld [vmem:[%s30066_s8 + $0x744] ss:$16 sps:$4 sm:$0xff]  }
 0x8d2   : > { %12892 = vmatpush1.bf16.msra.mxu1 %v22550_v28  ;;  %12923 = vmatprep.mubr.bf16.mxu1 %v30109_v14  ;;  %v22625_v28 = vld [vmem:[%s30066_s8 + $0x1a8] ss:$16 sps:$4 sm:$0xff]  }
 0x8d3   : > { %12893 = vmatprep.subr.bf16.mxu1 %v22558_v46  ;;  %v22633_v46 = vld [vmem:[%s30066_s8 + $0x18c] ss:$16 sps:$4 sm:$0xff]  }
 0x8d4   : > { %12740 = vmatpush1.bf16.msra.mxu0 %v22553_v42  ;;  %v22628_v42 = vld [vmem:[%s30066_s8 + $0x740] ss:$16 sps:$4 sm:$0xff]  }
 0x8d5   : > { %12741 = vmatprep.subr.bf16.mxu0 %v22561_v30  ;;  %v22636_v30 = vld [vmem:[%s30066_s8 + $0x724] ss:$16 sps:$4 sm:$0xff]  }
 0x8d6   : > { %12894 = vmatpush1.bf16.msra.mxu1 %v22556_v13  ;;  %v22631_v13 = vld [vmem:[%s30066_s8 + $0x188] ss:$16 sps:$4 sm:$0xff]  }
 0x8d7   : > { %12895 = vmatprep.subr.bf16.mxu1 %v22564_v38  ;;  %v22639_v38 = vld [vmem:[%s30066_s8 + $0x16c] ss:$16 sps:$4 sm:$0xff]  }
 0x8d8   : > { %12742 = vmatpush1.bf16.msra.mxu0 %v22559_v44  ;;  %v22634_v44 = vld [vmem:[%s30066_s8 + $0x720] ss:$16 sps:$4 sm:$0xff]  }
 0x8d9   : > { %12768 = vmatprep.subr.bf16.mxu0 %v22567_v10  ;;  %v22637_v10 = vld [vmem:[%s30066_s8 + $0x168] ss:$16 sps:$4 sm:$0xff]  }
 0x8da   : > { %12896 = vmatpush1.bf16.msra.mxu1 %v22562_v4  ;;  %v22645_v4 = vld [vmem:[%s30066_s8 + $0x14c] ss:$16 sps:$4 sm:$0xff]  }
 0x8db   : > { %12760 = vmatmul.mubr.bf16.vlgmr.msra.gmra.mxu0 %v28261_v50  ;;  %12897 = vmatprep.subr.bf16.mxu1 %v22570_v51  ;;  %v22640_v51 = vld [vmem:[%s30066_s8 + $0x700] ss:$16 sps:$4 sm:$0xff]  }
 0x8dc   : > { %12769 = vmatpush1.bf16.msra.mxu0 %v22565_v34  ;;  %12800 = vmatprep.mubr.bf16.mxu0 %v27929_v8  ;;  %v22648_v34 = vld [vmem:[%s30066_s8 + $0x8e4] ss:$16 sps:$4 sm:$0xff]  }
 0x8dd   : > { %12770 = vmatprep.subr.bf16.mxu0 %v22573_v32  ;;  %v22643_v32 = vld [vmem:[%s30066_s8 + $0x148] ss:$16 sps:$4 sm:$0xff]  }
 0x8de   : > { %12898 = vmatpush1.bf16.msra.mxu1 %v22568_v52  ;;  %v22651_v52 = vld [vmem:[%s30066_s8 + $0x12c] ss:$16 sps:$4 sm:$0xff]  }
 0x8df   : > { %12899 = vmatprep.subr.bf16.mxu1 %v22576_v47  ;;  %v22646_v47 = vld [vmem:[%s30066_s8 + $0x8e0] ss:$16 sps:$4 sm:$0xff]  }
 0x8e0   : > { %12771 = vmatpush1.bf16.msra.mxu0 %v22571_v31  ;;  %v22654_v31 = vld [vmem:[%s30066_s8 + $0x8c4] ss:$16 sps:$4 sm:$0xff]  }
 0x8e1   : > { %12772 = vmatprep.subr.bf16.mxu0 %v22579_v27  ;;  %v28292_v24 = vpop.f32.mrf.mxu1  ;;  %v22649_v27 = vld [vmem:[%s30066_s8 + $0x128] ss:$16 sps:$4 sm:$0xff]  }
 0x8e2   : > { %12900 = vmatpush1.bf16.msra.mxu1 %v22574_v15  ;;  %v22657_v15 = vld [vmem:[%s30066_s8 + $0x10c] ss:$16 sps:$4 sm:$0xff]  }
 0x8e3   : > { %12901 = vmatprep.subr.bf16.mxu1 %v22582_v41  ;;  %v28300_v7 = vpop.f32.mrf.mxu1  ;;  %v22652_v41 = vld [vmem:[%s30066_s8 + $0x8c0] ss:$16 sps:$4 sm:$0xff]  }
 0x8e4   : > { %12773 = vmatpush1.bf16.msra.mxu0 %v22577_v59  ;;  %v22660_v59 = vld [vmem:[%s30066_s8 + $0x8a4] ss:$16 sps:$4 sm:$0xff]  }
 0x8e5   : > { %12774 = vmatprep.subr.bf16.mxu0 %v22585_v1  ;;  %v12642_v62 = vpop.f32.mrf.mxu1  ;;  %v22655_v1 = vld [vmem:[%s30066_s8 + $0x108] ss:$16 sps:$4 sm:$0xff]  }
 0x8e6   : > { %12902 = vmatpush1.bf16.msra.mxu1 %v22580_v6  ;;  %v22663_v6 = vld [vmem:[%s30066_s8 + $0x4ec] ss:$16 sps:$4 sm:$0xff]  }
 0x8e7   : > { %12903 = vmatprep.subr.bf16.mxu1 %v22588_v39  ;;  %v12643_v55 = vpop.f32.mrf.mxu1  ;;  %v22658_v39 = vld [vmem:[%s30066_s8 + $0x8a0] ss:$16 sps:$4 sm:$0xff]   ;;  %v22669_v62 = vld [vmem:[%s30066_s8 + $0x4cc] ss:$16 sps:$4 sm:$0xff]  }
 0x8e8   : > { %12775 = vmatpush1.bf16.msra.mxu0 %v22583_v29  ;;  %v22666_v29 = vld [vmem:[%s30066_s8 + $0x884] ss:$16 sps:$4 sm:$0xff]   ;;  %v22667_v55 = vld [vmem:[%s30066_s8 + $0x4c8] ss:$16 sps:$4 sm:$0xff]  }
 0x8e9   : > { %12776 = vmatprep.subr.bf16.mxu0 %v22591_v53  ;;  %v22661_v53 = vld [vmem:[%s30066_s8 + $0x4e8] ss:$16 sps:$4 sm:$0xff]  }
 0x8ea   : > { %12904 = vmatpush1.bf16.msra.mxu1 %v22586_v25  ;;  %v22664_v25 = vld [vmem:[%s30066_s8 + $0x880] ss:$16 sps:$4 sm:$0xff]  }
 0x8eb   : > { %12905 = vmatprep.subr.bf16.mxu1 %v22594_v48  ;;  %v22672_v48 = vld [vmem:[%s30066_s8 + $0x864] ss:$16 sps:$4 sm:$0xff]  }
 0x8ec   : > { %12777 = vmatpush1.bf16.msra.mxu0 %v22589_v16  ;;  %v22675_v16 = vld [vmem:[%s30066_s8 + $0x4ac] ss:$16 sps:$4 sm:$0xff]  }
 0x8ed   : > { %12778 = vmatprep.subr.bf16.mxu0 %v22597_v5  ;;  %v22670_v5 = vld [vmem:[%s30066_s8 + $0x860] ss:$16 sps:$4 sm:$0xff]  }
 0x8ee   : > { %12906 = vmatpush1.bf16.msra.mxu1 %v22592_v9  ;;  %v22678_v9 = vld [vmem:[%s30066_s8 + $0x844] ss:$16 sps:$4 sm:$0xff]  }
 0x8ef   : > { %14277 = vmatprep.subr.bf16.mxu1 %v22600_v61  ;;  %v22673_v61 = vld [vmem:[%s30066_s8 + $0x4a8] ss:$16 sps:$4 sm:$0xff]  }
 0x8f0   : > { %12779 = vmatpush1.bf16.msra.mxu0 %v22595_v37  ;;  %v22681_v37 = vld [vmem:[%s30066_s8 + $0x48c] ss:$16 sps:$4 sm:$0xff]  }
 0x8f1   : > { %12924 = vmatmul.mubr.bf16.vlgmr.msra.gmra.mxu1 %v28261_v50  ;;  %12780 = vmatprep.subr.bf16.mxu0 %v22603_v56  ;;  %v22676_v56 = vld [vmem:[%s30066_s8 + $0x840] ss:$16 sps:$4 sm:$0xff]  }
 0x8f2   : > { %14278 = vmatpush1.bf16.msra.mxu1 %v22598_v18  ;;  %14309 = vmatprep.mubr.bf16.mxu1 %v27929_v8  ;;  %v22684_v18 = vld [vmem:[%s30066_s8 + $0x824] ss:$16 sps:$4 sm:$0xff]  }
 0x8f3   : > { %14279 = vmatprep.subr.bf16.mxu1 %v22606_v26  ;;  %v22679_v26 = vld [vmem:[%s30066_s8 + $0x488] ss:$16 sps:$4 sm:$0xff]  }
 0x8f4   : > { %12781 = vmatpush1.bf16.msra.mxu0 %v22601_v20  ;;  %v22687_v20 = vld [vmem:[%s30066_s8 + $0x46c] ss:$16 sps:$4 sm:$0xff]  }
 0x8f5   : > { %12782 = vmatprep.subr.bf16.mxu0 %v22609_v40  ;;  %v22682_v40 = vld [vmem:[%s30066_s8 + $0x820] ss:$16 sps:$4 sm:$0xff]  }
 0x8f6   : > { %14280 = vmatpush1.bf16.msra.mxu1 %v22604_v54  ;;  %v22690_v54 = vld [vmem:[%s30066_s8 + $0x804] ss:$16 sps:$4 sm:$0xff]  }
 0x8f7   : > { %14281 = vmatprep.subr.bf16.mxu1 %v22612_v63  ;;  %v22685_v63 = vld [vmem:[%s30066_s8 + $0x468] ss:$16 sps:$4 sm:$0xff]  }
 0x8f8   : > { %12783 = vmatpush1.bf16.msra.mxu0 %v22607_v11  ;;  %v22693_v11 = vld [vmem:[%s30066_s8 + $0x44c] ss:$16 sps:$4 sm:$0xff]  }
 0x8f9   : > { %12784 = vmatprep.subr.bf16.mxu0 %v22615_v3  ;;  %v22688_v3 = vld [vmem:[%s30066_s8 + $0x800] ss:$16 sps:$4 sm:$0xff]  }
 0x8fa   : > { %14282 = vmatpush1.bf16.msra.mxu1 %v22610_v2  ;;  %v22696_v2 = vld [vmem:[%s30066_s8 + $0xbe4] ss:$16 sps:$4 sm:$0xff]  }
 0x8fb   : > { %14283 = vmatprep.subr.bf16.mxu1 %v22618_v23  ;;  %v22691_v23 = vld [vmem:[%s30066_s8 + $0x448] ss:$16 sps:$4 sm:$0xff]  }
 0x8fc   : > { %12785 = vmatpush2.bf16.msra.mxu0 %v22613_v12  ;;  %v22699_v12 = vld [vmem:[%s30066_s8 + $0x42c] ss:$16 sps:$4 sm:$0xff]  }
 0x8fd   : > { %12786 = vmatprep.subr.bf16.mxu0 %v22621_v17  ;;  %v22694_v17 = vld [vmem:[%s30066_s8 + $0xbe0] ss:$16 sps:$4 sm:$0xff]  }
 0x8fe   : > { %14284 = vmatpush1.bf16.msra.mxu1 %v22616_v19  ;;  %v22702_v19 = vld [vmem:[%s30066_s8 + $0xbc4] ss:$16 sps:$4 sm:$0xff]  }
 0x8ff   : > { %14285 = vmatprep.subr.bf16.mxu1 %v22624_v33  ;;  %v22697_v33 = vld [vmem:[%s30066_s8 + $0x428] ss:$16 sps:$4 sm:$0xff]  }
 0x900   : > { %12787 = vmatpush2.bf16.msra.mxu0 %v22619_v45  ;;  %v22705_v45 = vld [vmem:[%s30066_s8 + $0x40c] ss:$16 sps:$4 sm:$0xff]  }
 0x901   : > { %12788 = vmatprep.subr.bf16.mxu0 %v22627_v58  ;;  %v22700_v58 = vld [vmem:[%s30066_s8 + $0xbc0] ss:$16 sps:$4 sm:$0xff]  }
 0x902   : > { %14286 = vmatpush1.bf16.msra.mxu1 %v22622_v22  ;;  %v22708_v22 = vld [vmem:[%s30066_s8 + $0xba4] ss:$16 sps:$4 sm:$0xff]  }
 0x903   : > { %14287 = vmatprep.subr.bf16.mxu1 %v22630_v49  ;;  %v22703_v49 = vld [vmem:[%s30066_s8 + $0x408] ss:$16 sps:$4 sm:$0xff]  }
 0x904   : > { %12789 = vmatpush2.bf16.msra.mxu0 %v22625_v28  ;;  %v22711_v28 = vld [vmem:[%s30066_s8 + $0x5ec] ss:$16 sps:$4 sm:$0xff]  }
 0x905   : > { %12790 = vmatprep.subr.bf16.mxu0 %v22633_v46  ;;  %v22706_v46 = vld [vmem:[%s30066_s8 + $0xba0] ss:$16 sps:$4 sm:$0xff]  }
 0x906   : > { %14288 = vmatpush1.bf16.msra.mxu1 %v22628_v42  ;;  %v22714_v42 = vld [vmem:[%s30066_s8 + $0xb84] ss:$16 sps:$4 sm:$0xff]  }
 0x907   : > { %14289 = vmatprep.subr.bf16.mxu1 %v22636_v30  ;;  %v22709_v30 = vld [vmem:[%s30066_s8 + $0x5e8] ss:$16 sps:$4 sm:$0xff]  }
 0x908   : > { %12791 = vmatpush2.bf16.msra.mxu0 %v22631_v13  ;;  %v22717_v13 = vld [vmem:[%s30066_s8 + $0x5cc] ss:$16 sps:$4 sm:$0xff]  }
 0x909   : > { %12792 = vmatprep.subr.bf16.mxu0 %v22639_v38  ;;  %v22712_v38 = vld [vmem:[%s30066_s8 + $0xb80] ss:$16 sps:$4 sm:$0xff]  }
 0x90a   : > { %14290 = vmatpush1.bf16.msra.mxu1 %v22634_v44  ;;  %v22720_v44 = vld [vmem:[%s30066_s8 + $0xb64] ss:$16 sps:$4 sm:$0xff]  }
 0x90b   : > { %14291 = vmatprep.subr.bf16.mxu1 %v22642_v21  ;;  %v22715_v21 = vld [vmem:[%s30066_s8 + $0x5c8] ss:$16 sps:$4 sm:$0xff]  }
 0x90c   : > { %12793 = vmatpush2.bf16.msra.mxu0 %v22637_v10  ;;  %v22723_v10 = vld [vmem:[%s30066_s8 + $0x5ac] ss:$16 sps:$4 sm:$0xff]  }
 0x90d   : > { %12794 = vmatprep.subr.bf16.mxu0 %v22645_v4  ;;  %v22718_v4 = vld [vmem:[%s30066_s8 + $0xb60] ss:$16 sps:$4 sm:$0xff]  }
 0x90e   : > { %14292 = vmatpush1.bf16.msra.mxu1 %v22640_v51  ;;  %v22726_v51 = vld [vmem:[%s30066_s8 + $0xb44] ss:$16 sps:$4 sm:$0xff]  }
 0x90f   : > { %14293 = vmatprep.subr.bf16.mxu1 %v22648_v34  ;;  %v22721_v34 = vld [vmem:[%s30066_s8 + $0x5a8] ss:$16 sps:$4 sm:$0xff]  }
 0x910   : > { %12795 = vmatpush2.bf16.msra.mxu0 %v22643_v32  ;;  %v22729_v32 = vld [vmem:[%s30066_s8 + $0x58c] ss:$16 sps:$4 sm:$0xff]  }
 0x911   : > { %12796 = vmatprep.subr.bf16.mxu0 %v22651_v52  ;;  %v22724_v52 = vld [vmem:[%s30066_s8 + $0xb40] ss:$16 sps:$4 sm:$0xff]  }
 0x912   : > { %14294 = vmatpush2.bf16.msra.mxu1 %v22646_v47  ;;  %v22732_v47 = vld [vmem:[%s30066_s8 + $0xb24] ss:$16 sps:$4 sm:$0xff]  }
 0x913   : > { %14295 = vmatprep.subr.bf16.mxu1 %v22654_v31  ;;  %v22727_v31 = vld [vmem:[%s30066_s8 + $0x588] ss:$16 sps:$4 sm:$0xff]  }
 0x914   : > { %12797 = vmatpush2.bf16.msra.mxu0 %v22649_v27  ;;  %v22735_v27 = vld [vmem:[%s30066_s8 + $0x56c] ss:$16 sps:$4 sm:$0xff]  }
 0x915   : > { %12798 = vmatprep.subr.bf16.mxu0 %v22657_v15  ;;  %v22730_v15 = vld [vmem:[%s30066_s8 + $0xb20] ss:$16 sps:$4 sm:$0xff]  }
 0x916   : > { %14296 = vmatpush2.bf16.msra.mxu1 %v22652_v41  ;;  %v22738_v41 = vld [vmem:[%s30066_s8 + $0xb04] ss:$16 sps:$4 sm:$0xff]  }
 0x917   : > { %14297 = vmatprep.subr.bf16.mxu1 %v22660_v59  ;;  %v22733_v59 = vld [vmem:[%s30066_s8 + $0x568] ss:$16 sps:$4 sm:$0xff]  }
 0x918   : > { %12799 = vmatpush2.bf16.msra.mxu0 %v22655_v1  ;;  %v22741_v1 = vld [vmem:[%s30066_s8 + $0x54c] ss:$16 sps:$4 sm:$0xff]  }
 0x919   : > { %12850 = vmatprep.subr.bf16.mxu0 %v22663_v6  ;;  %v22736_v6 = vld [vmem:[%s30066_s8 + $0xb00] ss:$16 sps:$4 sm:$0xff]  }
 0x91a   : > { %14298 = vmatpush2.bf16.msra.mxu1 %v22658_v39  ;;  %v22744_v39 = vld [vmem:[%s30066_s8 + $0xce4] ss:$16 sps:$4 sm:$0xff]  }
 0x91b   : > { %12801 = vmatmul.mubr.bf16.vlgmr.msra.gmra.mxu0 %v27924_v57  ;;  %14299 = vmatprep.subr.bf16.mxu1 %v22666_v29  ;;  %v22739_v29 = vld [vmem:[%s30066_s8 + $0x548] ss:$16 sps:$4 sm:$0xff]  }
 0x91c   : > { %12851 = vmatpush1.bf16.msra.mxu0 %v22661_v53  ;;  %12882 = vmatprep.mubr.bf16.mxu0 %v28077_v0  ;;  %v22747_v53 = vld [vmem:[%s30066_s8 + $0x52c] ss:$16 sps:$4 sm:$0xff]  }
 0x91d   : > { %12852 = vmatprep.subr.bf16.mxu0 %v22669_v62  ;;  %v22742_v62 = vld [vmem:[%s30066_s8 + $0xce0] ss:$16 sps:$4 sm:$0xff]  }
 0x91e   : > { %14300 = vmatpush2.bf16.msra.mxu1 %v22664_v25  ;;  %v22750_v25 = vld [vmem:[%s30066_s8 + $0xcc4] ss:$16 sps:$4 sm:$0xff]  }
 0x91f   : > { %14301 = vmatprep.subr.bf16.mxu1 %v22672_v48  ;;  %v22745_v48 = vld [vmem:[%s30066_s8 + $0x528] ss:$16 sps:$4 sm:$0xff]  }
 0x920   : > { %12853 = vmatpush1.bf16.msra.mxu0 %v22667_v55  ;;  %v22753_v55 = vld [vmem:[%s30066_s8 + $0x50c] ss:$16 sps:$4 sm:$0xff]  }
 0x921   : > { %12854 = vmatprep.subr.bf16.mxu0 %v22675_v16 }
 0x922   : > { %14302 = vmatpush2.bf16.msra.mxu1 %v22670_v5  ;;  %v22748_v5 = vld [vmem:[%s30066_s8 + $0xcc0] ss:$16 sps:$4 sm:$0xff]  }
 0x923   : > { %14303 = vmatprep.subr.bf16.mxu1 %v22678_v9  ;;  %v22756_v9 = vld [vmem:[%s30066_s8 + $0xca4] ss:$16 sps:$4 sm:$0xff]  }
 0x924   : > { %12855 = vmatpush1.bf16.msra.mxu0 %v22673_v61 }
 0x925   : > { %12856 = vmatprep.subr.bf16.mxu0 %v22681_v37  ;;  %v22751_v37 = vld [vmem:[%s30066_s8 + $0x508] ss:$16 sps:$4 sm:$0xff]  }
 0x926   : > { %14304 = vmatpush2.bf16.msra.mxu1 %v22676_v56  ;;  %v22759_v56 = vld [vmem:[%s30066_s8 + $0x9e4] ss:$16 sps:$4 sm:$0xff]  }
 0x927   : > { %14305 = vmatprep.subr.bf16.mxu1 %v22684_v18 }
 0x928   : > { %12857 = vmatpush1.bf16.msra.mxu0 %v22679_v26  ;;  %v22754_v26 = vld [vmem:[%s30066_s8 + $0xca0] ss:$16 sps:$4 sm:$0xff]  }
 0x929   : > { %12858 = vmatprep.subr.bf16.mxu0 %v22687_v20  ;;  %v22762_v20 = vld [vmem:[%s30066_s8 + $0xc84] ss:$16 sps:$4 sm:$0xff]  }
 0x92a   : > { %14306 = vmatpush2.bf16.msra.mxu1 %v22682_v40 }
 0x92b   : > { %14307 = vmatprep.subr.bf16.mxu1 %v22690_v54  ;;  %v22757_v54 = vld [vmem:[%s30066_s8 + $0x9e0] ss:$16 sps:$4 sm:$0xff]  }
 0x92c   : > { %12859 = vmatpush1.bf16.msra.mxu0 %v22685_v63  ;;  %v22765_v63 = vld [vmem:[%s30066_s8 + $0x9c4] ss:$16 sps:$4 sm:$0xff]  }
 0x92d   : > { %12860 = vmatprep.subr.bf16.mxu0 %v22693_v11  ;;  %v22760_v11 = vld [vmem:[%s30066_s8 + $0xc80] ss:$16 sps:$4 sm:$0xff]  }
 0x92e   : > { %14308 = vmatpush2.bf16.msra.mxu1 %v22688_v3  ;;  %v22768_v3 = vld [vmem:[%s30066_s8 + $0xc64] ss:$16 sps:$4 sm:$0xff]  }
 0x92f   : > { %14359 = vmatprep.subr.bf16.mxu1 %v22696_v2  ;;  %v22763_v2 = vld [vmem:[%s30066_s8 + $0x9c0] ss:$16 sps:$4 sm:$0xff]  }
 0x930   : > { %12861 = vmatpush1.bf16.msra.mxu0 %v22691_v23  ;;  %v22771_v23 = vld [vmem:[%s30066_s8 + $0x9a4] ss:$16 sps:$4 sm:$0xff]  }
 0x931   : > { %14310 = vmatmul.mubr.bf16.vlgmr.msra.gmra.mxu1 %v27924_v57  ;;  %12862 = vmatprep.subr.bf16.mxu0 %v22699_v12  ;;  %v22766_v12 = vld [vmem:[%s30066_s8 + $0xc60] ss:$16 sps:$4 sm:$0xff]  }
 0x932   : > { %14360 = vmatpush1.bf16.msra.mxu1 %v22694_v17  ;;  %14391 = vmatprep.mubr.bf16.mxu1 %v28077_v0  ;;  %v22774_v17 = vld [vmem:[%s30066_s8 + $0xc44] ss:$16 sps:$4 sm:$0xff]  }
 0x933   : > { %14361 = vmatprep.subr.bf16.mxu1 %v22702_v19  ;;  %v22769_v19 = vld [vmem:[%s30066_s8 + $0x9a0] ss:$16 sps:$4 sm:$0xff]  }
 0x934   : > { %12863 = vmatpush1.bf16.msra.mxu0 %v22697_v33  ;;  %v22777_v33 = vld [vmem:[%s30066_s8 + $0x984] ss:$16 sps:$4 sm:$0xff]  }
 0x935   : > { %12864 = vmatprep.subr.bf16.mxu0 %v22705_v45  ;;  %v22772_v45 = vld [vmem:[%s30066_s8 + $0xc40] ss:$16 sps:$4 sm:$0xff]  }
 0x936   : > { %14362 = vmatpush1.bf16.msra.mxu1 %v22700_v58  ;;  %v22780_v58 = vld [vmem:[%s30066_s8 + $0xc24] ss:$16 sps:$4 sm:$0xff]  }
 0x937   : > { %14363 = vmatprep.subr.bf16.mxu1 %v22708_v22  ;;  %v22775_v22 = vld [vmem:[%s30066_s8 + $0x980] ss:$16 sps:$4 sm:$0xff]  }
 0x938   : > { %12865 = vmatpush1.bf16.msra.mxu0 %v22703_v49  ;;  %v22783_v49 = vld [vmem:[%s30066_s8 + $0x964] ss:$16 sps:$4 sm:$0xff]  }
 0x939   : > { %12866 = vmatprep.subr.bf16.mxu0 %v22711_v28  ;;  %v22778_v28 = vld [vmem:[%s30066_s8 + $0xc20] ss:$16 sps:$4 sm:$0xff]  }
 0x93a   : > { %14364 = vmatpush1.bf16.msra.mxu1 %v22706_v46  ;;  %v22786_v46 = vld [vmem:[%s30066_s8 + $0xc04] ss:$16 sps:$4 sm:$0xff]  }
 0x93b   : > { %14365 = vmatprep.subr.bf16.mxu1 %v22714_v42  ;;  %v22781_v42 = vld [vmem:[%s30066_s8 + $0x960] ss:$16 sps:$4 sm:$0xff]  }
 0x93c   : > { %12867 = vmatpush2.bf16.msra.mxu0 %v22709_v30  ;;  %v22789_v30 = vld [vmem:[%s30066_s8 + $0x944] ss:$16 sps:$4 sm:$0xff]  }
 0x93d   : > { %12868 = vmatprep.subr.bf16.mxu0 %v22717_v13  ;;  %v22784_v13 = vld [vmem:[%s30066_s8 + $0xc00] ss:$16 sps:$4 sm:$0xff]  }
 0x93e   : > { %14366 = vmatpush1.bf16.msra.mxu1 %v22712_v38  ;;  %v22792_v38 = vld [vmem:[%s30066_s8 + $0x9ec] ss:$16 sps:$4 sm:$0xff]  }
 0x93f   : > { %14367 = vmatprep.subr.bf16.mxu1 %v22720_v44  ;;  %v22787_v44 = vld [vmem:[%s30066_s8 + $0x940] ss:$16 sps:$4 sm:$0xff]  }
 0x940   : > { %12869 = vmatpush2.bf16.msra.mxu0 %v22715_v21  ;;  %v22795_v21 = vld [vmem:[%s30066_s8 + $0x924] ss:$16 sps:$4 sm:$0xff]  }
 0x941   : > { %12870 = vmatprep.subr.bf16.mxu0 %v22723_v10  ;;  %v22790_v10 = vld [vmem:[%s30066_s8 + $0x9e8] ss:$16 sps:$4 sm:$0xff]  }
 0x942   : > { %14368 = vmatpush1.bf16.msra.mxu1 %v22718_v4  ;;  %v22798_v4 = vld [vmem:[%s30066_s8 + $0x9cc] ss:$16 sps:$4 sm:$0xff]  }
 0x943   : > { %14369 = vmatprep.subr.bf16.mxu1 %v22726_v51  ;;  %v22793_v51 = vld [vmem:[%s30066_s8 + $0x920] ss:$16 sps:$4 sm:$0xff]  }
 0x944   : > { %12871 = vmatpush2.bf16.msra.mxu0 %v22721_v34  ;;  %v22801_v34 = vld [vmem:[%s30066_s8 + $0x904] ss:$16 sps:$4 sm:$0xff]  }
 0x945   : > { %12872 = vmatprep.subr.bf16.mxu0 %v22729_v32  ;;  %v22796_v32 = vld [vmem:[%s30066_s8 + $0x9c8] ss:$16 sps:$4 sm:$0xff]  }
 0x946   : > { %14370 = vmatpush1.bf16.msra.mxu1 %v22724_v52  ;;  %v22804_v52 = vld [vmem:[%s30066_s8 + $0x9ac] ss:$16 sps:$4 sm:$0xff]  }
 0x947   : > { %14371 = vmatprep.subr.bf16.mxu1 %v22732_v47  ;;  %v22799_v47 = vld [vmem:[%s30066_s8 + $0x900] ss:$16 sps:$4 sm:$0xff]  }
 0x948   : > { %12873 = vmatpush2.bf16.msra.mxu0 %v22727_v31  ;;  %v22807_v31 = vld [vmem:[%s30066_s8 + $0xae4] ss:$16 sps:$4 sm:$0xff]  }
 0x949   : > { %12874 = vmatprep.subr.bf16.mxu0 %v22735_v27  ;;  %v22810_v27 = vld [vmem:[%s30066_s8 + $0x98c] ss:$16 sps:$4 sm:$0xff]  }
 0x94a   : > { %14372 = vmatpush1.bf16.msra.mxu1 %v22730_v15  ;;  %v22805_v15 = vld [vmem:[%s30066_s8 + $0xae0] ss:$16 sps:$4 sm:$0xff]  }
 0x94b   : > { %14373 = vmatprep.subr.bf16.mxu1 %v22738_v41  ;;  %v22813_v41 = vld [vmem:[%s30066_s8 + $0xac4] ss:$16 sps:$4 sm:$0xff]  }
 0x94c   : > { %12875 = vmatpush2.bf16.msra.mxu0 %v22733_v59  ;;  %v22808_v59 = vld [vmem:[%s30066_s8 + $0x988] ss:$16 sps:$4 sm:$0xff]  }
 0x94d   : > { %12876 = vmatprep.subr.bf16.mxu0 %v22741_v1 }
 0x94e   : > { %14374 = vmatpush1.bf16.msra.mxu1 %v22736_v6  ;;  %v22816_v6 = vld [vmem:[%s30066_s8 + $0x96c] ss:$16 sps:$4 sm:$0xff]  }
 0x94f   : > { %14375 = vmatprep.subr.bf16.mxu1 %v22744_v39 }
 0x950   : > { %12877 = vmatpush2.bf16.msra.mxu0 %v22739_v29  ;;  %v22811_v29 = vld [vmem:[%s30066_s8 + $0xac0] ss:$16 sps:$4 sm:$0xff]  }
 0x951   : > { %12878 = vmatprep.subr.bf16.mxu0 %v22747_v53  ;;  %v28638_v16 = vpop.f32.mrf.mxu1 }
 0x952   : > { %14376 = vmatpush2.bf16.msra.mxu1 %v22742_v62  ;;  %v22819_v62 = vld [vmem:[%s30066_s8 + $0xaa4] ss:$16 sps:$4 sm:$0xff]  }
 0x953   : > { %14377 = vmatprep.subr.bf16.mxu1 %v22750_v25  ;;  %v28646_v61 = vpop.f32.mrf.mxu1 }
 0x954   : > { %12879 = vmatpush2.bf16.msra.mxu0 %v22745_v48  ;;  %v22814_v48 = vld [vmem:[%s30066_s8 + $0x968] ss:$16 sps:$4 sm:$0xff]  }
 0x955   : > { %12880 = vmatprep.subr.bf16.mxu0 %v22753_v55  ;;  %v12724_v18 = vpop.f32.mrf.mxu1 }
 0x956   : > { %14378 = vmatpush2.bf16.msra.mxu1 %v22748_v5  ;;  %v22822_v5 = vld [vmem:[%s30066_s8 + $0x94c] ss:$16 sps:$4 sm:$0xff]  }
 0x957   : > { %14379 = vmatprep.subr.bf16.mxu1 %v22756_v9  ;;  %v12725_v40 = vpop.f32.mrf.mxu1  ;;  %v22817_v9 = vld [vmem:[%s30066_s8 + $0xaa0] ss:$16 sps:$4 sm:$0xff]   ;;  %v22828_v18 = vld [vmem:[%s30066_s8 + $0x92c] ss:$16 sps:$4 sm:$0xff]  }
 0x958   : > { %12881 = vmatpush2.bf16.msra.mxu0 %v22751_v37  ;;  %v22834_v40 = vld [vmem:[%s30066_s8 + $0x90c] ss:$16 sps:$4 sm:$0xff]  }
 0x959   : > { %14318 = vmatprep.subr.bf16.mxu0 %v22759_v56  ;;  %v22820_v56 = vld [vmem:[%s30066_s8 + $0x948] ss:$16 sps:$4 sm:$0xff]  }
 0x95a   : > { %14380 = vmatpush2.bf16.msra.mxu1 %v22754_v26  ;;  %v22831_v26 = vld [vmem:[%s30066_s8 + $0xa64] ss:$16 sps:$4 sm:$0xff]  }
 0x95b   : > { %12883 = vmatmul.mubr.bf16.vlgmr.msra.gmra.mxu0 %v28075_v60  ;;  %14381 = vmatprep.subr.bf16.mxu1 %v22762_v20  ;;  %v22826_v20 = vld [vmem:[%s30066_s8 + $0x928] ss:$16 sps:$4 sm:$0xff]  }
 0x95c   : > { %14319 = vmatpush1.bf16.msra.mxu0 %v22757_v54  ;;  %14350 = vmatprep.mubr.bf16.mxu0 %v28148_v43  ;;  %v22829_v54 = vld [vmem:[%s30066_s8 + $0xa60] ss:$16 sps:$4 sm:$0xff]  }
 0x95d   : > { %14320 = vmatprep.subr.bf16.mxu0 %v22765_v63  ;;  %v22837_v63 = vld [vmem:[%s30066_s8 + $0xa44] ss:$16 sps:$4 sm:$0xff]  }
 0x95e   : > { %14382 = vmatpush2.bf16.msra.mxu1 %v22760_v11  ;;  %v22832_v11 = vld [vmem:[%s30066_s8 + $0x908] ss:$16 sps:$4 sm:$0xff]  }
 0x95f   : > { %14383 = vmatprep.subr.bf16.mxu1 %v22768_v3  ;;  %v22840_v3 = vld [vmem:[%s30066_s8 + $0xaec] ss:$16 sps:$4 sm:$0xff]  }
 0x960   : > { %14321 = vmatpush1.bf16.msra.mxu0 %v22763_v2  ;;  %v22835_v2 = vld [vmem:[%s30066_s8 + $0xa40] ss:$16 sps:$4 sm:$0xff]  }
 0x961   : > { %14322 = vmatprep.subr.bf16.mxu0 %v22771_v23  ;;  %v22843_v23 = vld [vmem:[%s30066_s8 + $0xa24] ss:$16 sps:$4 sm:$0xff]  }
 0x962   : > { %14384 = vmatpush2.bf16.msra.mxu1 %v22766_v12  ;;  %v22838_v12 = vld [vmem:[%s30066_s8 + $0xae8] ss:$16 sps:$4 sm:$0xff]  }
 0x963   : > { %14385 = vmatprep.subr.bf16.mxu1 %v22774_v17  ;;  %v22846_v17 = vld [vmem:[%s30066_s8 + $0xacc] ss:$16 sps:$4 sm:$0xff]  }
 0x964   : > { %14323 = vmatpush1.bf16.msra.mxu0 %v22769_v19  ;;  %v22841_v19 = vld [vmem:[%s30066_s8 + $0xa20] ss:$16 sps:$4 sm:$0xff]  }
 0x965   : > { %14324 = vmatprep.subr.bf16.mxu0 %v22777_v33 }
 0x966   : > { %14386 = vmatpush2.bf16.msra.mxu1 %v22772_v45  ;;  %v22849_v45 = vld [vmem:[%s30066_s8 + $0xa04] ss:$16 sps:$4 sm:$0xff]  }
 0x967   : > { %14387 = vmatprep.subr.bf16.mxu1 %v22780_v58  ;;  %v22844_v58 = vld [vmem:[%s30066_s8 + $0xac8] ss:$16 sps:$4 sm:$0xff]  }
 0x968   : > { %14325 = vmatpush1.bf16.msra.mxu0 %v22775_v22 }
 0x969   : > { %14326 = vmatprep.subr.bf16.mxu0 %v22783_v49  ;;  %v22852_v49 = vld [vmem:[%s30066_s8 + $0xaac] ss:$16 sps:$4 sm:$0xff]  }
 0x96a   : > { %14388 = vmatpush2.bf16.msra.mxu1 %v22778_v28  ;;  %v22847_v28 = vld [vmem:[%s30066_s8 + $0xa00] ss:$16 sps:$4 sm:$0xff]  }
 0x96b   : > { %14389 = vmatprep.subr.bf16.mxu1 %v22786_v46 }
 0x96c   : > { %14327 = vmatpush1.bf16.msra.mxu0 %v22781_v42  ;;  %v22855_v42 = vld [vmem:[%s30066_s8 + $0xde4] ss:$16 sps:$4 sm:$0xff]  }
 0x96d   : > { %14328 = vmatprep.subr.bf16.mxu0 %v22789_v30  ;;  %v22850_v30 = vld [vmem:[%s30066_s8 + $0xaa8] ss:$16 sps:$4 sm:$0xff]  }
 0x96e   : > { %14390 = vmatpush2.bf16.msra.mxu1 %v22784_v13 }
 0x96f   : > { %14482 = vmatprep.subr.bf16.mxu1 %v22792_v38  ;;  %v22858_v38 = vld [vmem:[%s30066_s8 + $0xa8c] ss:$16 sps:$4 sm:$0xff]  }
 0x970   : > { %14329 = vmatpush1.bf16.msra.mxu0 %v22787_v44  ;;  %v22853_v44 = vld [vmem:[%s30066_s8 + $0xde0] ss:$16 sps:$4 sm:$0xff]  }
 0x971   : > { %14392 = vmatmul.mubr.bf16.vlgmr.msra.gmra.mxu1 %v28075_v60  ;;  %14330 = vmatprep.subr.bf16.mxu0 %v22795_v21  ;;  %v22861_v21 = vld [vmem:[%s30066_s8 + $0xdc4] ss:$16 sps:$4 sm:$0xff]  }
 0x972   : > { %14483 = vmatpush1.bf16.msra.mxu1 %v22790_v10  ;;  %14514 = vmatprep.mubr.bf16.mxu1 %v28148_v43  ;;  %v22802_v43 = vld [vmem:[%s30066_s8 + $0x9a8] ss:$16 sps:$4 sm:$0xff]  }
 0x973   : > { %14484 = vmatprep.subr.bf16.mxu1 %v22798_v4  ;;  %v22856_v10 = vld [vmem:[%s30066_s8 + $0xa88] ss:$16 sps:$4 sm:$0xff]  }
 0x974   : > { %14331 = vmatpush1.bf16.msra.mxu0 %v22793_v51  ;;  %v22864_v51 = vld [vmem:[%s30066_s8 + $0xa6c] ss:$16 sps:$4 sm:$0xff]  }
 0x975   : > { %14332 = vmatprep.subr.bf16.mxu0 %v22801_v34 }
 0x976   : > { %14485 = vmatpush1.bf16.msra.mxu1 %v22796_v32  ;;  %v22859_v32 = vld [vmem:[%s30066_s8 + $0xdc0] ss:$16 sps:$4 sm:$0xff]  }
 0x977   : > { %14486 = vmatprep.subr.bf16.mxu1 %v22804_v52 }
 0x978   : > { %14333 = vmatpush1.bf16.msra.mxu0 %v22799_v47  ;;  %v22867_v47 = vld [vmem:[%s30066_s8 + $0xda4] ss:$16 sps:$4 sm:$0xff]  }
 0x979   : > { %14334 = vmatprep.subr.bf16.mxu0 %v22807_v31 }
 0x97a   : > { %14487 = vmatpush1.bf16.msra.mxu1 %v22802_v43  ;;  %v22862_v43 = vld [vmem:[%s30066_s8 + $0xa68] ss:$16 sps:$4 sm:$0xff]  }
 0x97b   : > { %v12679_v1 = vpop.f32.mrf.mxu0  ;;  %14488 = vmatprep.subr.bf16.mxu1 %v22810_v27 }
 0x97c   : > { %v12680_v39 = vadd.f32 %v12679_v1, %v28292_v24  ;;  %14335 = vmatpush2.bf16.msra.mxu0 %v22805_v15  ;;  %v22870_v15 = vld [vmem:[%s30066_s8 + $0xa4c] ss:$16 sps:$4 sm:$0xff]   ;;  %v22873_v1 = vld [vmem:[%s30066_s8 + $0xd84] ss:$16 sps:$4 sm:$0xff]  }
 0x97d   : > { %v12681_v53 = vpop.f32.mrf.mxu0  ;;  %14336 = vmatprep.subr.bf16.mxu0 %v22813_v41  ;;  %v22865_v41 = vld [vmem:[%s30066_s8 + $0xda0] ss:$16 sps:$4 sm:$0xff]  }
 0x97e   : > { %v12682_v25 = vadd.f32 %v12681_v53, %v28300_v7  ;;  %14489 = vmatpush1.bf16.msra.mxu1 %v22808_v59  ;;  %v28784_v24 = vadd.f32 %v28638_v16, %v12680_v39  ;;  %v22825_v16 = vld [vmem:[%s30066_s8 + $0xa84] ss:$16 sps:$4 sm:$0xff]   ;;  %v22876_v39 = vld [vmem:[%s30066_s8 + $0xa2c] ss:$16 sps:$4 sm:$0xff]  }
 0x97f   : > { %v12683_v55 = vpop.f32.mrf.mxu0  ;;  %14490 = vmatprep.subr.bf16.mxu1 %v22816_v6  ;;  %v22868_v6 = vld [vmem:[%s30066_s8 + $0xa48] ss:$16 sps:$4 sm:$0xff]   ;;  %v22879_v53 = vld [vmem:[%s30066_s8 + $0xd64] ss:$16 sps:$4 sm:$0xff]  }
 0x980   : > { %14337 = vmatpush2.bf16.msra.mxu0 %v22811_v29  ;;  %v28793_v7 = vadd.f32 %v28646_v61, %v12682_v25  ;;  %v22823_v61 = vld [vmem:[%s30066_s8 + $0xa80] ss:$16 sps:$4 sm:$0xff]   ;;  %v22882_v25 = vld [vmem:[%s30066_s8 + $0xa0c] ss:$16 sps:$4 sm:$0xff]   ;;  %v22880_v55 = vld [vmem:[%s30066_s8 + $0xa08] ss:$16 sps:$4 sm:$0xff]  }
 0x981   : > { %v12684_v37 = vpop.f32.mrf.mxu0  ;;  %14338 = vmatprep.subr.bf16.mxu0 %v22819_v62  ;;  %v22871_v29 = vld [vmem:[%s30066_s8 + $0xd80] ss:$16 sps:$4 sm:$0xff]   ;;  %v22874_v62 = vld [vmem:[%s30066_s8 + $0xa28] ss:$16 sps:$4 sm:$0xff]  }
 0x982   : > { %14491 = vmatpush1.bf16.msra.mxu1 %v22814_v48  ;;  %v22877_v48 = vld [vmem:[%s30066_s8 + $0xd60] ss:$16 sps:$4 sm:$0xff]   ;;  %v22886_v37 = vld [vmem:[%s30066_s8 + $0xde8] ss:$16 sps:$4 sm:$0xff]  }
 0x983   : > { %14492 = vmatprep.subr.bf16.mxu1 %v22822_v5  ;;  %v22888_v5 = vld [vmem:[%s30066_s8 + $0xdec] ss:$16 sps:$4 sm:$0xff]  }
 0x984   : > { %14339 = vmatpush2.bf16.msra.mxu0 %v22817_v9  ;;  %v22883_v9 = vld [vmem:[%s30066_s8 + $0xd40] ss:$16 sps:$4 sm:$0xff]  }
 0x985   : > { %14340 = vmatprep.subr.bf16.mxu0 %v22825_v16  ;;  %v22894_v16 = vld [vmem:[%s30066_s8 + $0xdcc] ss:$16 sps:$4 sm:$0xff]  }
 0x986   : > { %14493 = vmatpush1.bf16.msra.mxu1 %v22820_v56  ;;  %v22889_v56 = vld [vmem:[%s30066_s8 + $0xd20] ss:$16 sps:$4 sm:$0xff]  }
 0x987   : > { %14494 = vmatprep.subr.bf16.mxu1 %v22828_v18 }
 0x988   : > { %14341 = vmatpush2.bf16.msra.mxu0 %v22823_v61  ;;  %v22897_v61 = vld [vmem:[%s30066_s8 + $0xd04] ss:$16 sps:$4 sm:$0xff]  }
 0x989   : > { %14342 = vmatprep.subr.bf16.mxu0 %v22831_v26  ;;  %v22892_v26 = vld [vmem:[%s30066_s8 + $0xdc8] ss:$16 sps:$4 sm:$0xff]  }
 0x98a   : > { %14495 = vmatpush1.bf16.msra.mxu1 %v22826_v20 }
 0x98b   : > { %14496 = vmatprep.subr.bf16.mxu1 %v22834_v40  ;;  %v22900_v40 = vld [vmem:[%s30066_s8 + $0xdac] ss:$16 sps:$4 sm:$0xff]  }
 0x98c   : > { %14343 = vmatpush2.bf16.msra.mxu0 %v22829_v54 }
 0x98d   : > { %14344 = vmatprep.subr.bf16.mxu0 %v22837_v63  ;;  %v22903_v63 = vld [vmem:[%s30066_s8 + $0x7ec] ss:$16 sps:$4 sm:$0xff]  }
 0x98e   : > { %14497 = vmatpush1.bf16.msra.mxu1 %v22832_v11  ;;  %v22898_v11 = vld [vmem:[%s30066_s8 + $0xda8] ss:$16 sps:$4 sm:$0xff]  }
 0x98f   : > { %14498 = vmatprep.subr.bf16.mxu1 %v22840_v3 }
 0x990   : > { %14345 = vmatpush2.bf16.msra.mxu0 %v22835_v2  ;;  %v22906_v2 = vld [vmem:[%s30066_s8 + $0xd8c] ss:$16 sps:$4 sm:$0xff]  }
 0x991   : > { %v28843_v33 = vpop.f32.mrf.mxu1  ;;  %14346 = vmatprep.subr.bf16.mxu0 %v22843_v23  ;;  %v22901_v23 = vld [vmem:[%s30066_s8 + $0x7e8] ss:$16 sps:$4 sm:$0xff]  }
 0x992   : > { %14499 = vmatpush2.bf16.msra.mxu1 %v22838_v12  ;;  %v22909_v12 = vld [vmem:[%s30066_s8 + $0x7cc] ss:$16 sps:$4 sm:$0xff]  }
 0x993   : > { %v28851_v22 = vpop.f32.mrf.mxu1  ;;  %14500 = vmatprep.subr.bf16.mxu1 %v22846_v17  ;;  %v22904_v17 = vld [vmem:[%s30066_s8 + $0xd88] ss:$16 sps:$4 sm:$0xff]  }
 0x994   : > { %14347 = vmatpush2.bf16.msra.mxu0 %v22841_v19  ;;  %v22912_v19 = vld [vmem:[%s30066_s8 + $0xd6c] ss:$16 sps:$4 sm:$0xff]  }
 0x995   : > { %v12847_v46 = vpop.f32.mrf.mxu1  ;;  %14348 = vmatprep.subr.bf16.mxu0 %v22849_v45  ;;  %v22907_v45 = vld [vmem:[%s30066_s8 + $0x7c8] ss:$16 sps:$4 sm:$0xff]  }
 0x996   : > { %14501 = vmatpush2.bf16.msra.mxu1 %v22844_v58  ;;  %v22915_v58 = vld [vmem:[%s30066_s8 + $0x7ac] ss:$16 sps:$4 sm:$0xff]  }
 0x997   : > { %v12848_v13 = vpop.f32.mrf.mxu1  ;;  %14502 = vmatprep.subr.bf16.mxu1 %v22852_v49  ;;  %v22910_v49 = vld [vmem:[%s30066_s8 + $0xd68] ss:$16 sps:$4 sm:$0xff]   ;;  %v22921_v46 = vld [vmem:[%s30066_s8 + $0x78c] ss:$16 sps:$4 sm:$0xff]  }
 0x998   : > { %14349 = vmatpush2.bf16.msra.mxu0 %v22847_v28  ;;  %v22918_v28 = vld [vmem:[%s30066_s8 + $0xd4c] ss:$16 sps:$4 sm:$0xff]   ;;  %v22919_v13 = vld [vmem:[%s30066_s8 + $0x788] ss:$16 sps:$4 sm:$0xff]  }
 0x999   : > { %14400 = vmatprep.subr.bf16.mxu0 %v22855_v42  ;;  %v22916_v42 = vld [vmem:[%s30066_s8 + $0xd48] ss:$16 sps:$4 sm:$0xff]  }
 0x99a   : > { %14503 = vmatpush2.bf16.msra.mxu1 %v22850_v30  ;;  %v22924_v30 = vld [vmem:[%s30066_s8 + $0xd2c] ss:$16 sps:$4 sm:$0xff]  }
 0x99b   : > { %v12761_v4 = vpop.f32.mrf.mxu0  ;;  %14351 = vmatmul.mubr.bf16.vlgmr.msra.gmra.mxu0 %v28156_v36  ;;  %14504 = vmatprep.subr.bf16.mxu1 %v22858_v38  ;;  %v22927_v38 = vld [vmem:[%s30066_s8 + $0x76c] ss:$16 sps:$4 sm:$0xff]  }
 0x99c   : > { %v28882_v34 = vadd.f32 %v12761_v4, %v28784_v24  ;;  %14401 = vmatpush1.bf16.msra.mxu0 %v22853_v44  ;;  %14432 = vmatprep.mubr.bf16.mxu0 %v30109_v14  ;;  %v22885_v24 = vld [vmem:[%s30066_s8 + $0xd44] ss:$16 sps:$4 sm:$0xff]   ;;  %v22922_v44 = vld [vmem:[%s30066_s8 + $0xd28] ss:$16 sps:$4 sm:$0xff]   ;;  %v22933_v4 = vld [vmem:[%s30066_s8 + $0x74c] ss:$16 sps:$4 sm:$0xff]  }
 0x99d   : > { %v12763_v52 = vpop.f32.mrf.mxu0  ;;  %14402 = vmatprep.subr.bf16.mxu0 %v22861_v21  ;;  %v22930_v21 = vld [vmem:[%s30066_s8 + $0xd0c] ss:$16 sps:$4 sm:$0xff]  }
 0x99e   : > { %v28892_v31 = vadd.f32 %v12763_v52, %v28793_v7  ;;  %14505 = vmatpush2.bf16.msra.mxu1 %v22856_v10  ;;  %v22891_v7 = vld [vmem:[%s30066_s8 + $0xd24] ss:$16 sps:$4 sm:$0xff]   ;;  %v22925_v10 = vld [vmem:[%s30066_s8 + $0x768] ss:$16 sps:$4 sm:$0xff]   ;;  %v22936_v52 = vld [vmem:[%s30066_s8 + $0x72c] ss:$16 sps:$4 sm:$0xff]  }
 0x99f   : > { %v12765_v27 = vpop.f32.mrf.mxu0  ;;  %14506 = vmatprep.subr.bf16.mxu1 %v22864_v51  ;;  %v22928_v51 = vld [vmem:[%s30066_s8 + $0xd08] ss:$16 sps:$4 sm:$0xff]  }
 0x9a0   : > { %14403 = vmatpush1.bf16.msra.mxu0 %v22859_v32  ;;  %v22931_v32 = vld [vmem:[%s30066_s8 + $0x748] ss:$16 sps:$4 sm:$0xff]  }
 0x9a1   : > { %v12766_v59 = vpop.f32.mrf.mxu0  ;;  %14404 = vmatprep.subr.bf16.mxu0 %v22867_v47  ;;  %v22934_v47 = vld [vmem:[%s30066_s8 + $0x728] ss:$16 sps:$4 sm:$0xff]  }
 0x9a2   : > { %14507 = vmatpush2.bf16.msra.mxu1 %v22862_v43  ;;  %v22939_v43 = vld [vmem:[%s30066_s8 + $0x70c] ss:$16 sps:$4 sm:$0xff]   ;;  %v22937_v27 = vld [vmem:[%s30066_s8 + $0x708] ss:$16 sps:$4 sm:$0xff]  }
 0x9a3   : > { %14508 = vmatprep.subr.bf16.mxu1 %v22870_v15  ;;  %v22942_v15 = vld [vmem:[%s30066_s8 + $0x8ec] ss:$16 sps:$4 sm:$0xff]  }
 0x9a4   : > { %14405 = vmatpush1.bf16.msra.mxu0 %v22865_v41  ;;  %v22945_v41 = vld [vmem:[%s30066_s8 + $0x8cc] ss:$16 sps:$4 sm:$0xff]  }
 0x9a5   : > { %14406 = vmatprep.subr.bf16.mxu0 %v22873_v1  ;;  %v22943_v1 = vld [vmem:[%s30066_s8 + $0x8c8] ss:$16 sps:$4 sm:$0xff]  }
 0x9a6   : > { %14509 = vmatpush2.bf16.msra.mxu1 %v22868_v6 }
 0x9a7   : > { %14510 = vmatprep.subr.bf16.mxu1 %v22876_v39  ;;  %v22948_v39 = vld [vmem:[%s30066_s8 + $0x8ac] ss:$16 sps:$4 sm:$0xff]  }
 0x9a8   : > { %14407 = vmatpush1.bf16.msra.mxu0 %v22871_v29 }
 0x9a9   : > { %14408 = vmatprep.subr.bf16.mxu0 %v22879_v53  ;;  %v22946_v53 = vld [vmem:[%s30066_s8 + $0x8a8] ss:$16 sps:$4 sm:$0xff]  }
 0x9aa   : > { %14511 = vmatpush2.bf16.msra.mxu1 %v22874_v62  ;;  %v22951_v62 = vld [vmem:[%s30066_s8 + $0x88c] ss:$16 sps:$4 sm:$0xff]  }
 0x9ab   : > { %14512 = vmatprep.subr.bf16.mxu1 %v22882_v25 }
 0x9ac   : > { %14409 = vmatpush1.bf16.msra.mxu0 %v22877_v48  ;;  %v23012_v48 = vld [vmem:[%s30068_s10 + $0x158] sm:$0xff]  }
 0x9ad   : > { %14410 = vmatprep.subr.bf16.mxu0 %v22885_v24  ;;  %v23013_v24 = vld [vmem:[%s30068_s10 + $0x118] sm:$0xff]  }
 0x9ae   : > { %14513 = vmatpush2.bf16.msra.mxu1 %v22880_v55  ;;  %v23014_v55 = vld [vmem:[%s30068_s10 + $0x150] sm:$0xff]  }
 0x9af   : > { %14564 = vmatprep.subr.bf16.mxu1 %v22888_v5  ;;  %v22949_v5 = vld [vmem:[%s30066_s8 + $0x888] ss:$16 sps:$4 sm:$0xff]  }
 0x9b0   : > { %14411 = vmatpush1.bf16.msra.mxu0 %v22883_v9  ;;  %v23015_v9 = vld [vmem:[%s30068_s10 + $0x110] sm:$0xff]  }
 0x9b1   : > { %v28951_v18 = vpop.f32.mrf.mxu1  ;;  %14515 = vmatmul.mubr.bf16.vlgmr.msra.gmra.mxu1 %v28156_v36  ;;  %14412 = vmatprep.subr.bf16.mxu0 %v22891_v7  ;;  %v22895_v36 = vld [vmem:[%s30066_s8 + $0xd00] ss:$16 sps:$4 sm:$0xff]   ;;  %v22954_v7 = vld [vmem:[%s30066_s8 + $0x86c] ss:$16 sps:$4 sm:$0xff]  }
 0x9b2   : > { %14565 = vmatpush1.bf16.msra.mxu1 %v22886_v37  ;;  %14596 = vmatprep.mubr.bf16.mxu1 %v30109_v14  ;;  %v23016_v37 = vld [vmem:[%s30068_s10 + $0x148] sm:$0xff]  }
 0x9b3   : > { %v28961_v20 = vpop.f32.mrf.mxu1  ;;  %14566 = vmatprep.subr.bf16.mxu1 %v22894_v16  ;;  %v22952_v16 = vld [vmem:[%s30066_s8 + $0x868] ss:$16 sps:$4 sm:$0xff]  }
 0x9b4   : > { %14413 = vmatpush1.bf16.msra.mxu0 %v22889_v56  ;;  %v23017_v56 = vld [vmem:[%s30068_s10 + $0x108] sm:$0xff]  }
 0x9b5   : > { %v12929_v54 = vpop.f32.mrf.mxu1  ;;  %14414 = vmatprep.subr.bf16.mxu0 %v22897_v61  ;;  %v22957_v61 = vld [vmem:[%s30066_s8 + $0x84c] ss:$16 sps:$4 sm:$0xff]  }
 0x9b6   : > { %14567 = vmatpush1.bf16.msra.mxu1 %v22892_v26  ;;  %v22955_v26 = vld [vmem:[%s30066_s8 + $0x848] ss:$16 sps:$4 sm:$0xff]   ;;  %v23018_v54 = vld [vmem:[%s30068_s10 + $0x140] sm:$0xff]  }
 0x9b7   : > { %v12930_v3 = vpop.f32.mrf.mxu1  ;;  %14568 = vmatprep.subr.bf16.mxu1 %v22900_v40  ;;  %v22960_v40 = vld [vmem:[%s30066_s8 + $0x82c] ss:$16 sps:$4 sm:$0xff]  }
 0x9b8   : > { %14415 = vmatpush1.bf16.msra.mxu0 %v22895_v36  ;;  %v22958_v36 = vld [vmem:[%s30066_s8 + $0x828] ss:$16 sps:$4 sm:$0xff]   ;;  %v23019_v3 = vld [vmem:[%s30068_s10 + $0x100] sm:$0xff]  }
 0x9b9   : > { %14441 = vmatprep.subr.bf16.mxu0 %v22903_v63 }
 0x9ba   : > { %14569 = vmatpush1.bf16.msra.mxu1 %v22898_v11  ;;  %v22963_v11 = vld [vmem:[%s30066_s8 + $0x80c] ss:$16 sps:$4 sm:$0xff]  }
 0x9bb   : > { %14433 = vmatmul.mubr.bf16.vlgmr.msra.gmra.mxu0 %v28261_v50  ;;  %14570 = vmatprep.subr.bf16.mxu1 %v22906_v2 }
 0x9bc   : > { %14442 = vmatpush1.bf16.msra.mxu0 %v22901_v23  ;;  %14473 = vmatprep.mubr.bf16.mxu0 %v27929_v8  ;;  %v22913_v8 = vld [vmem:[%s30066_s8 + $0x7a8] ss:$16 sps:$4 sm:$0xff]  }
 0x9bd   : > { %14443 = vmatprep.subr.bf16.mxu0 %v22909_v12  ;;  %v22961_v23 = vld [vmem:[%s30066_s8 + $0x808] ss:$16 sps:$4 sm:$0xff]  }
 0x9be   : > { %14571 = vmatpush1.bf16.msra.mxu1 %v22904_v17  ;;  %v23020_v12 = vld [vmem:[%s30068_s10 + $0x138] sm:$0xff]  }
 0x9bf   : > { %14572 = vmatprep.subr.bf16.mxu1 %v22912_v19  ;;  %v22966_v19 = vld [vmem:[%s30066_s8 + $0xbec] ss:$16 sps:$4 sm:$0xff]  }
 0x9c0   : > { %14444 = vmatpush1.bf16.msra.mxu0 %v22907_v45  ;;  %v23021_v45 = vld [vmem:[%s30068_s10 + $0xf8] sm:$0xff]  }
 0x9c1   : > { %14445 = vmatprep.subr.bf16.mxu0 %v22915_v58 }
 0x9c2   : > { %14573 = vmatpush1.bf16.msra.mxu1 %v22910_v49  ;;  %v23022_v49 = vld [vmem:[%s30068_s10 + $0x130] sm:$0xff]  }
 0x9c3   : > { %14574 = vmatprep.subr.bf16.mxu1 %v22918_v28  ;;  %v22964_v28 = vld [vmem:[%s30066_s8 + $0xbe8] ss:$16 sps:$4 sm:$0xff]  }
 0x9c4   : > { %14446 = vmatpush1.bf16.msra.mxu0 %v22913_v8  ;;  %v22969_v8 = vld [vmem:[%s30066_s8 + $0xbcc] ss:$16 sps:$4 sm:$0xff]  }
 0x9c5   : > { %14447 = vmatprep.subr.bf16.mxu0 %v22921_v46  ;;  %v23023_v46 = vld [vmem:[%s30068_s10 + $0xf0] sm:$0xff]  }
 0x9c6   : > { %14575 = vmatpush1.bf16.msra.mxu1 %v22916_v42  ;;  %v22967_v42 = vld [vmem:[%s30066_s8 + $0xbc8] ss:$16 sps:$4 sm:$0xff]  }
 0x9c7   : > { %14576 = vmatprep.subr.bf16.mxu1 %v22924_v30  ;;  %v23024_v30 = vld [vmem:[%s30068_s10 + $0x128] sm:$0xff]  }
 0x9c8   : > { %14448 = vmatpush1.bf16.msra.mxu0 %v22919_v13  ;;  %v22972_v13 = vld [vmem:[%s30066_s8 + $0xbac] ss:$16 sps:$4 sm:$0xff]  }
 0x9c9   : > { %14449 = vmatprep.subr.bf16.mxu0 %v22927_v38  ;;  %v23026_v38 = vld [vmem:[%s30068_s10 + $0x120] sm:$0xff]  }
 0x9ca   : > { %14577 = vmatpush1.bf16.msra.mxu1 %v22922_v44  ;;  %v22975_v44 = vld [vmem:[%s30066_s8 + $0xb8c] ss:$16 sps:$4 sm:$0xff]  }
 0x9cb   : > { %14578 = vmatprep.subr.bf16.mxu1 %v22930_v21  ;;  %v23027_v21 = vld [vmem:[%s30068_s10 + $0xe0] sm:$0xff]  }
 0x9cc   : > { %14450 = vmatpush1.bf16.msra.mxu0 %v22925_v10  ;;  %v22973_v10 = vld [vmem:[%s30066_s8 + $0xb88] ss:$16 sps:$4 sm:$0xff]  }
 0x9cd   : > { %14451 = vmatprep.subr.bf16.mxu0 %v22933_v4  ;;  %v23028_v4 = vld [vmem:[%s30068_s10 + $0x78] sm:$0xff]  }
 0x9ce   : > { %14579 = vmatpush1.bf16.msra.mxu1 %v22928_v51  ;;  %v22978_v51 = vld [vmem:[%s30066_s8 + $0xb6c] ss:$16 sps:$4 sm:$0xff]  }
 0x9cf   : > { %20347 = vmatprep.subr.bf16.mxu1 %v23012_v48  ;;  %v22991_v48 = vld [vmem:[%s30066_s8 + $0xcc8] ss:$16 sps:$4 sm:$0xff]  }
 0x9d0   : > { %14452 = vmatpush1.bf16.msra.mxu0 %v22931_v32  ;;  %v22976_v32 = vld [vmem:[%s30066_s8 + $0xb68] ss:$16 sps:$4 sm:$0xff]  }
 0x9d1   : > { %14597 = vmatmul.mubr.bf16.vlgmr.msra.gmra.mxu1 %v28261_v50  ;;  %14453 = vmatprep.subr.bf16.mxu0 %v22936_v52  ;;  %v22940_v50 = vld [vmem:[%s30066_s8 + $0x8e8] ss:$16 sps:$4 sm:$0xff]   ;;  %v22981_v52 = vld [vmem:[%s30066_s8 + $0xb4c] ss:$16 sps:$4 sm:$0xff]  }
 0x9d2   : > { %20348 = vmatpush3.bf16.msra.mxu1 %v23013_v24 }
 0x9d3   : > { %20349 = vmatprep.subr.bf16.mxu1 %v23014_v55  ;;  %v22996_v55 = vld [vmem:[%s30066_s8 + $0xcac] ss:$16 sps:$4 sm:$0xff]  }
 0x9d4   : > { %14454 = vmatpush1.bf16.msra.mxu0 %v22934_v47  ;;  %v22979_v47 = vld [vmem:[%s30066_s8 + $0xb48] ss:$16 sps:$4 sm:$0xff]  }
 0x9d5   : > { %14455 = vmatprep.subr.bf16.mxu0 %v22939_v43  ;;  %v22984_v43 = vld [vmem:[%s30066_s8 + $0xb2c] ss:$16 sps:$4 sm:$0xff]  }
 0x9d6   : > { %20350 = vmatpush3.bf16.msra.mxu1 %v23015_v9  ;;  %v22997_v9 = vld [vmem:[%s30066_s8 + $0xc88] ss:$16 sps:$4 sm:$0xff]  }
 0x9d7   : > { %20351 = vmatprep.subr.bf16.mxu1 %v23016_v37  ;;  %v23000_v37 = vld [vmem:[%s30066_s8 + $0xc68] ss:$16 sps:$4 sm:$0xff]  }
 0x9d8   : > { %14456 = vmatpush1.bf16.msra.mxu0 %v22937_v27  ;;  %v22982_v27 = vld [vmem:[%s30066_s8 + $0xb28] ss:$16 sps:$4 sm:$0xff]  }
 0x9d9   : > { %14457 = vmatprep.subr.bf16.mxu0 %v22942_v15  ;;  %v22987_v15 = vld [vmem:[%s30066_s8 + $0xb0c] ss:$16 sps:$4 sm:$0xff]  }
 0x9da   : > { %20352 = vmatpush3.bf16.msra.mxu1 %v23017_v56  ;;  %v23003_v56 = vld [vmem:[%s30066_s8 + $0xc48] ss:$16 sps:$4 sm:$0xff]  }
 0x9db   : > { %v29062_v59 = vpop.f32.mrf.mxu0  ;;  %20353 = vmatprep.subr.bf16.mxu1 %v23018_v54 }
 0x9dc   : > { %14458 = vmatpush2.bf16.msra.mxu0 %v22940_v50  ;;  %v22985_v50 = vld [vmem:[%s30066_s8 + $0xb08] ss:$16 sps:$4 sm:$0xff]  }
 0x9dd   : > { %v29067_v6 = vpop.f32.mrf.mxu0  ;;  %14459 = vmatprep.subr.bf16.mxu0 %v22945_v41  ;;  %v22990_v41 = vld [vmem:[%s30066_s8 + $0xcec] ss:$16 sps:$4 sm:$0xff]  }
 0x9de   : > { %20354 = vmatpush3.bf16.msra.mxu1 %v23019_v3 }
 0x9df   : > { %v12806_v29 = vpop.f32.mrf.mxu0  ;;  %20355 = vmatprep.subr.bf16.mxu1 %v23020_v12  ;;  %v23060_v12 = vld [vmem:[%s30068_s10 + $0x198] sm:$0xff]  }
 0x9e0   : > { %14460 = vmatpush2.bf16.msra.mxu0 %v22943_v1  ;;  %v22988_v1 = vld [vmem:[%s30066_s8 + $0xce8] ss:$16 sps:$4 sm:$0xff]   ;;  %v12844_v29 = vadd.f32 %v28843_v33, %v29062_v59 }
 0x9e1   : > { %v12807_v25 = vpop.f32.mrf.mxu0  ;;  %14461 = vmatprep.subr.bf16.mxu0 %v22948_v39  ;;  %v22993_v39 = vld [vmem:[%s30066_s8 + $0xccc] ss:$16 sps:$4 sm:$0xff]  }
 0x9e2   : > { %20356 = vmatpush3.bf16.msra.mxu1 %v23021_v45  ;;  %v23068_v45 = vld [vmem:[%s30068_s10 + $0x178] sm:$0xff]  }
 0x9e3   : > { %20357 = vmatprep.subr.bf16.mxu1 %v23022_v49 }
 0x9e4   : > { %14462 = vmatpush2.bf16.msra.mxu0 %v22946_v53 }
 0x9e5   : > { %14463 = vmatprep.subr.bf16.mxu0 %v22951_v62  ;;  %v12846_v62 = vadd.f32 %v28851_v22, %v29067_v6  ;;  %v22994_v22 = vld [vmem:[%s30066_s8 + $0xca8] ss:$16 sps:$4 sm:$0xff]   ;;  %v22999_v6 = vld [vmem:[%s30066_s8 + $0xc8c] ss:$16 sps:$4 sm:$0xff]  }
 0x9e6   : > { %20358 = vmatpush3.bf16.msra.mxu1 %v23023_v46 }
 0x9e7   : > { %20359 = vmatprep.subr.bf16.mxu1 %v23024_v30  ;;  %v23074_v30 = vld [vmem:[%s30068_s10 + $0x160] sm:$0xff]  }
 0x9e8   : > { %14464 = vmatpush2.bf16.msra.mxu0 %v22949_v5 }
 0x9e9   : > { %14465 = vmatprep.subr.bf16.mxu0 %v22954_v7  ;;  %v23002_v7 = vld [vmem:[%s30066_s8 + $0xc6c] ss:$16 sps:$4 sm:$0xff]  }
 0x9ec   : > { %14466 = vmatpush2.bf16.msra.mxu0 %v22952_v16  ;;  %v23005_v16 = vld [vmem:[%s30066_s8 + $0xc4c] ss:$16 sps:$4 sm:$0xff]  }
 0x9ed   : > { %14467 = vmatprep.subr.bf16.mxu0 %v22957_v61  ;;  %v23008_v61 = vld [vmem:[%s30066_s8 + $0xc2c] ss:$16 sps:$4 sm:$0xff]  }
 0x9f0   : > { %14468 = vmatpush2.bf16.msra.mxu0 %v22955_v26  ;;  %v23006_v26 = vld [vmem:[%s30066_s8 + $0xc28] ss:$16 sps:$4 sm:$0xff]  }
 0x9f1   : > { %v29120_v63 = vpop.f32.mrf.mxu1  ;;  %14469 = vmatprep.subr.bf16.mxu0 %v22960_v40 }
 0x9f3   : > { %v29128_v2 = vpop.f32.mrf.mxu1 }
 0x9f4   : > { %14470 = vmatpush2.bf16.msra.mxu0 %v22958_v36  ;;  %v23011_v36 = vld [vmem:[%s30066_s8 + $0xc0c] ss:$16 sps:$4 sm:$0xff]  }
 0x9f5   : > { %v14315_v17 = vpop.f32.mrf.mxu1  ;;  %14471 = vmatprep.subr.bf16.mxu0 %v22963_v11  ;;  %v23009_v11 = vld [vmem:[%s30066_s8 + $0xc08] ss:$16 sps:$4 sm:$0xff]  }
 0x9f6   : > { %v23062_v17 = vld [vmem:[%s30068_s10 + $0x190] sm:$0xff]  }
 0x9f7   : > { %v14316_v58 = vpop.f32.mrf.mxu1 }
 0x9f8   : > { %14472 = vmatpush2.bf16.msra.mxu0 %v22961_v23  ;;  %v23070_v58 = vld [vmem:[%s30068_s10 + $0x170] sm:$0xff]  }
 0x9f9   : > { %14523 = vmatprep.subr.bf16.mxu0 %v22966_v19  ;;  %v23064_v19 = vld [vmem:[%s30068_s10 + $0x188] sm:$0xff]  }
 0x9fb   : > { %14474 = vmatmul.mubr.bf16.vlgmr.msra.gmra.mxu0 %v27924_v57  ;;  %v23025_v57 = vld [vmem:[%s30068_s10 + $0xe8] sm:$0xff]  }
 0x9fc   : > { %14524 = vmatpush1.bf16.msra.mxu0 %v22964_v28  ;;  %14555 = vmatprep.mubr.bf16.mxu0 %v28077_v0  ;;  %v22970_v0 = vld [vmem:[%s30066_s8 + $0xba8] ss:$16 sps:$4 sm:$0xff]  }
 0x9fd   : > { %14525 = vmatprep.subr.bf16.mxu0 %v22969_v8  ;;  %20360 = vmatpush3.bf16.msra.mxu1 %v23025_v57  ;;  %v23072_v8 = vld [vmem:[%s30068_s10 + $0x168] sm:$0xff]  }
 0x9fe   : > { %20361 = vmatprep.subr.bf16.mxu1 %v23026_v38 }
 0xa00   : > { %14526 = vmatpush1.bf16.msra.mxu0 %v22967_v42 }
 0xa01   : > { %14527 = vmatprep.subr.bf16.mxu0 %v22972_v13  ;;  %20362 = vmatpush3.bf16.msra.mxu1 %v23027_v21  ;;  %v23076_v13 = vld [vmem:[%s30068_s10 + $0x1b8] sm:$0xff]  }
 0xa02   : > { %20369 = vmatprep.subr.bf16.mxu1 %v23028_v4 }
 0xa04   : > { %14528 = vmatpush1.bf16.msra.mxu0 %v22970_v0 }
 0xa05   : > { %14529 = vmatprep.subr.bf16.mxu0 %v22975_v44 }
 0xa08   : > { %14530 = vmatpush1.bf16.msra.mxu0 %v22973_v10 }
 0xa09   : > { %14531 = vmatprep.subr.bf16.mxu0 %v22978_v51 }
 0xa0c   : > { %14532 = vmatpush1.bf16.msra.mxu0 %v22976_v32 }
 0xa0d   : > { %14533 = vmatprep.subr.bf16.mxu0 %v22981_v52 }
 0xa10   : > { %14534 = vmatpush1.bf16.msra.mxu0 %v22979_v47  ;;  %v23078_v47 = vld [vmem:[%s30068_s10 + $0x1b0] sm:$0xff]  }
 0xa11   : > { %14535 = vmatprep.subr.bf16.mxu0 %v22984_v43 }
 0xa14   : > { %14536 = vmatpush1.bf16.msra.mxu0 %v22982_v27 }
 0xa15   : > { %14537 = vmatprep.subr.bf16.mxu0 %v22987_v15 }
 0xa18   : > { %14538 = vmatpush1.bf16.msra.mxu0 %v22985_v50 }
 0xa19   : > { %14539 = vmatprep.subr.bf16.mxu0 %v22990_v41 }
 0xa1b   : > { %v12884_v53 = vpop.f32.mrf.mxu0 }
 0xa1c   : > { %v29223_v25 = vadd.f32 %v12884_v53, %v12844_v29  ;;  %14540 = vmatpush2.bf16.msra.mxu0 %v22988_v1  ;;  %v23029_v29 = vld [vmem:[%s30068_s10 + $0x38] sm:$0xff]  }
 0xa1d   : > { %v12886_v24 = vpop.f32.mrf.mxu0  ;;  %14541 = vmatprep.subr.bf16.mxu0 %v22993_v39 }
 0xa1e   : > { %v29231_v5 = vadd.f32 %v12886_v24, %v12846_v62  ;;  %v23030_v62 = vld [vmem:[%s30068_s10 + $0x70] sm:$0xff]   ;;  %v23032_v24 = vld [vmem:[%s30068_s10 + $0x68] sm:$0xff]  }
 0xa1f   : > { %v12888_v33 = vpop.f32.mrf.mxu0 }
 0xa20   : > { %14542 = vmatpush2.bf16.msra.mxu0 %v22991_v48  ;;  %v23031_v48 = vld [vmem:[%s30068_s10 + $0x30] sm:$0xff]   ;;  %v23034_v33 = vld [vmem:[%s30068_s10 + $0x60] sm:$0xff]  }
 0xa21   : > { %v12889_v59 = vpop.f32.mrf.mxu0  ;;  %14543 = vmatprep.subr.bf16.mxu0 %v22996_v55  ;;  %v23033_v55 = vld [vmem:[%s30068_s10 + $0x28] sm:$0xff]  }
 0xa24   : > { %14544 = vmatpush2.bf16.msra.mxu0 %v22994_v22  ;;  %v23035_v22 = vld [vmem:[%s30068_s10 + $0x20] sm:$0xff]  }
 0xa25   : > { %14545 = vmatprep.subr.bf16.mxu0 %v22999_v6  ;;  %v23036_v6 = vld [vmem:[%s30068_s10 + $0x58] sm:$0xff]  }
 0xa28   : > { %14546 = vmatpush2.bf16.msra.mxu0 %v22997_v9 }
 0xa29   : > { %14547 = vmatprep.subr.bf16.mxu0 %v23002_v7  ;;  %v23037_v7 = vld [vmem:[%s30068_s10 + $0x18] sm:$0xff]  }
 0xa2c   : > { %14548 = vmatpush2.bf16.msra.mxu0 %v23000_v37 }
 0xa2d   : > { %14549 = vmatprep.subr.bf16.mxu0 %v23005_v16  ;;  %v23038_v16 = vld [vmem:[%s30068_s10 + $0x50] sm:$0xff]  }
 0xa30   : > { %14550 = vmatpush2.bf16.msra.mxu0 %v23003_v56 }
 0xa31   : > { %v14393_v40 = vpop.f32.mrf.mxu1  ;;  %14551 = vmatprep.subr.bf16.mxu0 %v23008_v61  ;;  %v23039_v61 = vld [vmem:[%s30068_s10 + $0x10] sm:$0xff]  }
 0xa33   : > { %v14395_v54 = vpop.f32.mrf.mxu1 }
 0xa34   : > { %14552 = vmatpush2.bf16.msra.mxu0 %v23006_v26  ;;  %v23040_v26 = vld [vmem:[%s30068_s10 + $0x48] sm:$0xff]  }
 0xa35   : > { %v14397_v3 = vpop.f32.mrf.mxu1  ;;  %14553 = vmatprep.subr.bf16.mxu0 %v23011_v36  ;;  %v23042_v36 = vld [vmem:[%s30068_s10 + $0x40] sm:$0xff]  }
 0xa36   : > { %v23045_v3 = vld [vmem:[%s30068_s10 + $0x1f8] sm:$0xff]  }
 0xa37   : > { %v14398_v23 = vpop.f32.mrf.mxu1 }
 0xa38   : > { %14554 = vmatpush2.bf16.msra.mxu0 %v23009_v11  ;;  %v23044_v11 = vld [vmem:[%s30068_s10 + $0x238] sm:$0xff]   ;;  %v23046_v23 = vld [vmem:[%s30068_s10 + $0x230] sm:$0xff]  }
 0xa39   : > { %14952 = vmatprep.subr.bf16.mxu0 %v30109_v14 }
 0xa3b   : > { %14556 = vmatmul.mubr.bf16.vlgmr.msra.gmra.mxu0 %v28075_v60  ;;  %v23066_v60 = vld [vmem:[%s30068_s10 + $0x180] sm:$0xff]  }
 0xa3c   : > { %14953 = vmatpush1.bf16.msra.mxu0 %v23060_v12 }
 0xa3d   : > { %14954 = vmatprep.subr.bf16.mxu0 %v30109_v14 }
 0xa40   : > { %14955 = vmatpush1.bf16.msra.mxu0 %v23062_v17  ;;  %v23047_v17 = vld [vmem:[%s30068_s10 + $0x1f0] sm:$0xff]  }
 0xa41   : > { %14956 = vmatprep.subr.bf16.mxu0 %v30109_v14 }
 0xa44   : > { %14957 = vmatpush1.bf16.msra.mxu0 %v23064_v19  ;;  %v23048_v19 = vld [vmem:[%s30068_s10 + $0x228] sm:$0xff]  }
 0xa45   : > { %14958 = vmatprep.subr.bf16.mxu0 %v30109_v14 }
 0xa48   : > { %14959 = vmatpush1.bf16.msra.mxu0 %v23066_v60  ;;  %v23049_v60 = vld [vmem:[%s30068_s10 + $0x1e8] sm:$0xff]  }
 0xa49   : > { %14960 = vmatprep.subr.bf16.mxu0 %v30109_v14 }
 0xa4c   : > { %14961 = vmatpush1.bf16.msra.mxu0 %v23068_v45  ;;  %v23050_v45 = vld [vmem:[%s30068_s10 + $0x220] sm:$0xff]  }
 0xa4d   : > { %14962 = vmatprep.subr.bf16.mxu0 %v30109_v14 }
 0xa50   : > { %14963 = vmatpush1.bf16.msra.mxu0 %v23070_v58  ;;  %v23051_v58 = vld [vmem:[%s30068_s10 + $0x1e0] sm:$0xff]  }
 0xa51   : > { %14964 = vmatprep.subr.bf16.mxu0 %v30109_v14 }
 0xa54   : > { %14965 = vmatpush1.bf16.msra.mxu0 %v23072_v8  ;;  %v23054_v8 = vld [vmem:[%s30068_s10 + $0x210] sm:$0xff]  }
 0xa55   : > { %14966 = vmatprep.subr.bf16.mxu0 %v30109_v14 }
 0xa58   : > { %14967 = vmatpush1.bf16.msra.mxu0 %v23074_v30 }
 0xa59   : > { %14976 = vmatprep.subr.bf16.mxu0 %v30109_v14 }
 0xa5b   : > { %v14352_v49 = vpop.f32.mrf.mxu0 }
 0xa5c   : > { %14977 = vmatpush2.bf16.msra.mxu0 %v23076_v13  ;;  %v14353_v44 = vadd.f32 %v14352_v49, %v29120_v63  ;;  %v23052_v49 = vld [vmem:[%s30068_s10 + $0x218] sm:$0xff]   ;;  %v23057_v13 = vld [vmem:[%s30068_s10 + $0x1c8] sm:$0xff]  }
 0xa5d   : > { %v14354_v28 = vpop.f32.mrf.mxu0  ;;  %14978 = vmatprep.subr.bf16.mxu0 %v30109_v14 }
 0xa5e   : > { %v14355_v10 = vadd.f32 %v14354_v28, %v29128_v2  ;;  %v14394_v4 = vadd.f32 %v14393_v40, %v14353_v44  ;;  %v23080_v2 = vld [vmem:[%s30068_s10 + $0x1a8] sm:$0xff]   ;;  %v23053_v28 = vld [vmem:[%s30068_s10 + $0x1d8] sm:$0xff]   ;;  %v23058_v44 = vld [vmem:[%s30068_s10 + $0x200] sm:$0xff]  }
 0xa5f   : > { %v14356_v46 = vpop.f32.mrf.mxu0  ;;  %v23041_v40 = vld [vmem:[%s30068_s10 + $0x8] sm:$0xff]  }
 0xa60   : > { %v14396_v52 = vadd.f32 %v14395_v54, %v14355_v10  ;;  %14979 = vmatpush2.bf16.msra.mxu0 %v23078_v47  ;;  %v23043_v54 = vld [vmem:[%s30068_s10] sm:$0xff]   ;;  %v23055_v46 = vld [vmem:[%s30068_s10 + $0x1d0] sm:$0xff]   ;;  %v23065_v47 = vld [vmem:[%s30068_s10 + $0x268] sm:$0xff]  }
 0xa61   : > { %v14357_v42 = vpop.f32.mrf.mxu0  ;;  %14980 = vmatprep.subr.bf16.mxu0 %v30109_v14  ;;  %v23059_v10 = vld [vmem:[%s30068_s10 + $0x1c0] sm:$0xff]  }
 0xa62   : > { %v23056_v42 = vld [vmem:[%s30068_s10 + $0x208] sm:$0xff]  }
 0xa64   : > { %14981 = vmatpush2.bf16.msra.mxu0 %v23080_v2  ;;  %v23077_v2 = vld [vmem:[%s30068_s10 + $0x298] sm:$0xff]  }
 0xa65   : > { %14982 = vmatprep.subr.bf16.mxu0 %v30109_v14 }
 0xa71   : > { %v29304_v57 = vpop.f32.mrf.mxu1 }
 0xa73   : > { %v29306_v0 = vpop.f32.mrf.mxu1 }
 0xa75   : > { %v14520_v38 = vpop.f32.mrf.mxu1 }
 0xa77   : > { %v14521_v21 = vpop.f32.mrf.mxu1 }
 0xa7b   : > { %v14434_v51 = vpop.f32.mrf.mxu0 }
 0xa7c   : > { %v14435_v32 = vadd.f32 %v14434_v51, %v14394_v4  ;;  %v23061_v51 = vld [vmem:[%s30068_s10 + $0x278] sm:$0xff]  }
 0xa7d   : > { %v14436_v43 = vpop.f32.mrf.mxu0 }
 0xa7e   : > { %v14605_v27 = vmax.f32 %v28882_v34, %v14435_v32  ;;  %v14437_v15 = vadd.f32 %v14436_v43, %v14396_v52  ;;  %v23063_v52 = vld [vmem:[%s30068_s10 + $0x270] sm:$0xff]   ;;  %v23067_v43 = vld [vmem:[%s30068_s10 + $0x260] sm:$0xff]  }
 0xa7f   : > { %v14438_v50 = vpop.f32.mrf.mxu0 }
 0xa80   : > { %v14606_v63 = vmax.f32 %v28892_v31, %v14437_v15  ;;  %v29319_v41 = vpack.c.bf16 %v14605_v27, %v14605_v27  ;;  %v23082_v31 = vld [vmem:[%s30068_s10 + $0x1a0] sm:$0xff]   ;;  %v23069_v27 = vld [vmem:[%s30068_s10 + $0x258] sm:$0xff]   ;;  %v23071_v15 = vld [vmem:[%s30068_s10 + $0x250] sm:$0xff]  }
 0xa81   : > { %v14439_v1 = vpop.f32.mrf.mxu0  ;;  %14983 = vmatpush2.bf16.msra.mxu0 %v23082_v31  ;;  %v23073_v50 = vld [vmem:[%s30068_s10 + $0x248] sm:$0xff]   ;;  %v23083_v31 = vld [vmem:[%s30068_s10 + $0x280] sm:$0xff]  }
 0xa82   : > { %v29321_v39 = vpack.c.bf16 %v14606_v63, %v14606_v63  ;;  %v29334_v53 = vshrl.u32 %v29319_v41, 16  ;;  %15202 = vmatprep.subr.bf16.mxu0 %v30109_v14  ;;  %v15303_v32 = vrot.slane %v29319_v41, 1  ;;  %v23075_v63 = vld [vmem:[%s30068_s10 + $0x240] sm:$0xff]   ;;  %v23079_v1 = vld [vmem:[%s30068_s10 + $0x290] sm:$0xff]  }
 0xa84   : > { %v29325_v34 = vshrl.u32 %v29321_v39, 16  ;;  %v15304_v12 = vrot.slane %v29321_v39, 1 }
 0xa86   : > { %14944 = vmatprep.mubr.bf16.mxu1 %v29325_v34 }
 0xa87   : > { %14945 = vmatmul.mubr.bf16.vlgmr.msra.gmra.mxu1 %v29334_v53 }
 0xa88   : > { %20370 = vmatpush3.bf16.msra.mxu1 %v23029_v29  ;;  %15194 = vmatprep.mubr.bf16.mxu1 %v29321_v39  ;;  %v23081_v29 = vld [vmem:[%s30068_s10 + $0x288] sm:$0xff]  }
 0xa89   : > { %20371 = vmatprep.subr.bf16.mxu1 %v23030_v62  ;;  %v23084_v62 = vld [vmem:[%s30068_s10 + $0x3f8] sm:$0xff]  }
 0xa8c   : > { %20372 = vmatpush3.bf16.msra.mxu1 %v23031_v48 }
 0xa8d   : > { %20373 = vmatprep.subr.bf16.mxu1 %v23032_v24 }
 0xa90   : > { %20374 = vmatpush3.bf16.msra.mxu1 %v23033_v55 }
 0xa91   : > { %v29358_v59 = vpop.f32.mrf.mxu1  ;;  %20375 = vmatprep.subr.bf16.mxu1 %v23034_v33 }
 0xa93   : > { %v29363_v9 = vpop.f32.mrf.mxu1 }
 0xa94   : > { %20376 = vmatpush3.bf16.msra.mxu1 %v23035_v22 }
 0xa95   : > { %v14602_v37 = vpop.f32.mrf.mxu1  ;;  %20377 = vmatprep.subr.bf16.mxu1 %v23036_v6  ;;  %v12926_v6 = vadd.f32 %v28951_v18, %v29223_v25  ;;  %v23085_v25 = vld [vmem:[%s30068_s10 + $0xb8] sm:$0xff]  }
 0xa97   : > { %v14603_v56 = vpop.f32.mrf.mxu1 }
 0xa98   : > { %20378 = vmatpush3.bf16.msra.mxu1 %v23037_v7  ;;  %v12928_v56 = vadd.f32 %v28961_v20, %v29231_v5  ;;  %v23086_v20 = vld [vmem:[%s30068_s10 + $0x3b8] sm:$0xff]  }
 0xa99   : > { %20379 = vmatprep.subr.bf16.mxu1 %v23038_v16 }
 0xa9c   : > { %20380 = vmatpush3.bf16.msra.mxu1 %v23039_v61 }
 0xa9d   : > { %20381 = vmatprep.subr.bf16.mxu1 %v23040_v26 }
 0xaa0   : > { %20382 = vmatpush3.bf16.msra.mxu1 %v23041_v40 }
 0xaa1   : > { %20383 = vmatprep.subr.bf16.mxu1 %v23042_v36 }
 0xaa4   : > { %20384 = vmatpush3.bf16.msra.mxu1 %v23043_v54 }
 0xaa5   : > { %20391 = vmatprep.subr.bf16.mxu1 %v23044_v11  ;;  %v15936_v11 = vrot.slane %v29321_v39, 2 }
 0xaa7   : > { %15195 = vmatmul.mubr.bf16.vlgmr.msra.gmra.mxu1 %v29319_v41 }
 0xaa8   : > { %20392 = vmatpush3.bf16.msra.mxu1 %v23045_v3  ;;  %15513 = vmatprep.mubr.bf16.mxu1 %v15304_v12  ;;  %v23088_v3 = vld [vmem:[%s30068_s10 + $0xb0] sm:$0xff]   ;;  %v23090_v12 = vld [vmem:[%s30068_s10 + $0x3e8] sm:$0xff]  }
 0xaa9   : > { %20393 = vmatprep.subr.bf16.mxu1 %v23046_v23  ;;  %v23089_v23 = vld [vmem:[%s30068_s10 + $0x3b0] sm:$0xff]  }
 0xaac   : > { %20394 = vmatpush3.bf16.msra.mxu1 %v23047_v17  ;;  %v23091_v17 = vld [vmem:[%s30068_s10 + $0xa8] sm:$0xff]  }
 0xaad   : > { %20395 = vmatprep.subr.bf16.mxu1 %v23048_v19  ;;  %v23092_v19 = vld [vmem:[%s30068_s10 + $0x3a8] sm:$0xff]  }
 0xab0   : > { %20396 = vmatpush3.bf16.msra.mxu1 %v23049_v60  ;;  %v23093_v60 = vld [vmem:[%s30068_s10 + $0x3e0] sm:$0xff]  }
 0xab1   : > { %20397 = vmatprep.subr.bf16.mxu1 %v23050_v45  ;;  %v23094_v45 = vld [vmem:[%s30068_s10 + $0xa0] sm:$0xff]  }
 0xab4   : > { %20398 = vmatpush3.bf16.msra.mxu1 %v23051_v58  ;;  %v23095_v58 = vld [vmem:[%s30068_s10 + $0x3a0] sm:$0xff]  }
 0xab5   : > { %20399 = vmatprep.subr.bf16.mxu1 %v23052_v49  ;;  %v23096_v49 = vld [vmem:[%s30068_s10 + $0x3d8] sm:$0xff]  }
 0xab8   : > { %20400 = vmatpush3.bf16.msra.mxu1 %v23053_v28  ;;  %v23097_v28 = vld [vmem:[%s30068_s10 + $0x98] sm:$0xff]  }
 0xab9   : > { %20401 = vmatprep.subr.bf16.mxu1 %v23054_v8  ;;  %v23098_v8 = vld [vmem:[%s30068_s10 + $0x398] sm:$0xff]  }
 0xabb   : > { %v14475_v30 = vpop.f32.mrf.mxu0 }
 0xabc   : > { %20402 = vmatpush3.bf16.msra.mxu1 %v23055_v46  ;;  %v14517_v48 = vadd.f32 %v29304_v57, %v14475_v30  ;;  %v23099_v46 = vld [vmem:[%s30068_s10 + $0x3d0] sm:$0xff]  }
 0xabd   : > { %v14477_v38 = vpop.f32.mrf.mxu0  ;;  %20403 = vmatprep.subr.bf16.mxu1 %v23056_v42  ;;  %v23100_v42 = vld [vmem:[%s30068_s10 + $0x90] sm:$0xff]  }
 0xabe   : > { %v14519_v55 = vadd.f32 %v29306_v0, %v14477_v38  ;;  %v23101_v30 = vld [vmem:[%s30068_s10 + $0x390] sm:$0xff]   ;;  %v23103_v38 = vld [vmem:[%s30068_s10 + $0x88] sm:$0xff]  }
 0xabf   : > { %v14479_v21 = vpop.f32.mrf.mxu0 }
 0xac0   : > { %20404 = vmatpush3.bf16.msra.mxu1 %v23057_v13  ;;  %v23102_v13 = vld [vmem:[%s30068_s10 + $0x3c8] sm:$0xff]   ;;  %v23105_v21 = vld [vmem:[%s30068_s10 + $0x3c0] sm:$0xff]  }
 0xac1   : > { %v14480_v4 = vpop.f32.mrf.mxu0  ;;  %20405 = vmatprep.subr.bf16.mxu1 %v23058_v44  ;;  %v23104_v44 = vld [vmem:[%s30068_s10 + $0x388] sm:$0xff]  }
 0xac2   : > { %v23107_v4 = vld [vmem:[%s30068_s10 + $0x380] sm:$0xff]  }
 0xac4   : > { %20406 = vmatpush3.bf16.msra.mxu1 %v23059_v10  ;;  %v23106_v10 = vld [vmem:[%s30068_s10 + $0x80] sm:$0xff]  }
 0xac5   : > { %15521 = vmatprep.subr.bf16.mxu1 %v30109_v14 }
 0xac7   : > { %15514 = vmatmul.mubr.bf16.vlgmr.msra.gmra.mxu1 %v15303_v32  ;;  %v23109_v32 = vld [vmem:[%s30068_s10 + $0x438] sm:$0xff]  }
 0xac8   : > { %15522 = vmatpush1.bf16.msra.mxu1 %v23061_v51  ;;  %v23108_v51 = vld [vmem:[%s30068_s10 + $0xd8] sm:$0xff]  }
 0xac9   : > { %15523 = vmatprep.subr.bf16.mxu1 %v30109_v14 }
 0xacc   : > { %15524 = vmatpush1.bf16.msra.mxu1 %v23063_v52  ;;  %v15935_v52 = vrot.slane %v29319_v41, 2 }
 0xacd   : > { %15525 = vmatprep.subr.bf16.mxu1 %v30109_v14 }
 0xad0   : > { %15526 = vmatpush1.bf16.msra.mxu1 %v23065_v47 }
 0xad1   : > { %15527 = vmatprep.subr.bf16.mxu1 %v30109_v14 }
 0xad4   : > { %15528 = vmatpush1.bf16.msra.mxu1 %v23067_v43  ;;  %v23110_v43 = vld [vmem:[%s30068_s10 + $0xd0] sm:$0xff]  }
 0xad5   : > { %15529 = vmatprep.subr.bf16.mxu1 %v30109_v14 }
 0xad8   : > { %15530 = vmatpush1.bf16.msra.mxu1 %v23069_v27  ;;  %v23111_v27 = vld [vmem:[%s30068_s10 + $0x430] sm:$0xff]  }
 0xad9   : > { %15531 = vmatprep.subr.bf16.mxu1 %v30109_v14 }
 0xadc   : > { %15532 = vmatpush1.bf16.msra.mxu1 %v23071_v15  ;;  %v23112_v15 = vld [vmem:[%s30068_s10 + $0xc8] sm:$0xff]  }
 0xadd   : > { %15533 = vmatprep.subr.bf16.mxu1 %v30109_v14 }
 0xae0   : > { %15534 = vmatpush1.bf16.msra.mxu1 %v23073_v50  ;;  %v23113_v50 = vld [vmem:[%s30068_s10 + $0x428] sm:$0xff]  }
 0xae1   : > { %15535 = vmatprep.subr.bf16.mxu1 %v30109_v14 }
 0xae4   : > { %15536 = vmatpush1.bf16.msra.mxu1 %v23075_v63  ;;  %v23114_v63 = vld [vmem:[%s30068_s10 + $0xc0] sm:$0xff]  }
 0xae5   : > { %15545 = vmatprep.subr.bf16.mxu1 %v30109_v14 }
 0xae8   : > { %15546 = vmatpush2.bf16.msra.mxu1 %v23077_v2  ;;  %v23115_v2 = vld [vmem:[%s30068_s10 + $0x420] sm:$0xff]  }
 0xae9   : > { %15547 = vmatprep.subr.bf16.mxu1 %v30109_v14 }
 0xaec   : > { %15548 = vmatpush2.bf16.msra.mxu1 %v23079_v1  ;;  %v23116_v1 = vld [vmem:[%s30068_s10 + $0x318] sm:$0xff]  }
 0xaed   : > { %15549 = vmatprep.subr.bf16.mxu1 %v30109_v14 }
 0xaf0   : > { %15550 = vmatpush2.bf16.msra.mxu1 %v23081_v29  ;;  %v23117_v29 = vld [vmem:[%s30068_s10 + $0x2d8] sm:$0xff]  }
 0xaf1   : > { %15551 = vmatprep.subr.bf16.mxu1 %v30109_v14 }
 0xaf4   : > { %15552 = vmatpush2.bf16.msra.mxu1 %v23083_v31  ;;  %v23118_v31 = vld [vmem:[%s30068_s10 + $0x418] sm:$0xff]  }
 0xaf5   : > { %20435 = vmatprep.subr.bf16.mxu1 %v23084_v62  ;;  %v23119_v62 = vld [vmem:[%s30068_s10 + $0x310] sm:$0xff]  }
 0xafb   : > { %v14557_v24 = vpop.f32.mrf.mxu0 }
 0xafc   : > { %v14558_v33 = vadd.f32 %v14557_v24, %v14517_v48  ;;  %v15620_v48 = vrot.slane %v29325_v34, 1  ;;  %v23120_v24 = vld [vmem:[%s30068_s10 + $0x2d0] sm:$0xff]  }
 0xafd   : > { %v14559_v22 = vpop.f32.mrf.mxu0 }
 0xafe   : > { %v14599_v7 = vadd.f32 %v29358_v59, %v14558_v33  ;;  %v14560_v37 = vadd.f32 %v14559_v22, %v14519_v55  ;;  %v23121_v55 = vld [vmem:[%s30068_s10 + $0x410] sm:$0xff]   ;;  %v23122_v33 = vld [vmem:[%s30068_s10 + $0x308] sm:$0xff]  }
 0xaff   : > { %v14561_v16 = vpop.f32.mrf.mxu0  ;;  %v23123_v22 = vld [vmem:[%s30068_s10 + $0x2c8] sm:$0xff]  }
 0xb00   : > { %v14607_v61 = vmax.f32 %v12926_v6, %v14599_v7  ;;  %v14601_v26 = vadd.f32 %v29363_v9, %v14560_v37  ;;  %v23087_v9 = vld [vmem:[%s30068_s10 + $0x3f0] sm:$0xff]   ;;  %v23124_v6 = vld [vmem:[%s30068_s10 + $0x408] sm:$0xff]   ;;  %v23125_v7 = vld [vmem:[%s30068_s10 + $0x300] sm:$0xff]  }
 0xb01   : > { %v14562_v40 = vpop.f32.mrf.mxu0  ;;  %v23126_v37 = vld [vmem:[%s30068_s10 + $0x2c0] sm:$0xff]  }
 0xb02   : > { %v14608_v57 = vmax.f32 %v12928_v56, %v14601_v26  ;;  %v29496_v36 = vpack.c.bf16 %v14607_v61, %v14607_v61  ;;  %v23127_v16 = vld [vmem:[%s30068_s10 + $0x400] sm:$0xff]   ;;  %v23128_v56 = vld [vmem:[%s30068_s10 + $0x2f8] sm:$0xff]  }
 0xb03   : > { %v23129_v61 = vld [vmem:[%s30068_s10 + $0x2b8] sm:$0xff]  }
 0xb04   : > { %v29498_v0 = vpack.c.bf16 %v14608_v57, %v14608_v57  ;;  %v29511_v5 = vshrl.u32 %v29496_v36, 16  ;;  %v15305_v59 = vrot.slane %v29496_v36, 1  ;;  %v23130_v40 = vld [vmem:[%s30068_s10 + $0x458] sm:$0xff]   ;;  %v23131_v57 = vld [vmem:[%s30068_s10 + $0x2f0] sm:$0xff]  }
 0xb06   : > { %v29501_v54 = vshrl.u32 %v29498_v0, 16  ;;  %v15306_v18 = vrot.slane %v29498_v0, 1  ;;  %v15938_v47 = vrot.slane %v29498_v0, 2 }
 0xb08   : > { %19780 = vmatprep.mubr.msk.bf16.mxu0 %vm7530_vm8, %v29501_v54  ;;  %19894 = vmatprep.mubr.msk.bf16.mxu1 %vm7530_vm8, %v15306_v18 }
 0xb09   : > { %14985 = vmatmul.mubr.bf16.vlgmr.msra.gmra.mxu0 %v29511_v5  ;;  %15554 = vmatmul.mubr.bf16.vlgmr.msra.gmra.mxu1 %v15305_v59 }
 0xb0a   : > { %15203 = vmatpush1.bf16.msra.mxu0 %v23085_v25  ;;  %20436 = vmatpush3.bf16.msra.mxu1 %v23086_v20  ;;  %v23132_v20 = vld [vmem:[%s30068_s10 + $0x2b0] sm:$0xff]  }
 0xb0b   : > { %19809 = vmatprep.mubr.msk.bf16.mxu0 %vm7530_vm8, %v29498_v0  ;;  %16145 = vmatprep.mubr.bf16.mxu1 %v15936_v11  ;;  %v23134_v11 = vld [vmem:[%s30068_s10 + $0x2e8] sm:$0xff]  }
 0xb0c   : > { %15204 = vmatprep.subr.bf16.mxu0 %v30109_v14  ;;  %20437 = vmatprep.subr.bf16.mxu1 %v23087_v9  ;;  %v23133_v9 = vld [vmem:[%s30068_s10 + $0x450] sm:$0xff]  }
 0xb0e   : > { %15205 = vmatpush1.bf16.msra.mxu0 %v23088_v3  ;;  %20438 = vmatpush3.bf16.msra.mxu1 %v23089_v23  ;;  %v23135_v23 = vld [vmem:[%s30068_s10 + $0x2a8] sm:$0xff]  }
 0xb0f   : > { %15206 = vmatprep.subr.bf16.mxu0 %v30109_v14  ;;  %20439 = vmatprep.subr.bf16.mxu1 %v23090_v12  ;;  %v23136_v12 = vld [vmem:[%s30068_s10 + $0x448] sm:$0xff]  }
 0xb12   : > { %15207 = vmatpush1.bf16.msra.mxu0 %v23091_v17  ;;  %20440 = vmatpush3.bf16.msra.mxu1 %v23092_v19  ;;  %v23137_v17 = vld [vmem:[%s30068_s10 + $0x2e0] sm:$0xff]  }
 0xb13   : > { %15208 = vmatprep.subr.bf16.mxu0 %v30109_v14  ;;  %20441 = vmatprep.subr.bf16.mxu1 %v23093_v60  ;;  %v23138_v19 = vld [vmem:[%s30068_s10 + $0x2a0] sm:$0xff]  }
 0xb14   : > { %v23139_v60 = vld [vmem:[%s30068_s10 + $0x440] sm:$0xff]  }
 0xb16   : > { %15209 = vmatpush1.bf16.msra.mxu0 %v23094_v45  ;;  %20442 = vmatpush3.bf16.msra.mxu1 %v23095_v58  ;;  %v23140_v45 = vld [vmem:[%s30068_s10 + $0x5b8] sm:$0xff]  }
 0xb17   : > { %15210 = vmatprep.subr.bf16.mxu0 %v30109_v14  ;;  %20443 = vmatprep.subr.bf16.mxu1 %v23096_v49  ;;  %v23141_v58 = vld [vmem:[%s30068_s10 + $0x358] sm:$0xff]   ;;  %v15619_v49 = vrot.slane %v29334_v53, 1 }
 0xb1a   : > { %15211 = vmatpush1.bf16.msra.mxu0 %v23097_v28  ;;  %20444 = vmatpush3.bf16.msra.mxu1 %v23098_v8  ;;  %v23142_v28 = vld [vmem:[%s30068_s10 + $0x578] sm:$0xff]   ;;  %v15937_v8 = vrot.slane %v29496_v36, 2 }
 0xb1b   : > { %15212 = vmatprep.subr.bf16.mxu0 %v30109_v14  ;;  %20445 = vmatprep.subr.bf16.mxu1 %v23099_v46  ;;  %v15622_v46 = vrot.slane %v29501_v54, 1 }
 0xb1e   : > { %15213 = vmatpush1.bf16.msra.mxu0 %v23100_v42  ;;  %20446 = vmatpush3.bf16.msra.mxu1 %v23101_v30  ;;  %v23143_v42 = vld [vmem:[%s30068_s10 + $0x5b0] sm:$0xff]   ;;  %v16568_v30 = vrot.slane %v29321_v39, 3  ;;  %v23147_v39 = vld [vmem:[%s30068_s10 + $0x348] sm:$0xff]  }
 0xb1f   : > { %15214 = vmatprep.subr.bf16.mxu0 %v30109_v14  ;;  %20447 = vmatprep.subr.bf16.mxu1 %v23102_v13  ;;  %v23144_v13 = vld [vmem:[%s30068_s10 + $0x350] sm:$0xff]  }
 0xb22   : > { %15215 = vmatpush1.bf16.msra.mxu0 %v23103_v38  ;;  %20448 = vmatpush3.bf16.msra.mxu1 %v23104_v44  ;;  %v23145_v38 = vld [vmem:[%s30068_s10 + $0x570] sm:$0xff]   ;;  %v23146_v44 = vld [vmem:[%s30068_s10 + $0x5a8] sm:$0xff]  }
 0xb23   : > { %15216 = vmatprep.subr.bf16.mxu0 %v30109_v14  ;;  %20449 = vmatprep.subr.bf16.mxu1 %v23105_v21  ;;  %v23148_v21 = vld [vmem:[%s30068_s10 + $0x568] sm:$0xff]  }
 0xb26   : > { %15217 = vmatpush1.bf16.msra.mxu0 %v23106_v10  ;;  %20450 = vmatpush3.bf16.msra.mxu1 %v23107_v4  ;;  %v23149_v10 = vld [vmem:[%s30068_s10 + $0x5a0] sm:$0xff]  }
 0xb27   : > { %15226 = vmatprep.subr.bf16.mxu0 %v30109_v14  ;;  %16153 = vmatprep.subr.bf16.mxu1 %v30109_v14  ;;  %v23150_v4 = vld [vmem:[%s30068_s10 + $0x340] sm:$0xff]  }
 0xb29   : > { %16146 = vmatmul.mubr.bf16.vlgmr.msra.gmra.mxu1 %v15935_v52  ;;  %v23153_v52 = vld [vmem:[%s30068_s10 + $0x338] sm:$0xff]  }
 0xb2a   : > { %15227 = vmatpush2.bf16.msra.mxu0 %v23108_v51  ;;  %16154 = vmatpush1.bf16.msra.mxu1 %v23109_v32  ;;  %v23151_v51 = vld [vmem:[%s30068_s10 + $0x560] sm:$0xff]   ;;  %v23152_v32 = vld [vmem:[%s30068_s10 + $0x598] sm:$0xff]  }
 0xb2b   : > { %20064 = vmatprep.mubr.msk.bf16.mxu1 %vm7530_vm8, %v15938_v47  ;;  %15228 = vmatprep.subr.bf16.mxu0 %v30109_v14 }
 0xb2c   : > { %16155 = vmatprep.subr.bf16.mxu1 %v30109_v14 }
 0xb2e   : > { %15229 = vmatpush2.bf16.msra.mxu0 %v23110_v43  ;;  %16156 = vmatpush1.bf16.msra.mxu1 %v23111_v27  ;;  %v23154_v43 = vld [vmem:[%s30068_s10 + $0x558] sm:$0xff]   ;;  %v23155_v27 = vld [vmem:[%s30068_s10 + $0x590] sm:$0xff]  }
 0xb2f   : > { %15230 = vmatprep.subr.bf16.mxu0 %v30109_v14  ;;  %16157 = vmatprep.subr.bf16.mxu1 %v30109_v14 }
 0xb32   : > { %15231 = vmatpush2.bf16.msra.mxu0 %v23112_v15  ;;  %16158 = vmatpush1.bf16.msra.mxu1 %v23113_v50 }
 0xb33   : > { %15232 = vmatprep.subr.bf16.mxu0 %v30109_v14  ;;  %16159 = vmatprep.subr.bf16.mxu1 %v30109_v14 }
 0xb36   : > { %15233 = vmatpush2.bf16.msra.mxu0 %v23114_v63  ;;  %16160 = vmatpush1.bf16.msra.mxu1 %v23115_v2  ;;  %v23156_v63 = vld [vmem:[%s30068_s10 + $0x330] sm:$0xff]  }
 0xb37   : > { %20413 = vmatprep.subr.bf16.mxu0 %v23116_v1  ;;  %16161 = vmatprep.subr.bf16.mxu1 %v30109_v14  ;;  %v23157_v1 = vld [vmem:[%s30068_s10 + $0x550] sm:$0xff]  }
 0xb39   : > { %15235 = vmatmul.mubr.bf16.vlgmr.msra.gmra.mxu0 %v29496_v36 }
 0xb3a   : > { %20414 = vmatpush3.bf16.msra.mxu0 %v23117_v29  ;;  %15829 = vmatprep.mubr.bf16.mxu0 %v15620_v48  ;;  %v23158_v29 = vld [vmem:[%s30068_s10 + $0x588] sm:$0xff]  }
 0xb3b   : > { %16162 = vmatpush1.bf16.msra.mxu1 %v23118_v31  ;;  %20415 = vmatprep.subr.bf16.mxu0 %v23119_v62  ;;  %v23159_v62 = vld [vmem:[%s30068_s10 + $0x328] sm:$0xff]  }
 0xb3c   : > { %16163 = vmatprep.subr.bf16.mxu1 %v30109_v14  ;;  %v23160_v48 = vld [vmem:[%s30068_s10 + $0x548] sm:$0xff]  }
 0xb3e   : > { %20416 = vmatpush3.bf16.msra.mxu0 %v23120_v24  ;;  %v23161_v24 = vld [vmem:[%s30068_s10 + $0x580] sm:$0xff]  }
 0xb3f   : > { %16164 = vmatpush1.bf16.msra.mxu1 %v23121_v55  ;;  %20417 = vmatprep.subr.bf16.mxu0 %v23122_v33  ;;  %v23162_v55 = vld [vmem:[%s30068_s10 + $0x320] sm:$0xff]  }
 0xb40   : > { %16165 = vmatprep.subr.bf16.mxu1 %v30109_v14  ;;  %v23163_v33 = vld [vmem:[%s30068_s10 + $0x540] sm:$0xff]  }
 0xb42   : > { %20418 = vmatpush3.bf16.msra.mxu0 %v23123_v22  ;;  %v23164_v22 = vld [vmem:[%s30068_s10 + $0x378] sm:$0xff]  }
 0xb43   : > { %16166 = vmatpush1.bf16.msra.mxu1 %v23124_v6  ;;  %20419 = vmatprep.subr.bf16.mxu0 %v23125_v7  ;;  %v23165_v6 = vld [vmem:[%s30068_s10 + $0x5f8] sm:$0xff]   ;;  %v16567_v7 = vrot.slane %v29319_v41, 3  ;;  %v23168_v41 = vld [vmem:[%s30068_s10 + $0x368] sm:$0xff]  }
 0xb44   : > { %16167 = vmatprep.subr.bf16.mxu1 %v30109_v14 }
 0xb46   : > { %20420 = vmatpush3.bf16.msra.mxu0 %v23126_v37  ;;  %v16570_v37 = vrot.slane %v29498_v0, 3  ;;  %v23169_v0 = vld [vmem:[%s30068_s10 + $0x5e8] sm:$0xff]  }
 0xb47   : > { %16168 = vmatpush1.bf16.msra.mxu1 %v23127_v16  ;;  %v20363_v26 = vpop.f32.mrf.mxu1  ;;  %20421 = vmatprep.subr.bf16.mxu0 %v23128_v56  ;;  %v23166_v16 = vld [vmem:[%s30068_s10 + $0x370] sm:$0xff]  }
 0xb48   : > { %16177 = vmatprep.subr.bf16.mxu1 %v30109_v14  ;;  %v23167_v56 = vld [vmem:[%s30068_s10 + $0x5f0] sm:$0xff]  }
 0xb49   : > { %v20364_v18 = vpop.f32.mrf.mxu1 }
 0xb4a   : > { %v29681_v25 = vadd.f32 %v20364_v18, %v20363_v26  ;;  %20422 = vmatpush3.bf16.msra.mxu0 %v23129_v61  ;;  %v23170_v61 = vld [vmem:[%s30068_s10 + $0x360] sm:$0xff]  }
 0xb4b   : > { %16178 = vmatpush2.bf16.msra.mxu1 %v23130_v40  ;;  %v20366_v59 = vpop.f32.mrf.mxu1  ;;  %20423 = vmatprep.subr.bf16.mxu0 %v23131_v57  ;;  %v23171_v26 = vld [vmem:[%s30068_s10 + $0x5e0] sm:$0xff]   ;;  %v23172_v40 = vld [vmem:[%s30068_s10 + $0x4d8] sm:$0xff]  }
 0xb4c   : > { %16179 = vmatprep.subr.bf16.mxu1 %v30109_v14  ;;  %v23173_v57 = vld [vmem:[%s30068_s10 + $0x498] sm:$0xff]  }
 0xb4d   : > { %v20367_v3 = vpop.f32.mrf.mxu1  ;;  %v23174_v59 = vld [vmem:[%s30068_s10 + $0x5d8] sm:$0xff]  }
 0xb4e   : > { %20424 = vmatpush3.bf16.msra.mxu0 %v23132_v20  ;;  %v15621_v20 = vrot.slane %v29511_v5, 1 }
 0xb4f   : > { %16180 = vmatpush2.bf16.msra.mxu1 %v23133_v9  ;;  %20425 = vmatprep.subr.bf16.mxu0 %v23134_v11  ;;  %v23175_v9 = vld [vmem:[%s30068_s10 + $0x4d0] sm:$0xff]   ;;  %v16252_v11 = vrot.slane %v29325_v34, 2  ;;  %v23178_v34 = vld [vmem:[%s30068_s10 + $0x4c8] sm:$0xff]  }
 0xb50   : > { %16181 = vmatprep.subr.bf16.mxu1 %v30109_v14 }
 0xb52   : > { %20426 = vmatpush3.bf16.msra.mxu0 %v23135_v23 }
 0xb53   : > { %16182 = vmatpush2.bf16.msra.mxu1 %v23136_v12  ;;  %20427 = vmatprep.subr.bf16.mxu0 %v23137_v17  ;;  %v23176_v12 = vld [vmem:[%s30068_s10 + $0x490] sm:$0xff]  }
 0xb54   : > { %16183 = vmatprep.subr.bf16.mxu1 %v30109_v14 }
 0xb56   : > { %20428 = vmatpush3.bf16.msra.mxu0 %v23138_v19  ;;  %v23177_v19 = vld [vmem:[%s30068_s10 + $0x5d0] sm:$0xff]  }
 0xb57   : > { %16184 = vmatpush2.bf16.msra.mxu1 %v23139_v60  ;;  %15837 = vmatprep.subr.bf16.mxu0 %v30109_v14 }
 0xb58   : > { %20479 = vmatprep.subr.bf16.mxu1 %v23140_v45  ;;  %v23179_v45 = vld [vmem:[%s30068_s10 + $0x488] sm:$0xff]  }
 0xb59   : > { %15830 = vmatmul.mubr.bf16.vlgmr.msra.gmra.mxu0 %v15619_v49  ;;  %v23181_v49 = vld [vmem:[%s30068_s10 + $0x4c0] sm:$0xff]  }
 0xb5a   : > { %16186 = vmatmul.mubr.bf16.vlgmr.msra.gmra.mxu1 %v15937_v8  ;;  %15838 = vmatpush1.bf16.msra.mxu0 %v23141_v58  ;;  %v23180_v58 = vld [vmem:[%s30068_s10 + $0x5c8] sm:$0xff]   ;;  %v23183_v8 = vld [vmem:[%s30068_s10 + $0x5c0] sm:$0xff]  }
 0xb5b   : > { %19979 = vmatprep.mubr.msk.bf16.mxu0 %vm7530_vm8, %v15622_v46  ;;  %20480 = vmatpush3.bf16.msra.mxu1 %v23142_v28  ;;  %v23182_v28 = vld [vmem:[%s30068_s10 + $0x480] sm:$0xff]   ;;  %v23184_v46 = vld [vmem:[%s30068_s10 + $0x4b8] sm:$0xff]  }
 0xb5c   : > { %16777 = vmatprep.mubr.bf16.mxu1 %v16568_v30  ;;  %15839 = vmatprep.subr.bf16.mxu0 %v30109_v14  ;;  %v23186_v30 = vld [vmem:[%s30068_s10 + $0x618] sm:$0xff]  }
 0xb5d   : > { %20481 = vmatprep.subr.bf16.mxu1 %v23143_v42  ;;  %v23185_v42 = vld [vmem:[%s30068_s10 + $0x478] sm:$0xff]  }
 0xb5e   : > { %15840 = vmatpush1.bf16.msra.mxu0 %v23144_v13  ;;  %v23187_v13 = vld [vmem:[%s30068_s10 + $0x4b0] sm:$0xff]  }
 0xb5f   : > { %20482 = vmatpush3.bf16.msra.mxu1 %v23145_v38  ;;  %15841 = vmatprep.subr.bf16.mxu0 %v30109_v14  ;;  %v23188_v38 = vld [vmem:[%s30068_s10 + $0x470] sm:$0xff]  }
 0xb60   : > { %20483 = vmatprep.subr.bf16.mxu1 %v23146_v44  ;;  %v23189_v44 = vld [vmem:[%s30068_s10 + $0x610] sm:$0xff]  }
 0xb62   : > { %15842 = vmatpush1.bf16.msra.mxu0 %v23147_v39  ;;  %v23190_v39 = vld [vmem:[%s30068_s10 + $0x4a8] sm:$0xff]  }
 0xb63   : > { %20484 = vmatpush3.bf16.msra.mxu1 %v23148_v21  ;;  %15843 = vmatprep.subr.bf16.mxu0 %v30109_v14  ;;  %v23191_v21 = vld [vmem:[%s30068_s10 + $0x468] sm:$0xff]  }
 0xb64   : > { %20485 = vmatprep.subr.bf16.mxu1 %v23149_v10  ;;  %v23192_v10 = vld [vmem:[%s30068_s10 + $0x608] sm:$0xff]  }
 0xb66   : > { %15844 = vmatpush1.bf16.msra.mxu0 %v23150_v4  ;;  %v23193_v4 = vld [vmem:[%s30068_s10 + $0x4a0] sm:$0xff]  }
 0xb67   : > { %20486 = vmatpush3.bf16.msra.mxu1 %v23151_v51  ;;  %v20385_v47 = vpop.f32.mrf.mxu1  ;;  %15845 = vmatprep.subr.bf16.mxu0 %v30109_v14  ;;  %v23194_v51 = vld [vmem:[%s30068_s10 + $0x460] sm:$0xff]  }
 0xb68   : > { %20487 = vmatprep.subr.bf16.mxu1 %v23152_v32  ;;  %v23195_v32 = vld [vmem:[%s30068_s10 + $0x600] sm:$0xff]  }
 0xb69   : > { %v20386_v15 = vpop.f32.mrf.mxu1 }
 0xb6a   : > { %v29768_v50 = vadd.f32 %v20386_v15, %v20385_v47  ;;  %15846 = vmatpush1.bf16.msra.mxu0 %v23153_v52  ;;  %v23196_v52 = vld [vmem:[%s30068_s10 + $0x518] sm:$0xff]   ;;  %v16251_v47 = vrot.slane %v29334_v53, 2  ;;  %v23197_v15 = vld [vmem:[%s30068_s10 + $0x510] sm:$0xff]   ;;  %v23198_v53 = vld [vmem:[%s30068_s10 + $0x508] sm:$0xff]  }
 0xb6b   : > { %20488 = vmatpush3.bf16.msra.mxu1 %v23154_v43  ;;  %v20388_v2 = vpop.f32.mrf.mxu1  ;;  %15847 = vmatprep.subr.bf16.mxu0 %v30109_v14  ;;  %v16569_v43 = vrot.slane %v29496_v36, 3  ;;  %v23199_v36 = vld [vmem:[%s30068_s10 + $0x500] sm:$0xff]  }
 0xb6c   : > { %20489 = vmatprep.subr.bf16.mxu1 %v23155_v27  ;;  %v16254_v27 = vrot.slane %v29501_v54, 2  ;;  %v23200_v54 = vld [vmem:[%s30068_s10 + $0x4f8] sm:$0xff]   ;;  %v23202_v2 = vld [vmem:[%s30068_s10 + $0x4e8] sm:$0xff]  }
 0xb6d   : > { %v20389_v31 = vpop.f32.mrf.mxu1 }
 0xb6e   : > { %15848 = vmatpush1.bf16.msra.mxu0 %v23156_v63  ;;  %v23201_v63 = vld [vmem:[%s30068_s10 + $0x4f0] sm:$0xff]  }
 0xb6f   : > { %20490 = vmatpush3.bf16.msra.mxu1 %v23157_v1  ;;  %15849 = vmatprep.subr.bf16.mxu0 %v30109_v14  ;;  %v23203_v1 = vld [vmem:[%s30068_s10 + $0x4e0] sm:$0xff]  }
 0xb70   : > { %20491 = vmatprep.subr.bf16.mxu1 %v23158_v29  ;;  %v23204_v29 = vld [vmem:[%s30068_s10 + $0x538] sm:$0xff]  }
 0xb72   : > { %15850 = vmatpush1.bf16.msra.mxu0 %v23159_v62 }
 0xb73   : > { %20492 = vmatpush3.bf16.msra.mxu1 %v23160_v48  ;;  %15851 = vmatprep.subr.bf16.mxu0 %v30109_v14 }
 0xb74   : > { %20493 = vmatprep.subr.bf16.mxu1 %v23161_v24 }
 0xb76   : > { %15852 = vmatpush1.bf16.msra.mxu0 %v23162_v55  ;;  %v23205_v55 = vld [vmem:[%s30068_s10 + $0x530] sm:$0xff]  }
 0xb77   : > { %20494 = vmatpush3.bf16.msra.mxu1 %v23163_v33  ;;  %15861 = vmatprep.subr.bf16.mxu0 %v30109_v14 }
 0xb78   : > { %16785 = vmatprep.subr.bf16.mxu1 %v30109_v14 }
 0xb7a   : > { %16778 = vmatmul.mubr.bf16.vlgmr.msra.gmra.mxu1 %v16567_v7  ;;  %15862 = vmatpush2.bf16.msra.mxu0 %v23164_v22 }
 0xb7b   : > { %16786 = vmatpush1.bf16.msra.mxu1 %v23165_v6  ;;  %20234 = vmatprep.mubr.msk.bf16.mxu1 %vm7530_vm8, %v16570_v37 }
 0xb7c   : > { %15863 = vmatprep.subr.bf16.mxu0 %v30109_v14  ;;  %16787 = vmatprep.subr.bf16.mxu1 %v30109_v14 }
 0xb7e   : > { %15864 = vmatpush2.bf16.msra.mxu0 %v23166_v16 }
 0xb7f   : > { %16788 = vmatpush1.bf16.msra.mxu1 %v23167_v56  ;;  %15865 = vmatprep.subr.bf16.mxu0 %v30109_v14 }
 0xb80   : > { %16789 = vmatprep.subr.bf16.mxu1 %v30109_v14 }
 0xb82   : > { %15866 = vmatpush2.bf16.msra.mxu0 %v23168_v41  ;;  %v23207_v41 = vld [vmem:[%s30068_s10 + $0x520] sm:$0xff]  }
 0xb83   : > { %16790 = vmatpush1.bf16.msra.mxu1 %v23169_v0  ;;  %15867 = vmatprep.subr.bf16.mxu0 %v30109_v14 }
 0xb84   : > { %16791 = vmatprep.subr.bf16.mxu1 %v30109_v14 }
 0xb86   : > { %15868 = vmatpush2.bf16.msra.mxu0 %v23170_v61 }
 0xb87   : > { %16792 = vmatpush1.bf16.msra.mxu1 %v23171_v26  ;;  %v20407_v18 = vpop.f32.mrf.mxu1  ;;  %20457 = vmatprep.subr.bf16.mxu0 %v23172_v40 }
 0xb88   : > { %16793 = vmatprep.subr.bf16.mxu1 %v30109_v14 }
 0xb89   : > { %v20408_v3 = vpop.f32.mrf.mxu1  ;;  %15870 = vmatmul.mubr.bf16.vlgmr.msra.gmra.mxu0 %v15621_v20 }
 0xb8a   : > { %v29847_v23 = vadd.f32 %v20408_v3, %v20407_v18  ;;  %20458 = vmatpush3.bf16.msra.mxu0 %v23173_v57  ;;  %16461 = vmatprep.mubr.bf16.mxu0 %v16252_v11  ;;  %v23208_v18 = vld [vmem:[%s30070_s12 + $0x38] sm:$0xff]  }
 0xb8b   : > { %16794 = vmatpush1.bf16.msra.mxu1 %v23174_v59  ;;  %v20410_v17 = vpop.f32.mrf.mxu1  ;;  %20459 = vmatprep.subr.bf16.mxu0 %v23175_v9  ;;  %v23211_v9 = vld [vmem:[%s30070_s12 + $0x20] sm:$0xff]  }
 0xb8c   : > { %16795 = vmatprep.subr.bf16.mxu1 %v30109_v14 }
 0xb8d   : > { %v20411_v60 = vpop.f32.mrf.mxu1 }
 0xb8e   : > { %20460 = vmatpush3.bf16.msra.mxu0 %v23176_v12  ;;  %v23212_v12 = vld [vmem:[%s30070_s12 + $0x18] sm:$0xff]  }
 0xb8f   : > { %16796 = vmatpush1.bf16.msra.mxu1 %v23177_v19  ;;  %20461 = vmatprep.subr.bf16.mxu0 %v23178_v34 }
 0xb90   : > { %16797 = vmatprep.subr.bf16.mxu1 %v30109_v14 }
 0xb92   : > { %20462 = vmatpush3.bf16.msra.mxu0 %v23179_v45 }
 0xb93   : > { %16798 = vmatpush1.bf16.msra.mxu1 %v23180_v58  ;;  %20463 = vmatprep.subr.bf16.mxu0 %v23181_v49  ;;  %v23213_v58 = vld [vmem:[%s30070_s12 + $0x10] sm:$0xff]  }
 0xb94   : > { %16799 = vmatprep.subr.bf16.mxu1 %v30109_v14 }
 0xb96   : > { %20464 = vmatpush3.bf16.msra.mxu0 %v23182_v28 }
 0xb97   : > { %16800 = vmatpush1.bf16.msra.mxu1 %v23183_v8  ;;  %20465 = vmatprep.subr.bf16.mxu0 %v23184_v46 }
 0xb98   : > { %16809 = vmatprep.subr.bf16.mxu1 %v30109_v14 }
 0xb9a   : > { %20466 = vmatpush3.bf16.msra.mxu0 %v23185_v42 }
 0xb9b   : > { %16810 = vmatpush2.bf16.msra.mxu1 %v23186_v30  ;;  %20467 = vmatprep.subr.bf16.mxu0 %v23187_v13  ;;  %v23214_v30 = vld [vmem:[%s30070_s12 + $0x8] sm:$0xff]  }
 0xb9c   : > { %16811 = vmatprep.subr.bf16.mxu1 %v30109_v14 }
 0xb9e   : > { %20468 = vmatpush3.bf16.msra.mxu0 %v23188_v38  ;;  %v23215_v38 = vld [vmem:[%s30070_s12] sm:$0xff]  }
 0xb9f   : > { %16812 = vmatpush2.bf16.msra.mxu1 %v23189_v44  ;;  %20469 = vmatprep.subr.bf16.mxu0 %v23190_v39 }
 0xba0   : > { %16813 = vmatprep.subr.bf16.mxu1 %v30109_v14 }
 0xba2   : > { %20470 = vmatpush3.bf16.msra.mxu0 %v23191_v21 }
 0xba3   : > { %16814 = vmatpush2.bf16.msra.mxu1 %v23192_v10  ;;  %20471 = vmatprep.subr.bf16.mxu0 %v23193_v4 }
 0xba4   : > { %16815 = vmatprep.subr.bf16.mxu1 %v30109_v14 }
 0xba6   : > { %20472 = vmatpush3.bf16.msra.mxu0 %v23194_v51 }
 0xba7   : > { %16816 = vmatpush2.bf16.msra.mxu1 %v23195_v32  ;;  %16469 = vmatprep.subr.bf16.mxu0 %v30109_v14 }
 0xba9   : > { %16462 = vmatmul.mubr.bf16.vlgmr.msra.gmra.mxu0 %v16251_v47 }
 0xbaa   : > { %16818 = vmatmul.mubr.bf16.vlgmr.msra.gmra.mxu1 %v16569_v43  ;;  %16470 = vmatpush1.bf16.msra.mxu0 %v23196_v52 }
 0xbab   : > { %20149 = vmatprep.mubr.msk.bf16.mxu0 %vm7530_vm8, %v16254_v27  ;;  %16471 = vmatprep.subr.bf16.mxu0 %v30109_v14 }
 0xbae   : > { %16472 = vmatpush1.bf16.msra.mxu0 %v23197_v15 }
 0xbaf   : > { %16473 = vmatprep.subr.bf16.mxu0 %v30109_v14 }
 0xbb2   : > { %16474 = vmatpush1.bf16.msra.mxu0 %v23198_v53 }
 0xbb3   : > { %16475 = vmatprep.subr.bf16.mxu0 %v30109_v14 }
 0xbb6   : > { %16476 = vmatpush1.bf16.msra.mxu0 %v23199_v36 }
 0xbb7   : > { %16477 = vmatprep.subr.bf16.mxu0 %v30109_v14 }
 0xbba   : > { %16478 = vmatpush1.bf16.msra.mxu0 %v23200_v54 }
 0xbbb   : > { %16479 = vmatprep.subr.bf16.mxu0 %v30109_v14 }
 0xbbe   : > { %16480 = vmatpush1.bf16.msra.mxu0 %v23201_v63 }
 0xbbf   : > { %16481 = vmatprep.subr.bf16.mxu0 %v30109_v14 }
 0xbc2   : > { %16482 = vmatpush1.bf16.msra.mxu0 %v23202_v2 }
 0xbc3   : > { %16483 = vmatprep.subr.bf16.mxu0 %v30109_v14 }
 0xbc6   : > { %16484 = vmatpush1.bf16.msra.mxu0 %v23203_v1 }
 0xbc7   : > { %16493 = vmatprep.subr.bf16.mxu0 %v30109_v14 }
 0xbc9   : > { %v14986_v31 = vpop.f32.mrf.mxu0  ;;  %v15555_v62 = vpop.f32.mrf.mxu1 }
 0xbca   : > { %v14987_v48 = vadd.f32 %v29681_v25, %v14986_v31  ;;  %v15556_v24 = vadd.f32 %v29847_v23, %v15555_v62  ;;  %16494 = vmatpush2.bf16.msra.mxu0 %v23204_v29  ;;  %v23206_v25 = vld [vmem:[%s30068_s10 + $0x528] sm:$0xff]  }
 0xbcb   : > { %v14988_v33 = vpop.f32.mrf.mxu0  ;;  %v15557_v22 = vpop.f32.mrf.mxu1  ;;  %16495 = vmatprep.subr.bf16.mxu0 %v30109_v14 }
 0xbcc   : > { %v15197_v6 = vadd.f32 %v29768_v50, %v14987_v48  ;;  %v16253_v50 = vrot.slane %v29511_v5, 2  ;;  %v23210_v5 = vld [vmem:[%s30070_s12 + $0x28] sm:$0xff]   ;;  %v16826_v22 = vld [vmem:[%s30069_s11] sm:$0x1] }
 0xbcd   : > { %v14989_v7 = vpop.f32.mrf.mxu0  ;;  %v15558_v37 = vpop.f32.mrf.mxu1 }
 0xbce   : > { %16496 = vmatpush2.bf16.msra.mxu0 %v23205_v55 }
 0xbcf   : > { %v14990_v16 = vpop.f32.mrf.mxu0  ;;  %v15559_v56 = vpop.f32.mrf.mxu1  ;;  %16497 = vmatprep.subr.bf16.mxu0 %v30109_v14 }
 0xbd2   : > { %16498 = vmatpush2.bf16.msra.mxu0 %v23206_v25 }
 0xbd3   : > { %16499 = vmatprep.subr.bf16.mxu0 %v30109_v14  ;;  %v23209_v14 = vld [vmem:[%s30070_s12 + $0x30] sm:$0xff]  }
 0xbd6   : > { %16500 = vmatpush2.bf16.msra.mxu0 %v23207_v41  ;;  %v16846_v41 = vld [vmem:[%s30071_s13] sm:$0x1] }
 0xbd7   : > { %20586 = vmatprep.subr.bf16.mxu0 %v23279_v35 }
 0xbd9   : > { %16502 = vmatmul.mubr.bf16.vlgmr.msra.gmra.mxu0 %v16253_v50 }
 0xbda   : > { %20602 = vmatprep.mubr.msk.bf16.mxu0 %vm23280_vm6, %v23279_v35  ;;  %20587 = vmatpush3.bf16.msra.mxu0 %v23208_v18 }
 0xbdb   : > { %20588 = vmatprep.subr.bf16.mxu0 %v23279_v35 }
 0xbde   : > { %20589 = vmatpush3.bf16.msra.mxu0 %v23209_v14 }
 0xbdf   : > { %20590 = vmatprep.subr.bf16.mxu0 %v23279_v35 }
 0xbe2   : > { %20591 = vmatpush3.bf16.msra.mxu0 %v23210_v5 }
 0xbe3   : > { %20592 = vmatprep.subr.bf16.mxu0 %v23279_v35 }
 0xbe6   : > { %20593 = vmatpush3.bf16.msra.mxu0 %v23211_v9 }
 0xbe7   : > { %20594 = vmatprep.subr.bf16.mxu0 %v23279_v35 }
 0xbe9   : > { %v20451_v0 = vpop.f32.mrf.mxu1 }
 0xbea   : > { %20595 = vmatpush3.bf16.msra.mxu0 %v23212_v12 }
 0xbeb   : > { %v20452_v61 = vpop.f32.mrf.mxu1  ;;  %20596 = vmatprep.subr.bf16.mxu0 %v23279_v35 }
 0xbec   : > { %v20453_v26 = vadd.f32 %v20452_v61, %v20451_v0 }
 0xbed   : > { %v20454_v40 = vpop.f32.mrf.mxu1 }
 0xbee   : > { %20597 = vmatpush3.bf16.msra.mxu0 %v23213_v58 }
 0xbef   : > { %v20455_v57 = vpop.f32.mrf.mxu1  ;;  %20598 = vmatprep.subr.bf16.mxu0 %v23279_v35 }
 0xbf2   : > { %20599 = vmatpush3.bf16.msra.mxu0 %v23214_v30 }
 0xbf3   : > { %20600 = vmatprep.subr.bf16.mxu0 %v23279_v35 }
 0xbf6   : > { %20601 = vmatpush3.bf16.msra.mxu0 %v23215_v38 }
 0xbf9   : > { %v15236_v20 = vpop.f32.mrf.mxu0 }
 0xbfa   : > { %v15237_v59 = vadd.f32 %v15236_v20, %v15197_v6 }
 0xbfb   : > { %v15238_v11 = vpop.f32.mrf.mxu0 }
 0xbfc   : > { %v15561_v3 = vadd.f32 %v15556_v24, %v15237_v59 }
 0xbfd   : > { %v15239_v23 = vpop.f32.mrf.mxu0 }
 0xbff   : > { %v15240_v17 = vpop.f32.mrf.mxu0 }
 0xc19   : > { %v20429_v19 = vpop.f32.mrf.mxu0 }
 0xc1a   : > { %v16187_v34 = vpop.f32.mrf.mxu1 }
 0xc1b   : > { %v16188_v60 = vadd.f32 %v20453_v26, %v16187_v34  ;;  %v20430_v45 = vpop.f32.mrf.mxu0 }
 0xc1c   : > { %v20431_v49 = vadd.f32 %v20430_v45, %v20429_v19  ;;  %v16189_v28 = vpop.f32.mrf.mxu1 }
 0xc1d   : > { %v20432_v8 = vpop.f32.mrf.mxu0 }
 0xc1e   : > { %v16190_v46 = vpop.f32.mrf.mxu1 }
 0xc1f   : > { %v20433_v42 = vpop.f32.mrf.mxu0 }
 0xc20   : > { %v16191_v13 = vpop.f32.mrf.mxu1 }
 0xc3a   : > { %v20495_v44 = vpop.f32.mrf.mxu1 }
 0xc3c   : > { %v20496_v39 = vpop.f32.mrf.mxu1 }
 0xc3d   : > { %v20497_v21 = vadd.f32 %v20496_v39, %v20495_v44 }
 0xc3e   : > { %v20498_v10 = vpop.f32.mrf.mxu1 }
 0xc40   : > { %v20499_v4 = vpop.f32.mrf.mxu1 }
 0xc49   : > { %v15871_v51 = vpop.f32.mrf.mxu0 }
 0xc4a   : > { %v15872_v32 = vadd.f32 %v20431_v49, %v15871_v51 }
 0xc4b   : > { %v15873_v52 = vpop.f32.mrf.mxu0 }
 0xc4c   : > { %v15877_v47 = vadd.f32 %v15872_v32, %v15561_v3 }
 0xc4d   : > { %v15874_v43 = vpop.f32.mrf.mxu0 }
 0xc4e   : > { %v16193_v27 = vadd.f32 %v16188_v60, %v15877_v47 }
 0xc4f   : > { %v15875_v15 = vpop.f32.mrf.mxu0 }
 0xc69   : > { %v20473_v53 = vpop.f32.mrf.mxu0 }
 0xc6a   : > { %v16819_v36 = vpop.f32.mrf.mxu1 }
 0xc6b   : > { %v20474_v35 = vpop.f32.mrf.mxu0  ;;  %v16820_v55 = vadd.f32 %v20497_v21, %v16819_v36 }
 0xc6c   : > { %v16821_v54 = vpop.f32.mrf.mxu1  ;;  %v20475_v31 = vadd.f32 %v20474_v35, %v20473_v53 }
 0xc6d   : > { %v20476_v63 = vpop.f32.mrf.mxu0 }
 0xc6e   : > { %v16822_v2 = vpop.f32.mrf.mxu1 }
 0xc6f   : > { %v20477_v1 = vpop.f32.mrf.mxu0 }
 0xc70   : > { %v16823_v29 = vpop.f32.mrf.mxu1 }
 0xc99   : > { %v16503_v62 = vpop.f32.mrf.mxu0 }
 0xc9a   : > { %v16504_v48 = vadd.f32 %v20475_v31, %v16503_v62 }
 0xc9b   : > { %v16505_v24 = vpop.f32.mrf.mxu0 }
 0xc9c   : > { %v16509_v33 = vadd.f32 %v16504_v48, %v16193_v27 }
 0xc9d   : > { %v16506_v6 = vpop.f32.mrf.mxu0 }
 0xc9e   : > { %v16825_v7 = vadd.f32 %v16820_v55, %v16509_v33 }
 0xc9f   : > { %v16507_v37 = vpop.f32.mrf.mxu0 }
 0xca0   : > { %v16827_v25 = vadd.f32 %v16826_v22, %v16825_v7 }
 0xca2   : > { %v16828_v16 = vmax.f32 %v16827_v25, 0.0 }
 0xca4   : > { %v16845_v56 = vpack.c.bf16 %v16828_v16, %v16828_v16 }
 0xca6   : > { %20603 = vmatmul.mubr.bf16.vlgmr.msra.gmra.mxu0 %v16845_v56 }
 0xd66   : > { %v16929_v50 = vpop.f32.mrf.mxu0 }
 0xd67   : > { %v16930_v0 = vadd.f32 %v16929_v50, %v16846_v41 }
 0xd68   : > { %v20604_v61 = vpop.f32.mrf.mxu0 }
 0xd69   : > { %16935 = vst [vmem:[%s459_s24] sm:$0x1] %v16930_v0 }
 0xd6a   : > { %v16932_v26 = vpop.f32.mrf.mxu0 }
 0xd6b   : > { %23229 = shalt.err (!%p23226_p3)
}
 0xd6c   : > { %s23230_s25 = scalar_lea.hbm %s30017_s29, 16  ;;  %s23234_s24 = scalar_lea.hbm %s30072_s14, 32 }
 0xd6d   : > { %p23231_p4 = scmp.ne.s32.totalorder %s30017_s29, %s23230_s25  ;;  %p23235_p9 = scmp.lt.s32.totalorder %s30017_s29, %s30072_s14 }
 0xd6e   : > { %p23236_p10 = scmp.lt.s32.totalorder %s23234_s24, %s23230_s25 }
 0xd6f   : > { %p23232_p7 = pnand %p23231_p4, %p23395_p5 }
 0xd70   : > { %p23237_p11 = por %p23236_p10, %p23235_p9 }
 0xd71   : > { %p23233_p8 = pneg %p23232_p7 }
 0xd73   : > { %p23238_p12 = pnand %p23237_p11, %p23233_p8 }
 0xd75   : > { %23241 = shalt.err (!%p23238_p12)
}
 0xd76   : > { %20609 = dma.vmem_to_hbm [thread:$0]  (%p23395_p5), %s30019_s26, 16, %s30017_s29, %s16937_s19   ;;  %v20605_v40 = vpop.f32.mrf.mxu0 }
 0xd77 PF: > { %s30120_s18 = sld [smem:[#allocation5_spill]]  ;;  %p20615_p13 = scmp.ge.s32.totalorder %s23276_s16, 2 }
 0xd79   : > { %p20612_p0 = pnand %p20615_p13, %p23399_p6 }
 0xd7b   : > { %p20613_p1 = pneg %p20612_p0 }
 0xd7d   : > { %s16961_s20 = sand.u32 1, %s30120_s18  }
 0xd7e   : > { %s16962_s15 = scalar_lea.sflag [#allocation3], %s16961_s20 }
 0xd7f   : > { %23259 = dma.done.wait (%p20613_p1), %s16962_s15, 16  }
 0xd80   : > { %23261 = vsyncadd (%p20613_p1), %s16962_s15, 4294967280  ;;  %s30122_s16 = sld [smem:[#allocation7_spill]]  ;;  %s30125_s29 = smov %s23268_s30 }
 0xd81   : > { %s30123_s25 = sld [smem:[#allocation6_spill]] }
 0xd82   : > { %s30124_s15 = sld [smem:[#allocation8_spill]] }
 0xd86   : > { %p24_p2 = scmp.ge.s32.totalorder %s30122_s16, 4  }
 0xd87   : > { %s30126_s30 = smov %s30123_s25 }
 0xd88   :  { %26 = sbr.rel (!%p24_p2) target bundleno = 3 (0x3), region = 126 }
 0xd8d   :  { %16966 = vsyncpa [#allocation3], 1 }
 0xd8e   :  { %16968 = vsyncpa [#allocation3 + $0x1], 1 }

</bundles_post_ra>
